<compile_context>
chip_gen: v7x
topology: tpu7x:2x2x1
jax: 0.10.0
libtpu: 0.0.40
codegen_flags: <defaults>
</compile_context>

<pallas_src>
import functools

import jax
import jax.numpy as jnp
from jax.experimental import pallas as pl
from jax.experimental.pallas import tpu as pltpu

NEG_SLOPE = 0.05
BN_EPS = 1e-5
NUM_TYPE = 7
LANES = 128  # TPU lane width; all kernel outputs / channel vectors padded to this.


def _pad_lanes(v, fill=0.0):
    """Pad the last dim of `v` up to LANES."""
    c = v.shape[-1]
    if c == LANES:
        return v
    pad = [(0, 0)] * (v.ndim - 1) + [(0, LANES - c)]
    return jnp.pad(v, pad, constant_values=fill)


# ----------------------------- Pallas kernels ------------------------------

def _conv_block_kernel(p_ref, w_ref, pk_ref, o_ref,
                       mx_ref, mn_ref, s1_ref, s2_ref, *, inv_cnt):
    """Fused Conv(im2col matmul) + bias + LeakyReLU + BatchNorm2d + MaxPool2d(2).

    Grid: (4,) over the 2x2 pooling candidates ("arbitrary").
      p_ref : (Mo, Kp)  bf16 -- im2col patch slab for candidate q
      w_ref : (Kp, 128) bf16 -- conv weight (lane-padded Cout)
      pk_ref: (8, 128)  f32  -- row0 bias, row1 gamma, row2 beta
      o_ref : (Mo, 128) f32  -- pooled output (rows = (n, ho, wo)); written at q==3
      mx/mn : (Mo, 128) bf16 -- running max/min over candidates (scratch)
      s1/s2 : (1, 128)  f32  -- BN sum / sum-of-squares (scratch)
    """
    q = pl.program_id(0)

    y = jnp.dot(p_ref[...], w_ref[...], preferred_element_type=jnp.float32)
    y = y + pk_ref[0:1, :]                       # conv bias
    y = jnp.maximum(y, NEG_SLOPE * y)            # LeakyReLU(0.05), max-form
    yb = y.astype(jnp.bfloat16)

    @pl.when(q == 0)
    def _():
        s1_ref[...] = jnp.zeros_like(s1_ref)
        s2_ref[...] = jnp.zeros_like(s2_ref)
        mx_ref[...] = yb
        mn_ref[...] = yb

    # Training-mode BatchNorm2d statistics over all 4*Mo pre-pool pixels.
    s1_ref[...] += jnp.sum(y, axis=0, keepdims=True)
    s2_ref[...] += jnp.sum(y * y, axis=0, keepdims=True)

    @pl.when(q > 0)
    def _():
        mx_ref[...] = jnp.maximum(mx_ref[...], yb)
        mn_ref[...] = jnp.minimum(mn_ref[...], yb)

    @pl.when(q == pl.num_programs(0) - 1)
    def _():
        mean = s1_ref[...] * inv_cnt
        var = jnp.maximum(s2_ref[...] * inv_cnt - mean * mean, 0.0)
        scale = pk_ref[1:2, :] * jax.lax.rsqrt(var + BN_EPS)
        shift = pk_ref[2:3, :] - mean * scale
        # MaxPool after the BN affine: sign(scale) decides max vs min candidate.
        cond = jnp.broadcast_to(scale >= 0.0, mx_ref.shape)
        sel = jnp.where(cond, mx_ref[...].astype(jnp.float32),
                        mn_ref[...].astype(jnp.float32))
        o_ref[...] = sel * scale + shift


def _fc_kernel(x_ref, w1_ref, pk1_ref, w2_ref, pk2_ref, w3_ref, o_ref,
               *, m_real, inv_m):
    """Fused FC head: Linear+ReLU+BN1d -> Linear+ReLU+BN1d -> Linear.

    Batch rows are padded to a multiple of 8; BN1d stats use only real rows.
    pk1: (8,256) rows b1/g1/be1;  pk2: (8,128) rows b2/g2/be2/b3(padded).
    """
    def bn(h, g, be):
        rows = jax.lax.broadcasted_iota(jnp.int32, h.shape, 0)
        hm = jnp.where(rows < m_real, h, 0.0)
        mean = jnp.sum(hm, axis=0, keepdims=True) * inv_m
        var = jnp.maximum(jnp.sum(hm * hm, axis=0, keepdims=True) * inv_m
                          - mean * mean, 0.0)
        scale = g * jax.lax.rsqrt(var + BN_EPS)
        return h * scale + (be - mean * scale)

    h = jnp.dot(x_ref[...], w1_ref[...],
                preferred_element_type=jnp.float32) + pk1_ref[0:1, :]
    h = jnp.maximum(h, 0.0)
    h = bn(h, pk1_ref[1:2, :], pk1_ref[2:3, :])
    h = jnp.dot(h.astype(jnp.bfloat16), w2_ref[...],
                preferred_element_type=jnp.float32) + pk2_ref[0:1, :]
    h = jnp.maximum(h, 0.0)
    h = bn(h, pk2_ref[1:2, :], pk2_ref[2:3, :])
    o_ref[...] = jnp.dot(h.astype(jnp.bfloat16), w3_ref[...],
                         preferred_element_type=jnp.float32) + pk2_ref[3:4, :]


# ------------------------------- JAX glue -----------------------------------

def conv_block(x_nhwc, Wc, bc, gamma, beta, k, pad):
    """Conv2d(k, pad) -> LeakyReLU(0.05) -> BatchNorm2d -> MaxPool2d(2), one kernel."""
    N, H, W, Cin = x_nhwc.shape
    Cout = Wc.shape[0]
    Ho, Wo = H // 2, W // 2
    Mo = N * Ho * Wo
    K = k * k * Cin
    Kp = ((K + 7) // 8) * 8  # align contraction dim

    xb = x_nhwc.astype(jnp.bfloat16)
    xp = jnp.pad(xb, ((0, 0), (pad, pad), (pad, pad), (0, 0)))

    # Candidate-split im2col: one patch slab per 2x2 pooling candidate (py, px).
    # Row order within a slab is (n, ho, wo); tap order (kh, kw) matches the
    # (kh, kw, cin, cout) weight reshape below.
    cands = []
    for py in range(2):
        for px in range(2):
            taps = []
            for di in range(k):
                for dj in range(k):
                    a, b = py + di, px + dj
                    taps.append(xp[:, a:a + 2 * (Ho - 1) + 1:2,
                                   b:b + 2 * (Wo - 1) + 1:2, :])
            pq = jnp.stack(taps, axis=3).reshape(Mo, K)
            cands.append(pq)
    patches = jnp.stack(cands, axis=0)                    # (4, Mo, K) bf16
    if Kp != K:
        patches = jnp.pad(patches, ((0, 0), (0, 0), (0, Kp - K)))

    # PyTorch conv weight (Cout, Cin, kh, kw) -> (kh*kw*Cin, Cout), lane-padded.
    Wmat = jnp.transpose(Wc, (2, 3, 1, 0)).reshape(K, Cout).astype(jnp.bfloat16)
    Wmat = _pad_lanes(Wmat)
    if Kp != K:
        Wmat = jnp.pad(Wmat, ((0, Kp - K), (0, 0)))

    # Per-channel params packed into one (8,128) tile (one DMA instead of 3).
    pk = jnp.zeros((8, LANES), jnp.float32)
    pk = pk.at[0, :Cout].set(bc)
    pk = pk.at[1, :Cout].set(gamma)
    pk = pk.at[2, :Cout].set(beta)

    flops = 2 * 4 * Mo * Kp * LANES + 10 * 4 * Mo * LANES
    bytes_accessed = (patches.size * 2 + Wmat.size * 2 + pk.size * 4
                      + Mo * LANES * 4)

    # Resident VMEM footprint (double-buffered patch slab + weights + output
    # + scratch), used to set the scoped VMEM limit explicitly.
    resident = (2 * Mo * Kp * 2 + 2 * Kp * LANES * 2 + 2 * 8 * LANES * 4
                + 2 * Mo * LANES * 4            # f32 output (+ headroom)
                + 2 * Mo * LANES * 2            # bf16 max/min scratch
                + 2 * 8 * LANES * 4)            # s1/s2 scratch (tile-padded)
    vmem_limit = int(min(64 * 2**20, max(32 * 2**20, 2 * resident)))

    out = pl.pallas_call(
        functools.partial(_conv_block_kernel, inv_cnt=1.0 / (4.0 * Mo)),
        out_shape=jax.ShapeDtypeStruct((Mo, LANES), jnp.float32),
        grid=(4,),
        in_specs=[
            pl.BlockSpec((None, Mo, Kp), lambda q: (q, 0, 0)),   # one slab per step
            pl.BlockSpec((Kp, LANES), lambda q: (0, 0)),         # weights resident
            pl.BlockSpec((8, LANES), lambda q: (0, 0)),          # packed params
        ],
        out_specs=pl.BlockSpec((Mo, LANES), lambda q: (0, 0)),   # resident accumulator
        scratch_shapes=[
            pltpu.VMEM((Mo, LANES), jnp.bfloat16),   # running max
            pltpu.VMEM((Mo, LANES), jnp.bfloat16),   # running min
            pltpu.VMEM((1, LANES), jnp.float32),     # BN sum
            pltpu.VMEM((1, LANES), jnp.float32),     # BN sum of squares
        ],
        compiler_params=pltpu.CompilerParams(
            dimension_semantics=("arbitrary",),
            vmem_limit_bytes=vmem_limit),
        cost_estimate=pl.CostEstimate(flops=int(flops), transcendentals=LANES,
                                      bytes_accessed=int(bytes_accessed)),
    )(patches, Wmat, pk)

    out = out.reshape(N, Ho, Wo, LANES)
    return out[..., :Cout] if Cout < LANES else out


def fc_head(x_flat, fc_params):
    (w1, b1, g1, be1, w2, b2, g2, be2, w3, b3) = fc_params
    M = x_flat.shape[0]
    Mp = ((M + 7) // 8) * 8                 # pad batch rows to a sublane multiple
    xb = x_flat.astype(jnp.bfloat16)
    if Mp != M:
        xb = jnp.pad(xb, ((0, Mp - M), (0, 0)))

    # x_flat is the NHWC flatten of the (N, 3, 3, 128) conv4 output.  Fold the
    # PyTorch NCHW-flatten permutation into w1 instead of transposing the data:
    # column c*9 + h*3 + w of w1  ->  row (h*3 + w)*128 + c of w1m.
    w1m = (w1.reshape(256, 128, 3, 3).transpose(2, 3, 1, 0)
             .reshape(3 * 3 * 128, 256).astype(jnp.bfloat16))
    w2m = w2.T.astype(jnp.bfloat16)                       # (256, 128)
    w3m = _pad_lanes(w3.T.astype(jnp.bfloat16))           # (128, 128) lane-dense
    pk1 = jnp.zeros((8, 256), jnp.float32)
    pk1 = pk1.at[0].set(b1).at[1].set(g1).at[2].set(be1)
    pk2 = jnp.zeros((8, LANES), jnp.float32)
    pk2 = pk2.at[0].set(b2).at[1].set(g2).at[2].set(be2)
    pk2 = pk2.at[3, :NUM_TYPE].set(b3)

    flops = 2 * Mp * (1152 * 256 + 256 * 128 + 128 * 128) + 30 * Mp * 256
    bytes_accessed = (xb.size * 2 + w1m.size * 2 + w2m.size * 2 + w3m.size * 2
                      + pk1.size * 4 + pk2.size * 4 + Mp * LANES * 4)

    out = pl.pallas_call(
        functools.partial(_fc_kernel, m_real=M, inv_m=1.0 / M),
        out_shape=jax.ShapeDtypeStruct((Mp, LANES), jnp.float32),
        in_specs=[pl.BlockSpec(memory_space=pltpu.MemorySpace.VMEM)] * 6,
        out_specs=pl.BlockSpec(memory_space=pltpu.MemorySpace.VMEM),
        cost_estimate=pl.CostEstimate(flops=int(flops),
                                      transcendentals=2 * (256 + 128),
                                      bytes_accessed=int(bytes_accessed)),
    )(xb, w1m, pk1, w2m, pk2, w3m)
    return out[:M, :NUM_TYPE]


def convnet_forward(x_nchw, params):
    x = jnp.transpose(x_nchw, (0, 2, 3, 1))  # NCHW -> NHWC (channels on lanes)
    for (Wc, bc, g, be, k, pad) in params["conv_layers"]:
        x = conv_block(x, Wc, bc, g, be, k, pad)
    N = x.shape[0]
    # Flatten in NHWC order; the NCHW permutation PyTorch's .view implies is
    # folded into the first FC weight inside fc_head.
    x = x.reshape(N, 3 * 3 * 128)
    return fc_head(x, params["fc"])


# --------------------------- Parameter construction -------------------------

def init_params(key):
    conv_cfg = [(1, 32, 5, 2), (32, 64, 3, 1), (64, 128, 3, 1), (128, 128, 3, 1)]
    conv_layers = []
    i = 0
    for (cin, cout, k, pad) in conv_cfg:
        kW, kb, kg, kbe = (jax.random.fold_in(key, i + j) for j in range(4))
        i += 4
        Wc = 0.1 * jax.random.normal(kW, (cout, cin, k, k), jnp.float32)
        bc = 0.1 * jax.random.normal(kb, (cout,), jnp.float32)
        gamma = 1.0 + 0.1 * jax.random.normal(kg, (cout,), jnp.float32)
        beta = 0.1 * jax.random.normal(kbe, (cout,), jnp.float32)
        conv_layers.append((Wc, bc, gamma, beta, k, pad))

    def lin(kid, nout, nin):
        kW, kb = jax.random.fold_in(key, kid), jax.random.fold_in(key, kid + 1)
        return (0.05 * jax.random.normal(kW, (nout, nin), jnp.float32),
                0.05 * jax.random.normal(kb, (nout,), jnp.float32))

    w1, b1 = lin(100, 256, 3 * 3 * 128)
    w2, b2 = lin(102, 128, 256)
    w3, b3 = lin(104, NUM_TYPE, 128)
    g1 = 1.0 + 0.1 * jax.random.normal(jax.random.fold_in(key, 200), (256,), jnp.float32)
    be1 = 0.1 * jax.random.normal(jax.random.fold_in(key, 201), (256,), jnp.float32)
    g2 = 1.0 + 0.1 * jax.random.normal(jax.random.fold_in(key, 202), (128,), jnp.float32)
    be2 = 0.1 * jax.random.normal(jax.random.fold_in(key, 203), (128,), jnp.float32)
    return {"conv_layers": conv_layers,
            "fc": (w1, b1, g1, be1, w2, b2, g2, be2, w3, b3)}


# ---------------------------------- main -------------------------------------

if __name__ == "__main__":
    key = jax.random.PRNGKey(0)
    params = init_params(key)
    # 48x48 single-channel input: 48 -> 24 -> 12 -> 6 -> 3, giving 3*3*128 features.
    x = jax.random.normal(jax.random.fold_in(key, 999), (2, 1, 48, 48), jnp.float32)

    fwd = jax.jit(lambda xx: convnet_forward(xx, params))
    out = jax.block_until_ready(fwd(x))

    assert out.shape == (2, NUM_TYPE), out.shape
    assert out.dtype == jnp.float32
    assert bool(jnp.all(jnp.isfinite(out)))
    print("KERNEL_OK")
</pallas_src>

<mosaic_0001>
module attributes {stable_mosaic.version = 11 : i64} {
  func.func @_conv_block_kernel(%arg0: i32, %arg1: memref<1x1152x32xbf16, #tpu.memory_space<vmem>>, %arg2: memref<32x128xbf16, #tpu.memory_space<vmem>>, %arg3: memref<8x128xf32, #tpu.memory_space<vmem>>, %arg4: memref<1152x128xf32, #tpu.memory_space<vmem>>, %arg5: memref<1152x128xbf16, #tpu.memory_space<vmem>>, %arg6: memref<1152x128xbf16, #tpu.memory_space<vmem>>, %arg7: memref<1x128xf32, #tpu.memory_space<vmem>>, %arg8: memref<1x128xf32, #tpu.memory_space<vmem>>) attributes {dimension_semantics = [#tpu.dimension_semantics<arbitrary>], iteration_bounds = array<i64: 4>, scalar_prefetch = 0 : i64, scratch_operands = 4 : i64, tpu.core_type = #tpu.core_type<tc>, window_params = [{transform_indices = @transform_0, window_bounds = array<i64: 1, 1152, 32>}, {pipeline_mode = #tpu.pipeline_mode<synchronous>, transform_indices = @transform_1, window_bounds = array<i64: 32, 128>}, {pipeline_mode = #tpu.pipeline_mode<synchronous>, transform_indices = @transform_2, window_bounds = array<i64: 8, 128>}, {pipeline_mode = #tpu.pipeline_mode<synchronous>, transform_indices = @transform_3, window_bounds = array<i64: 1152, 128>}]} {
    %c0 = arith.constant 0 : index
    %c0_0 = arith.constant 0 : index
    %c0_1 = arith.constant 0 : index
    %0 = vector.load %arg1[%c0, %c0_0, %c0_1] : memref<1x1152x32xbf16, #tpu.memory_space<vmem>>, vector<1x1152x32xbf16>
    %1 = vector.shape_cast %0 : vector<1x1152x32xbf16> to vector<1152x32xbf16>
    %c0_2 = arith.constant 0 : index
    %c0_3 = arith.constant 0 : index
    %2 = vector.load %arg2[%c0_2, %c0_3] : memref<32x128xbf16, #tpu.memory_space<vmem>>, vector<32x128xbf16>
    %cst = arith.constant dense<0.000000e+00> : vector<1152x128xf32>
    %3 = tpu.matmul %1, %2, %cst {dimension_numbers = #tpu.dot_dimension_numbers<[1], [0], [0], [1], [0, 0, 1, 1], [], []>} : vector<1152x32xbf16>, vector<32x128xbf16>, vector<1152x128xf32> -> vector<1152x128xf32>
    %c0_4 = arith.constant 0 : index
    %c0_5 = arith.constant 0 : index
    %4 = vector.load %arg3[%c0_4, %c0_5] : memref<8x128xf32, #tpu.memory_space<vmem>>, vector<1x128xf32>
    %5 = vector.broadcast %4 : vector<1x128xf32> to vector<1152x128xf32>
    %6 = arith.addf %3, %5 : vector<1152x128xf32>
    %cst_6 = arith.constant 5.000000e-02 : f32
    %7 = vector.broadcast %cst_6 : f32 to vector<1152x128xf32>
    %8 = arith.mulf %7, %6 : vector<1152x128xf32>
    %9 = arith.maximumf %6, %8 : vector<1152x128xf32>
    %10 = arith.truncf %9 : vector<1152x128xf32> to vector<1152x128xbf16>
    %c0_i32 = arith.constant 0 : i32
    %11 = arith.cmpi eq, %arg0, %c0_i32 : i32
    %12 = arith.extui %11 : i1 to i32
    %c0_i32_7 = arith.constant 0 : i32
    %13 = arith.cmpi ne, %12, %c0_i32_7 : i32
    scf.if %13 {
      %cst_21 = arith.constant 0.000000e+00 : f32
      %31 = vector.broadcast %cst_21 : f32 to vector<1x128xf32>
      %c0_22 = arith.constant 0 : index
      %c0_23 = arith.constant 0 : index
      %32 = vector.load %arg7[%c0_22, %c0_23] : memref<1x128xf32, #tpu.memory_space<vmem>>, vector<1x128xf32>
      tpu.vector_store %arg7[%c0_22, %c0_23], %31 {strides = array<i32>} : memref<1x128xf32, #tpu.memory_space<vmem>>, vector<1x128xf32>,
      %cst_24 = arith.constant 0.000000e+00 : f32
      %33 = vector.broadcast %cst_24 : f32 to vector<1x128xf32>
      %c0_25 = arith.constant 0 : index
      %c0_26 = arith.constant 0 : index
      %34 = vector.load %arg8[%c0_25, %c0_26] : memref<1x128xf32, #tpu.memory_space<vmem>>, vector<1x128xf32>
      tpu.vector_store %arg8[%c0_25, %c0_26], %33 {strides = array<i32>} : memref<1x128xf32, #tpu.memory_space<vmem>>, vector<1x128xf32>,
      %c0_27 = arith.constant 0 : index
      %c0_28 = arith.constant 0 : index
      %35 = vector.load %arg5[%c0_27, %c0_28] : memref<1152x128xbf16, #tpu.memory_space<vmem>>, vector<1152x128xbf16>
      tpu.vector_store %arg5[%c0_27, %c0_28], %10 {strides = array<i32>} : memref<1152x128xbf16, #tpu.memory_space<vmem>>, vector<1152x128xbf16>,
      %c0_29 = arith.constant 0 : index
      %c0_30 = arith.constant 0 : index
      %36 = vector.load %arg6[%c0_29, %c0_30] : memref<1152x128xbf16, #tpu.memory_space<vmem>>, vector<1152x128xbf16>
      tpu.vector_store %arg6[%c0_29, %c0_30], %10 {strides = array<i32>} : memref<1152x128xbf16, #tpu.memory_space<vmem>>, vector<1152x128xbf16>,
    } else {
    }
    %c0_8 = arith.constant 0 : index
    %c0_9 = arith.constant 0 : index
    %14 = vector.load %arg7[%c0_8, %c0_9] : memref<1x128xf32, #tpu.memory_space<vmem>>, vector<1x128xf32>
    %cst_10 = arith.constant dense<0.000000e+00> : vector<128xf32>
    %15 = vector.multi_reduction <add>, %9, %cst_10 [0] : vector<1152x128xf32> to vector<128xf32>
    %16 = vector.shape_cast %15 : vector<128xf32> to vector<1x128xf32>
    %17 = arith.addf %14, %16 : vector<1x128xf32>
    %c0_11 = arith.constant 0 : index
    %c0_12 = arith.constant 0 : index
    %18 = vector.load %arg7[%c0_11, %c0_12] : memref<1x128xf32, #tpu.memory_space<vmem>>, vector<1x128xf32>
    tpu.vector_store %arg7[%c0_11, %c0_12], %17 {strides = array<i32>} : memref<1x128xf32, #tpu.memory_space<vmem>>, vector<1x128xf32>,
    %c0_13 = arith.constant 0 : index
    %c0_14 = arith.constant 0 : index
    %19 = vector.load %arg8[%c0_13, %c0_14] : memref<1x128xf32, #tpu.memory_space<vmem>>, vector<1x128xf32>
    %20 = arith.mulf %9, %9 : vector<1152x128xf32>
    %cst_15 = arith.constant dense<0.000000e+00> : vector<128xf32>
    %21 = vector.multi_reduction <add>, %20, %cst_15 [0] : vector<1152x128xf32> to vector<128xf32>
    %22 = vector.shape_cast %21 : vector<128xf32> to vector<1x128xf32>
    %23 = arith.addf %19, %22 : vector<1x128xf32>
    %c0_16 = arith.constant 0 : index
    %c0_17 = arith.constant 0 : index
    %24 = vector.load %arg8[%c0_16, %c0_17] : memref<1x128xf32, #tpu.memory_space<vmem>>, vector<1x128xf32>
    tpu.vector_store %arg8[%c0_16, %c0_17], %23 {strides = array<i32>} : memref<1x128xf32, #tpu.memory_space<vmem>>, vector<1x128xf32>,
    %c0_i32_18 = arith.constant 0 : i32
    %25 = arith.cmpi sgt, %arg0, %c0_i32_18 : i32
    %26 = arith.extui %25 : i1 to i32
    %c0_i32_19 = arith.constant 0 : i32
    %27 = arith.cmpi ne, %26, %c0_i32_19 : i32
    scf.if %27 {
      %c0_21 = arith.constant 0 : index
      %c0_22 = arith.constant 0 : index
      %31 = vector.load %arg5[%c0_21, %c0_22] : memref<1152x128xbf16, #tpu.memory_space<vmem>>, vector<1152x128xbf16>
      %32 = arith.maximumf %31, %10 : vector<1152x128xbf16>
      %c0_23 = arith.constant 0 : index
      %c0_24 = arith.constant 0 : index
      %33 = vector.load %arg5[%c0_23, %c0_24] : memref<1152x128xbf16, #tpu.memory_space<vmem>>, vector<1152x128xbf16>
      tpu.vector_store %arg5[%c0_23, %c0_24], %32 {strides = array<i32>} : memref<1152x128xbf16, #tpu.memory_space<vmem>>, vector<1152x128xbf16>,
      %c0_25 = arith.constant 0 : index
      %c0_26 = arith.constant 0 : index
      %34 = vector.load %arg6[%c0_25, %c0_26] : memref<1152x128xbf16, #tpu.memory_space<vmem>>, vector<1152x128xbf16>
      %35 = arith.minimumf %34, %10 : vector<1152x128xbf16>
      %c0_27 = arith.constant 0 : index
      %c0_28 = arith.constant 0 : index
      %36 = vector.load %arg6[%c0_27, %c0_28] : memref<1152x128xbf16, #tpu.memory_space<vmem>>, vector<1152x128xbf16>
      tpu.vector_store %arg6[%c0_27, %c0_28], %35 {strides = array<i32>} : memref<1152x128xbf16, #tpu.memory_space<vmem>>, vector<1152x128xbf16>,
    } else {
    }
    %c3_i32 = arith.constant 3 : i32
    %28 = arith.cmpi eq, %arg0, %c3_i32 : i32
    %29 = arith.extui %28 : i1 to i32
    %c0_i32_20 = arith.constant 0 : i32
    %30 = arith.cmpi ne, %29, %c0_i32_20 : i32
    scf.if %30 {
      %c0_21 = arith.constant 0 : index
      %c0_22 = arith.constant 0 : index
      %31 = vector.load %arg7[%c0_21, %c0_22] : memref<1x128xf32, #tpu.memory_space<vmem>>, vector<1x128xf32>
      %cst_23 = arith.constant 2.17013891E-4 : f32
      %32 = vector.broadcast %cst_23 : f32 to vector<1x128xf32>
      %33 = arith.mulf %31, %32 : vector<1x128xf32>
      %c0_24 = arith.constant 0 : index
      %c0_25 = arith.constant 0 : index
      %34 = vector.load %arg8[%c0_24, %c0_25] : memref<1x128xf32, #tpu.memory_space<vmem>>, vector<1x128xf32>
      %cst_26 = arith.constant 2.17013891E-4 : f32
      %35 = vector.broadcast %cst_26 : f32 to vector<1x128xf32>
      %36 = arith.mulf %34, %35 : vector<1x128xf32>
      %37 = arith.mulf %33, %33 : vector<1x128xf32>
      %38 = arith.subf %36, %37 : vector<1x128xf32>
      %cst_27 = arith.constant 0.000000e+00 : f32
      %39 = vector.broadcast %cst_27 : f32 to vector<1x128xf32>
      %40 = arith.maximumf %38, %39 : vector<1x128xf32>
      %c1 = arith.constant 1 : index
      %c0_28 = arith.constant 0 : index
      %41 = vector.load %arg3[%c1, %c0_28] : memref<8x128xf32, #tpu.memory_space<vmem>>, vector<1x128xf32>
      %cst_29 = arith.constant 9.99999974E-6 : f32
      %42 = vector.broadcast %cst_29 : f32 to vector<1x128xf32>
      %43 = arith.addf %40, %42 : vector<1x128xf32>
      %44 = math.rsqrt %43 : vector<1x128xf32>
      %45 = arith.mulf %41, %44 : vector<1x128xf32>
      %c2 = arith.constant 2 : index
      %c0_30 = arith.constant 0 : index
      %46 = vector.load %arg3[%c2, %c0_30] : memref<8x128xf32, #tpu.memory_space<vmem>>, vector<1x128xf32>
      %47 = arith.mulf %33, %45 : vector<1x128xf32>
      %48 = arith.subf %46, %47 : vector<1x128xf32>
      %cst_31 = arith.constant 0.000000e+00 : f32
      %49 = vector.broadcast %cst_31 : f32 to vector<1x128xf32>
      %50 = arith.cmpf oge, %45, %49 : vector<1x128xf32>
      %51 = vector.shape_cast %50 : vector<1x128xi1> to vector<1x128xi1>
      %52 = vector.broadcast %51 : vector<1x128xi1> to vector<1152x128xi1>
      %c0_32 = arith.constant 0 : index
      %c0_33 = arith.constant 0 : index
      %53 = vector.load %arg5[%c0_32, %c0_33] : memref<1152x128xbf16, #tpu.memory_space<vmem>>, vector<1152x128xbf16>
      %54 = arith.extf %53 : vector<1152x128xbf16> to vector<1152x128xf32>
      %c0_34 = arith.constant 0 : index
      %c0_35 = arith.constant 0 : index
      %55 = vector.load %arg6[%c0_34, %c0_35] : memref<1152x128xbf16, #tpu.memory_space<vmem>>, vector<1152x128xbf16>
      %56 = arith.extf %55 : vector<1152x128xbf16> to vector<1152x128xf32>
      %57 = arith.select %52, %54, %56 : vector<1152x128xi1>, vector<1152x128xf32>
      %58 = vector.broadcast %45 : vector<1x128xf32> to vector<1152x128xf32>
      %59 = arith.mulf %57, %58 : vector<1152x128xf32>
      %60 = vector.broadcast %48 : vector<1x128xf32> to vector<1152x128xf32>
      %61 = arith.addf %59, %60 : vector<1152x128xf32>
      %c0_36 = arith.constant 0 : index
      %c0_37 = arith.constant 0 : index
      %62 = vector.load %arg4[%c0_36, %c0_37] : memref<1152x128xf32, #tpu.memory_space<vmem>>, vector<1152x128xf32>
      tpu.vector_store %arg4[%c0_36, %c0_37], %61 {strides = array<i32>} : memref<1152x128xf32, #tpu.memory_space<vmem>>, vector<1152x128xf32>,
    } else {
    }
    return
  }
  func.func @transform_0(%arg0: i32) -> (i32, i32, i32) {
    %c0_i32 = arith.constant 0 : i32
    %c0_i32_0 = arith.constant 0 : i32
    %c0_i32_1 = arith.constant 0 : i32
    return %arg0, %c0_i32, %c0_i32_0 : i32, i32, i32
  }
  func.func @transform_1(%arg0: i32) -> (i32, i32) {
    %c0_i32 = arith.constant 0 : i32
    %c0_i32_0 = arith.constant 0 : i32
    %c0_i32_1 = arith.constant 0 : i32
    return %c0_i32, %c0_i32_0 : i32, i32
  }
  func.func @transform_2(%arg0: i32) -> (i32, i32) {
    %c0_i32 = arith.constant 0 : i32
    %c0_i32_0 = arith.constant 0 : i32
    %c0_i32_1 = arith.constant 0 : i32
    return %c0_i32, %c0_i32_0 : i32, i32
  }
  func.func @transform_3(%arg0: i32) -> (i32, i32) {
    %c0_i32 = arith.constant 0 : i32
    %c0_i32_0 = arith.constant 0 : i32
    %c0_i32_1 = arith.constant 0 : i32
    return %c0_i32, %c0_i32_0 : i32, i32
  }
}

module attributes {stable_mosaic.version = 11 : i64} {
  func.func @_conv_block_kernel(%arg0: i32, %arg1: memref<1x288x288xbf16, #tpu.memory_space<vmem>>, %arg2: memref<288x128xbf16, #tpu.memory_space<vmem>>, %arg3: memref<8x128xf32, #tpu.memory_space<vmem>>, %arg4: memref<288x128xf32, #tpu.memory_space<vmem>>, %arg5: memref<288x128xbf16, #tpu.memory_space<vmem>>, %arg6: memref<288x128xbf16, #tpu.memory_space<vmem>>, %arg7: memref<1x128xf32, #tpu.memory_space<vmem>>, %arg8: memref<1x128xf32, #tpu.memory_space<vmem>>) attributes {dimension_semantics = [#tpu.dimension_semantics<arbitrary>], iteration_bounds = array<i64: 4>, scalar_prefetch = 0 : i64, scratch_operands = 4 : i64, tpu.core_type = #tpu.core_type<tc>, window_params = [{transform_indices = @transform_0, window_bounds = array<i64: 1, 288, 288>}, {pipeline_mode = #tpu.pipeline_mode<synchronous>, transform_indices = @transform_1, window_bounds = array<i64: 288, 128>}, {pipeline_mode = #tpu.pipeline_mode<synchronous>, transform_indices = @transform_2, window_bounds = array<i64: 8, 128>}, {pipeline_mode = #tpu.pipeline_mode<synchronous>, transform_indices = @transform_3, window_bounds = array<i64: 288, 128>}]} {
    %c0 = arith.constant 0 : index
    %c0_0 = arith.constant 0 : index
    %c0_1 = arith.constant 0 : index
    %0 = vector.load %arg1[%c0, %c0_0, %c0_1] : memref<1x288x288xbf16, #tpu.memory_space<vmem>>, vector<1x288x288xbf16>
    %1 = vector.shape_cast %0 : vector<1x288x288xbf16> to vector<288x288xbf16>
    %c0_2 = arith.constant 0 : index
    %c0_3 = arith.constant 0 : index
    %2 = vector.load %arg2[%c0_2, %c0_3] : memref<288x128xbf16, #tpu.memory_space<vmem>>, vector<288x128xbf16>
    %cst = arith.constant dense<0.000000e+00> : vector<288x128xf32>
    %3 = tpu.matmul %1, %2, %cst {dimension_numbers = #tpu.dot_dimension_numbers<[1], [0], [0], [1], [0, 0, 1, 1], [], []>} : vector<288x288xbf16>, vector<288x128xbf16>, vector<288x128xf32> -> vector<288x128xf32>
    %c0_4 = arith.constant 0 : index
    %c0_5 = arith.constant 0 : index
    %4 = vector.load %arg3[%c0_4, %c0_5] : memref<8x128xf32, #tpu.memory_space<vmem>>, vector<1x128xf32>
    %5 = vector.broadcast %4 : vector<1x128xf32> to vector<288x128xf32>
    %6 = arith.addf %3, %5 : vector<288x128xf32>
    %cst_6 = arith.constant 5.000000e-02 : f32
    %7 = vector.broadcast %cst_6 : f32 to vector<288x128xf32>
    %8 = arith.mulf %7, %6 : vector<288x128xf32>
    %9 = arith.maximumf %6, %8 : vector<288x128xf32>
    %10 = arith.truncf %9 : vector<288x128xf32> to vector<288x128xbf16>
    %c0_i32 = arith.constant 0 : i32
    %11 = arith.cmpi eq, %arg0, %c0_i32 : i32
    %12 = arith.extui %11 : i1 to i32
    %c0_i32_7 = arith.constant 0 : i32
    %13 = arith.cmpi ne, %12, %c0_i32_7 : i32
    scf.if %13 {
      %cst_21 = arith.constant 0.000000e+00 : f32
      %31 = vector.broadcast %cst_21 : f32 to vector<1x128xf32>
      %c0_22 = arith.constant 0 : index
      %c0_23 = arith.constant 0 : index
      %32 = vector.load %arg7[%c0_22, %c0_23] : memref<1x128xf32, #tpu.memory_space<vmem>>, vector<1x128xf32>
      tpu.vector_store %arg7[%c0_22, %c0_23], %31 {strides = array<i32>} : memref<1x128xf32, #tpu.memory_space<vmem>>, vector<1x128xf32>,
      %cst_24 = arith.constant 0.000000e+00 : f32
      %33 = vector.broadcast %cst_24 : f32 to vector<1x128xf32>
      %c0_25 = arith.constant 0 : index
      %c0_26 = arith.constant 0 : index
      %34 = vector.load %arg8[%c0_25, %c0_26] : memref<1x128xf32, #tpu.memory_space<vmem>>, vector<1x128xf32>
      tpu.vector_store %arg8[%c0_25, %c0_26], %33 {strides = array<i32>} : memref<1x128xf32, #tpu.memory_space<vmem>>, vector<1x128xf32>,
      %c0_27 = arith.constant 0 : index
      %c0_28 = arith.constant 0 : index
      %35 = vector.load %arg5[%c0_27, %c0_28] : memref<288x128xbf16, #tpu.memory_space<vmem>>, vector<288x128xbf16>
      tpu.vector_store %arg5[%c0_27, %c0_28], %10 {strides = array<i32>} : memref<288x128xbf16, #tpu.memory_space<vmem>>, vector<288x128xbf16>,
      %c0_29 = arith.constant 0 : index
      %c0_30 = arith.constant 0 : index
      %36 = vector.load %arg6[%c0_29, %c0_30] : memref<288x128xbf16, #tpu.memory_space<vmem>>, vector<288x128xbf16>
      tpu.vector_store %arg6[%c0_29, %c0_30], %10 {strides = array<i32>} : memref<288x128xbf16, #tpu.memory_space<vmem>>, vector<288x128xbf16>,
    } else {
    }
    %c0_8 = arith.constant 0 : index
    %c0_9 = arith.constant 0 : index
    %14 = vector.load %arg7[%c0_8, %c0_9] : memref<1x128xf32, #tpu.memory_space<vmem>>, vector<1x128xf32>
    %cst_10 = arith.constant dense<0.000000e+00> : vector<128xf32>
    %15 = vector.multi_reduction <add>, %9, %cst_10 [0] : vector<288x128xf32> to vector<128xf32>
    %16 = vector.shape_cast %15 : vector<128xf32> to vector<1x128xf32>
    %17 = arith.addf %14, %16 : vector<1x128xf32>
    %c0_11 = arith.constant 0 : index
    %c0_12 = arith.constant 0 : index
    %18 = vector.load %arg7[%c0_11, %c0_12] : memref<1x128xf32, #tpu.memory_space<vmem>>, vector<1x128xf32>
    tpu.vector_store %arg7[%c0_11, %c0_12], %17 {strides = array<i32>} : memref<1x128xf32, #tpu.memory_space<vmem>>, vector<1x128xf32>,
    %c0_13 = arith.constant 0 : index
    %c0_14 = arith.constant 0 : index
    %19 = vector.load %arg8[%c0_13, %c0_14] : memref<1x128xf32, #tpu.memory_space<vmem>>, vector<1x128xf32>
    %20 = arith.mulf %9, %9 : vector<288x128xf32>
    %cst_15 = arith.constant dense<0.000000e+00> : vector<128xf32>
    %21 = vector.multi_reduction <add>, %20, %cst_15 [0] : vector<288x128xf32> to vector<128xf32>
    %22 = vector.shape_cast %21 : vector<128xf32> to vector<1x128xf32>
    %23 = arith.addf %19, %22 : vector<1x128xf32>
    %c0_16 = arith.constant 0 : index
    %c0_17 = arith.constant 0 : index
    %24 = vector.load %arg8[%c0_16, %c0_17] : memref<1x128xf32, #tpu.memory_space<vmem>>, vector<1x128xf32>
    tpu.vector_store %arg8[%c0_16, %c0_17], %23 {strides = array<i32>} : memref<1x128xf32, #tpu.memory_space<vmem>>, vector<1x128xf32>,
    %c0_i32_18 = arith.constant 0 : i32
    %25 = arith.cmpi sgt, %arg0, %c0_i32_18 : i32
    %26 = arith.extui %25 : i1 to i32
    %c0_i32_19 = arith.constant 0 : i32
    %27 = arith.cmpi ne, %26, %c0_i32_19 : i32
    scf.if %27 {
      %c0_21 = arith.constant 0 : index
      %c0_22 = arith.constant 0 : index
      %31 = vector.load %arg5[%c0_21, %c0_22] : memref<288x128xbf16, #tpu.memory_space<vmem>>, vector<288x128xbf16>
      %32 = arith.maximumf %31, %10 : vector<288x128xbf16>
      %c0_23 = arith.constant 0 : index
      %c0_24 = arith.constant 0 : index
      %33 = vector.load %arg5[%c0_23, %c0_24] : memref<288x128xbf16, #tpu.memory_space<vmem>>, vector<288x128xbf16>
      tpu.vector_store %arg5[%c0_23, %c0_24], %32 {strides = array<i32>} : memref<288x128xbf16, #tpu.memory_space<vmem>>, vector<288x128xbf16>,
      %c0_25 = arith.constant 0 : index
      %c0_26 = arith.constant 0 : index
      %34 = vector.load %arg6[%c0_25, %c0_26] : memref<288x128xbf16, #tpu.memory_space<vmem>>, vector<288x128xbf16>
      %35 = arith.minimumf %34, %10 : vector<288x128xbf16>
      %c0_27 = arith.constant 0 : index
      %c0_28 = arith.constant 0 : index
      %36 = vector.load %arg6[%c0_27, %c0_28] : memref<288x128xbf16, #tpu.memory_space<vmem>>, vector<288x128xbf16>
      tpu.vector_store %arg6[%c0_27, %c0_28], %35 {strides = array<i32>} : memref<288x128xbf16, #tpu.memory_space<vmem>>, vector<288x128xbf16>,
    } else {
    }
    %c3_i32 = arith.constant 3 : i32
    %28 = arith.cmpi eq, %arg0, %c3_i32 : i32
    %29 = arith.extui %28 : i1 to i32
    %c0_i32_20 = arith.constant 0 : i32
    %30 = arith.cmpi ne, %29, %c0_i32_20 : i32
    scf.if %30 {
      %c0_21 = arith.constant 0 : index
      %c0_22 = arith.constant 0 : index
      %31 = vector.load %arg7[%c0_21, %c0_22] : memref<1x128xf32, #tpu.memory_space<vmem>>, vector<1x128xf32>
      %cst_23 = arith.constant 8.68055562E-4 : f32
      %32 = vector.broadcast %cst_23 : f32 to vector<1x128xf32>
      %33 = arith.mulf %31, %32 : vector<1x128xf32>
      %c0_24 = arith.constant 0 : index
      %c0_25 = arith.constant 0 : index
      %34 = vector.load %arg8[%c0_24, %c0_25] : memref<1x128xf32, #tpu.memory_space<vmem>>, vector<1x128xf32>
      %cst_26 = arith.constant 8.68055562E-4 : f32
      %35 = vector.broadcast %cst_26 : f32 to vector<1x128xf32>
      %36 = arith.mulf %34, %35 : vector<1x128xf32>
      %37 = arith.mulf %33, %33 : vector<1x128xf32>
      %38 = arith.subf %36, %37 : vector<1x128xf32>
      %cst_27 = arith.constant 0.000000e+00 : f32
      %39 = vector.broadcast %cst_27 : f32 to vector<1x128xf32>
      %40 = arith.maximumf %38, %39 : vector<1x128xf32>
      %c1 = arith.constant 1 : index
      %c0_28 = arith.constant 0 : index
      %41 = vector.load %arg3[%c1, %c0_28] : memref<8x128xf32, #tpu.memory_space<vmem>>, vector<1x128xf32>
      %cst_29 = arith.constant 9.99999974E-6 : f32
      %42 = vector.broadcast %cst_29 : f32 to vector<1x128xf32>
      %43 = arith.addf %40, %42 : vector<1x128xf32>
      %44 = math.rsqrt %43 : vector<1x128xf32>
      %45 = arith.mulf %41, %44 : vector<1x128xf32>
      %c2 = arith.constant 2 : index
      %c0_30 = arith.constant 0 : index
      %46 = vector.load %arg3[%c2, %c0_30] : memref<8x128xf32, #tpu.memory_space<vmem>>, vector<1x128xf32>
      %47 = arith.mulf %33, %45 : vector<1x128xf32>
      %48 = arith.subf %46, %47 : vector<1x128xf32>
      %cst_31 = arith.constant 0.000000e+00 : f32
      %49 = vector.broadcast %cst_31 : f32 to vector<1x128xf32>
      %50 = arith.cmpf oge, %45, %49 : vector<1x128xf32>
      %51 = vector.shape_cast %50 : vector<1x128xi1> to vector<1x128xi1>
      %52 = vector.broadcast %51 : vector<1x128xi1> to vector<288x128xi1>
      %c0_32 = arith.constant 0 : index
      %c0_33 = arith.constant 0 : index
      %53 = vector.load %arg5[%c0_32, %c0_33] : memref<288x128xbf16, #tpu.memory_space<vmem>>, vector<288x128xbf16>
      %54 = arith.extf %53 : vector<288x128xbf16> to vector<288x128xf32>
      %c0_34 = arith.constant 0 : index
      %c0_35 = arith.constant 0 : index
      %55 = vector.load %arg6[%c0_34, %c0_35] : memref<288x128xbf16, #tpu.memory_space<vmem>>, vector<288x128xbf16>
      %56 = arith.extf %55 : vector<288x128xbf16> to vector<288x128xf32>
      %57 = arith.select %52, %54, %56 : vector<288x128xi1>, vector<288x128xf32>
      %58 = vector.broadcast %45 : vector<1x128xf32> to vector<288x128xf32>
      %59 = arith.mulf %57, %58 : vector<288x128xf32>
      %60 = vector.broadcast %48 : vector<1x128xf32> to vector<288x128xf32>
      %61 = arith.addf %59, %60 : vector<288x128xf32>
      %c0_36 = arith.constant 0 : index
      %c0_37 = arith.constant 0 : index
      %62 = vector.load %arg4[%c0_36, %c0_37] : memref<288x128xf32, #tpu.memory_space<vmem>>, vector<288x128xf32>
      tpu.vector_store %arg4[%c0_36, %c0_37], %61 {strides = array<i32>} : memref<288x128xf32, #tpu.memory_space<vmem>>, vector<288x128xf32>,
    } else {
    }
    return
  }
  func.func @transform_0(%arg0: i32) -> (i32, i32, i32) {
    %c0_i32 = arith.constant 0 : i32
    %c0_i32_0 = arith.constant 0 : i32
    %c0_i32_1 = arith.constant 0 : i32
    return %arg0, %c0_i32, %c0_i32_0 : i32, i32, i32
  }
  func.func @transform_1(%arg0: i32) -> (i32, i32) {
    %c0_i32 = arith.constant 0 : i32
    %c0_i32_0 = arith.constant 0 : i32
    %c0_i32_1 = arith.constant 0 : i32
    return %c0_i32, %c0_i32_0 : i32, i32
  }
  func.func @transform_2(%arg0: i32) -> (i32, i32) {
    %c0_i32 = arith.constant 0 : i32
    %c0_i32_0 = arith.constant 0 : i32
    %c0_i32_1 = arith.constant 0 : i32
    return %c0_i32, %c0_i32_0 : i32, i32
  }
  func.func @transform_3(%arg0: i32) -> (i32, i32) {
    %c0_i32 = arith.constant 0 : i32
    %c0_i32_0 = arith.constant 0 : i32
    %c0_i32_1 = arith.constant 0 : i32
    return %c0_i32, %c0_i32_0 : i32, i32
  }
}

module attributes {stable_mosaic.version = 11 : i64} {
  func.func @_conv_block_kernel(%arg0: i32, %arg1: memref<1x72x576xbf16, #tpu.memory_space<vmem>>, %arg2: memref<576x128xbf16, #tpu.memory_space<vmem>>, %arg3: memref<8x128xf32, #tpu.memory_space<vmem>>, %arg4: memref<72x128xf32, #tpu.memory_space<vmem>>, %arg5: memref<72x128xbf16, #tpu.memory_space<vmem>>, %arg6: memref<72x128xbf16, #tpu.memory_space<vmem>>, %arg7: memref<1x128xf32, #tpu.memory_space<vmem>>, %arg8: memref<1x128xf32, #tpu.memory_space<vmem>>) attributes {dimension_semantics = [#tpu.dimension_semantics<arbitrary>], iteration_bounds = array<i64: 4>, scalar_prefetch = 0 : i64, scratch_operands = 4 : i64, tpu.core_type = #tpu.core_type<tc>, window_params = [{transform_indices = @transform_0, window_bounds = array<i64: 1, 72, 576>}, {pipeline_mode = #tpu.pipeline_mode<synchronous>, transform_indices = @transform_1, window_bounds = array<i64: 576, 128>}, {pipeline_mode = #tpu.pipeline_mode<synchronous>, transform_indices = @transform_2, window_bounds = array<i64: 8, 128>}, {pipeline_mode = #tpu.pipeline_mode<synchronous>, transform_indices = @transform_3, window_bounds = array<i64: 72, 128>}]} {
    %c0 = arith.constant 0 : index
    %c0_0 = arith.constant 0 : index
    %c0_1 = arith.constant 0 : index
    %0 = vector.load %arg1[%c0, %c0_0, %c0_1] : memref<1x72x576xbf16, #tpu.memory_space<vmem>>, vector<1x72x576xbf16>
    %1 = vector.shape_cast %0 : vector<1x72x576xbf16> to vector<72x576xbf16>
    %c0_2 = arith.constant 0 : index
    %c0_3 = arith.constant 0 : index
    %2 = vector.load %arg2[%c0_2, %c0_3] : memref<576x128xbf16, #tpu.memory_space<vmem>>, vector<576x128xbf16>
    %cst = arith.constant dense<0.000000e+00> : vector<72x128xf32>
    %3 = tpu.matmul %1, %2, %cst {dimension_numbers = #tpu.dot_dimension_numbers<[1], [0], [0], [1], [0, 0, 1, 1], [], []>} : vector<72x576xbf16>, vector<576x128xbf16>, vector<72x128xf32> -> vector<72x128xf32>
    %c0_4 = arith.constant 0 : index
    %c0_5 = arith.constant 0 : index
    %4 = vector.load %arg3[%c0_4, %c0_5] : memref<8x128xf32, #tpu.memory_space<vmem>>, vector<1x128xf32>
    %5 = vector.broadcast %4 : vector<1x128xf32> to vector<72x128xf32>
    %6 = arith.addf %3, %5 : vector<72x128xf32>
    %cst_6 = arith.constant 5.000000e-02 : f32
    %7 = vector.broadcast %cst_6 : f32 to vector<72x128xf32>
    %8 = arith.mulf %7, %6 : vector<72x128xf32>
    %9 = arith.maximumf %6, %8 : vector<72x128xf32>
    %10 = arith.truncf %9 : vector<72x128xf32> to vector<72x128xbf16>
    %c0_i32 = arith.constant 0 : i32
    %11 = arith.cmpi eq, %arg0, %c0_i32 : i32
    %12 = arith.extui %11 : i1 to i32
    %c0_i32_7 = arith.constant 0 : i32
    %13 = arith.cmpi ne, %12, %c0_i32_7 : i32
    scf.if %13 {
      %cst_21 = arith.constant 0.000000e+00 : f32
      %31 = vector.broadcast %cst_21 : f32 to vector<1x128xf32>
      %c0_22 = arith.constant 0 : index
      %c0_23 = arith.constant 0 : index
      %32 = vector.load %arg7[%c0_22, %c0_23] : memref<1x128xf32, #tpu.memory_space<vmem>>, vector<1x128xf32>
      tpu.vector_store %arg7[%c0_22, %c0_23], %31 {strides = array<i32>} : memref<1x128xf32, #tpu.memory_space<vmem>>, vector<1x128xf32>,
      %cst_24 = arith.constant 0.000000e+00 : f32
      %33 = vector.broadcast %cst_24 : f32 to vector<1x128xf32>
      %c0_25 = arith.constant 0 : index
      %c0_26 = arith.constant 0 : index
      %34 = vector.load %arg8[%c0_25, %c0_26] : memref<1x128xf32, #tpu.memory_space<vmem>>, vector<1x128xf32>
      tpu.vector_store %arg8[%c0_25, %c0_26], %33 {strides = array<i32>} : memref<1x128xf32, #tpu.memory_space<vmem>>, vector<1x128xf32>,
      %c0_27 = arith.constant 0 : index
      %c0_28 = arith.constant 0 : index
      %35 = vector.load %arg5[%c0_27, %c0_28] : memref<72x128xbf16, #tpu.memory_space<vmem>>, vector<72x128xbf16>
      tpu.vector_store %arg5[%c0_27, %c0_28], %10 {strides = array<i32>} : memref<72x128xbf16, #tpu.memory_space<vmem>>, vector<72x128xbf16>,
      %c0_29 = arith.constant 0 : index
      %c0_30 = arith.constant 0 : index
      %36 = vector.load %arg6[%c0_29, %c0_30] : memref<72x128xbf16, #tpu.memory_space<vmem>>, vector<72x128xbf16>
      tpu.vector_store %arg6[%c0_29, %c0_30], %10 {strides = array<i32>} : memref<72x128xbf16, #tpu.memory_space<vmem>>, vector<72x128xbf16>,
    } else {
    }
    %c0_8 = arith.constant 0 : index
    %c0_9 = arith.constant 0 : index
    %14 = vector.load %arg7[%c0_8, %c0_9] : memref<1x128xf32, #tpu.memory_space<vmem>>, vector<1x128xf32>
    %cst_10 = arith.constant dense<0.000000e+00> : vector<128xf32>
    %15 = vector.multi_reduction <add>, %9, %cst_10 [0] : vector<72x128xf32> to vector<128xf32>
    %16 = vector.shape_cast %15 : vector<128xf32> to vector<1x128xf32>
    %17 = arith.addf %14, %16 : vector<1x128xf32>
    %c0_11 = arith.constant 0 : index
    %c0_12 = arith.constant 0 : index
    %18 = vector.load %arg7[%c0_11, %c0_12] : memref<1x128xf32, #tpu.memory_space<vmem>>, vector<1x128xf32>
    tpu.vector_store %arg7[%c0_11, %c0_12], %17 {strides = array<i32>} : memref<1x128xf32, #tpu.memory_space<vmem>>, vector<1x128xf32>,
    %c0_13 = arith.constant 0 : index
    %c0_14 = arith.constant 0 : index
    %19 = vector.load %arg8[%c0_13, %c0_14] : memref<1x128xf32, #tpu.memory_space<vmem>>, vector<1x128xf32>
    %20 = arith.mulf %9, %9 : vector<72x128xf32>
    %cst_15 = arith.constant dense<0.000000e+00> : vector<128xf32>
    %21 = vector.multi_reduction <add>, %20, %cst_15 [0] : vector<72x128xf32> to vector<128xf32>
    %22 = vector.shape_cast %21 : vector<128xf32> to vector<1x128xf32>
    %23 = arith.addf %19, %22 : vector<1x128xf32>
    %c0_16 = arith.constant 0 : index
    %c0_17 = arith.constant 0 : index
    %24 = vector.load %arg8[%c0_16, %c0_17] : memref<1x128xf32, #tpu.memory_space<vmem>>, vector<1x128xf32>
    tpu.vector_store %arg8[%c0_16, %c0_17], %23 {strides = array<i32>} : memref<1x128xf32, #tpu.memory_space<vmem>>, vector<1x128xf32>,
    %c0_i32_18 = arith.constant 0 : i32
    %25 = arith.cmpi sgt, %arg0, %c0_i32_18 : i32
    %26 = arith.extui %25 : i1 to i32
    %c0_i32_19 = arith.constant 0 : i32
    %27 = arith.cmpi ne, %26, %c0_i32_19 : i32
    scf.if %27 {
      %c0_21 = arith.constant 0 : index
      %c0_22 = arith.constant 0 : index
      %31 = vector.load %arg5[%c0_21, %c0_22] : memref<72x128xbf16, #tpu.memory_space<vmem>>, vector<72x128xbf16>
      %32 = arith.maximumf %31, %10 : vector<72x128xbf16>
      %c0_23 = arith.constant 0 : index
      %c0_24 = arith.constant 0 : index
      %33 = vector.load %arg5[%c0_23, %c0_24] : memref<72x128xbf16, #tpu.memory_space<vmem>>, vector<72x128xbf16>
      tpu.vector_store %arg5[%c0_23, %c0_24], %32 {strides = array<i32>} : memref<72x128xbf16, #tpu.memory_space<vmem>>, vector<72x128xbf16>,
      %c0_25 = arith.constant 0 : index
      %c0_26 = arith.constant 0 : index
      %34 = vector.load %arg6[%c0_25, %c0_26] : memref<72x128xbf16, #tpu.memory_space<vmem>>, vector<72x128xbf16>
      %35 = arith.minimumf %34, %10 : vector<72x128xbf16>
      %c0_27 = arith.constant 0 : index
      %c0_28 = arith.constant 0 : index
      %36 = vector.load %arg6[%c0_27, %c0_28] : memref<72x128xbf16, #tpu.memory_space<vmem>>, vector<72x128xbf16>
      tpu.vector_store %arg6[%c0_27, %c0_28], %35 {strides = array<i32>} : memref<72x128xbf16, #tpu.memory_space<vmem>>, vector<72x128xbf16>,
    } else {
    }
    %c3_i32 = arith.constant 3 : i32
    %28 = arith.cmpi eq, %arg0, %c3_i32 : i32
    %29 = arith.extui %28 : i1 to i32
    %c0_i32_20 = arith.constant 0 : i32
    %30 = arith.cmpi ne, %29, %c0_i32_20 : i32
    scf.if %30 {
      %c0_21 = arith.constant 0 : index
      %c0_22 = arith.constant 0 : index
      %31 = vector.load %arg7[%c0_21, %c0_22] : memref<1x128xf32, #tpu.memory_space<vmem>>, vector<1x128xf32>
      %cst_23 = arith.constant 0.00347222225 : f32
      %32 = vector.broadcast %cst_23 : f32 to vector<1x128xf32>
      %33 = arith.mulf %31, %32 : vector<1x128xf32>
      %c0_24 = arith.constant 0 : index
      %c0_25 = arith.constant 0 : index
      %34 = vector.load %arg8[%c0_24, %c0_25] : memref<1x128xf32, #tpu.memory_space<vmem>>, vector<1x128xf32>
      %cst_26 = arith.constant 0.00347222225 : f32
      %35 = vector.broadcast %cst_26 : f32 to vector<1x128xf32>
      %36 = arith.mulf %34, %35 : vector<1x128xf32>
      %37 = arith.mulf %33, %33 : vector<1x128xf32>
      %38 = arith.subf %36, %37 : vector<1x128xf32>
      %cst_27 = arith.constant 0.000000e+00 : f32
      %39 = vector.broadcast %cst_27 : f32 to vector<1x128xf32>
      %40 = arith.maximumf %38, %39 : vector<1x128xf32>
      %c1 = arith.constant 1 : index
      %c0_28 = arith.constant 0 : index
      %41 = vector.load %arg3[%c1, %c0_28] : memref<8x128xf32, #tpu.memory_space<vmem>>, vector<1x128xf32>
      %cst_29 = arith.constant 9.99999974E-6 : f32
      %42 = vector.broadcast %cst_29 : f32 to vector<1x128xf32>
      %43 = arith.addf %40, %42 : vector<1x128xf32>
      %44 = math.rsqrt %43 : vector<1x128xf32>
      %45 = arith.mulf %41, %44 : vector<1x128xf32>
      %c2 = arith.constant 2 : index
      %c0_30 = arith.constant 0 : index
      %46 = vector.load %arg3[%c2, %c0_30] : memref<8x128xf32, #tpu.memory_space<vmem>>, vector<1x128xf32>
      %47 = arith.mulf %33, %45 : vector<1x128xf32>
      %48 = arith.subf %46, %47 : vector<1x128xf32>
      %cst_31 = arith.constant 0.000000e+00 : f32
      %49 = vector.broadcast %cst_31 : f32 to vector<1x128xf32>
      %50 = arith.cmpf oge, %45, %49 : vector<1x128xf32>
      %51 = vector.shape_cast %50 : vector<1x128xi1> to vector<1x128xi1>
      %52 = vector.broadcast %51 : vector<1x128xi1> to vector<72x128xi1>
      %c0_32 = arith.constant 0 : index
      %c0_33 = arith.constant 0 : index
      %53 = vector.load %arg5[%c0_32, %c0_33] : memref<72x128xbf16, #tpu.memory_space<vmem>>, vector<72x128xbf16>
      %54 = arith.extf %53 : vector<72x128xbf16> to vector<72x128xf32>
      %c0_34 = arith.constant 0 : index
      %c0_35 = arith.constant 0 : index
      %55 = vector.load %arg6[%c0_34, %c0_35] : memref<72x128xbf16, #tpu.memory_space<vmem>>, vector<72x128xbf16>
      %56 = arith.extf %55 : vector<72x128xbf16> to vector<72x128xf32>
      %57 = arith.select %52, %54, %56 : vector<72x128xi1>, vector<72x128xf32>
      %58 = vector.broadcast %45 : vector<1x128xf32> to vector<72x128xf32>
      %59 = arith.mulf %57, %58 : vector<72x128xf32>
      %60 = vector.broadcast %48 : vector<1x128xf32> to vector<72x128xf32>
      %61 = arith.addf %59, %60 : vector<72x128xf32>
      %c0_36 = arith.constant 0 : index
      %c0_37 = arith.constant 0 : index
      %62 = vector.load %arg4[%c0_36, %c0_37] : memref<72x128xf32, #tpu.memory_space<vmem>>, vector<72x128xf32>
      tpu.vector_store %arg4[%c0_36, %c0_37], %61 {strides = array<i32>} : memref<72x128xf32, #tpu.memory_space<vmem>>, vector<72x128xf32>,
    } else {
    }
    return
  }
  func.func @transform_0(%arg0: i32) -> (i32, i32, i32) {
    %c0_i32 = arith.constant 0 : i32
    %c0_i32_0 = arith.constant 0 : i32
    %c0_i32_1 = arith.constant 0 : i32
    return %arg0, %c0_i32, %c0_i32_0 : i32, i32, i32
  }
  func.func @transform_1(%arg0: i32) -> (i32, i32) {
    %c0_i32 = arith.constant 0 : i32
    %c0_i32_0 = arith.constant 0 : i32
    %c0_i32_1 = arith.constant 0 : i32
    return %c0_i32, %c0_i32_0 : i32, i32
  }
  func.func @transform_2(%arg0: i32) -> (i32, i32) {
    %c0_i32 = arith.constant 0 : i32
    %c0_i32_0 = arith.constant 0 : i32
    %c0_i32_1 = arith.constant 0 : i32
    return %c0_i32, %c0_i32_0 : i32, i32
  }
  func.func @transform_3(%arg0: i32) -> (i32, i32) {
    %c0_i32 = arith.constant 0 : i32
    %c0_i32_0 = arith.constant 0 : i32
    %c0_i32_1 = arith.constant 0 : i32
    return %c0_i32, %c0_i32_0 : i32, i32
  }
}

module attributes {stable_mosaic.version = 11 : i64} {
  func.func @_conv_block_kernel(%arg0: i32, %arg1: memref<1x18x1152xbf16, #tpu.memory_space<vmem>>, %arg2: memref<1152x128xbf16, #tpu.memory_space<vmem>>, %arg3: memref<8x128xf32, #tpu.memory_space<vmem>>, %arg4: memref<18x128xf32, #tpu.memory_space<vmem>>, %arg5: memref<18x128xbf16, #tpu.memory_space<vmem>>, %arg6: memref<18x128xbf16, #tpu.memory_space<vmem>>, %arg7: memref<1x128xf32, #tpu.memory_space<vmem>>, %arg8: memref<1x128xf32, #tpu.memory_space<vmem>>) attributes {dimension_semantics = [#tpu.dimension_semantics<arbitrary>], iteration_bounds = array<i64: 4>, scalar_prefetch = 0 : i64, scratch_operands = 4 : i64, tpu.core_type = #tpu.core_type<tc>, window_params = [{transform_indices = @transform_0, window_bounds = array<i64: 1, 18, 1152>}, {pipeline_mode = #tpu.pipeline_mode<synchronous>, transform_indices = @transform_1, window_bounds = array<i64: 1152, 128>}, {pipeline_mode = #tpu.pipeline_mode<synchronous>, transform_indices = @transform_2, window_bounds = array<i64: 8, 128>}, {pipeline_mode = #tpu.pipeline_mode<synchronous>, transform_indices = @transform_3, window_bounds = array<i64: 18, 128>}]} {
    %c0 = arith.constant 0 : index
    %c0_0 = arith.constant 0 : index
    %c0_1 = arith.constant 0 : index
    %0 = vector.load %arg1[%c0, %c0_0, %c0_1] : memref<1x18x1152xbf16, #tpu.memory_space<vmem>>, vector<1x18x1152xbf16>
    %1 = vector.shape_cast %0 : vector<1x18x1152xbf16> to vector<18x1152xbf16>
    %c0_2 = arith.constant 0 : index
    %c0_3 = arith.constant 0 : index
    %2 = vector.load %arg2[%c0_2, %c0_3] : memref<1152x128xbf16, #tpu.memory_space<vmem>>, vector<1152x128xbf16>
    %cst = arith.constant dense<0.000000e+00> : vector<18x128xf32>
    %3 = tpu.matmul %1, %2, %cst {dimension_numbers = #tpu.dot_dimension_numbers<[1], [0], [0], [1], [0, 0, 1, 1], [], []>} : vector<18x1152xbf16>, vector<1152x128xbf16>, vector<18x128xf32> -> vector<18x128xf32>
    %c0_4 = arith.constant 0 : index
    %c0_5 = arith.constant 0 : index
    %4 = vector.load %arg3[%c0_4, %c0_5] : memref<8x128xf32, #tpu.memory_space<vmem>>, vector<1x128xf32>
    %5 = vector.broadcast %4 : vector<1x128xf32> to vector<18x128xf32>
    %6 = arith.addf %3, %5 : vector<18x128xf32>
    %cst_6 = arith.constant 5.000000e-02 : f32
    %7 = vector.broadcast %cst_6 : f32 to vector<18x128xf32>
    %8 = arith.mulf %7, %6 : vector<18x128xf32>
    %9 = arith.maximumf %6, %8 : vector<18x128xf32>
    %10 = arith.truncf %9 : vector<18x128xf32> to vector<18x128xbf16>
    %c0_i32 = arith.constant 0 : i32
    %11 = arith.cmpi eq, %arg0, %c0_i32 : i32
    %12 = arith.extui %11 : i1 to i32
    %c0_i32_7 = arith.constant 0 : i32
    %13 = arith.cmpi ne, %12, %c0_i32_7 : i32
    scf.if %13 {
      %cst_21 = arith.constant 0.000000e+00 : f32
      %31 = vector.broadcast %cst_21 : f32 to vector<1x128xf32>
      %c0_22 = arith.constant 0 : index
      %c0_23 = arith.constant 0 : index
      %32 = vector.load %arg7[%c0_22, %c0_23] : memref<1x128xf32, #tpu.memory_space<vmem>>, vector<1x128xf32>
      tpu.vector_store %arg7[%c0_22, %c0_23], %31 {strides = array<i32>} : memref<1x128xf32, #tpu.memory_space<vmem>>, vector<1x128xf32>,
      %cst_24 = arith.constant 0.000000e+00 : f32
      %33 = vector.broadcast %cst_24 : f32 to vector<1x128xf32>
      %c0_25 = arith.constant 0 : index
      %c0_26 = arith.constant 0 : index
      %34 = vector.load %arg8[%c0_25, %c0_26] : memref<1x128xf32, #tpu.memory_space<vmem>>, vector<1x128xf32>
      tpu.vector_store %arg8[%c0_25, %c0_26], %33 {strides = array<i32>} : memref<1x128xf32, #tpu.memory_space<vmem>>, vector<1x128xf32>,
      %c0_27 = arith.constant 0 : index
      %c0_28 = arith.constant 0 : index
      %35 = vector.load %arg5[%c0_27, %c0_28] : memref<18x128xbf16, #tpu.memory_space<vmem>>, vector<18x128xbf16>
      tpu.vector_store %arg5[%c0_27, %c0_28], %10 {strides = array<i32>} : memref<18x128xbf16, #tpu.memory_space<vmem>>, vector<18x128xbf16>,
      %c0_29 = arith.constant 0 : index
      %c0_30 = arith.constant 0 : index
      %36 = vector.load %arg6[%c0_29, %c0_30] : memref<18x128xbf16, #tpu.memory_space<vmem>>, vector<18x128xbf16>
      tpu.vector_store %arg6[%c0_29, %c0_30], %10 {strides = array<i32>} : memref<18x128xbf16, #tpu.memory_space<vmem>>, vector<18x128xbf16>,
    } else {
    }
    %c0_8 = arith.constant 0 : index
    %c0_9 = arith.constant 0 : index
    %14 = vector.load %arg7[%c0_8, %c0_9] : memref<1x128xf32, #tpu.memory_space<vmem>>, vector<1x128xf32>
    %cst_10 = arith.constant dense<0.000000e+00> : vector<128xf32>
    %15 = vector.multi_reduction <add>, %9, %cst_10 [0] : vector<18x128xf32> to vector<128xf32>
    %16 = vector.shape_cast %15 : vector<128xf32> to vector<1x128xf32>
    %17 = arith.addf %14, %16 : vector<1x128xf32>
    %c0_11 = arith.constant 0 : index
    %c0_12 = arith.constant 0 : index
    %18 = vector.load %arg7[%c0_11, %c0_12] : memref<1x128xf32, #tpu.memory_space<vmem>>, vector<1x128xf32>
    tpu.vector_store %arg7[%c0_11, %c0_12], %17 {strides = array<i32>} : memref<1x128xf32, #tpu.memory_space<vmem>>, vector<1x128xf32>,
    %c0_13 = arith.constant 0 : index
    %c0_14 = arith.constant 0 : index
    %19 = vector.load %arg8[%c0_13, %c0_14] : memref<1x128xf32, #tpu.memory_space<vmem>>, vector<1x128xf32>
    %20 = arith.mulf %9, %9 : vector<18x128xf32>
    %cst_15 = arith.constant dense<0.000000e+00> : vector<128xf32>
    %21 = vector.multi_reduction <add>, %20, %cst_15 [0] : vector<18x128xf32> to vector<128xf32>
    %22 = vector.shape_cast %21 : vector<128xf32> to vector<1x128xf32>
    %23 = arith.addf %19, %22 : vector<1x128xf32>
    %c0_16 = arith.constant 0 : index
    %c0_17 = arith.constant 0 : index
    %24 = vector.load %arg8[%c0_16, %c0_17] : memref<1x128xf32, #tpu.memory_space<vmem>>, vector<1x128xf32>
    tpu.vector_store %arg8[%c0_16, %c0_17], %23 {strides = array<i32>} : memref<1x128xf32, #tpu.memory_space<vmem>>, vector<1x128xf32>,
    %c0_i32_18 = arith.constant 0 : i32
    %25 = arith.cmpi sgt, %arg0, %c0_i32_18 : i32
    %26 = arith.extui %25 : i1 to i32
    %c0_i32_19 = arith.constant 0 : i32
    %27 = arith.cmpi ne, %26, %c0_i32_19 : i32
    scf.if %27 {
      %c0_21 = arith.constant 0 : index
      %c0_22 = arith.constant 0 : index
      %31 = vector.load %arg5[%c0_21, %c0_22] : memref<18x128xbf16, #tpu.memory_space<vmem>>, vector<18x128xbf16>
      %32 = arith.maximumf %31, %10 : vector<18x128xbf16>
      %c0_23 = arith.constant 0 : index
      %c0_24 = arith.constant 0 : index
      %33 = vector.load %arg5[%c0_23, %c0_24] : memref<18x128xbf16, #tpu.memory_space<vmem>>, vector<18x128xbf16>
      tpu.vector_store %arg5[%c0_23, %c0_24], %32 {strides = array<i32>} : memref<18x128xbf16, #tpu.memory_space<vmem>>, vector<18x128xbf16>,
      %c0_25 = arith.constant 0 : index
      %c0_26 = arith.constant 0 : index
      %34 = vector.load %arg6[%c0_25, %c0_26] : memref<18x128xbf16, #tpu.memory_space<vmem>>, vector<18x128xbf16>
      %35 = arith.minimumf %34, %10 : vector<18x128xbf16>
      %c0_27 = arith.constant 0 : index
      %c0_28 = arith.constant 0 : index
      %36 = vector.load %arg6[%c0_27, %c0_28] : memref<18x128xbf16, #tpu.memory_space<vmem>>, vector<18x128xbf16>
      tpu.vector_store %arg6[%c0_27, %c0_28], %35 {strides = array<i32>} : memref<18x128xbf16, #tpu.memory_space<vmem>>, vector<18x128xbf16>,
    } else {
    }
    %c3_i32 = arith.constant 3 : i32
    %28 = arith.cmpi eq, %arg0, %c3_i32 : i32
    %29 = arith.extui %28 : i1 to i32
    %c0_i32_20 = arith.constant 0 : i32
    %30 = arith.cmpi ne, %29, %c0_i32_20 : i32
    scf.if %30 {
      %c0_21 = arith.constant 0 : index
      %c0_22 = arith.constant 0 : index
      %31 = vector.load %arg7[%c0_21, %c0_22] : memref<1x128xf32, #tpu.memory_space<vmem>>, vector<1x128xf32>
      %cst_23 = arith.constant 0.013888889 : f32
      %32 = vector.broadcast %cst_23 : f32 to vector<1x128xf32>
      %33 = arith.mulf %31, %32 : vector<1x128xf32>
      %c0_24 = arith.constant 0 : index
      %c0_25 = arith.constant 0 : index
      %34 = vector.load %arg8[%c0_24, %c0_25] : memref<1x128xf32, #tpu.memory_space<vmem>>, vector<1x128xf32>
      %cst_26 = arith.constant 0.013888889 : f32
      %35 = vector.broadcast %cst_26 : f32 to vector<1x128xf32>
      %36 = arith.mulf %34, %35 : vector<1x128xf32>
      %37 = arith.mulf %33, %33 : vector<1x128xf32>
      %38 = arith.subf %36, %37 : vector<1x128xf32>
      %cst_27 = arith.constant 0.000000e+00 : f32
      %39 = vector.broadcast %cst_27 : f32 to vector<1x128xf32>
      %40 = arith.maximumf %38, %39 : vector<1x128xf32>
      %c1 = arith.constant 1 : index
      %c0_28 = arith.constant 0 : index
      %41 = vector.load %arg3[%c1, %c0_28] : memref<8x128xf32, #tpu.memory_space<vmem>>, vector<1x128xf32>
      %cst_29 = arith.constant 9.99999974E-6 : f32
      %42 = vector.broadcast %cst_29 : f32 to vector<1x128xf32>
      %43 = arith.addf %40, %42 : vector<1x128xf32>
      %44 = math.rsqrt %43 : vector<1x128xf32>
      %45 = arith.mulf %41, %44 : vector<1x128xf32>
      %c2 = arith.constant 2 : index
      %c0_30 = arith.constant 0 : index
      %46 = vector.load %arg3[%c2, %c0_30] : memref<8x128xf32, #tpu.memory_space<vmem>>, vector<1x128xf32>
      %47 = arith.mulf %33, %45 : vector<1x128xf32>
      %48 = arith.subf %46, %47 : vector<1x128xf32>
      %cst_31 = arith.constant 0.000000e+00 : f32
      %49 = vector.broadcast %cst_31 : f32 to vector<1x128xf32>
      %50 = arith.cmpf oge, %45, %49 : vector<1x128xf32>
      %51 = vector.shape_cast %50 : vector<1x128xi1> to vector<1x128xi1>
      %52 = vector.broadcast %51 : vector<1x128xi1> to vector<18x128xi1>
      %c0_32 = arith.constant 0 : index
      %c0_33 = arith.constant 0 : index
      %53 = vector.load %arg5[%c0_32, %c0_33] : memref<18x128xbf16, #tpu.memory_space<vmem>>, vector<18x128xbf16>
      %54 = arith.extf %53 : vector<18x128xbf16> to vector<18x128xf32>
      %c0_34 = arith.constant 0 : index
      %c0_35 = arith.constant 0 : index
      %55 = vector.load %arg6[%c0_34, %c0_35] : memref<18x128xbf16, #tpu.memory_space<vmem>>, vector<18x128xbf16>
      %56 = arith.extf %55 : vector<18x128xbf16> to vector<18x128xf32>
      %57 = arith.select %52, %54, %56 : vector<18x128xi1>, vector<18x128xf32>
      %58 = vector.broadcast %45 : vector<1x128xf32> to vector<18x128xf32>
      %59 = arith.mulf %57, %58 : vector<18x128xf32>
      %60 = vector.broadcast %48 : vector<1x128xf32> to vector<18x128xf32>
      %61 = arith.addf %59, %60 : vector<18x128xf32>
      %c0_36 = arith.constant 0 : index
      %c0_37 = arith.constant 0 : index
      %62 = vector.load %arg4[%c0_36, %c0_37] : memref<18x128xf32, #tpu.memory_space<vmem>>, vector<18x128xf32>
      tpu.vector_store %arg4[%c0_36, %c0_37], %61 {strides = array<i32>} : memref<18x128xf32, #tpu.memory_space<vmem>>, vector<18x128xf32>,
    } else {
    }
    return
  }
  func.func @transform_0(%arg0: i32) -> (i32, i32, i32) {
    %c0_i32 = arith.constant 0 : i32
    %c0_i32_0 = arith.constant 0 : i32
    %c0_i32_1 = arith.constant 0 : i32
    return %arg0, %c0_i32, %c0_i32_0 : i32, i32, i32
  }
  func.func @transform_1(%arg0: i32) -> (i32, i32) {
    %c0_i32 = arith.constant 0 : i32
    %c0_i32_0 = arith.constant 0 : i32
    %c0_i32_1 = arith.constant 0 : i32
    return %c0_i32, %c0_i32_0 : i32, i32
  }
  func.func @transform_2(%arg0: i32) -> (i32, i32) {
    %c0_i32 = arith.constant 0 : i32
    %c0_i32_0 = arith.constant 0 : i32
    %c0_i32_1 = arith.constant 0 : i32
    return %c0_i32, %c0_i32_0 : i32, i32
  }
  func.func @transform_3(%arg0: i32) -> (i32, i32) {
    %c0_i32 = arith.constant 0 : i32
    %c0_i32_0 = arith.constant 0 : i32
    %c0_i32_1 = arith.constant 0 : i32
    return %c0_i32, %c0_i32_0 : i32, i32
  }
}

module attributes {stable_mosaic.version = 11 : i64} {
  func.func @_fc_kernel(%arg0: memref<8x1152xbf16, #tpu.memory_space<vmem>>, %arg1: memref<1152x256xbf16, #tpu.memory_space<vmem>>, %arg2: memref<8x256xf32, #tpu.memory_space<vmem>>, %arg3: memref<256x128xbf16, #tpu.memory_space<vmem>>, %arg4: memref<8x128xf32, #tpu.memory_space<vmem>>, %arg5: memref<128x128xbf16, #tpu.memory_space<vmem>>, %arg6: memref<8x128xf32, #tpu.memory_space<vmem>>) attributes {dimension_semantics = [], scalar_prefetch = 0 : i64, scratch_operands = 0 : i64, tpu.core_type = #tpu.core_type<tc>} {
    %c0 = arith.constant 0 : index
    %c0_0 = arith.constant 0 : index
    %0 = vector.load %arg0[%c0, %c0_0] : memref<8x1152xbf16, #tpu.memory_space<vmem>>, vector<8x1152xbf16>
    %c0_1 = arith.constant 0 : index
    %c0_2 = arith.constant 0 : index
    %1 = vector.load %arg1[%c0_1, %c0_2] : memref<1152x256xbf16, #tpu.memory_space<vmem>>, vector<1152x256xbf16>
    %cst = arith.constant dense<0.000000e+00> : vector<8x256xf32>
    %2 = tpu.matmul %0, %1, %cst {dimension_numbers = #tpu.dot_dimension_numbers<[1], [0], [0], [1], [0, 0, 1, 1], [], []>} : vector<8x1152xbf16>, vector<1152x256xbf16>, vector<8x256xf32> -> vector<8x256xf32>
    %c0_3 = arith.constant 0 : index
    %c0_4 = arith.constant 0 : index
    %3 = vector.load %arg2[%c0_3, %c0_4] : memref<8x256xf32, #tpu.memory_space<vmem>>, vector<1x256xf32>
    %4 = vector.broadcast %3 : vector<1x256xf32> to vector<8x256xf32>
    %5 = arith.addf %2, %4 : vector<8x256xf32>
    %cst_5 = arith.constant 0.000000e+00 : f32
    %6 = vector.broadcast %cst_5 : f32 to vector<8x256xf32>
    %7 = arith.maximumf %5, %6 : vector<8x256xf32>
    %c1 = arith.constant 1 : index
    %c0_6 = arith.constant 0 : index
    %8 = vector.load %arg2[%c1, %c0_6] : memref<8x256xf32, #tpu.memory_space<vmem>>, vector<1x256xf32>
    %c2 = arith.constant 2 : index
    %c0_7 = arith.constant 0 : index
    %9 = vector.load %arg2[%c2, %c0_7] : memref<8x256xf32, #tpu.memory_space<vmem>>, vector<1x256xf32>
    %10 = tpu.iota {dimensions = array<i32: 0>} : vector<8x256xi32>
    %c2_i32 = arith.constant 2 : i32
    %11 = vector.broadcast %c2_i32 : i32 to vector<8x256xi32>
    %12 = arith.cmpi slt, %10, %11 : vector<8x256xi32>
    %cst_8 = arith.constant 0.000000e+00 : f32
    %13 = vector.broadcast %cst_8 : f32 to vector<8x256xf32>
    %14 = arith.select %12, %7, %13 : vector<8x256xi1>, vector<8x256xf32>
    %cst_9 = arith.constant dense<0.000000e+00> : vector<256xf32>
    %15 = vector.multi_reduction <add>, %14, %cst_9 [0] : vector<8x256xf32> to vector<256xf32>
    %16 = vector.shape_cast %15 : vector<256xf32> to vector<1x256xf32>
    %cst_10 = arith.constant 5.000000e-01 : f32
    %17 = vector.broadcast %cst_10 : f32 to vector<1x256xf32>
    %18 = arith.mulf %16, %17 : vector<1x256xf32>
    %19 = arith.mulf %14, %14 : vector<8x256xf32>
    %cst_11 = arith.constant dense<0.000000e+00> : vector<256xf32>
    %20 = vector.multi_reduction <add>, %19, %cst_11 [0] : vector<8x256xf32> to vector<256xf32>
    %21 = vector.shape_cast %20 : vector<256xf32> to vector<1x256xf32>
    %cst_12 = arith.constant 5.000000e-01 : f32
    %22 = vector.broadcast %cst_12 : f32 to vector<1x256xf32>
    %23 = arith.mulf %21, %22 : vector<1x256xf32>
    %24 = arith.mulf %18, %18 : vector<1x256xf32>
    %25 = arith.subf %23, %24 : vector<1x256xf32>
    %cst_13 = arith.constant 0.000000e+00 : f32
    %26 = vector.broadcast %cst_13 : f32 to vector<1x256xf32>
    %27 = arith.maximumf %25, %26 : vector<1x256xf32>
    %cst_14 = arith.constant 9.99999974E-6 : f32
    %28 = vector.broadcast %cst_14 : f32 to vector<1x256xf32>
    %29 = arith.addf %27, %28 : vector<1x256xf32>
    %30 = math.rsqrt %29 : vector<1x256xf32>
    %31 = arith.mulf %8, %30 : vector<1x256xf32>
    %32 = vector.broadcast %31 : vector<1x256xf32> to vector<8x256xf32>
    %33 = arith.mulf %7, %32 : vector<8x256xf32>
    %34 = arith.mulf %18, %31 : vector<1x256xf32>
    %35 = arith.subf %9, %34 : vector<1x256xf32>
    %36 = vector.broadcast %35 : vector<1x256xf32> to vector<8x256xf32>
    %37 = arith.addf %33, %36 : vector<8x256xf32>
    %38 = arith.truncf %37 : vector<8x256xf32> to vector<8x256xbf16>
    %c0_15 = arith.constant 0 : index
    %c0_16 = arith.constant 0 : index
    %39 = vector.load %arg3[%c0_15, %c0_16] : memref<256x128xbf16, #tpu.memory_space<vmem>>, vector<256x128xbf16>
    %cst_17 = arith.constant dense<0.000000e+00> : vector<8x128xf32>
    %40 = tpu.matmul %38, %39, %cst_17 {dimension_numbers = #tpu.dot_dimension_numbers<[1], [0], [0], [1], [0, 0, 1, 1], [], []>} : vector<8x256xbf16>, vector<256x128xbf16>, vector<8x128xf32> -> vector<8x128xf32>
    %c0_18 = arith.constant 0 : index
    %c0_19 = arith.constant 0 : index
    %41 = vector.load %arg4[%c0_18, %c0_19] : memref<8x128xf32, #tpu.memory_space<vmem>>, vector<1x128xf32>
    %42 = vector.broadcast %41 : vector<1x128xf32> to vector<8x128xf32>
    %43 = arith.addf %40, %42 : vector<8x128xf32>
    %cst_20 = arith.constant 0.000000e+00 : f32
    %44 = vector.broadcast %cst_20 : f32 to vector<8x128xf32>
    %45 = arith.maximumf %43, %44 : vector<8x128xf32>
    %c1_21 = arith.constant 1 : index
    %c0_22 = arith.constant 0 : index
    %46 = vector.load %arg4[%c1_21, %c0_22] : memref<8x128xf32, #tpu.memory_space<vmem>>, vector<1x128xf32>
    %c2_23 = arith.constant 2 : index
    %c0_24 = arith.constant 0 : index
    %47 = vector.load %arg4[%c2_23, %c0_24] : memref<8x128xf32, #tpu.memory_space<vmem>>, vector<1x128xf32>
    %48 = tpu.iota {dimensions = array<i32: 0>} : vector<8x128xi32>
    %c2_i32_25 = arith.constant 2 : i32
    %49 = vector.broadcast %c2_i32_25 : i32 to vector<8x128xi32>
    %50 = arith.cmpi slt, %48, %49 : vector<8x128xi32>
    %cst_26 = arith.constant 0.000000e+00 : f32
    %51 = vector.broadcast %cst_26 : f32 to vector<8x128xf32>
    %52 = arith.select %50, %45, %51 : vector<8x128xi1>, vector<8x128xf32>
    %cst_27 = arith.constant dense<0.000000e+00> : vector<128xf32>
    %53 = vector.multi_reduction <add>, %52, %cst_27 [0] : vector<8x128xf32> to vector<128xf32>
    %54 = vector.shape_cast %53 : vector<128xf32> to vector<1x128xf32>
    %cst_28 = arith.constant 5.000000e-01 : f32
    %55 = vector.broadcast %cst_28 : f32 to vector<1x128xf32>
    %56 = arith.mulf %54, %55 : vector<1x128xf32>
    %57 = arith.mulf %52, %52 : vector<8x128xf32>
    %cst_29 = arith.constant dense<0.000000e+00> : vector<128xf32>
    %58 = vector.multi_reduction <add>, %57, %cst_29 [0] : vector<8x128xf32> to vector<128xf32>
    %59 = vector.shape_cast %58 : vector<128xf32> to vector<1x128xf32>
    %cst_30 = arith.constant 5.000000e-01 : f32
    %60 = vector.broadcast %cst_30 : f32 to vector<1x128xf32>
    %61 = arith.mulf %59, %60 : vector<1x128xf32>
    %62 = arith.mulf %56, %56 : vector<1x128xf32>
    %63 = arith.subf %61, %62 : vector<1x128xf32>
    %cst_31 = arith.constant 0.000000e+00 : f32
    %64 = vector.broadcast %cst_31 : f32 to vector<1x128xf32>
    %65 = arith.maximumf %63, %64 : vector<1x128xf32>
    %cst_32 = arith.constant 9.99999974E-6 : f32
    %66 = vector.broadcast %cst_32 : f32 to vector<1x128xf32>
    %67 = arith.addf %65, %66 : vector<1x128xf32>
    %68 = math.rsqrt %67 : vector<1x128xf32>
    %69 = arith.mulf %46, %68 : vector<1x128xf32>
    %70 = vector.broadcast %69 : vector<1x128xf32> to vector<8x128xf32>
    %71 = arith.mulf %45, %70 : vector<8x128xf32>
    %72 = arith.mulf %56, %69 : vector<1x128xf32>
    %73 = arith.subf %47, %72 : vector<1x128xf32>
    %74 = vector.broadcast %73 : vector<1x128xf32> to vector<8x128xf32>
    %75 = arith.addf %71, %74 : vector<8x128xf32>
    %76 = arith.truncf %75 : vector<8x128xf32> to vector<8x128xbf16>
    %c0_33 = arith.constant 0 : index
    %c0_34 = arith.constant 0 : index
    %77 = vector.load %arg5[%c0_33, %c0_34] : memref<128x128xbf16, #tpu.memory_space<vmem>>, vector<128x128xbf16>
    %cst_35 = arith.constant dense<0.000000e+00> : vector<8x128xf32>
    %78 = tpu.matmul %76, %77, %cst_35 {dimension_numbers = #tpu.dot_dimension_numbers<[1], [0], [0], [1], [0, 0, 1, 1], [], []>} : vector<8x128xbf16>, vector<128x128xbf16>, vector<8x128xf32> -> vector<8x128xf32>
    %c3 = arith.constant 3 : index
    %c0_36 = arith.constant 0 : index
    %79 = vector.load %arg4[%c3, %c0_36] : memref<8x128xf32, #tpu.memory_space<vmem>>, vector<1x128xf32>
    %80 = vector.broadcast %79 : vector<1x128xf32> to vector<8x128xf32>
    %81 = arith.addf %78, %80 : vector<8x128xf32>
    %c0_37 = arith.constant 0 : index
    %c0_38 = arith.constant 0 : index
    %82 = vector.load %arg6[%c0_37, %c0_38] : memref<8x128xf32, #tpu.memory_space<vmem>>, vector<8x128xf32>
    tpu.vector_store %arg6[%c0_37, %c0_38], %81 {strides = array<i32>} : memref<8x128xf32, #tpu.memory_space<vmem>>, vector<8x128xf32>,
    return
  }
}

</mosaic_0001>

<bundles_post_ra>
// kernel: _lambda_.5
= control target key start
LH: loop header
LB: loop body
LE: loop exit
PB: predicated region body
PF: predicated region fallthrough
CT: control target
= control target key end

     0   :  { %s4472_s12 = smov 0   ;;  %s7485_s0 = inlined_call_operand.vmem [shape: bf16[4,1152,32], index: 0, kind: input, shape index: {}]   ;;  %s7486_s1 = inlined_call_operand.vmem [shape: bf16[32,128], index: 1, kind: input, shape index: {}]   ;;  %s7487_s2 = inlined_call_operand.vmem [shape: f32[8,128], index: 2, kind: input, shape index: {}]   ;;  %s7488_s3 = inlined_call_operand.vmem [shape: f32[1152,128], index: 3, kind: output, shape index: {}]  }
   0x1 LB: > { %s4478_s13 = sadd.s32 4294967295, %s4448_s12   ;;  %p3974_p0 = scmp.ge.s32.totalorder %s4448_s12, 1  ;;  %s4448_s12 = sphi %s4472_s12, %s13_s12  }
   0x2   : > { %p132_p1 = scmp.lt.s32.totalorder %s4448_s12, 5 }
   0x4   : > { %p133_p2 = pnand %p3974_p0, %p132_p1 }
   0x6   : > { %136 = sbr.rel (%p133_p2) target bundleno = 1024 (0x400), region = 32 }
   0xd   : > { %v4365_v0 = vld [vmem:[%s7486_s1] sm:$0xff]   ;;  %p151_p3 = scmp.lt.s32.totalorder %s4478_s13, 3  ;;  %v4366_v1 = vld [vmem:[%s7486_s1 + $0x8] sm:$0xff]   ;;  %vm682_vm0 = vcmask 261120   ;;  %p4123_p4 = scmp.ne.s32.totalorder %s4478_s13, 0 }
   0xe   : > { %4202 = vmatprep.subr.bf16.mxu0 %v4365_v0  ;;  %4350 = vmatprep.subr.bf16.mxu1 %v4365_v0 }
   0xf   : > { %s152_s18 = scalar_select %p151_p3, %s4478_s13, 3  ;;  %4203 = vmatpush3.bf16.msra.mxu0 %v4365_v0  ;;  %4352 = vmatpush3.bf16.msra.mxu1 %v4365_v0 }
  0x10   : > { %4204 = vmatprep.subr.bf16.mxu0 %v4366_v1  ;;  %4351 = vmatprep.subr.bf16.mxu1 %v4366_v1 }
  0x11   : > { %s4354_s19 = smul.u32 576, %s152_s18 }
  0x13   : > { %s4493_s22 = scalar_lea.vmem %s7485_s0, %s4354_s19  ;;  %4205 = vmatpush3.bf16.msra.mxu0 %v4366_v1  ;;  %4353 = vmatpush3.bf16.msra.mxu1 %v4366_v1 }
  0x14   : > { %v4367_v2 = vld [vmem:[%s4493_s22] sm:$0xff]   ;;  %v4369_v4 = vld [vmem:[%s4493_s22 + $0x8] sm:$0xff]   ;;  %v4371_v6 = vld [vmem:[%s4493_s22 + $0x10] sm:$0xff]  }
  0x15   : > { %v4368_v3 = vld [vmem:[%s4493_s22 + $0x120] sm:$0xff]   ;;  %4206 = vmatprep.mubr.msk.bf16.mxu0 %vm682_vm0, %v4367_v2  ;;  %v4370_v5 = vld [vmem:[%s4493_s22 + $0x128] sm:$0xff]   ;;  %v4372_v7 = vld [vmem:[%s4493_s22 + $0x130] sm:$0xff]  }
  0x16   : > { %4278 = vmatprep.mubr.msk.bf16.mxu1 %vm682_vm0, %v4368_v3  ;;  %4207 = vmatmul.mubr.msk.bf16.vlgmr.msra.gmra.mrb[0].mxu0 %vm682_vm0, %v4369_v4  ;;  %v4373_v8 = vld [vmem:[%s4493_s22 + $0x18] sm:$0xff]   ;;  %v4375_v10 = vld [vmem:[%s4493_s22 + $0x20] sm:$0xff]   ;;  %v4377_v12 = vld [vmem:[%s4493_s22 + $0x28] sm:$0xff]  }
  0x17   : > { %4279 = vmatmul.mubr.msk.bf16.vlgmr.msra.gmra.mrb[0].mxu1 %vm682_vm0, %v4370_v5  ;;  %4210 = vmatprep.mubr.msk.bf16.mxu0 %vm682_vm0, %v4371_v6  ;;  %v4374_v9 = vld [vmem:[%s4493_s22 + $0x138] sm:$0xff]   ;;  %v4376_v11 = vld [vmem:[%s4493_s22 + $0x140] sm:$0xff]   ;;  %v4378_v13 = vld [vmem:[%s4493_s22 + $0x148] sm:$0xff]  }
  0x18   : > { %4282 = vmatprep.mubr.msk.bf16.mxu1 %vm682_vm0, %v4372_v7  ;;  %v4379_v14 = vld [vmem:[%s4493_s22 + $0x30] sm:$0xff]   ;;  %v4381_v16 = vld [vmem:[%s4493_s22 + $0x38] sm:$0xff]   ;;  %v4383_v18 = vld [vmem:[%s4493_s22 + $0x40] sm:$0xff]  }
  0x19   : > { %v4380_v15 = vld [vmem:[%s4493_s22 + $0x150] sm:$0xff]   ;;  %v4382_v17 = vld [vmem:[%s4493_s22 + $0x158] sm:$0xff]   ;;  %v4384_v19 = vld [vmem:[%s4493_s22 + $0x160] sm:$0xff]  }
  0x1a   : > { %v4385_v20 = vld [vmem:[%s4493_s22 + $0x48] sm:$0xff]   ;;  %v4387_v22 = vld [vmem:[%s4493_s22 + $0x50] sm:$0xff]   ;;  %v4389_v24 = vld [vmem:[%s4493_s22 + $0x58] sm:$0xff]  }
  0x1b   : > { %v4386_v21 = vld [vmem:[%s4493_s22 + $0x168] sm:$0xff]   ;;  %v4388_v23 = vld [vmem:[%s4493_s22 + $0x170] sm:$0xff]   ;;  %v4390_v25 = vld [vmem:[%s4493_s22 + $0x178] sm:$0xff]  }
  0x1c   : > { %v4391_v26 = vld [vmem:[%s4493_s22 + $0x60] sm:$0xff]   ;;  %v4393_v28 = vld [vmem:[%s4493_s22 + $0x68] sm:$0xff]   ;;  %v4395_v30 = vld [vmem:[%s4493_s22 + $0x70] sm:$0xff]  }
  0x1d   : > { %v4392_v27 = vld [vmem:[%s4493_s22 + $0x180] sm:$0xff]   ;;  %v4394_v29 = vld [vmem:[%s4493_s22 + $0x188] sm:$0xff]   ;;  %v4396_v31 = vld [vmem:[%s4493_s22 + $0x190] sm:$0xff]  }
  0x1e   : > { %4211 = vmatmul.mubr.msk.bf16.gmra.mrb[4].mxu0 %vm682_vm0, %v4373_v8  ;;  %v4397_v32 = vld [vmem:[%s4493_s22 + $0x78] sm:$0xff]   ;;  %v4399_v34 = vld [vmem:[%s4493_s22 + $0x80] sm:$0xff]   ;;  %v4401_v36 = vld [vmem:[%s4493_s22 + $0x88] sm:$0xff]  }
  0x1f   : > { %4283 = vmatmul.mubr.msk.bf16.gmra.mrb[4].mxu1 %vm682_vm0, %v4374_v9  ;;  %4214 = vmatprep.mubr.msk.bf16.mxu0 %vm682_vm0, %v4375_v10  ;;  %v4398_v33 = vld [vmem:[%s4493_s22 + $0x198] sm:$0xff]   ;;  %v4400_v35 = vld [vmem:[%s4493_s22 + $0x1a0] sm:$0xff]   ;;  %v4402_v37 = vld [vmem:[%s4493_s22 + $0x1a8] sm:$0xff]  }
  0x20   : > { %4286 = vmatprep.mubr.msk.bf16.mxu1 %vm682_vm0, %v4376_v11  ;;  %v4403_v38 = vld [vmem:[%s4493_s22 + $0x90] sm:$0xff]   ;;  %v4405_v40 = vld [vmem:[%s4493_s22 + $0x98] sm:$0xff]   ;;  %v4407_v42 = vld [vmem:[%s4493_s22 + $0xa0] sm:$0xff]  }
  0x21   : > { %v4404_v39 = vld [vmem:[%s4493_s22 + $0x1b0] sm:$0xff]   ;;  %v4406_v41 = vld [vmem:[%s4493_s22 + $0x1b8] sm:$0xff]   ;;  %v4408_v43 = vld [vmem:[%s4493_s22 + $0x1c0] sm:$0xff]  }
  0x22   : > { %v4409_v44 = vld [vmem:[%s4493_s22 + $0xa8] sm:$0xff]   ;;  %v4411_v46 = vld [vmem:[%s4493_s22 + $0xb0] sm:$0xff]   ;;  %v4413_v48 = vld [vmem:[%s4493_s22 + $0xb8] sm:$0xff]  }
  0x23   : > { %v4410_v45 = vld [vmem:[%s4493_s22 + $0x1c8] sm:$0xff]   ;;  %v4412_v47 = vld [vmem:[%s4493_s22 + $0x1d0] sm:$0xff]   ;;  %v4414_v49 = vld [vmem:[%s4493_s22 + $0x1d8] sm:$0xff]  }
  0x24   : > { %v4415_v50 = vld [vmem:[%s4493_s22 + $0xc0] sm:$0xff]   ;;  %v4417_v52 = vld [vmem:[%s4493_s22 + $0xc8] sm:$0xff]   ;;  %v4419_v54 = vld [vmem:[%s4493_s22 + $0xd0] sm:$0xff]  }
  0x25   : > { %v4416_v51 = vld [vmem:[%s4493_s22 + $0x1e0] sm:$0xff]   ;;  %v4418_v53 = vld [vmem:[%s4493_s22 + $0x1e8] sm:$0xff]   ;;  %v4420_v55 = vld [vmem:[%s4493_s22 + $0x1f0] sm:$0xff]  }
  0x26   : > { %4215 = vmatmul.mubr.msk.bf16.gmra.mrb[8].mxu0 %vm682_vm0, %v4377_v12  ;;  %v4421_v56 = vld [vmem:[%s4493_s22 + $0xd8] sm:$0xff]   ;;  %v4423_v58 = vld [vmem:[%s4493_s22 + $0xe0] sm:$0xff]   ;;  %v4425_v60 = vld [vmem:[%s4493_s22 + $0xe8] sm:$0xff]  }
  0x27   : > { %4287 = vmatmul.mubr.msk.bf16.gmra.mrb[8].mxu1 %vm682_vm0, %v4378_v13  ;;  %4218 = vmatprep.mubr.msk.bf16.mxu0 %vm682_vm0, %v4379_v14  ;;  %v4422_v57 = vld [vmem:[%s4493_s22 + $0x1f8] sm:$0xff]   ;;  %v4424_v59 = vld [vmem:[%s4493_s22 + $0x200] sm:$0xff]   ;;  %v4426_v61 = vld [vmem:[%s4493_s22 + $0x208] sm:$0xff]  }
  0x28   : > { %4290 = vmatprep.mubr.msk.bf16.mxu1 %vm682_vm0, %v4380_v15  ;;  %v4427_v62 = vld [vmem:[%s4493_s22 + $0xf0] sm:$0xff]   ;;  %v4429_v0 = vld [vmem:[%s4493_s22 + $0xf8] sm:$0xff]   ;;  %v4431_v2 = vld [vmem:[%s4493_s22 + $0x100] sm:$0xff]  }
  0x29   : > { %v4428_v63 = vld [vmem:[%s4493_s22 + $0x210] sm:$0xff]   ;;  %v4430_v1 = vld [vmem:[%s4493_s22 + $0x218] sm:$0xff]   ;;  %v4432_v3 = vld [vmem:[%s4493_s22 + $0x220] sm:$0xff]  }
  0x2a   : > { %v4433_v4 = vld [vmem:[%s4493_s22 + $0x108] sm:$0xff]   ;;  %v4435_v6 = vld [vmem:[%s4493_s22 + $0x110] sm:$0xff]   ;;  %v4437_v8 = vld [vmem:[%s4493_s22 + $0x118] sm:$0xff]  }
  0x2b   : > { %v4434_v5 = vld [vmem:[%s4493_s22 + $0x228] sm:$0xff]   ;;  %v4436_v7 = vld [vmem:[%s4493_s22 + $0x230] sm:$0xff]   ;;  %v4438_v9 = vld [vmem:[%s4493_s22 + $0x238] sm:$0xff]  }
  0x2c   : > { %v4642_v10 = vld [vmem:[%s7487_s2] ss:$0 sm:$0xff] }
  0x2e   : > { %4219 = vmatmul.mubr.msk.bf16.gmra.mrb[12].mxu0 %vm682_vm0, %v4381_v16 }
  0x2f   : > { %4291 = vmatmul.mubr.msk.bf16.gmra.mrb[12].mxu1 %vm682_vm0, %v4382_v17  ;;  %4222 = vmatprep.mubr.msk.bf16.mxu0 %vm682_vm0, %v4383_v18 }
  0x30   : > { %4294 = vmatprep.mubr.msk.bf16.mxu1 %vm682_vm0, %v4384_v19 }
  0x36   : > { %4223 = vmatmul.mubr.msk.bf16.gmra.mrb[16].mxu0 %vm682_vm0, %v4385_v20 }
  0x37   : > { %4295 = vmatmul.mubr.msk.bf16.gmra.mrb[16].mxu1 %vm682_vm0, %v4386_v21  ;;  %4226 = vmatprep.mubr.msk.bf16.mxu0 %vm682_vm0, %v4387_v22 }
  0x38   : > { %4298 = vmatprep.mubr.msk.bf16.mxu1 %vm682_vm0, %v4388_v23 }
  0x3e   : > { %4227 = vmatmul.mubr.msk.bf16.gmra.mrb[20].mxu0 %vm682_vm0, %v4389_v24 }
  0x3f   : > { %4299 = vmatmul.mubr.msk.bf16.gmra.mrb[20].mxu1 %vm682_vm0, %v4390_v25  ;;  %4230 = vmatprep.mubr.msk.bf16.mxu0 %vm682_vm0, %v4391_v26 }
  0x40   : > { %4302 = vmatprep.mubr.msk.bf16.mxu1 %vm682_vm0, %v4392_v27 }
  0x46   : > { %4231 = vmatmul.mubr.msk.bf16.gmra.mrb[24].mxu0 %vm682_vm0, %v4393_v28 }
  0x47   : > { %4303 = vmatmul.mubr.msk.bf16.gmra.mrb[24].mxu1 %vm682_vm0, %v4394_v29  ;;  %4234 = vmatprep.mubr.msk.bf16.mxu0 %vm682_vm0, %v4395_v30 }
  0x48   : > { %4306 = vmatprep.mubr.msk.bf16.mxu1 %vm682_vm0, %v4396_v31 }
  0x4e   : > { %4235 = vmatmul.mubr.msk.bf16.gmra.mrb[28].mxu0 %vm682_vm0, %v4397_v32 }
  0x4f   : > { %4307 = vmatmul.mubr.msk.bf16.gmra.mrb[28].mxu1 %vm682_vm0, %v4398_v33  ;;  %4238 = vmatprep.mubr.msk.bf16.mxu0 %vm682_vm0, %v4399_v34 }
  0x50   : > { %4310 = vmatprep.mubr.msk.bf16.mxu1 %vm682_vm0, %v4400_v35 }
  0x56   : > { %4239 = vmatmul.mubr.msk.bf16.gmra.mrb[32].mxu0 %vm682_vm0, %v4401_v36 }
  0x57   : > { %4311 = vmatmul.mubr.msk.bf16.gmra.mrb[32].mxu1 %vm682_vm0, %v4402_v37  ;;  %4242 = vmatprep.mubr.msk.bf16.mxu0 %vm682_vm0, %v4403_v38 }
  0x58   : > { %4314 = vmatprep.mubr.msk.bf16.mxu1 %vm682_vm0, %v4404_v39 }
  0x5e   : > { %4243 = vmatmul.mubr.msk.bf16.gmra.mrb[36].mxu0 %vm682_vm0, %v4405_v40 }
  0x5f   : > { %4315 = vmatmul.mubr.msk.bf16.gmra.mrb[36].mxu1 %vm682_vm0, %v4406_v41  ;;  %4246 = vmatprep.mubr.msk.bf16.mxu0 %vm682_vm0, %v4407_v42 }
  0x60   : > { %4318 = vmatprep.mubr.msk.bf16.mxu1 %vm682_vm0, %v4408_v43 }
  0x66   : > { %4247 = vmatmul.mubr.msk.bf16.gmra.mrb[40].mxu0 %vm682_vm0, %v4409_v44 }
  0x67   : > { %4319 = vmatmul.mubr.msk.bf16.gmra.mrb[40].mxu1 %vm682_vm0, %v4410_v45  ;;  %4250 = vmatprep.mubr.msk.bf16.mxu0 %vm682_vm0, %v4411_v46 }
  0x68   : > { %4322 = vmatprep.mubr.msk.bf16.mxu1 %vm682_vm0, %v4412_v47 }
  0x6e   : > { %4251 = vmatmul.mubr.msk.bf16.gmra.mrb[44].mxu0 %vm682_vm0, %v4413_v48 }
  0x6f   : > { %4323 = vmatmul.mubr.msk.bf16.gmra.mrb[44].mxu1 %vm682_vm0, %v4414_v49  ;;  %4254 = vmatprep.mubr.msk.bf16.mxu0 %vm682_vm0, %v4415_v50 }
  0x70   : > { %4326 = vmatprep.mubr.msk.bf16.mxu1 %vm682_vm0, %v4416_v51 }
  0x76   : > { %4255 = vmatmul.mubr.msk.bf16.gmra.mrb[48].mxu0 %vm682_vm0, %v4417_v52 }
  0x77   : > { %4327 = vmatmul.mubr.msk.bf16.gmra.mrb[48].mxu1 %vm682_vm0, %v4418_v53  ;;  %4258 = vmatprep.mubr.msk.bf16.mxu0 %vm682_vm0, %v4419_v54 }
  0x78   : > { %4330 = vmatprep.mubr.msk.bf16.mxu1 %vm682_vm0, %v4420_v55 }
  0x7e   : > { %4259 = vmatmul.mubr.msk.bf16.gmra.mrb[52].mxu0 %vm682_vm0, %v4421_v56 }
  0x7f   : > { %4331 = vmatmul.mubr.msk.bf16.gmra.mrb[52].mxu1 %vm682_vm0, %v4422_v57  ;;  %4262 = vmatprep.mubr.msk.bf16.mxu0 %vm682_vm0, %v4423_v58 }
  0x80   : > { %4334 = vmatprep.mubr.msk.bf16.mxu1 %vm682_vm0, %v4424_v59 }
  0x86   : > { %4263 = vmatmul.mubr.msk.bf16.gmra.mrb[56].mxu0 %vm682_vm0, %v4425_v60 }
  0x87   : > { %4335 = vmatmul.mubr.msk.bf16.gmra.mrb[56].mxu1 %vm682_vm0, %v4426_v61  ;;  %4266 = vmatprep.mubr.msk.bf16.mxu0 %vm682_vm0, %v4427_v62 }
  0x88   : > { %4338 = vmatprep.mubr.msk.bf16.mxu1 %vm682_vm0, %v4428_v63 }
  0x8e   : > { %4267 = vmatmul.mubr.msk.bf16.gmra.mrb[60].mxu0 %vm682_vm0, %v4429_v0 }
  0x8f   : > { %4339 = vmatmul.mubr.msk.bf16.gmra.mrb[60].mxu1 %vm682_vm0, %v4430_v1  ;;  %4270 = vmatprep.mubr.msk.bf16.mxu0 %vm682_vm0, %v4431_v2 }
  0x90   : > { %4342 = vmatprep.mubr.msk.bf16.mxu1 %vm682_vm0, %v4432_v3 }
  0x96   : > { %4271 = vmatmul.mubr.msk.bf16.gmra.mrb[64].mxu0 %vm682_vm0, %v4433_v4 }
  0x97   : > { %4343 = vmatmul.mubr.msk.bf16.gmra.mrb[64].mxu1 %vm682_vm0, %v4434_v5  ;;  %4274 = vmatprep.mubr.msk.bf16.mxu0 %vm682_vm0, %v4435_v6 }
  0x98   : > { %4346 = vmatprep.mubr.msk.bf16.mxu1 %vm682_vm0, %v4436_v7 }
  0x9e   : > { %4275 = vmatmul.mubr.msk.bf16.gmra.mrb[68].mxu0 %vm682_vm0, %v4437_v8 }
  0x9f   : > { %4347 = vmatmul.mubr.msk.bf16.gmra.mrb[68].mxu1 %vm682_vm0, %v4438_v9 }
  0xe9   : > { %v4208_v11 = vpop.f32.mrb[0].mxu0 }
  0xea   : > { %v942_v12 = vadd.f32 %v4208_v11, %v4642_v10  ;;  %v4280_v13 = vpop.f32.mrb[0].mxu1  ;;  %v933_v14 = vpop.f32.mrb[1].mxu0 }
  0xeb   : > { %v1230_v15 = vadd.f32 %v4280_v13, %v4642_v10  ;;  %v934_v16 = vadd.f32 %v4642_v10, %v933_v14  ;;  %v1221_v17 = vpop.f32.mrb[1].mxu1  ;;  %v4209_v18 = vpop.f32.mrb[2].mxu0 }
  0xec   : > { %v1510_v19 = vmul.f32 0.05, %v942_v12  ;;  %v1222_v20 = vadd.f32 %v4642_v10, %v1221_v17  ;;  %v945_v21 = vadd.f32 %v4209_v18, %v4642_v10  ;;  %v4281_v22 = vpop.f32.mrb[2].mxu1  ;;  %v936_v23 = vpop.f32.mrb[3].mxu0 }
  0xed   : > { %v1582_v24 = vmul.f32 0.05, %v1230_v15  ;;  %v1508_v25 = vmul.f32 0.05, %v934_v16  ;;  %v1233_v26 = vadd.f32 %v4281_v22, %v4642_v10  ;;  %v937_v27 = vadd.f32 %v4642_v10, %v936_v23  ;;  %v1224_v28 = vpop.f32.mrb[3].mxu1 }
  0xee   : > { %v1580_v29 = vmul.f32 0.05, %v1222_v20  ;;  %v1511_v30 = vmul.f32 0.05, %v945_v21  ;;  %v1225_v31 = vadd.f32 %v4642_v10, %v1224_v28  ;;  %v4652_v34 = vmax.f32 %v942_v12, %v1510_v19 }
  0xef   : > { %v1583_v32 = vmul.f32 0.05, %v1233_v26  ;;  %v1509_v33 = vmul.f32 0.05, %v937_v27  ;;  %v4656_v37 = vmax.f32 %v1230_v15, %v1582_v24  ;;  %v4658_v38 = vmax.f32 %v934_v16, %v1508_v25 }
  0xf0   : > { %7847 = vst [vmem:[#allocation6_spill] sm:$0xff] %v4652_v34  ;;  %v4654_v35 = vmax.f32 %v945_v21, %v1511_v30  ;;  %v1581_v36 = vmul.f32 0.05, %v1225_v31  ;;  %v4664_v42 = vmax.f32 %v1222_v20, %v1580_v29 }
  0xf1   : > { %7849 = vst [vmem:[#allocation8_spill] sm:$0xff] %v4656_v37  ;;  %7850 = vst [vmem:[#allocation9_spill] sm:$0xff] %v4658_v38  ;;  %v4660_v39 = vmax.f32 %v1233_v26, %v1583_v32  ;;  %v4662_v40 = vmax.f32 %v937_v27, %v1509_v33  ;;  %v4212_v41 = vpop.f32.mrb[4].mxu0 }
  0xf2   : > { %7848 = vst [vmem:[#allocation7_spill] sm:$0xff] %v4654_v35  ;;  %7853 = vst [vmem:[#allocation12_spill] sm:$0xff] %v4664_v42  ;;  %v4668_v43 = vpack.c.bf16 %v4654_v35, %v4652_v34  ;;  %v4670_v44 = vmax.f32 %v1225_v31, %v1581_v36  ;;  %v958_v45 = vadd.f32 %v4212_v41, %v4642_v10  ;;  %v4284_v46 = vpop.f32.mrb[4].mxu1  ;;  %v949_v47 = vpop.f32.mrb[5].mxu0 }
  0xf3   : > { %7851 = vst [vmem:[#allocation10_spill] sm:$0xff] %v4660_v39  ;;  %7852 = vst [vmem:[#allocation11_spill] sm:$0xff] %v4662_v40  ;;  %v4675_v48 = vpack.c.bf16 %v4660_v39, %v4656_v37  ;;  %v4679_v49 = vpack.c.bf16 %v4662_v40, %v4658_v38  ;;  %v1246_v50 = vadd.f32 %v4284_v46, %v4642_v10  ;;  %v1237_v52 = vpop.f32.mrb[5].mxu1  ;;  %v4213_v53 = vpop.f32.mrb[6].mxu0 }
  0xf4   : > { %7854 = vst [vmem:[#allocation13_spill] sm:$0xff] %v4670_v44  ;;  %v950_v51 = vadd.f32 %v4642_v10, %v949_v47  ;;  %v4685_v54 = vpack.c.bf16 %v4670_v44, %v4664_v42  ;;  %v1514_v55 = vmul.f32 0.05, %v958_v45  ;;  %v1238_v56 = vadd.f32 %v4642_v10, %v1237_v52  ;;  %v4285_v58 = vpop.f32.mrb[6].mxu1  ;;  %v952_v59 = vpop.f32.mrb[7].mxu0  ;;  %1875 = vst [vmem:[#allocation2 + $0x8] sm:$0xff] (!%p4123_p4), %v4668_v43 }
  0xf5   : > { %7855 = vst [vmem:[#allocation14_spill] sm:$0xff] %v4675_v48  ;;  %v961_v57 = vadd.f32 %v4213_v53, %v4642_v10  ;;  %v1586_v60 = vmul.f32 0.05, %v1246_v50  ;;  %v1249_v62 = vadd.f32 %v4285_v58, %v4642_v10  ;;  %v953_v63 = vadd.f32 %v4642_v10, %v952_v59  ;;  %v1240_v0 = vpop.f32.mrb[7].mxu1  ;;  %1874 = vst [vmem:[#allocation2] sm:$0xff] (!%p4123_p4), %v4679_v49 }
  0xf6   : > { %v1512_v61 = vmul.f32 0.05, %v950_v51  ;;  %v1584_v1 = vmul.f32 0.05, %v1238_v56  ;;  %v1241_v3 = vadd.f32 %v4642_v10, %v1240_v0  ;;  %v4692_v6 = vmax.f32 %v958_v45, %v1514_v55  ;;  %1910 = vst [vmem:[#allocation2 + $0x120] sm:$0xff] (!%p4123_p4), %v4685_v54  ;;  %1911 = vst [vmem:[#allocation2 + $0x128] sm:$0xff] (!%p4123_p4), %v4675_v48 }
  0xf7   : > { %v1515_v2 = vmul.f32 0.05, %v961_v57  ;;  %v1587_v4 = vmul.f32 0.05, %v1249_v62  ;;  %v1513_v5 = vmul.f32 0.05, %v953_v63  ;;  %v4696_v9 = vmax.f32 %v1246_v50, %v1586_v60 }
  0xf8   : > { %7856 = vst [vmem:[#allocation15_spill] sm:$0xff] %v4692_v6  ;;  %v1585_v8 = vmul.f32 0.05, %v1241_v3  ;;  %v4698_v11 = vmax.f32 %v950_v51, %v1512_v61  ;;  %v4704_v15 = vmax.f32 %v1238_v56, %v1584_v1  ;;  %1946 = vst [vmem:[#allocation3] sm:$0xff] (!%p4123_p4), %v4679_v49 }
  0xf9   : > { %v4694_v7 = vmax.f32 %v961_v57, %v1515_v2  ;;  %7858 = vst [vmem:[#allocation17_spill] sm:$0xff] %v4696_v9  ;;  %v4700_v12 = vmax.f32 %v1249_v62, %v1587_v4  ;;  %v4702_v13 = vmax.f32 %v953_v63, %v1513_v5  ;;  %v4216_v14 = vpop.f32.mrb[8].mxu0  ;;  %1947 = vst [vmem:[#allocation3 + $0x8] sm:$0xff] (!%p4123_p4), %v4668_v43 }
  0xfa   : > { %7859 = vst [vmem:[#allocation18_spill] sm:$0xff] %v4698_v11  ;;  %7862 = vst [vmem:[#allocation21_spill] sm:$0xff] %v4704_v15  ;;  %v4710_v17 = vmax.f32 %v1241_v3, %v1585_v8  ;;  %v974_v18 = vadd.f32 %v4216_v14, %v4642_v10  ;;  %v4288_v19 = vpop.f32.mrb[8].mxu1  ;;  %v965_v20 = vpop.f32.mrb[9].mxu0 }
  0xfb   : > { %7857 = vst [vmem:[#allocation16_spill] sm:$0xff] %v4694_v7  ;;  %7860 = vst [vmem:[#allocation19_spill] sm:$0xff] %v4700_v12  ;;  %v4708_v16 = vpack.c.bf16 %v4694_v7, %v4692_v6  ;;  %v4715_v21 = vpack.c.bf16 %v4700_v12, %v4696_v9  ;;  %v4719_v22 = vpack.c.bf16 %v4702_v13, %v4698_v11  ;;  %v1253_v25 = vpop.f32.mrb[9].mxu1  ;;  %v4217_v26 = vpop.f32.mrb[10].mxu0 }
  0xfc   : > { %7861 = vst [vmem:[#allocation20_spill] sm:$0xff] %v4702_v13  ;;  %7863 = vst [vmem:[#allocation22_spill] sm:$0xff] %v4710_v17  ;;  %v1262_v23 = vadd.f32 %v4288_v19, %v4642_v10  ;;  %v966_v24 = vadd.f32 %v4642_v10, %v965_v20  ;;  %v4725_v27 = vpack.c.bf16 %v4710_v17, %v4704_v15  ;;  %v1518_v28 = vmul.f32 0.05, %v974_v18  ;;  %v4289_v31 = vpop.f32.mrb[10].mxu1  ;;  %v968_v32 = vpop.f32.mrb[11].mxu0 }
  0xfd   : > { %7864 = vst [vmem:[#allocation23_spill] sm:$0xff] %v4715_v21  ;;  %v1254_v29 = vadd.f32 %v4642_v10, %v1253_v25  ;;  %v977_v30 = vadd.f32 %v4217_v26, %v4642_v10  ;;  %v1265_v41 = vadd.f32 %v4289_v31, %v4642_v10  ;;  %v969_v45 = vadd.f32 %v4642_v10, %v968_v32  ;;  %v1256_v46 = vpop.f32.mrb[11].mxu1 }
  0xfe   : > { %7865 = vst [vmem:[#allocation24_spill] sm:$0xff] %v4725_v27  ;;  %v1590_v33 = vmul.f32 0.05, %v1262_v23  ;;  %v1516_v36 = vmul.f32 0.05, %v966_v24  ;;  %v1257_v51 = vadd.f32 %v4642_v10, %v1256_v46  ;;  %v4732_v55 = vmax.f32 %v974_v18, %v1518_v28  ;;  %1876 = vst [vmem:[#allocation2 + $0x10] sm:$0xff] (!%p4123_p4), %v4719_v22 }
  0xff   : > { %v1588_v47 = vmul.f32 0.05, %v1254_v29  ;;  %v1519_v50 = vmul.f32 0.05, %v977_v30  ;;  %v1591_v52 = vmul.f32 0.05, %v1265_v41 }
 0x100   : > { %v1517_v53 = vmul.f32 0.05, %v969_v45  ;;  %7866 = vst [vmem:[#allocation25_spill] sm:$0xff] %v4732_v55  ;;  %v1589_v57 = vmul.f32 0.05, %v1257_v51  ;;  %v4736_v58 = vmax.f32 %v1262_v23, %v1590_v33  ;;  %v4738_v59 = vmax.f32 %v966_v24, %v1516_v36  ;;  %1877 = vst [vmem:[#allocation2 + $0x18] sm:$0xff] (!%p4123_p4), %v4708_v16 }
 0x101   : > { %v4734_v56 = vmax.f32 %v977_v30, %v1519_v50  ;;  %v4740_v60 = vmax.f32 %v1265_v41, %v1591_v52  ;;  %v4220_v62 = vpop.f32.mrb[12].mxu0  ;;  %v4744_v63 = vmax.f32 %v1254_v29, %v1588_v47  ;;  %1912 = vst [vmem:[#allocation2 + $0x130] sm:$0xff] (!%p4123_p4), %v4725_v27  ;;  %1913 = vst [vmem:[#allocation2 + $0x138] sm:$0xff] (!%p4123_p4), %v4715_v21 }
 0x102   : > { %7868 = vst [vmem:[#allocation27_spill] sm:$0xff] %v4736_v58  ;;  %7869 = vst [vmem:[#allocation28_spill] sm:$0xff] %v4738_v59  ;;  %v4742_v61 = vmax.f32 %v969_v45, %v1517_v53  ;;  %v4750_v1 = vmax.f32 %v1257_v51, %v1589_v57  ;;  %v990_v2 = vadd.f32 %v4220_v62, %v4642_v10  ;;  %v4292_v3 = vpop.f32.mrb[12].mxu1  ;;  %v981_v4 = vpop.f32.mrb[13].mxu0 }
 0x103   : > { %7867 = vst [vmem:[#allocation26_spill] sm:$0xff] %v4734_v56  ;;  %7870 = vst [vmem:[#allocation29_spill] sm:$0xff] %v4740_v60  ;;  %v4748_v0 = vpack.c.bf16 %v4734_v56, %v4732_v55  ;;  %v4755_v5 = vpack.c.bf16 %v4740_v60, %v4736_v58  ;;  %v1278_v14 = vadd.f32 %v4292_v3, %v4642_v10  ;;  %v1269_v19 = vpop.f32.mrb[13].mxu1  ;;  %v4221_v20 = vpop.f32.mrb[14].mxu0 }
 0x104   : > { %7871 = vst [vmem:[#allocation30_spill] sm:$0xff] %v4742_v61  ;;  %7872 = vst [vmem:[#allocation31_spill] sm:$0xff] %v4744_v63  ;;  %v4759_v8 = vpack.c.bf16 %v4742_v61, %v4738_v59  ;;  %v982_v18 = vadd.f32 %v4642_v10, %v981_v4  ;;  %v4765_v23 = vpack.c.bf16 %v4750_v1, %v4744_v63  ;;  %v1522_v24 = vmul.f32 0.05, %v990_v2  ;;  %v4293_v28 = vpop.f32.mrb[14].mxu1  ;;  %v984_v29 = vpop.f32.mrb[15].mxu0 }
 0x105   : > { %7873 = vst [vmem:[#allocation32_spill] sm:$0xff] %v4750_v1  ;;  %7874 = vst [vmem:[#allocation33_spill] sm:$0xff] %v4755_v5  ;;  %v1270_v25 = vadd.f32 %v4642_v10, %v1269_v19  ;;  %v993_v26 = vadd.f32 %v4221_v20, %v4642_v10  ;;  %v1594_v30 = vmul.f32 0.05, %v1278_v14  ;;  %v1281_v32 = vadd.f32 %v4293_v28, %v4642_v10  ;;  %v1272_v36 = vpop.f32.mrb[15].mxu1 }
 0x106   : > { %7875 = vst [vmem:[#allocation34_spill] sm:$0xff] %v4765_v23  ;;  %v1520_v31 = vmul.f32 0.05, %v982_v18  ;;  %v985_v33 = vadd.f32 %v4642_v10, %v984_v29  ;;  %v1273_v46 = vadd.f32 %v4642_v10, %v1272_v36  ;;  %v4772_v51 = vmax.f32 %v990_v2, %v1522_v24  ;;  %1878 = vst [vmem:[#allocation2 + $0x20] sm:$0xff] (!%p4123_p4), %v4759_v8 }
 0x107   : > { %v1592_v41 = vmul.f32 0.05, %v1270_v25  ;;  %v1523_v45 = vmul.f32 0.05, %v993_v26  ;;  %v1595_v47 = vmul.f32 0.05, %v1281_v32  ;;  %v4776_v57 = vmax.f32 %v1278_v14, %v1594_v30 }
 0x108   : > { %v1521_v50 = vmul.f32 0.05, %v985_v33  ;;  %7876 = vst [vmem:[#allocation35_spill] sm:$0xff] %v4772_v51  ;;  %v1593_v53 = vmul.f32 0.05, %v1273_v46  ;;  %v4778_v62 = vmax.f32 %v982_v18, %v1520_v31  ;;  %1879 = vst [vmem:[#allocation2 + $0x28] sm:$0xff] (!%p4123_p4), %v4748_v0 }
 0x109   : > { %v4774_v52 = vmax.f32 %v993_v26, %v1523_v45  ;;  %7878 = vst [vmem:[#allocation37_spill] sm:$0xff] %v4776_v57  ;;  %v4780_v3 = vmax.f32 %v1281_v32, %v1595_v47  ;;  %v4224_v19 = vpop.f32.mrb[16].mxu0  ;;  %v4784_v20 = vmax.f32 %v1270_v25, %v1592_v41  ;;  %1914 = vst [vmem:[#allocation2 + $0x140] sm:$0xff] (!%p4123_p4), %v4765_v23 }
 0x10a   : > { %7879 = vst [vmem:[#allocation38_spill] sm:$0xff] %v4778_v62  ;;  %v4782_v4 = vmax.f32 %v985_v33, %v1521_v50  ;;  %v4790_v2 = vmax.f32 %v1273_v46, %v1593_v53  ;;  %v1006_v24 = vadd.f32 %v4224_v19, %v4642_v10  ;;  %v4296_v26 = vpop.f32.mrb[16].mxu1  ;;  %v997_v14 = vpop.f32.mrb[17].mxu0  ;;  %1948 = vst [vmem:[#allocation3 + $0x10] sm:$0xff] (!%p4123_p4), %v4719_v22 }
 0x10b   : > { %7877 = vst [vmem:[#allocation36_spill] sm:$0xff] %v4774_v52  ;;  %7880 = vst [vmem:[#allocation39_spill] sm:$0xff] %v4780_v3  ;;  %v4788_v28 = vpack.c.bf16 %v4774_v52, %v4772_v51  ;;  %v4795_v18 = vpack.c.bf16 %v4780_v3, %v4776_v57  ;;  %v1294_v25 = vadd.f32 %v4296_v26, %v4642_v10  ;;  %v1285_v31 = vpop.f32.mrb[17].mxu1  ;;  %v4225_v32 = vpop.f32.mrb[18].mxu0 }
 0x10c   : > { %7881 = vst [vmem:[#allocation40_spill] sm:$0xff] %v4782_v4  ;;  %7882 = vst [vmem:[#allocation41_spill] sm:$0xff] %v4784_v20  ;;  %v4799_v29 = vpack.c.bf16 %v4782_v4, %v4778_v62  ;;  %v998_v30 = vadd.f32 %v4642_v10, %v997_v14  ;;  %v4805_v33 = vpack.c.bf16 %v4790_v2, %v4784_v20  ;;  %v1526_v36 = vmul.f32 0.05, %v1006_v24  ;;  %v4297_v46 = vpop.f32.mrb[18].mxu1  ;;  %v1000_v47 = vpop.f32.mrb[19].mxu0 }
 0x10d   : > { %7883 = vst [vmem:[#allocation42_spill] sm:$0xff] %v4790_v2  ;;  %7884 = vst [vmem:[#allocation43_spill] sm:$0xff] %v4795_v18  ;;  %v1286_v41 = vadd.f32 %v4642_v10, %v1285_v31  ;;  %v1009_v45 = vadd.f32 %v4225_v32, %v4642_v10  ;;  %v1598_v50 = vmul.f32 0.05, %v1294_v25  ;;  %v1297_v19 = vadd.f32 %v4297_v46, %v4642_v10  ;;  %v1288_v14 = vpop.f32.mrb[19].mxu1 }
 0x10e   : > { %7885 = vst [vmem:[#allocation44_spill] sm:$0xff] %v4805_v33  ;;  %v1524_v53 = vmul.f32 0.05, %v998_v30  ;;  %v1001_v26 = vadd.f32 %v4642_v10, %v1000_v47  ;;  %v1289_v60 = vadd.f32 %v4642_v10, %v1288_v14  ;;  %v4812_v58 = vmax.f32 %v1006_v24, %v1526_v36  ;;  %1880 = vst [vmem:[#allocation2 + $0x30] sm:$0xff] (!%p4123_p4), %v4799_v29 }
 0x10f   : > { %v1596_v3 = vmul.f32 0.05, %v1286_v41  ;;  %v1527_v57 = vmul.f32 0.05, %v1009_v45  ;;  %v1599_v2 = vmul.f32 0.05, %v1297_v19  ;;  %v4816_v1 = vmax.f32 %v1294_v25, %v1598_v50 }
 0x110   : > { %v1525_v20 = vmul.f32 0.05, %v1001_v26  ;;  %7886 = vst [vmem:[#allocation45_spill] sm:$0xff] %v4812_v58  ;;  %v1597_v32 = vmul.f32 0.05, %v1289_v60  ;;  %v4818_v63 = vmax.f32 %v998_v30, %v1524_v53  ;;  %1881 = vst [vmem:[#allocation2 + $0x38] sm:$0xff] (!%p4123_p4), %v4788_v28 }
 0x111   : > { %v4814_v31 = vmax.f32 %v1009_v45, %v1527_v57  ;;  %7888 = vst [vmem:[#allocation47_spill] sm:$0xff] %v4816_v1  ;;  %v4820_v12 = vmax.f32 %v1297_v19, %v1599_v2  ;;  %v4228_v47 = vpop.f32.mrb[20].mxu0  ;;  %v4824_v9 = vmax.f32 %v1286_v41, %v1596_v3  ;;  %1949 = vst [vmem:[#allocation3 + $0x18] sm:$0xff] (!%p4123_p4), %v4708_v16 }
 0x112   : > { %7889 = vst [vmem:[#allocation48_spill] sm:$0xff] %v4818_v63  ;;  %v4822_v46 = vmax.f32 %v1001_v26, %v1525_v20  ;;  %v4830_v24 = vmax.f32 %v1289_v60, %v1597_v32  ;;  %v1022_v57 = vadd.f32 %v4228_v47, %v4642_v10  ;;  %v4300_v36 = vpop.f32.mrb[20].mxu1  ;;  %v1013_v25 = vpop.f32.mrb[21].mxu0  ;;  %1950 = vst [vmem:[#allocation3 + $0x20] sm:$0xff] (!%p4123_p4), %v4759_v8 }
 0x113   : > { %7887 = vst [vmem:[#allocation46_spill] sm:$0xff] %v4814_v31  ;;  %7890 = vst [vmem:[#allocation49_spill] sm:$0xff] %v4820_v12  ;;  %v4828_v14 = vpack.c.bf16 %v4814_v31, %v4812_v58  ;;  %v4835_v30 = vpack.c.bf16 %v4820_v12, %v4816_v1  ;;  %v1310_v3 = vadd.f32 %v4300_v36, %v4642_v10  ;;  %v1301_v41 = vpop.f32.mrb[21].mxu1  ;;  %v4229_v45 = vpop.f32.mrb[22].mxu0 }
 0x114   : > { %7891 = vst [vmem:[#allocation50_spill] sm:$0xff] %v4822_v46  ;;  %7892 = vst [vmem:[#allocation51_spill] sm:$0xff] %v4824_v9  ;;  %v4839_v20 = vpack.c.bf16 %v4822_v46, %v4818_v63  ;;  %v1014_v2 = vadd.f32 %v4642_v10, %v1013_v25  ;;  %v4845_v60 = vpack.c.bf16 %v4830_v24, %v4824_v9  ;;  %v1530_v50 = vmul.f32 0.05, %v1022_v57  ;;  %v4301_v26 = vpop.f32.mrb[22].mxu1  ;;  %v1016_v32 = vpop.f32.mrb[23].mxu0 }
 0x115   : > { %7893 = vst [vmem:[#allocation52_spill] sm:$0xff] %v4830_v24  ;;  %7894 = vst [vmem:[#allocation53_spill] sm:$0xff] %v4835_v30  ;;  %v1302_v53 = vadd.f32 %v4642_v10, %v1301_v41  ;;  %v1025_v19 = vadd.f32 %v4229_v45, %v4642_v10  ;;  %v1602_v47 = vmul.f32 0.05, %v1310_v3  ;;  %v1313_v1 = vadd.f32 %v4301_v26, %v4642_v10  ;;  %v1304_v25 = vpop.f32.mrb[23].mxu1 }
 0x116   : > { %7895 = vst [vmem:[#allocation54_spill] sm:$0xff] %v4845_v60  ;;  %v1528_v12 = vmul.f32 0.05, %v1014_v2  ;;  %v1017_v36 = vadd.f32 %v4642_v10, %v1016_v32  ;;  %v1305_v39 = vadd.f32 %v4642_v10, %v1304_v25  ;;  %v4852_v37 = vmax.f32 %v1022_v57, %v1530_v50  ;;  %1882 = vst [vmem:[#allocation2 + $0x40] sm:$0xff] (!%p4123_p4), %v4839_v20 }
 0x117   : > { %v1600_v17 = vmul.f32 0.05, %v1302_v53  ;;  %v1531_v15 = vmul.f32 0.05, %v1025_v19  ;;  %v1603_v24 = vmul.f32 0.05, %v1313_v1  ;;  %v4856_v44 = vmax.f32 %v1310_v3, %v1602_v47 }
 0x118   : > { %v1529_v9 = vmul.f32 0.05, %v1017_v36  ;;  %7896 = vst [vmem:[#allocation55_spill] sm:$0xff] %v4852_v37  ;;  %v1601_v45 = vmul.f32 0.05, %v1305_v39  ;;  %v4858_v42 = vmax.f32 %v1014_v2, %v1528_v12  ;;  %1883 = vst [vmem:[#allocation2 + $0x48] sm:$0xff] (!%p4123_p4), %v4828_v14 }
 0x119   : > { %v4854_v41 = vmax.f32 %v1025_v19, %v1531_v15  ;;  %7898 = vst [vmem:[#allocation57_spill] sm:$0xff] %v4856_v44  ;;  %v4860_v31 = vmax.f32 %v1313_v1, %v1603_v24  ;;  %v4232_v32 = vpop.f32.mrb[24].mxu0  ;;  %v4864_v58 = vmax.f32 %v1302_v53, %v1600_v17  ;;  %1951 = vst [vmem:[#allocation3 + $0x28] sm:$0xff] (!%p4123_p4), %v4748_v0 }
 0x11a   : > { %7899 = vst [vmem:[#allocation58_spill] sm:$0xff] %v4858_v42  ;;  %v4862_v26 = vmax.f32 %v1017_v36, %v1529_v9  ;;  %v4870_v57 = vmax.f32 %v1305_v39, %v1601_v45  ;;  %v1038_v15 = vadd.f32 %v4232_v32, %v4642_v10  ;;  %v4304_v50 = vpop.f32.mrb[24].mxu1  ;;  %v1029_v3 = vpop.f32.mrb[25].mxu0  ;;  %1952 = vst [vmem:[#allocation3 + $0x30] sm:$0xff] (!%p4123_p4), %v4799_v29 }
 0x11b   : > { %7897 = vst [vmem:[#allocation56_spill] sm:$0xff] %v4854_v41  ;;  %7900 = vst [vmem:[#allocation59_spill] sm:$0xff] %v4860_v31  ;;  %v4868_v25 = vpack.c.bf16 %v4854_v41, %v4852_v37  ;;  %v4875_v12 = vpack.c.bf16 %v4860_v31, %v4856_v44  ;;  %v1326_v17 = vadd.f32 %v4304_v50, %v4642_v10  ;;  %v1317_v24 = vpop.f32.mrb[25].mxu1  ;;  %v4233_v2 = vpop.f32.mrb[26].mxu0 }
 0x11c   : > { %7901 = vst [vmem:[#allocation60_spill] sm:$0xff] %v4862_v26  ;;  %7902 = vst [vmem:[#allocation61_spill] sm:$0xff] %v4864_v58  ;;  %v4879_v9 = vpack.c.bf16 %v4862_v26, %v4858_v42  ;;  %v1030_v1 = vadd.f32 %v4642_v10, %v1029_v3  ;;  %v4885_v39 = vpack.c.bf16 %v4870_v57, %v4864_v58  ;;  %v1534_v53 = vmul.f32 0.05, %v1038_v15  ;;  %v4305_v36 = vpop.f32.mrb[26].mxu1  ;;  %v1032_v45 = vpop.f32.mrb[27].mxu0 }
 0x11d   : > { %7903 = vst [vmem:[#allocation62_spill] sm:$0xff] %v4870_v57  ;;  %7904 = vst [vmem:[#allocation63_spill] sm:$0xff] %v4875_v12  ;;  %v1318_v19 = vadd.f32 %v4642_v10, %v1317_v24  ;;  %v1041_v47 = vadd.f32 %v4233_v2, %v4642_v10  ;;  %v1606_v32 = vmul.f32 0.05, %v1326_v17  ;;  %v1329_v44 = vadd.f32 %v4305_v36, %v4642_v10  ;;  %v1320_v3 = vpop.f32.mrb[27].mxu1 }
 0x11e   : > { %7905 = vst [vmem:[#allocation64_spill] sm:$0xff] %v4885_v39  ;;  %v1532_v31 = vmul.f32 0.05, %v1030_v1  ;;  %v1033_v50 = vadd.f32 %v4642_v10, %v1032_v45  ;;  %v1321_v26 = vadd.f32 %v4642_v10, %v1320_v3  ;;  %v4892_v42 = vmax.f32 %v1038_v15, %v1534_v53  ;;  %1884 = vst [vmem:[#allocation2 + $0x50] sm:$0xff] (!%p4123_p4), %v4879_v9 }
 0x11f   : > { %v1604_v41 = vmul.f32 0.05, %v1318_v19  ;;  %v1535_v37 = vmul.f32 0.05, %v1041_v47  ;;  %v1607_v57 = vmul.f32 0.05, %v1329_v44  ;;  %v4896_v46 = vmax.f32 %v1326_v17, %v1606_v32 }
 0x120   : > { %v1533_v58 = vmul.f32 0.05, %v1033_v50  ;;  %7906 = vst [vmem:[#allocation65_spill] sm:$0xff] %v4892_v42  ;;  %v1605_v2 = vmul.f32 0.05, %v1321_v26  ;;  %v4898_v63 = vmax.f32 %v1030_v1, %v1532_v31  ;;  %1885 = vst [vmem:[#allocation2 + $0x58] sm:$0xff] (!%p4123_p4), %v4868_v25 }
 0x121   : > { %v4894_v24 = vmax.f32 %v1041_v47, %v1535_v37  ;;  %7908 = vst [vmem:[#allocation67_spill] sm:$0xff] %v4896_v46  ;;  %v4900_v52 = vmax.f32 %v1329_v44, %v1607_v57  ;;  %v4236_v45 = vpop.f32.mrb[28].mxu0  ;;  %v4904_v51 = vmax.f32 %v1318_v19, %v1604_v41  ;;  %1953 = vst [vmem:[#allocation3 + $0x38] sm:$0xff] (!%p4123_p4), %v4788_v28 }
 0x122   : > { %7909 = vst [vmem:[#allocation68_spill] sm:$0xff] %v4898_v63  ;;  %v4902_v36 = vmax.f32 %v1033_v50, %v1533_v58  ;;  %v4910_v15 = vmax.f32 %v1321_v26, %v1605_v2  ;;  %v1054_v37 = vadd.f32 %v4236_v45, %v4642_v10  ;;  %v4308_v53 = vpop.f32.mrb[28].mxu1  ;;  %v1045_v17 = vpop.f32.mrb[29].mxu0  ;;  %1954 = vst [vmem:[#allocation3 + $0x40] sm:$0xff] (!%p4123_p4), %v4839_v20 }
 0x123   : > { %7907 = vst [vmem:[#allocation66_spill] sm:$0xff] %v4894_v24  ;;  %7910 = vst [vmem:[#allocation69_spill] sm:$0xff] %v4900_v52  ;;  %v4908_v3 = vpack.c.bf16 %v4894_v24, %v4892_v42  ;;  %v4915_v31 = vpack.c.bf16 %v4900_v52, %v4896_v46  ;;  %v1342_v58 = vadd.f32 %v4308_v53, %v4642_v10  ;;  %v1333_v57 = vpop.f32.mrb[29].mxu1  ;;  %v4237_v1 = vpop.f32.mrb[30].mxu0 }
 0x124   : > { %7911 = vst [vmem:[#allocation70_spill] sm:$0xff] %v4902_v36  ;;  %7912 = vst [vmem:[#allocation71_spill] sm:$0xff] %v4904_v51  ;;  %v4919_v44 = vpack.c.bf16 %v4902_v36, %v4898_v63  ;;  %v1046_v41 = vadd.f32 %v4642_v10, %v1045_v17  ;;  %v4925_v26 = vpack.c.bf16 %v4910_v15, %v4904_v51  ;;  %v1538_v19 = vmul.f32 0.05, %v1054_v37  ;;  %v4309_v50 = vpop.f32.mrb[30].mxu1  ;;  %v1048_v2 = vpop.f32.mrb[31].mxu0 }
 0x125   : > { %7913 = vst [vmem:[#allocation72_spill] sm:$0xff] %v4910_v15  ;;  %7914 = vst [vmem:[#allocation73_spill] sm:$0xff] %v4915_v31  ;;  %v1334_v47 = vadd.f32 %v4642_v10, %v1333_v57  ;;  %v1057_v32 = vadd.f32 %v4237_v1, %v4642_v10  ;;  %v1610_v45 = vmul.f32 0.05, %v1342_v58  ;;  %v1345_v46 = vadd.f32 %v4309_v50, %v4642_v10  ;;  %v1336_v17 = vpop.f32.mrb[31].mxu1 }
 0x126   : > { %7915 = vst [vmem:[#allocation74_spill] sm:$0xff] %v4925_v26  ;;  %v1536_v52 = vmul.f32 0.05, %v1046_v41  ;;  %v1049_v53 = vadd.f32 %v4642_v10, %v1048_v2  ;;  %v1337_v36 = vadd.f32 %v4642_v10, %v1336_v17  ;;  %v4932_v63 = vmax.f32 %v1054_v37, %v1538_v19  ;;  %1886 = vst [vmem:[#allocation2 + $0x60] sm:$0xff] (!%p4123_p4), %v4919_v44 }
 0x127   : > { %v1608_v24 = vmul.f32 0.05, %v1334_v47  ;;  %v1539_v42 = vmul.f32 0.05, %v1057_v32  ;;  %v1611_v15 = vmul.f32 0.05, %v1345_v46  ;;  %v4936_v4 = vmax.f32 %v1342_v58, %v1610_v45 }
 0x128   : > { %v1537_v51 = vmul.f32 0.05, %v1049_v53  ;;  %7916 = vst [vmem:[#allocation75_spill] sm:$0xff] %v4932_v63  ;;  %v1609_v1 = vmul.f32 0.05, %v1337_v36  ;;  %v4938_v62 = vmax.f32 %v1046_v41, %v1536_v52  ;;  %1887 = vst [vmem:[#allocation2 + $0x68] sm:$0xff] (!%p4123_p4), %v4908_v3 }
 0x129   : > { %v4934_v57 = vmax.f32 %v1057_v32, %v1539_v42  ;;  %7918 = vst [vmem:[#allocation77_spill] sm:$0xff] %v4936_v4  ;;  %v4940_v56 = vmax.f32 %v1345_v46, %v1611_v15  ;;  %v4240_v2 = vpop.f32.mrb[32].mxu0  ;;  %v4944_v55 = vmax.f32 %v1334_v47, %v1608_v24  ;;  %1955 = vst [vmem:[#allocation3 + $0x48] sm:$0xff] (!%p4123_p4), %v4828_v14 }
 0x12a   : > { %7919 = vst [vmem:[#allocation78_spill] sm:$0xff] %v4938_v62  ;;  %v4942_v50 = vmax.f32 %v1049_v53, %v1537_v51  ;;  %v4950_v37 = vmax.f32 %v1337_v36, %v1609_v1  ;;  %v1070_v42 = vadd.f32 %v4240_v2, %v4642_v10  ;;  %v4312_v19 = vpop.f32.mrb[32].mxu1  ;;  %v1061_v58 = vpop.f32.mrb[33].mxu0  ;;  %1956 = vst [vmem:[#allocation3 + $0x50] sm:$0xff] (!%p4123_p4), %v4879_v9 }
 0x12b   : > { %7917 = vst [vmem:[#allocation76_spill] sm:$0xff] %v4934_v57  ;;  %7920 = vst [vmem:[#allocation79_spill] sm:$0xff] %v4940_v56  ;;  %v4948_v17 = vpack.c.bf16 %v4934_v57, %v4932_v63  ;;  %v4955_v52 = vpack.c.bf16 %v4940_v56, %v4936_v4  ;;  %v1358_v46 = vadd.f32 %v4312_v19, %v4642_v10  ;;  %v1349_v15 = vpop.f32.mrb[33].mxu1  ;;  %v4241_v41 = vpop.f32.mrb[34].mxu0 }
 0x12c   : > { %7921 = vst [vmem:[#allocation80_spill] sm:$0xff] %v4942_v50  ;;  %7922 = vst [vmem:[#allocation81_spill] sm:$0xff] %v4944_v55  ;;  %v4959_v51 = vpack.c.bf16 %v4942_v50, %v4938_v62  ;;  %v1062_v24 = vadd.f32 %v4642_v10, %v1061_v58  ;;  %v4965_v36 = vpack.c.bf16 %v4950_v37, %v4944_v55  ;;  %v1542_v47 = vmul.f32 0.05, %v1070_v42  ;;  %v4313_v53 = vpop.f32.mrb[34].mxu1  ;;  %v1064_v1 = vpop.f32.mrb[35].mxu0 }
 0x12d   : > { %7923 = vst [vmem:[#allocation82_spill] sm:$0xff] %v4950_v37  ;;  %7924 = vst [vmem:[#allocation83_spill] sm:$0xff] %v4955_v52  ;;  %v1350_v32 = vadd.f32 %v4642_v10, %v1349_v15  ;;  %v1073_v45 = vadd.f32 %v4241_v41, %v4642_v10  ;;  %v1614_v2 = vmul.f32 0.05, %v1358_v46  ;;  %v1361_v4 = vadd.f32 %v4313_v53, %v4642_v10  ;;  %v1352_v58 = vpop.f32.mrb[35].mxu1 }
 0x12e   : > { %7925 = vst [vmem:[#allocation84_spill] sm:$0xff] %v4965_v36  ;;  %v1540_v56 = vmul.f32 0.05, %v1062_v24  ;;  %v1065_v19 = vadd.f32 %v4642_v10, %v1064_v1  ;;  %v1353_v50 = vadd.f32 %v4642_v10, %v1352_v58  ;;  %v4972_v62 = vmax.f32 %v1070_v42, %v1542_v47  ;;  %1888 = vst [vmem:[#allocation2 + $0x70] sm:$0xff] (!%p4123_p4), %v4959_v51 }
 0x12f   : > { %v1612_v57 = vmul.f32 0.05, %v1350_v32  ;;  %v1543_v63 = vmul.f32 0.05, %v1073_v45  ;;  %v1615_v37 = vmul.f32 0.05, %v1361_v4  ;;  %v4976_v61 = vmax.f32 %v1358_v46, %v1614_v2 }
 0x130   : > { %v1541_v55 = vmul.f32 0.05, %v1065_v19  ;;  %7926 = vst [vmem:[#allocation85_spill] sm:$0xff] %v4972_v62  ;;  %v1613_v41 = vmul.f32 0.05, %v1353_v50  ;;  %v4978_v59 = vmax.f32 %v1062_v24, %v1540_v56  ;;  %1889 = vst [vmem:[#allocation2 + $0x78] sm:$0xff] (!%p4123_p4), %v4948_v17 }
 0x131   : > { %v4974_v15 = vmax.f32 %v1073_v45, %v1543_v63  ;;  %7928 = vst [vmem:[#allocation87_spill] sm:$0xff] %v4976_v61  ;;  %v4980_v7 = vmax.f32 %v1361_v4, %v1615_v37  ;;  %v4244_v1 = vpop.f32.mrb[36].mxu0  ;;  %v4984_v6 = vmax.f32 %v1350_v32, %v1612_v57  ;;  %1957 = vst [vmem:[#allocation3 + $0x58] sm:$0xff] (!%p4123_p4), %v4868_v25 }
 0x132   : > { %7929 = vst [vmem:[#allocation88_spill] sm:$0xff] %v4978_v59  ;;  %v4982_v53 = vmax.f32 %v1065_v19, %v1541_v55  ;;  %v4990_v42 = vmax.f32 %v1353_v50, %v1613_v41  ;;  %v1086_v63 = vadd.f32 %v4244_v1, %v4642_v10  ;;  %v4316_v47 = vpop.f32.mrb[36].mxu1  ;;  %v1077_v46 = vpop.f32.mrb[37].mxu0  ;;  %1958 = vst [vmem:[#allocation3 + $0x60] sm:$0xff] (!%p4123_p4), %v4919_v44 }
 0x133   : > { %7927 = vst [vmem:[#allocation86_spill] sm:$0xff] %v4974_v15  ;;  %7930 = vst [vmem:[#allocation89_spill] sm:$0xff] %v4980_v7  ;;  %v4988_v58 = vpack.c.bf16 %v4974_v15, %v4972_v62  ;;  %v4995_v56 = vpack.c.bf16 %v4980_v7, %v4976_v61  ;;  %v1374_v4 = vadd.f32 %v4316_v47, %v4642_v10  ;;  %v1365_v37 = vpop.f32.mrb[37].mxu1  ;;  %v4245_v24 = vpop.f32.mrb[38].mxu0 }
 0x134   : > { %7931 = vst [vmem:[#allocation90_spill] sm:$0xff] %v4982_v53  ;;  %7932 = vst [vmem:[#allocation91_spill] sm:$0xff] %v4984_v6  ;;  %v4999_v55 = vpack.c.bf16 %v4982_v53, %v4978_v59  ;;  %v1078_v57 = vadd.f32 %v4642_v10, %v1077_v46  ;;  %v5005_v50 = vpack.c.bf16 %v4990_v42, %v4984_v6  ;;  %v1546_v32 = vmul.f32 0.05, %v1086_v63  ;;  %v4317_v19 = vpop.f32.mrb[38].mxu1  ;;  %v1080_v41 = vpop.f32.mrb[39].mxu0 }
 0x135   : > { %7933 = vst [vmem:[#allocation92_spill] sm:$0xff] %v4990_v42  ;;  %7934 = vst [vmem:[#allocation93_spill] sm:$0xff] %v4995_v56  ;;  %v1366_v45 = vadd.f32 %v4642_v10, %v1365_v37  ;;  %v1089_v2 = vadd.f32 %v4245_v24, %v4642_v10  ;;  %v1618_v1 = vmul.f32 0.05, %v1374_v4  ;;  %v1377_v61 = vadd.f32 %v4317_v19, %v4642_v10  ;;  %v1368_v46 = vpop.f32.mrb[39].mxu1 }
 0x136   : > { %7935 = vst [vmem:[#allocation94_spill] sm:$0xff] %v5005_v50  ;;  %v1544_v7 = vmul.f32 0.05, %v1078_v57  ;;  %v1081_v47 = vadd.f32 %v4642_v10, %v1080_v41  ;;  %v1369_v53 = vadd.f32 %v4642_v10, %v1368_v46  ;;  %v5012_v59 = vmax.f32 %v1086_v63, %v1546_v32  ;;  %1890 = vst [vmem:[#allocation2 + $0x80] sm:$0xff] (!%p4123_p4), %v4999_v55 }
 0x137   : > { %v1616_v15 = vmul.f32 0.05, %v1366_v45  ;;  %v1547_v62 = vmul.f32 0.05, %v1089_v2  ;;  %v1619_v42 = vmul.f32 0.05, %v1377_v61  ;;  %v5016_v13 = vmax.f32 %v1374_v4, %v1618_v1 }
 0x138   : > { %v1545_v6 = vmul.f32 0.05, %v1081_v47  ;;  %7936 = vst [vmem:[#allocation95_spill] sm:$0xff] %v5012_v59  ;;  %v1617_v24 = vmul.f32 0.05, %v1369_v53  ;;  %v5018_v11 = vmax.f32 %v1078_v57, %v1544_v7  ;;  %1891 = vst [vmem:[#allocation2 + $0x88] sm:$0xff] (!%p4123_p4), %v4988_v58 }
 0x139   : > { %v5014_v37 = vmax.f32 %v1089_v2, %v1547_v62  ;;  %7938 = vst [vmem:[#allocation97_spill] sm:$0xff] %v5016_v13  ;;  %v5020_v35 = vmax.f32 %v1377_v61, %v1619_v42  ;;  %v4248_v41 = vpop.f32.mrb[40].mxu0  ;;  %v5024_v34 = vmax.f32 %v1366_v45, %v1616_v15  ;;  %1959 = vst [vmem:[#allocation3 + $0x68] sm:$0xff] (!%p4123_p4), %v4908_v3 }
 0x13a   : > { %7939 = vst [vmem:[#allocation98_spill] sm:$0xff] %v5018_v11  ;;  %v5022_v19 = vmax.f32 %v1081_v47, %v1545_v6  ;;  %v5030_v63 = vmax.f32 %v1369_v53, %v1617_v24  ;;  %v1102_v62 = vadd.f32 %v4248_v41, %v4642_v10  ;;  %v4320_v32 = vpop.f32.mrb[40].mxu1  ;;  %v1093_v4 = vpop.f32.mrb[41].mxu0  ;;  %1960 = vst [vmem:[#allocation3 + $0x70] sm:$0xff] (!%p4123_p4), %v4959_v51 }
 0x13b   : > { %7937 = vst [vmem:[#allocation96_spill] sm:$0xff] %v5014_v37  ;;  %7940 = vst [vmem:[#allocation99_spill] sm:$0xff] %v5020_v35  ;;  %v5028_v46 = vpack.c.bf16 %v5014_v37, %v5012_v59  ;;  %v5035_v7 = vpack.c.bf16 %v5020_v35, %v5016_v13  ;;  %v1390_v61 = vadd.f32 %v4320_v32, %v4642_v10  ;;  %v1381_v42 = vpop.f32.mrb[41].mxu1  ;;  %v4249_v57 = vpop.f32.mrb[42].mxu0 }
 0x13c   : > { %7941 = vst [vmem:[#allocation100_spill] sm:$0xff] %v5022_v19  ;;  %7942 = vst [vmem:[#allocation101_spill] sm:$0xff] %v5024_v34  ;;  %v5039_v6 = vpack.c.bf16 %v5022_v19, %v5018_v11  ;;  %v1094_v15 = vadd.f32 %v4642_v10, %v1093_v4  ;;  %v5045_v53 = vpack.c.bf16 %v5030_v63, %v5024_v34  ;;  %v1550_v45 = vmul.f32 0.05, %v1102_v62  ;;  %v4321_v47 = vpop.f32.mrb[42].mxu1  ;;  %v1096_v24 = vpop.f32.mrb[43].mxu0 }
 0x13d   : > { %7943 = vst [vmem:[#allocation102_spill] sm:$0xff] %v5030_v63  ;;  %7944 = vst [vmem:[#allocation103_spill] sm:$0xff] %v5035_v7  ;;  %v1382_v2 = vadd.f32 %v4642_v10, %v1381_v42  ;;  %v1105_v1 = vadd.f32 %v4249_v57, %v4642_v10  ;;  %v1622_v41 = vmul.f32 0.05, %v1390_v61  ;;  %v1393_v13 = vadd.f32 %v4321_v47, %v4642_v10  ;;  %v1384_v4 = vpop.f32.mrb[43].mxu1 }
 0x13e   : > { %7945 = vst [vmem:[#allocation104_spill] sm:$0xff] %v5045_v53  ;;  %v1548_v35 = vmul.f32 0.05, %v1094_v15  ;;  %v1097_v32 = vadd.f32 %v4642_v10, %v1096_v24  ;;  %v1385_v19 = vadd.f32 %v4642_v10, %v1384_v4  ;;  %v5052_v11 = vmax.f32 %v1102_v62, %v1550_v45  ;;  %1892 = vst [vmem:[#allocation2 + $0x90] sm:$0xff] (!%p4123_p4), %v5039_v6 }
 0x13f   : > { %v1620_v37 = vmul.f32 0.05, %v1382_v2  ;;  %v1551_v59 = vmul.f32 0.05, %v1105_v1  ;;  %v1623_v63 = vmul.f32 0.05, %v1393_v13  ;;  %v5056_v40 = vmax.f32 %v1390_v61, %v1622_v41 }
 0x140   : > { %v1549_v34 = vmul.f32 0.05, %v1097_v32  ;;  %7946 = vst [vmem:[#allocation105_spill] sm:$0xff] %v5052_v11  ;;  %v1621_v57 = vmul.f32 0.05, %v1385_v19  ;;  %v5058_v38 = vmax.f32 %v1094_v15, %v1548_v35  ;;  %1893 = vst [vmem:[#allocation2 + $0x98] sm:$0xff] (!%p4123_p4), %v5028_v46 }
 0x141   : > { %v5054_v42 = vmax.f32 %v1105_v1, %v1551_v59  ;;  %7948 = vst [vmem:[#allocation107_spill] sm:$0xff] %v5056_v40  ;;  %v5060_v7 = vmax.f32 %v1393_v13, %v1623_v63  ;;  %v4252_v24 = vpop.f32.mrb[44].mxu0  ;;  %v5064_v53 = vmax.f32 %v1382_v2, %v1620_v37  ;;  %1961 = vst [vmem:[#allocation3 + $0x78] sm:$0xff] (!%p4123_p4), %v4948_v17 }
 0x142   : > { %7949 = vst [vmem:[#allocation108_spill] sm:$0xff] %v5058_v38  ;;  %v5062_v47 = vmax.f32 %v1097_v32, %v1549_v34  ;;  %v5070_v62 = vmax.f32 %v1385_v19, %v1621_v57  ;;  %v1118_v59 = vadd.f32 %v4252_v24, %v4642_v10  ;;  %v4324_v45 = vpop.f32.mrb[44].mxu1  ;;  %v1109_v61 = vpop.f32.mrb[45].mxu0  ;;  %1962 = vst [vmem:[#allocation3 + $0x80] sm:$0xff] (!%p4123_p4), %v4999_v55 }
 0x143   : > { %7947 = vst [vmem:[#allocation106_spill] sm:$0xff] %v5054_v42  ;;  %7950 = vst [vmem:[#allocation109_spill] sm:$0xff] %v5060_v7  ;;  %v5068_v4 = vpack.c.bf16 %v5054_v42, %v5052_v11  ;;  %v5075_v35 = vpack.c.bf16 %v5060_v7, %v5056_v40  ;;  %v1406_v13 = vadd.f32 %v4324_v45, %v4642_v10  ;;  %v1397_v63 = vpop.f32.mrb[45].mxu1  ;;  %v4253_v15 = vpop.f32.mrb[46].mxu0 }
 0x144   : > { %7951 = vst [vmem:[#allocation110_spill] sm:$0xff] %v5062_v47  ;;  %7952 = vst [vmem:[#allocation111_spill] sm:$0xff] %v5064_v53  ;;  %v5079_v34 = vpack.c.bf16 %v5062_v47, %v5058_v38  ;;  %v1110_v37 = vadd.f32 %v4642_v10, %v1109_v61  ;;  %v5085_v19 = vpack.c.bf16 %v5070_v62, %v5064_v53  ;;  %v1554_v2 = vmul.f32 0.05, %v1118_v59  ;;  %v4325_v32 = vpop.f32.mrb[46].mxu1  ;;  %v1112_v57 = vpop.f32.mrb[47].mxu0 }
 0x145   : > { %7953 = vst [vmem:[#allocation112_spill] sm:$0xff] %v5070_v62  ;;  %7954 = vst [vmem:[#allocation113_spill] sm:$0xff] %v5075_v35  ;;  %v1398_v1 = vadd.f32 %v4642_v10, %v1397_v63  ;;  %v1121_v41 = vadd.f32 %v4253_v15, %v4642_v10  ;;  %v1626_v24 = vmul.f32 0.05, %v1406_v13  ;;  %v1409_v40 = vadd.f32 %v4325_v32, %v4642_v10  ;;  %v1400_v61 = vpop.f32.mrb[47].mxu1 }
 0x146   : > { %7955 = vst [vmem:[#allocation114_spill] sm:$0xff] %v5085_v19  ;;  %v1552_v7 = vmul.f32 0.05, %v1110_v37  ;;  %v1113_v45 = vadd.f32 %v4642_v10, %v1112_v57  ;;  %v1401_v47 = vadd.f32 %v4642_v10, %v1400_v61  ;;  %v5092_v38 = vmax.f32 %v1118_v59, %v1554_v2  ;;  %1894 = vst [vmem:[#allocation2 + $0xa0] sm:$0xff] (!%p4123_p4), %v5079_v34 }
 0x147   : > { %v1624_v42 = vmul.f32 0.05, %v1398_v1  ;;  %v1555_v11 = vmul.f32 0.05, %v1121_v41  ;;  %v1627_v62 = vmul.f32 0.05, %v1409_v40  ;;  %v5096_v35 = vmax.f32 %v1406_v13, %v1626_v24 }
 0x148   : > { %v1553_v53 = vmul.f32 0.05, %v1113_v45  ;;  %7956 = vst [vmem:[#allocation115_spill] sm:$0xff] %v5092_v38  ;;  %v1625_v15 = vmul.f32 0.05, %v1401_v47  ;;  %v5098_v19 = vmax.f32 %v1110_v37, %v1552_v7  ;;  %1895 = vst [vmem:[#allocation2 + $0xa8] sm:$0xff] (!%p4123_p4), %v5068_v4 }
 0x149   : > { %v5094_v63 = vmax.f32 %v1121_v41, %v1555_v11  ;;  %7958 = vst [vmem:[#allocation117_spill] sm:$0xff] %v5096_v35  ;;  %v5100_v56 = vmax.f32 %v1409_v40, %v1627_v62  ;;  %v4256_v57 = vpop.f32.mrb[48].mxu0  ;;  %v5104_v50 = vmax.f32 %v1398_v1, %v1624_v42  ;;  %1963 = vst [vmem:[#allocation3 + $0x88] sm:$0xff] (!%p4123_p4), %v4988_v58 }
 0x14a   : > { %7959 = vst [vmem:[#allocation118_spill] sm:$0xff] %v5098_v19  ;;  %v5102_v32 = vmax.f32 %v1113_v45, %v1553_v53  ;;  %v5110_v59 = vmax.f32 %v1401_v47, %v1625_v15  ;;  %v1134_v11 = vadd.f32 %v4256_v57, %v4642_v10  ;;  %v4328_v2 = vpop.f32.mrb[48].mxu1  ;;  %v1125_v13 = vpop.f32.mrb[49].mxu0  ;;  %1964 = vst [vmem:[#allocation3 + $0x90] sm:$0xff] (!%p4123_p4), %v5039_v6 }
 0x14b   : > { %7957 = vst [vmem:[#allocation116_spill] sm:$0xff] %v5094_v63  ;;  %7960 = vst [vmem:[#allocation119_spill] sm:$0xff] %v5100_v56  ;;  %v5108_v61 = vpack.c.bf16 %v5094_v63, %v5092_v38  ;;  %v5115_v7 = vpack.c.bf16 %v5100_v56, %v5096_v35  ;;  %v1422_v53 = vadd.f32 %v4328_v2, %v4642_v10  ;;  %v1413_v62 = vpop.f32.mrb[49].mxu1  ;;  %v4257_v37 = vpop.f32.mrb[50].mxu0 }
 0x14c   : > { %7961 = vst [vmem:[#allocation120_spill] sm:$0xff] %v5102_v32  ;;  %7962 = vst [vmem:[#allocation121_spill] sm:$0xff] %v5104_v50  ;;  %v5119_v40 = vpack.c.bf16 %v5102_v32, %v5098_v19  ;;  %v1126_v42 = vadd.f32 %v4642_v10, %v1125_v13  ;;  %v5125_v47 = vpack.c.bf16 %v5110_v59, %v5104_v50  ;;  %v1558_v1 = vmul.f32 0.05, %v1134_v11  ;;  %v4329_v45 = vpop.f32.mrb[50].mxu1  ;;  %v1128_v15 = vpop.f32.mrb[51].mxu0 }
 0x14d   : > { %7963 = vst [vmem:[#allocation122_spill] sm:$0xff] %v5110_v59  ;;  %7964 = vst [vmem:[#allocation123_spill] sm:$0xff] %v5115_v7  ;;  %v1414_v41 = vadd.f32 %v4642_v10, %v1413_v62  ;;  %v1137_v24 = vadd.f32 %v4257_v37, %v4642_v10  ;;  %v1630_v57 = vmul.f32 0.05, %v1422_v53  ;;  %v1425_v35 = vadd.f32 %v4329_v45, %v4642_v10  ;;  %v1416_v13 = vpop.f32.mrb[51].mxu1 }
 0x14e   : > { %7965 = vst [vmem:[#allocation124_spill] sm:$0xff] %v5125_v47  ;;  %v1556_v56 = vmul.f32 0.05, %v1126_v42  ;;  %v1129_v2 = vadd.f32 %v4642_v10, %v1128_v15  ;;  %v1417_v32 = vadd.f32 %v4642_v10, %v1416_v13  ;;  %v5132_v19 = vmax.f32 %v1134_v11, %v1558_v1  ;;  %1896 = vst [vmem:[#allocation2 + $0xb0] sm:$0xff] (!%p4123_p4), %v5119_v40 }
 0x14f   : > { %v1628_v63 = vmul.f32 0.05, %v1414_v41  ;;  %v1559_v38 = vmul.f32 0.05, %v1137_v24  ;;  %v1631_v59 = vmul.f32 0.05, %v1425_v35  ;;  %v5136_v7 = vmax.f32 %v1422_v53, %v1630_v57 }
 0x150   : > { %v1557_v50 = vmul.f32 0.05, %v1129_v2  ;;  %7966 = vst [vmem:[#allocation125_spill] sm:$0xff] %v5132_v19  ;;  %v1629_v37 = vmul.f32 0.05, %v1417_v32  ;;  %v5138_v47 = vmax.f32 %v1126_v42, %v1556_v56  ;;  %1897 = vst [vmem:[#allocation2 + $0xb8] sm:$0xff] (!%p4123_p4), %v5108_v61 }
 0x151   : > { %v5134_v62 = vmax.f32 %v1137_v24, %v1559_v38  ;;  %7968 = vst [vmem:[#allocation127_spill] sm:$0xff] %v5136_v7  ;;  %v5140_v52 = vmax.f32 %v1425_v35, %v1631_v59  ;;  %v4260_v15 = vpop.f32.mrb[52].mxu0  ;;  %v5144_v36 = vmax.f32 %v1414_v41, %v1628_v63  ;;  %1965 = vst [vmem:[#allocation3 + $0x98] sm:$0xff] (!%p4123_p4), %v5028_v46 }
 0x152   : > { %7969 = vst [vmem:[#allocation128_spill] sm:$0xff] %v5138_v47  ;;  %v5142_v45 = vmax.f32 %v1129_v2, %v1557_v50  ;;  %v5150_v11 = vmax.f32 %v1417_v32, %v1629_v37  ;;  %v1150_v38 = vadd.f32 %v4260_v15, %v4642_v10  ;;  %v4332_v1 = vpop.f32.mrb[52].mxu1  ;;  %v1141_v53 = vpop.f32.mrb[53].mxu0  ;;  %1966 = vst [vmem:[#allocation3 + $0xa0] sm:$0xff] (!%p4123_p4), %v5079_v34 }
 0x153   : > { %7967 = vst [vmem:[#allocation126_spill] sm:$0xff] %v5134_v62  ;;  %7970 = vst [vmem:[#allocation129_spill] sm:$0xff] %v5140_v52  ;;  %v5148_v13 = vpack.c.bf16 %v5134_v62, %v5132_v19  ;;  %v5155_v56 = vpack.c.bf16 %v5140_v52, %v5136_v7  ;;  %v1438_v35 = vadd.f32 %v4332_v1, %v4642_v10  ;;  %v1429_v59 = vpop.f32.mrb[53].mxu1  ;;  %v4261_v42 = vpop.f32.mrb[54].mxu0 }
 0x154   : > { %7971 = vst [vmem:[#allocation130_spill] sm:$0xff] %v5142_v45  ;;  %7972 = vst [vmem:[#allocation131_spill] sm:$0xff] %v5144_v36  ;;  %v5159_v50 = vpack.c.bf16 %v5142_v45, %v5138_v47  ;;  %v1142_v63 = vadd.f32 %v4642_v10, %v1141_v53  ;;  %v5165_v32 = vpack.c.bf16 %v5150_v11, %v5144_v36  ;;  %v1562_v41 = vmul.f32 0.05, %v1150_v38  ;;  %v4333_v2 = vpop.f32.mrb[54].mxu1  ;;  %v1144_v37 = vpop.f32.mrb[55].mxu0 }
 0x155   : > { %7973 = vst [vmem:[#allocation132_spill] sm:$0xff] %v5150_v11  ;;  %7974 = vst [vmem:[#allocation133_spill] sm:$0xff] %v5155_v56  ;;  %v1430_v24 = vadd.f32 %v4642_v10, %v1429_v59  ;;  %v1153_v57 = vadd.f32 %v4261_v42, %v4642_v10  ;;  %v1634_v15 = vmul.f32 0.05, %v1438_v35  ;;  %v1441_v7 = vadd.f32 %v4333_v2, %v4642_v10  ;;  %v1432_v53 = vpop.f32.mrb[55].mxu1 }
 0x156   : > { %7975 = vst [vmem:[#allocation134_spill] sm:$0xff] %v5165_v32  ;;  %v1560_v52 = vmul.f32 0.05, %v1142_v63  ;;  %v1145_v1 = vadd.f32 %v4642_v10, %v1144_v37  ;;  %v1433_v45 = vadd.f32 %v4642_v10, %v1432_v53  ;;  %v5172_v47 = vmax.f32 %v1150_v38, %v1562_v41  ;;  %1898 = vst [vmem:[#allocation2 + $0xc0] sm:$0xff] (!%p4123_p4), %v5159_v50 }
 0x157   : > { %v1632_v62 = vmul.f32 0.05, %v1430_v24  ;;  %v1563_v19 = vmul.f32 0.05, %v1153_v57  ;;  %v1635_v11 = vmul.f32 0.05, %v1441_v7  ;;  %v5176_v56 = vmax.f32 %v1438_v35, %v1634_v15 }
 0x158   : > { %v1561_v36 = vmul.f32 0.05, %v1145_v1  ;;  %7976 = vst [vmem:[#allocation135_spill] sm:$0xff] %v5172_v47  ;;  %v1633_v42 = vmul.f32 0.05, %v1433_v45  ;;  %v5178_v32 = vmax.f32 %v1142_v63, %v1560_v52  ;;  %1899 = vst [vmem:[#allocation2 + $0xc8] sm:$0xff] (!%p4123_p4), %v5148_v13 }
 0x159   : > { %v5174_v59 = vmax.f32 %v1153_v57, %v1563_v19  ;;  %7978 = vst [vmem:[#allocation137_spill] sm:$0xff] %v5176_v56  ;;  %v5180_v31 = vmax.f32 %v1441_v7, %v1635_v11  ;;  %v4264_v37 = vpop.f32.mrb[56].mxu0  ;;  %v5184_v26 = vmax.f32 %v1430_v24, %v1632_v62  ;;  %v5210_v57 = vld [vmem:[%s7487_s2] ss:$0 sm:$0xff]  ;;  %1967 = vst [vmem:[#allocation3 + $0xa8] sm:$0xff] (!%p4123_p4), %v5068_v4 }
 0x15a   : > { %7979 = vst [vmem:[#allocation138_spill] sm:$0xff] %v5178_v32  ;;  %v5182_v2 = vmax.f32 %v1145_v1, %v1561_v36  ;;  %v5190_v38 = vmax.f32 %v1433_v45, %v1633_v42  ;;  %v1166_v19 = vadd.f32 %v4264_v37, %v4642_v10  ;;  %v4336_v41 = vpop.f32.mrb[56].mxu1  ;;  %v1157_v35 = vpop.f32.mrb[57].mxu0  ;;  %1968 = vst [vmem:[#allocation3 + $0xb0] sm:$0xff] (!%p4123_p4), %v5119_v40 }
 0x15b   : > { %7977 = vst [vmem:[#allocation136_spill] sm:$0xff] %v5174_v59  ;;  %7980 = vst [vmem:[#allocation139_spill] sm:$0xff] %v5180_v31  ;;  %v5188_v53 = vpack.c.bf16 %v5174_v59, %v5172_v47  ;;  %v5195_v52 = vpack.c.bf16 %v5180_v31, %v5176_v56  ;;  %v1454_v7 = vadd.f32 %v4336_v41, %v4642_v10  ;;  %v1445_v11 = vpop.f32.mrb[57].mxu1  ;;  %v4265_v63 = vpop.f32.mrb[58].mxu0 }
 0x15c   : > { %7981 = vst [vmem:[#allocation140_spill] sm:$0xff] %v5182_v2  ;;  %7982 = vst [vmem:[#allocation141_spill] sm:$0xff] %v5184_v26  ;;  %v5199_v36 = vpack.c.bf16 %v5182_v2, %v5178_v32  ;;  %v1158_v62 = vadd.f32 %v4642_v10, %v1157_v35  ;;  %v5205_v45 = vpack.c.bf16 %v5190_v38, %v5184_v26  ;;  %v1566_v24 = vmul.f32 0.05, %v1166_v19  ;;  %v4337_v42 = vpop.f32.mrb[58].mxu1  ;;  %v1160_v37 = vpop.f32.mrb[59].mxu0 }
 0x15d   : > { %7983 = vst [vmem:[#allocation142_spill] sm:$0xff] %v5190_v38  ;;  %7984 = vst [vmem:[#allocation143_spill] sm:$0xff] %v5195_v52  ;;  %v1446_v15 = vadd.f32 %v5210_v57, %v1445_v11  ;;  %v1169_v1 = vadd.f32 %v5210_v57, %v4265_v63  ;;  %v1638_v41 = vmul.f32 0.05, %v1454_v7  ;;  %v1457_v35 = vadd.f32 %v5210_v57, %v4337_v42  ;;  %v1448_v56 = vpop.f32.mrb[59].mxu1 }
 0x15e   : > { %7985 = vst [vmem:[#allocation144_spill] sm:$0xff] %v5205_v45  ;;  %v1564_v10 = vmul.f32 0.05, %v1158_v62  ;;  %v1161_v31 = vadd.f32 %v5210_v57, %v1160_v37  ;;  %v1449_v59 = vadd.f32 %v5210_v57, %v1448_v56  ;;  %v5217_v32 = vmax.f32 %v1166_v19, %v1566_v24  ;;  %1900 = vst [vmem:[#allocation2 + $0xd0] sm:$0xff] (!%p4123_p4), %v5199_v36 }
 0x15f   : > { %v1636_v38 = vmul.f32 0.05, %v1446_v15  ;;  %v1567_v26 = vmul.f32 0.05, %v1169_v1  ;;  %v1639_v47 = vmul.f32 0.05, %v1457_v35  ;;  %v5221_v52 = vmax.f32 %v1454_v7, %v1638_v41 }
 0x160   : > { %v1565_v2 = vmul.f32 0.05, %v1161_v31  ;;  %7986 = vst [vmem:[#allocation145_spill] sm:$0xff] %v5217_v32  ;;  %v1637_v63 = vmul.f32 0.05, %v1449_v59  ;;  %v5223_v45 = vmax.f32 %v1158_v62, %v1564_v10  ;;  %1901 = vst [vmem:[#allocation2 + $0xd8] sm:$0xff] (!%p4123_p4), %v5188_v53 }
 0x161   : > { %v5219_v11 = vmax.f32 %v1169_v1, %v1567_v26  ;;  %7988 = vst [vmem:[#allocation147_spill] sm:$0xff] %v5221_v52  ;;  %v5225_v12 = vmax.f32 %v1457_v35, %v1639_v47  ;;  %v4268_v37 = vpop.f32.mrb[60].mxu0  ;;  %v5229_v39 = vmax.f32 %v1446_v15, %v1636_v38  ;;  %1969 = vst [vmem:[#allocation3 + $0xb8] sm:$0xff] (!%p4123_p4), %v5108_v61 }
 0x162   : > { %7989 = vst [vmem:[#allocation148_spill] sm:$0xff] %v5223_v45  ;;  %v5227_v42 = vmax.f32 %v1161_v31, %v1565_v2  ;;  %v5235_v19 = vmax.f32 %v1449_v59, %v1637_v63  ;;  %v1182_v26 = vadd.f32 %v5210_v57, %v4268_v37  ;;  %v4340_v24 = vpop.f32.mrb[60].mxu1  ;;  %v1173_v7 = vpop.f32.mrb[61].mxu0  ;;  %1970 = vst [vmem:[#allocation3 + $0xc0] sm:$0xff] (!%p4123_p4), %v5159_v50 }
 0x163   : > { %7987 = vst [vmem:[#allocation146_spill] sm:$0xff] %v5219_v11  ;;  %7990 = vst [vmem:[#allocation149_spill] sm:$0xff] %v5225_v12  ;;  %v5233_v56 = vpack.c.bf16 %v5219_v11, %v5217_v32  ;;  %v5240_v62 = vpack.c.bf16 %v5225_v12, %v5221_v52  ;;  %v1470_v47 = vadd.f32 %v5210_v57, %v4340_v24  ;;  %v1461_v38 = vpop.f32.mrb[61].mxu1  ;;  %v4269_v15 = vpop.f32.mrb[62].mxu0 }
 0x164   : > { %7991 = vst [vmem:[#allocation150_spill] sm:$0xff] %v5227_v42  ;;  %7992 = vst [vmem:[#allocation151_spill] sm:$0xff] %v5229_v39  ;;  %v5244_v31 = vpack.c.bf16 %v5227_v42, %v5223_v45  ;;  %v1174_v2 = vadd.f32 %v5210_v57, %v1173_v7  ;;  %v5250_v59 = vpack.c.bf16 %v5235_v19, %v5229_v39  ;;  %v1570_v1 = vmul.f32 0.05, %v1182_v26  ;;  %v4341_v35 = vpop.f32.mrb[62].mxu1  ;;  %v1176_v63 = vpop.f32.mrb[63].mxu0 }
 0x165   : > { %7993 = vst [vmem:[#allocation152_spill] sm:$0xff] %v5235_v19  ;;  %7994 = vst [vmem:[#allocation153_spill] sm:$0xff] %v5240_v62  ;;  %v1462_v41 = vadd.f32 %v5210_v57, %v1461_v38  ;;  %v1185_v10 = vadd.f32 %v5210_v57, %v4269_v15  ;;  %v1642_v37 = vmul.f32 0.05, %v1470_v47  ;;  %v1473_v52 = vadd.f32 %v5210_v57, %v4341_v35  ;;  %v1464_v7 = vpop.f32.mrb[63].mxu1 }
 0x166   : > { %7995 = vst [vmem:[#allocation154_spill] sm:$0xff] %v5250_v59  ;;  %v1568_v12 = vmul.f32 0.05, %v1174_v2  ;;  %v1177_v24 = vadd.f32 %v5210_v57, %v1176_v63  ;;  %v1465_v42 = vadd.f32 %v5210_v57, %v1464_v7  ;;  %v5257_v45 = vmax.f32 %v1182_v26, %v1570_v1  ;;  %1902 = vst [vmem:[#allocation2 + $0xe0] sm:$0xff] (!%p4123_p4), %v5244_v31 }
 0x167   : > { %v1640_v11 = vmul.f32 0.05, %v1462_v41  ;;  %v1571_v32 = vmul.f32 0.05, %v1185_v10  ;;  %v1643_v19 = vmul.f32 0.05, %v1473_v52  ;;  %v5261_v62 = vmax.f32 %v1470_v47, %v1642_v37 }
 0x168   : > { %v1569_v39 = vmul.f32 0.05, %v1177_v24  ;;  %7996 = vst [vmem:[#allocation155_spill] sm:$0xff] %v5257_v45  ;;  %v1641_v15 = vmul.f32 0.05, %v1465_v42  ;;  %v5263_v59 = vmax.f32 %v1174_v2, %v1568_v12  ;;  %1903 = vst [vmem:[#allocation2 + $0xe8] sm:$0xff] (!%p4123_p4), %v5233_v56 }
 0x169   : > { %v5259_v38 = vmax.f32 %v1185_v10, %v1571_v32  ;;  %7998 = vst [vmem:[#allocation157_spill] sm:$0xff] %v5261_v62  ;;  %v5265_v30 = vmax.f32 %v1473_v52, %v1643_v19  ;;  %v4272_v63 = vpop.f32.mrb[64].mxu0  ;;  %v5269_v60 = vmax.f32 %v1462_v41, %v1640_v11  ;;  %1971 = vst [vmem:[#allocation3 + $0xc8] sm:$0xff] (!%p4123_p4), %v5148_v13 }
 0x16a   : > { %7999 = vst [vmem:[#allocation158_spill] sm:$0xff] %v5263_v59  ;;  %v5267_v35 = vmax.f32 %v1177_v24, %v1569_v39  ;;  %v5275_v26 = vmax.f32 %v1465_v42, %v1641_v15  ;;  %v1198_v32 = vadd.f32 %v5210_v57, %v4272_v63  ;;  %v4344_v1 = vpop.f32.mrb[64].mxu1  ;;  %v1189_v47 = vpop.f32.mrb[65].mxu0  ;;  %1972 = vst [vmem:[#allocation3 + $0xd0] sm:$0xff] (!%p4123_p4), %v5199_v36 }
 0x16b   : > { %7997 = vst [vmem:[#allocation156_spill] sm:$0xff] %v5259_v38  ;;  %8000 = vst [vmem:[#allocation159_spill] sm:$0xff] %v5265_v30  ;;  %v5273_v7 = vpack.c.bf16 %v5259_v38, %v5257_v45  ;;  %v5280_v12 = vpack.c.bf16 %v5265_v30, %v5261_v62  ;;  %v1486_v52 = vadd.f32 %v5210_v57, %v4344_v1  ;;  %v1477_v19 = vpop.f32.mrb[65].mxu1  ;;  %v4273_v2 = vpop.f32.mrb[66].mxu0 }
 0x16c   : > { %8001 = vst [vmem:[#allocation160_spill] sm:$0xff] %v5267_v35  ;;  %8002 = vst [vmem:[#allocation161_spill] sm:$0xff] %v5269_v60  ;;  %v5284_v39 = vpack.c.bf16 %v5267_v35, %v5263_v59  ;;  %v1190_v11 = vadd.f32 %v5210_v57, %v1189_v47  ;;  %v5290_v42 = vpack.c.bf16 %v5275_v26, %v5269_v60  ;;  %v1574_v41 = vmul.f32 0.05, %v1198_v32  ;;  %v4345_v24 = vpop.f32.mrb[66].mxu1  ;;  %v1192_v15 = vpop.f32.mrb[67].mxu0 }
 0x16d   : > { %8003 = vst [vmem:[#allocation162_spill] sm:$0xff] %v5275_v26  ;;  %8004 = vst [vmem:[#allocation163_spill] sm:$0xff] %v5280_v12  ;;  %v1478_v10 = vadd.f32 %v5210_v57, %v1477_v19  ;;  %v1201_v37 = vadd.f32 %v5210_v57, %v4273_v2  ;;  %v1646_v63 = vmul.f32 0.05, %v1486_v52  ;;  %v1489_v62 = vadd.f32 %v5210_v57, %v4345_v24  ;;  %v1480_v47 = vpop.f32.mrb[67].mxu1 }
 0x16e   : > { %8005 = vst [vmem:[#allocation164_spill] sm:$0xff] %v5290_v42  ;;  %v1572_v30 = vmul.f32 0.05, %v1190_v11  ;;  %v1193_v1 = vadd.f32 %v5210_v57, %v1192_v15  ;;  %v1481_v35 = vadd.f32 %v5210_v57, %v1480_v47  ;;  %v5297_v59 = vmax.f32 %v1198_v32, %v1574_v41  ;;  %1904 = vst [vmem:[#allocation2 + $0xf0] sm:$0xff] (!%p4123_p4), %v5284_v39 }
 0x16f   : > { %v1644_v38 = vmul.f32 0.05, %v1478_v10  ;;  %v1575_v45 = vmul.f32 0.05, %v1201_v37  ;;  %v1647_v26 = vmul.f32 0.05, %v1489_v62  ;;  %v5301_v12 = vmax.f32 %v1486_v52, %v1646_v63 }
 0x170   : > { %v1573_v60 = vmul.f32 0.05, %v1193_v1  ;;  %8006 = vst [vmem:[#allocation165_spill] sm:$0xff] %v5297_v59  ;;  %v1645_v2 = vmul.f32 0.05, %v1481_v35  ;;  %v5303_v42 = vmax.f32 %v1190_v11, %v1572_v30  ;;  %1905 = vst [vmem:[#allocation2 + $0xf8] sm:$0xff] (!%p4123_p4), %v5273_v7 }
 0x171   : > { %v5299_v19 = vmax.f32 %v1201_v37, %v1575_v45  ;;  %8008 = vst [vmem:[#allocation167_spill] sm:$0xff] %v5301_v12  ;;  %v5305_v18 = vmax.f32 %v1489_v62, %v1647_v26  ;;  %v4276_v15 = vpop.f32.mrb[68].mxu0  ;;  %v5309_v33 = vmax.f32 %v1478_v10, %v1644_v38  ;;  %1973 = vst [vmem:[#allocation3 + $0xd8] sm:$0xff] (!%p4123_p4), %v5188_v53 }
 0x172   : > { %8009 = vst [vmem:[#allocation168_spill] sm:$0xff] %v5303_v42  ;;  %v5307_v24 = vmax.f32 %v1193_v1, %v1573_v60  ;;  %v5315_v32 = vmax.f32 %v1481_v35, %v1645_v2  ;;  %v1214_v45 = vadd.f32 %v5210_v57, %v4276_v15  ;;  %v4348_v41 = vpop.f32.mrb[68].mxu1  ;;  %v1205_v52 = vpop.f32.mrb[69].mxu0  ;;  %1974 = vst [vmem:[#allocation3 + $0xe0] sm:$0xff] (!%p4123_p4), %v5244_v31 }
 0x173   : > { %8007 = vst [vmem:[#allocation166_spill] sm:$0xff] %v5299_v19  ;;  %8010 = vst [vmem:[#allocation169_spill] sm:$0xff] %v5305_v18  ;;  %v5313_v47 = vpack.c.bf16 %v5299_v19, %v5297_v59  ;;  %v5320_v30 = vpack.c.bf16 %v5305_v18, %v5301_v12  ;;  %v1502_v62 = vadd.f32 %v5210_v57, %v4348_v41  ;;  %v1493_v26 = vpop.f32.mrb[69].mxu1  ;;  %v4277_v11 = vpop.f32.mrb[70].mxu0 }
 0x174   : > { %8011 = vst [vmem:[#allocation170_spill] sm:$0xff] %v5307_v24  ;;  %8012 = vst [vmem:[#allocation171_spill] sm:$0xff] %v5309_v33  ;;  %v5324_v60 = vpack.c.bf16 %v5307_v24, %v5303_v42  ;;  %v1206_v38 = vadd.f32 %v5210_v57, %v1205_v52  ;;  %v5330_v35 = vpack.c.bf16 %v5315_v32, %v5309_v33  ;;  %v1578_v10 = vmul.f32 0.05, %v1214_v45  ;;  %v4349_v1 = vpop.f32.mrb[70].mxu1  ;;  %v1208_v2 = vpop.f32.mrb[71].mxu0 }
 0x175   : > { %8013 = vst [vmem:[#allocation172_spill] sm:$0xff] %v5315_v32  ;;  %8014 = vst [vmem:[#allocation173_spill] sm:$0xff] %v5320_v30  ;;  %v1494_v37 = vadd.f32 %v5210_v57, %v1493_v26  ;;  %v1217_v63 = vadd.f32 %v5210_v57, %v4277_v11  ;;  %v1650_v15 = vmul.f32 0.05, %v1502_v62  ;;  %v1505_v12 = vadd.f32 %v5210_v57, %v4349_v1  ;;  %v1496_v52 = vpop.f32.mrb[71].mxu1 }
 0x176   : > { %8015 = vst [vmem:[#allocation174_spill] sm:$0xff] %v5330_v35  ;;  %v1576_v18 = vmul.f32 0.05, %v1206_v38  ;;  %v1209_v41 = vadd.f32 %v5210_v57, %v1208_v2  ;;  %v1497_v24 = vadd.f32 %v5210_v57, %v1496_v52  ;;  %v5337_v42 = vmax.f32 %v1214_v45, %v1578_v10  ;;  %1906 = vst [vmem:[#allocation2 + $0x100] sm:$0xff] (!%p4123_p4), %v5324_v60  ;;  %v8030_v45 = vld [vmem:[#allocation53_spill] sm:$0xff] (!%p4123_p4)  ;;  %v8033_v10 = vld [vmem:[#allocation74_spill] sm:$0xff] (!%p4123_p4) }
 0x177   : > { %v1648_v19 = vmul.f32 0.05, %v1494_v37  ;;  %v1579_v59 = vmul.f32 0.05, %v1217_v63  ;;  %v1651_v32 = vmul.f32 0.05, %v1505_v12  ;;  %v5341_v30 = vmax.f32 %v1502_v62, %v1650_v15 }
 0x178   : > { %v1577_v33 = vmul.f32 0.05, %v1209_v41  ;;  %8016 = vst [vmem:[#allocation175_spill] sm:$0xff] %v5337_v42  ;;  %v1649_v11 = vmul.f32 0.05, %v1497_v24  ;;  %v5343_v35 = vmax.f32 %v1206_v38, %v1576_v18  ;;  %1871 = sbr.rel (%p4123_p4) target bundleno = 421 (0x1a5), region = 36 }
 0x179   : > { %v5339_v26 = vmax.f32 %v1217_v63, %v1579_v59  ;;  %8018 = vst [vmem:[#allocation177_spill] sm:$0xff] %v5341_v30  ;;  %v5345_v5 = vmax.f32 %v1505_v12, %v1651_v32  ;;  %v5349_v2 = vmax.f32 %v1494_v37, %v1648_v19  ;;  %1907 = vst [vmem:[#allocation2 + $0x108] sm:$0xff] (!%p4123_p4), %v5313_v47  ;;  %v8026_v12 = vld [vmem:[#allocation33_spill] sm:$0xff] (!%p4123_p4)  ;;  %v8027_v19 = vld [vmem:[#allocation44_spill] sm:$0xff] (!%p4123_p4) }
 0x17a   : > { %8019 = vst [vmem:[#allocation178_spill] sm:$0xff] %v5343_v35  ;;  %v5347_v1 = vmax.f32 %v1209_v41, %v1577_v33  ;;  %v5355_v52 = vmax.f32 %v1497_v24, %v1649_v11  ;;  %1915 = vst [vmem:[#allocation2 + $0x148] sm:$0xff] (!%p4123_p4), %v8026_v12  ;;  %v8028_v24 = vld [vmem:[#allocation43_spill] sm:$0xff] (!%p4123_p4)  ;;  %v8029_v32 = vld [vmem:[#allocation54_spill] sm:$0xff] (!%p4123_p4) }
 0x17b   : > { %8017 = vst [vmem:[#allocation176_spill] sm:$0xff] %v5339_v26  ;;  %8020 = vst [vmem:[#allocation179_spill] sm:$0xff] %v5345_v5  ;;  %v5353_v57 = vpack.c.bf16 %v5339_v26, %v5337_v42  ;;  %v5359_v59 = vpack.c.bf16 %v5345_v5, %v5341_v30  ;;  %v8031_v62 = vld [vmem:[#allocation64_spill] sm:$0xff] (!%p4123_p4)  ;;  %v8032_v38 = vld [vmem:[#allocation63_spill] sm:$0xff] (!%p4123_p4) }
 0x17c   : > { %8021 = vst [vmem:[#allocation180_spill] sm:$0xff] %v5347_v1  ;;  %8022 = vst [vmem:[#allocation181_spill] sm:$0xff] %v5349_v2  ;;  %v5363_v18 = vpack.c.bf16 %v5347_v1, %v5343_v35  ;;  %v5367_v33 = vpack.c.bf16 %v5355_v52, %v5349_v2  ;;  %v8034_v37 = vld [vmem:[#allocation73_spill] sm:$0xff] (!%p4123_p4)  ;;  %v8035_v63 = vld [vmem:[#allocation84_spill] sm:$0xff] (!%p4123_p4) }
 0x17d   : > { %8023 = vst [vmem:[#allocation182_spill] sm:$0xff] %v5355_v52  ;;  %8024 = vst [vmem:[#allocation183_spill] sm:$0xff] %v5359_v59  ;;  %v8036_v15 = vld [vmem:[#allocation83_spill] sm:$0xff] (!%p4123_p4)  ;;  %v8037_v41 = vld [vmem:[#allocation94_spill] sm:$0xff] (!%p4123_p4) }
 0x17e   : > { %8025 = vst [vmem:[#allocation184_spill] sm:$0xff] %v5367_v33  ;;  %1908 = vst [vmem:[#allocation2 + $0x110] sm:$0xff] (!%p4123_p4), %v5363_v18  ;;  %v8038_v11 = vld [vmem:[#allocation93_spill] sm:$0xff] (!%p4123_p4)  ;;  %v8039_v5 = vld [vmem:[#allocation104_spill] sm:$0xff] (!%p4123_p4) }
 0x17f   : > { %1909 = vst [vmem:[#allocation2 + $0x118] sm:$0xff] %v5353_v57  ;;  %1916 = vst [vmem:[#allocation2 + $0x150] sm:$0xff] %v8027_v19  ;;  %v8040_v30 = vld [vmem:[#allocation103_spill] sm:$0xff]  ;;  %v8041_v52 = vld [vmem:[#allocation114_spill] sm:$0xff] }
 0x180   : > { %1917 = vst [vmem:[#allocation2 + $0x158] sm:$0xff] %v8028_v24  ;;  %1918 = vst [vmem:[#allocation2 + $0x160] sm:$0xff] %v8029_v32  ;;  %v8042_v2 = vld [vmem:[#allocation113_spill] sm:$0xff]  ;;  %v8043_v26 = vld [vmem:[#allocation124_spill] sm:$0xff] }
 0x181   : > { %1919 = vst [vmem:[#allocation2 + $0x168] sm:$0xff] %v8030_v45  ;;  %1920 = vst [vmem:[#allocation2 + $0x170] sm:$0xff] %v8031_v62  ;;  %v8044_v42 = vld [vmem:[#allocation123_spill] sm:$0xff]  ;;  %v8045_v1 = vld [vmem:[#allocation134_spill] sm:$0xff] }
 0x182   : > { %1921 = vst [vmem:[#allocation2 + $0x178] sm:$0xff] %v8032_v38  ;;  %1922 = vst [vmem:[#allocation2 + $0x180] sm:$0xff] %v8033_v10  ;;  %v8046_v35 = vld [vmem:[#allocation133_spill] sm:$0xff] }
 0x183   : > { %1923 = vst [vmem:[#allocation2 + $0x188] sm:$0xff] %v8034_v37  ;;  %1924 = vst [vmem:[#allocation2 + $0x190] sm:$0xff] %v8035_v63 }
 0x184   : > { %1925 = vst [vmem:[#allocation2 + $0x198] sm:$0xff] %v8036_v15  ;;  %1926 = vst [vmem:[#allocation2 + $0x1a0] sm:$0xff] %v8037_v41  ;;  %v8047_v15 = vld [vmem:[#allocation144_spill] sm:$0xff]  ;;  %v8048_v41 = vld [vmem:[#allocation143_spill] sm:$0xff] }
 0x185   : > { %1927 = vst [vmem:[#allocation2 + $0x1a8] sm:$0xff] %v8038_v11  ;;  %1928 = vst [vmem:[#allocation2 + $0x1b0] sm:$0xff] %v8039_v5  ;;  %v8049_v11 = vld [vmem:[#allocation154_spill] sm:$0xff]  ;;  %v8050_v5 = vld [vmem:[#allocation153_spill] sm:$0xff] }
 0x186   : > { %1929 = vst [vmem:[#allocation2 + $0x1b8] sm:$0xff] %v8040_v30  ;;  %1930 = vst [vmem:[#allocation2 + $0x1c0] sm:$0xff] %v8041_v52  ;;  %v8051_v30 = vld [vmem:[#allocation164_spill] sm:$0xff]  ;;  %v8052_v52 = vld [vmem:[#allocation163_spill] sm:$0xff] }
 0x187   : > { %1931 = vst [vmem:[#allocation2 + $0x1c8] sm:$0xff] %v8042_v2  ;;  %1932 = vst [vmem:[#allocation2 + $0x1d0] sm:$0xff] %v8043_v26  ;;  %v8053_v2 = vld [vmem:[#allocation174_spill] sm:$0xff]  ;;  %v8054_v26 = vld [vmem:[#allocation173_spill] sm:$0xff] }
 0x188   : > { %1933 = vst [vmem:[#allocation2 + $0x1d8] sm:$0xff] %v8044_v42  ;;  %1934 = vst [vmem:[#allocation2 + $0x1e0] sm:$0xff] %v8045_v1 }
 0x189   : > { %1935 = vst [vmem:[#allocation2 + $0x1e8] sm:$0xff] %v8046_v35  ;;  %1936 = vst [vmem:[#allocation2 + $0x1f0] sm:$0xff] %v8047_v15 }
 0x18a   : > { %1937 = vst [vmem:[#allocation2 + $0x1f8] sm:$0xff] %v8048_v41  ;;  %1938 = vst [vmem:[#allocation2 + $0x200] sm:$0xff] %v8049_v11 }
 0x18b   : > { %1939 = vst [vmem:[#allocation2 + $0x208] sm:$0xff] %v8050_v5  ;;  %1940 = vst [vmem:[#allocation2 + $0x210] sm:$0xff] %v8051_v30 }
 0x18c   : > { %1941 = vst [vmem:[#allocation2 + $0x218] sm:$0xff] %v8052_v52  ;;  %1942 = vst [vmem:[#allocation2 + $0x220] sm:$0xff] %v8053_v2 }
 0x18d   : > { %1943 = vst [vmem:[#allocation2 + $0x228] sm:$0xff] %v8054_v26  ;;  %1944 = vst [vmem:[#allocation2 + $0x230] sm:$0xff] %v5367_v33 }
 0x18e   : > { %1945 = vst [vmem:[#allocation2 + $0x238] sm:$0xff] %v5359_v59  ;;  %1975 = vst [vmem:[#allocation3 + $0xe8] sm:$0xff] %v5233_v56 }
 0x18f   : > { %1976 = vst [vmem:[#allocation3 + $0xf0] sm:$0xff] %v5284_v39  ;;  %1977 = vst [vmem:[#allocation3 + $0xf8] sm:$0xff] %v5273_v7 }
 0x190   : > { %1978 = vst [vmem:[#allocation3 + $0x100] sm:$0xff] %v5324_v60  ;;  %1979 = vst [vmem:[#allocation3 + $0x108] sm:$0xff] %v5313_v47 }
 0x191   : > { %1980 = vst [vmem:[#allocation3 + $0x110] sm:$0xff] %v5363_v18  ;;  %1981 = vst [vmem:[#allocation3 + $0x118] sm:$0xff] %v5353_v57 }
 0x192   : > { %1982 = vst [vmem:[#allocation3 + $0x120] sm:$0xff] %v4685_v54  ;;  %1983 = vst [vmem:[#allocation3 + $0x128] sm:$0xff] %v4675_v48 }
 0x193   : > { %1984 = vst [vmem:[#allocation3 + $0x130] sm:$0xff] %v4725_v27  ;;  %1985 = vst [vmem:[#allocation3 + $0x138] sm:$0xff] %v4715_v21 }
 0x194   : > { %1986 = vst [vmem:[#allocation3 + $0x140] sm:$0xff] %v4765_v23  ;;  %1987 = vst [vmem:[#allocation3 + $0x148] sm:$0xff] %v8026_v12  ;;  %v8055_v23 = vld [vmem:[#allocation83_spill] sm:$0xff]  ;;  %v8056_v12 = vld [vmem:[#allocation94_spill] sm:$0xff] }
 0x195   : > { %1988 = vst [vmem:[#allocation3 + $0x150] sm:$0xff] %v8027_v19  ;;  %1989 = vst [vmem:[#allocation3 + $0x158] sm:$0xff] %v8028_v24  ;;  %v8057_v19 = vld [vmem:[#allocation93_spill] sm:$0xff]  ;;  %v8058_v24 = vld [vmem:[#allocation104_spill] sm:$0xff] }
 0x196   : > { %1990 = vst [vmem:[#allocation3 + $0x160] sm:$0xff] %v8029_v32  ;;  %1991 = vst [vmem:[#allocation3 + $0x168] sm:$0xff] %v8030_v45  ;;  %v8059_v32 = vld [vmem:[#allocation103_spill] sm:$0xff]  ;;  %v8060_v45 = vld [vmem:[#allocation114_spill] sm:$0xff] }
 0x197   : > { %1992 = vst [vmem:[#allocation3 + $0x170] sm:$0xff] %v8031_v62  ;;  %1993 = vst [vmem:[#allocation3 + $0x178] sm:$0xff] %v8032_v38  ;;  %v8061_v62 = vld [vmem:[#allocation113_spill] sm:$0xff]  ;;  %v8062_v38 = vld [vmem:[#allocation124_spill] sm:$0xff] }
 0x198   : > { %1994 = vst [vmem:[#allocation3 + $0x180] sm:$0xff] %v8033_v10  ;;  %1995 = vst [vmem:[#allocation3 + $0x188] sm:$0xff] %v8034_v37 }
 0x199   : > { %1996 = vst [vmem:[#allocation3 + $0x190] sm:$0xff] %v8035_v63  ;;  %1997 = vst [vmem:[#allocation3 + $0x198] sm:$0xff] %v8055_v23  ;;  %v4450_v23 = vmov 0.0  }
 0x19a   : > { %1998 = vst [vmem:[#allocation3 + $0x1a0] sm:$0xff] %v8056_v12  ;;  %1999 = vst [vmem:[#allocation3 + $0x1a8] sm:$0xff] %v8057_v19 }
 0x19b   : > { %2000 = vst [vmem:[#allocation3 + $0x1b0] sm:$0xff] %v8058_v24  ;;  %2001 = vst [vmem:[#allocation3 + $0x1b8] sm:$0xff] %v8059_v32 }
 0x19c   : > { %2002 = vst [vmem:[#allocation3 + $0x1c0] sm:$0xff] %v8060_v45  ;;  %2003 = vst [vmem:[#allocation3 + $0x1c8] sm:$0xff] %v8061_v62 }
 0x19d   : > { %2004 = vst [vmem:[#allocation3 + $0x1d0] sm:$0xff] %v8062_v38  ;;  %2005 = vst [vmem:[#allocation3 + $0x1d8] sm:$0xff] %v8044_v42 }
 0x19e   : > { %2006 = vst [vmem:[#allocation3 + $0x1e0] sm:$0xff] %v8045_v1  ;;  %2007 = vst [vmem:[#allocation3 + $0x1e8] sm:$0xff] %v8046_v35 }
 0x19f   : > { %2008 = vst [vmem:[#allocation3 + $0x1f0] sm:$0xff] %v8047_v15  ;;  %2009 = vst [vmem:[#allocation3 + $0x1f8] sm:$0xff] %v8048_v41 }
 0x1a0   : > { %2010 = vst [vmem:[#allocation3 + $0x200] sm:$0xff] %v8049_v11  ;;  %2011 = vst [vmem:[#allocation3 + $0x208] sm:$0xff] %v8050_v5 }
 0x1a1   : > { %2012 = vst [vmem:[#allocation3 + $0x210] sm:$0xff] %v8051_v30  ;;  %2013 = vst [vmem:[#allocation3 + $0x218] sm:$0xff] %v8052_v52 }
 0x1a2   : > { %2014 = vst [vmem:[#allocation3 + $0x220] sm:$0xff] %v8053_v2  ;;  %2015 = vst [vmem:[#allocation3 + $0x228] sm:$0xff] %v8054_v26 }
 0x1a3   : > { %2016 = vst [vmem:[#allocation3 + $0x230] sm:$0xff] %v5367_v33  ;;  %2017 = vst [vmem:[#allocation3 + $0x238] sm:$0xff] %v5359_v59 }
 0x1a4   : > { %1872 = vst [vmem:[#allocation4] sm:$0x1] %v4450_v23  ;;  %1873 = vst [vmem:[#allocation5] sm:$0x1] %v4450_v23 }
 0x1a5 PF: > { %v8063_v42 = vld [vmem:[#allocation9_spill] sm:$0xff]  ;;  %v8064_v35 = vld [vmem:[#allocation11_spill] sm:$0xff]  ;;  %v8065_v5 = vld [vmem:[#allocation6_spill] sm:$0xff]  ;;  %p4124_p5 = scmp.le.s32.totalorder %s4478_s13, 0 }
 0x1a6   : > { %v2019_v1 = vadd.f32 %v8064_v35, %v8063_v42  ;;  %v8066_v30 = vld [vmem:[#allocation7_spill] sm:$0xff]  ;;  %v8067_v52 = vld [vmem:[#allocation18_spill] sm:$0xff]  ;;  %v8068_v2 = vld [vmem:[#allocation20_spill] sm:$0xff]  ;;  %v2171_v62 = vmul.f32 %v8063_v42, %v8063_v42  ;;  %v2172_v38 = vmul.f32 %v8064_v35, %v8064_v35 }
 0x1a7   : > { %v8069_v26 = vld [vmem:[#allocation15_spill] sm:$0xff]  ;;  %v8070_v11 = vld [vmem:[#allocation16_spill] sm:$0xff]  ;;  %v8072_v32 = vld [vmem:[#allocation30_spill] sm:$0xff]  ;;  %v2176_v35 = vmul.f32 %v8068_v2, %v8068_v2 }
 0x1a8   : > { %v2020_v10 = vadd.f32 %v2019_v1, %v8065_v5  ;;  %v8071_v19 = vld [vmem:[#allocation28_spill] sm:$0xff]  ;;  %v8073_v23 = vld [vmem:[#allocation25_spill] sm:$0xff]  ;;  %v8077_v27 = vld [vmem:[#allocation35_spill] sm:$0xff] }
 0x1a9   : > { %v8076_v33 = vld [vmem:[#allocation40_spill] sm:$0xff] }
 0x1aa   : > { %v2021_v37 = vadd.f32 %v2020_v10, %v8066_v30  ;;  %v2173_v10 = vmul.f32 %v8065_v5, %v8065_v5 }
 0x1ac   : > { %v2022_v63 = vadd.f32 %v2021_v37, %v8067_v52  ;;  %v8074_v37 = vld [vmem:[#allocation26_spill] sm:$0xff] }
 0x1ae   : > { %v2023_v15 = vadd.f32 %v2022_v63, %v8068_v2  ;;  %v8080_v2 = vld [vmem:[#allocation50_spill] sm:$0xff] }
 0x1b0   : > { %v2024_v41 = vadd.f32 %v2023_v15, %v8069_v26  ;;  %v2174_v15 = vmul.f32 %v8066_v30, %v8066_v30  ;;  %v8078_v30 = vld [vmem:[#allocation36_spill] sm:$0xff] }
 0x1b2   : > { %v2025_v12 = vadd.f32 %v2024_v41, %v8070_v11  ;;  %v2315_v41 = vadd.f32 %v2172_v38, %v2171_v62  ;;  %v2178_v38 = vmul.f32 %v8070_v11, %v8070_v11  ;;  %v8082_v11 = vld [vmem:[#allocation46_spill] sm:$0xff] }
 0x1b4   : > { %v2026_v24 = vadd.f32 %v2025_v12, %v8071_v19  ;;  %v8075_v12 = vld [vmem:[#allocation38_spill] sm:$0xff]  ;;  %v2316_v42 = vadd.f32 %v2315_v41, %v2173_v10 }
 0x1b6   : > { %v2027_v45 = vadd.f32 %v2026_v24, %v8072_v32  ;;  %v2175_v24 = vmul.f32 %v8067_v52, %v8067_v52  ;;  %v8079_v52 = vld [vmem:[#allocation48_spill] sm:$0xff] }
 0x1b8   : > { %v2028_v1 = vadd.f32 %v2027_v45, %v8073_v23  ;;  %v2317_v45 = vadd.f32 %v2316_v42, %v2174_v15 }
 0x1ba   : > { %v2029_v63 = vadd.f32 %v2028_v1, %v8074_v37  ;;  %v2177_v1 = vmul.f32 %v8069_v26, %v8069_v26  ;;  %v2318_v48 = vadd.f32 %v2317_v45, %v2175_v24  ;;  %v8081_v26 = vld [vmem:[#allocation45_spill] sm:$0xff]  ;;  %v2181_v45 = vmul.f32 %v8073_v23, %v8073_v23  ;;  %v8085_v23 = vld [vmem:[#allocation55_spill] sm:$0xff] }
 0x1bc   : > { %v2030_v59 = vadd.f32 %v2029_v63, %v8075_v12  ;;  %v2319_v63 = vadd.f32 %v2318_v48, %v2176_v35  ;;  %v2182_v35 = vmul.f32 %v8074_v37, %v8074_v37  ;;  %v8086_v37 = vld [vmem:[#allocation56_spill] sm:$0xff] }
 0x1be   : > { %v2031_v21 = vadd.f32 %v2030_v59, %v8076_v33  ;;  %v2179_v59 = vmul.f32 %v8071_v19, %v8071_v19  ;;  %v2320_v41 = vadd.f32 %v2319_v63, %v2177_v1  ;;  %v8083_v19 = vld [vmem:[#allocation58_spill] sm:$0xff]  ;;  %v2183_v63 = vmul.f32 %v8075_v12, %v8075_v12  ;;  %v8087_v12 = vld [vmem:[#allocation68_spill] sm:$0xff] }
 0x1c0   : > { %v2032_v5 = vadd.f32 %v2031_v21, %v8077_v27  ;;  %v2180_v21 = vmul.f32 %v8072_v32, %v8072_v32  ;;  %v2321_v42 = vadd.f32 %v2320_v41, %v2178_v38  ;;  %v8084_v32 = vld [vmem:[#allocation60_spill] sm:$0xff]  ;;  %v2184_v41 = vmul.f32 %v8076_v33, %v8076_v33  ;;  %v8088_v33 = vld [vmem:[#allocation70_spill] sm:$0xff] }
 0x1c2   : > { %v2033_v62 = vadd.f32 %v2032_v5, %v8078_v30  ;;  %v2322_v5 = vadd.f32 %v2321_v42, %v2179_v59  ;;  %v2185_v42 = vmul.f32 %v8077_v27, %v8077_v27  ;;  %v8089_v27 = vld [vmem:[#allocation65_spill] sm:$0xff] }
 0x1c4   : > { %v2034_v10 = vadd.f32 %v2033_v62, %v8079_v52  ;;  %v2323_v62 = vadd.f32 %v2322_v5, %v2180_v21  ;;  %v2186_v5 = vmul.f32 %v8078_v30, %v8078_v30  ;;  %v8090_v30 = vld [vmem:[#allocation66_spill] sm:$0xff] }
 0x1c6   : > { %v2035_v15 = vadd.f32 %v2034_v10, %v8080_v2  ;;  %v2324_v10 = vadd.f32 %v2323_v62, %v2181_v45  ;;  %v2187_v62 = vmul.f32 %v8079_v52, %v8079_v52  ;;  %v8091_v52 = vld [vmem:[#allocation78_spill] sm:$0xff] }
 0x1c8   : > { %v2036_v24 = vadd.f32 %v2035_v15, %v8081_v26  ;;  %v2325_v15 = vadd.f32 %v2324_v10, %v2182_v35  ;;  %v2188_v10 = vmul.f32 %v8080_v2, %v8080_v2  ;;  %v8092_v2 = vld [vmem:[#allocation80_spill] sm:$0xff] }
 0x1ca   : > { %v2037_v48 = vadd.f32 %v2036_v24, %v8082_v11  ;;  %v2326_v24 = vadd.f32 %v2325_v15, %v2183_v63  ;;  %v2189_v15 = vmul.f32 %v8081_v26, %v8081_v26  ;;  %v8093_v26 = vld [vmem:[#allocation75_spill] sm:$0xff] }
 0x1cc   : > { %v2038_v1 = vadd.f32 %v2037_v48, %v8083_v19  ;;  %v2327_v48 = vadd.f32 %v2326_v24, %v2184_v41  ;;  %v2190_v24 = vmul.f32 %v8082_v11, %v8082_v11  ;;  %v8094_v11 = vld [vmem:[#allocation76_spill] sm:$0xff] }
 0x1ce   : > { %v2039_v38 = vadd.f32 %v2038_v1, %v8084_v32  ;;  %v2328_v1 = vadd.f32 %v2327_v48, %v2185_v42  ;;  %v2191_v48 = vmul.f32 %v8083_v19, %v8083_v19  ;;  %v8095_v19 = vld [vmem:[#allocation88_spill] sm:$0xff] }
 0x1d0   : > { %v2040_v59 = vadd.f32 %v2039_v38, %v8085_v23  ;;  %v2329_v38 = vadd.f32 %v2328_v1, %v2186_v5  ;;  %v2192_v1 = vmul.f32 %v8084_v32, %v8084_v32  ;;  %v8096_v32 = vld [vmem:[#allocation90_spill] sm:$0xff] }
 0x1d2   : > { %v2041_v21 = vadd.f32 %v2040_v59, %v8086_v37  ;;  %v2330_v59 = vadd.f32 %v2329_v38, %v2187_v62  ;;  %v2193_v38 = vmul.f32 %v8085_v23, %v8085_v23  ;;  %v8097_v23 = vld [vmem:[#allocation85_spill] sm:$0xff] }
 0x1d4   : > { %v2042_v45 = vadd.f32 %v2041_v21, %v8087_v12  ;;  %v2331_v21 = vadd.f32 %v2330_v59, %v2188_v10  ;;  %v2194_v59 = vmul.f32 %v8086_v37, %v8086_v37  ;;  %v8098_v37 = vld [vmem:[#allocation86_spill] sm:$0xff] }
 0x1d6   : > { %v2043_v35 = vadd.f32 %v2042_v45, %v8088_v33  ;;  %v2332_v45 = vadd.f32 %v2331_v21, %v2189_v15  ;;  %v2195_v21 = vmul.f32 %v8087_v12, %v8087_v12  ;;  %v8099_v12 = vld [vmem:[#allocation98_spill] sm:$0xff] }
 0x1d8   : > { %v2044_v63 = vadd.f32 %v2043_v35, %v8089_v27  ;;  %v2333_v35 = vadd.f32 %v2332_v45, %v2190_v24  ;;  %v2196_v45 = vmul.f32 %v8088_v33, %v8088_v33  ;;  %v8100_v33 = vld [vmem:[#allocation100_spill] sm:$0xff] }
 0x1da   : > { %v2045_v41 = vadd.f32 %v2044_v63, %v8090_v30  ;;  %v2334_v63 = vadd.f32 %v2333_v35, %v2191_v48  ;;  %v2197_v35 = vmul.f32 %v8089_v27, %v8089_v27  ;;  %v8101_v27 = vld [vmem:[#allocation95_spill] sm:$0xff] }
 0x1dc   : > { %v2046_v42 = vadd.f32 %v2045_v41, %v8091_v52  ;;  %v2335_v41 = vadd.f32 %v2334_v63, %v2192_v1  ;;  %v2198_v63 = vmul.f32 %v8090_v30, %v8090_v30  ;;  %v8102_v30 = vld [vmem:[#allocation96_spill] sm:$0xff] }
 0x1de   : > { %v2047_v5 = vadd.f32 %v2046_v42, %v8092_v2  ;;  %v2336_v42 = vadd.f32 %v2335_v41, %v2193_v38  ;;  %v2199_v41 = vmul.f32 %v8091_v52, %v8091_v52  ;;  %v8103_v52 = vld [vmem:[#allocation108_spill] sm:$0xff] }
 0x1e0   : > { %v2048_v62 = vadd.f32 %v2047_v5, %v8093_v26  ;;  %v2337_v5 = vadd.f32 %v2336_v42, %v2194_v59  ;;  %v2200_v42 = vmul.f32 %v8092_v2, %v8092_v2  ;;  %v8104_v2 = vld [vmem:[#allocation110_spill] sm:$0xff] }
 0x1e2   : > { %v2049_v10 = vadd.f32 %v2048_v62, %v8094_v11  ;;  %v2338_v62 = vadd.f32 %v2337_v5, %v2195_v21  ;;  %v2201_v5 = vmul.f32 %v8093_v26, %v8093_v26  ;;  %v8105_v26 = vld [vmem:[#allocation105_spill] sm:$0xff] }
 0x1e4   : > { %v2050_v15 = vadd.f32 %v2049_v10, %v8095_v19  ;;  %v2339_v10 = vadd.f32 %v2338_v62, %v2196_v45  ;;  %v2202_v62 = vmul.f32 %v8094_v11, %v8094_v11  ;;  %v8106_v11 = vld [vmem:[#allocation106_spill] sm:$0xff] }
 0x1e6   : > { %v2051_v24 = vadd.f32 %v2050_v15, %v8096_v32  ;;  %v2340_v15 = vadd.f32 %v2339_v10, %v2197_v35  ;;  %v2203_v10 = vmul.f32 %v8095_v19, %v8095_v19  ;;  %v8107_v19 = vld [vmem:[#allocation118_spill] sm:$0xff] }
 0x1e8   : > { %v2052_v48 = vadd.f32 %v2051_v24, %v8097_v23  ;;  %v2341_v24 = vadd.f32 %v2340_v15, %v2198_v63  ;;  %v2204_v15 = vmul.f32 %v8096_v32, %v8096_v32  ;;  %v8108_v32 = vld [vmem:[#allocation120_spill] sm:$0xff] }
 0x1ea   : > { %v2053_v1 = vadd.f32 %v2052_v48, %v8098_v37  ;;  %v2342_v48 = vadd.f32 %v2341_v24, %v2199_v41  ;;  %v2205_v24 = vmul.f32 %v8097_v23, %v8097_v23  ;;  %v8109_v23 = vld [vmem:[#allocation115_spill] sm:$0xff] }
 0x1ec   : > { %v2054_v38 = vadd.f32 %v2053_v1, %v8099_v12  ;;  %v2343_v1 = vadd.f32 %v2342_v48, %v2200_v42  ;;  %v2206_v48 = vmul.f32 %v8098_v37, %v8098_v37  ;;  %v8110_v37 = vld [vmem:[#allocation116_spill] sm:$0xff] }
 0x1ee   : > { %v2055_v59 = vadd.f32 %v2054_v38, %v8100_v33  ;;  %v2344_v38 = vadd.f32 %v2343_v1, %v2201_v5  ;;  %v2207_v1 = vmul.f32 %v8099_v12, %v8099_v12  ;;  %v8111_v12 = vld [vmem:[#allocation128_spill] sm:$0xff] }
 0x1f0   : > { %v2056_v21 = vadd.f32 %v2055_v59, %v8101_v27  ;;  %v2345_v59 = vadd.f32 %v2344_v38, %v2202_v62  ;;  %v2208_v38 = vmul.f32 %v8100_v33, %v8100_v33  ;;  %v8112_v33 = vld [vmem:[#allocation130_spill] sm:$0xff] }
 0x1f2   : > { %v2057_v45 = vadd.f32 %v2056_v21, %v8102_v30  ;;  %v2346_v21 = vadd.f32 %v2345_v59, %v2203_v10  ;;  %v2209_v59 = vmul.f32 %v8101_v27, %v8101_v27  ;;  %v8113_v27 = vld [vmem:[#allocation125_spill] sm:$0xff] }
 0x1f4   : > { %v2058_v35 = vadd.f32 %v2057_v45, %v8103_v52  ;;  %v2347_v45 = vadd.f32 %v2346_v21, %v2204_v15  ;;  %v2210_v21 = vmul.f32 %v8102_v30, %v8102_v30  ;;  %v8114_v30 = vld [vmem:[#allocation126_spill] sm:$0xff] }
 0x1f6   : > { %v2059_v63 = vadd.f32 %v2058_v35, %v8104_v2  ;;  %v2348_v35 = vadd.f32 %v2347_v45, %v2205_v24  ;;  %v2211_v45 = vmul.f32 %v8103_v52, %v8103_v52  ;;  %v8115_v52 = vld [vmem:[#allocation138_spill] sm:$0xff] }
 0x1f8   : > { %v2060_v41 = vadd.f32 %v2059_v63, %v8105_v26  ;;  %v2349_v63 = vadd.f32 %v2348_v35, %v2206_v48  ;;  %v2212_v35 = vmul.f32 %v8104_v2, %v8104_v2  ;;  %v8116_v2 = vld [vmem:[#allocation140_spill] sm:$0xff] }
 0x1fa   : > { %v2061_v42 = vadd.f32 %v2060_v41, %v8106_v11  ;;  %v2350_v41 = vadd.f32 %v2349_v63, %v2207_v1  ;;  %v2213_v63 = vmul.f32 %v8105_v26, %v8105_v26  ;;  %v8117_v26 = vld [vmem:[#allocation135_spill] sm:$0xff] }
 0x1fc   : > { %v2062_v5 = vadd.f32 %v2061_v42, %v8107_v19  ;;  %v2351_v42 = vadd.f32 %v2350_v41, %v2208_v38  ;;  %v2214_v41 = vmul.f32 %v8106_v11, %v8106_v11  ;;  %v8118_v11 = vld [vmem:[#allocation136_spill] sm:$0xff] }
 0x1fe   : > { %v2063_v62 = vadd.f32 %v2062_v5, %v8108_v32  ;;  %v2352_v5 = vadd.f32 %v2351_v42, %v2209_v59  ;;  %v2215_v42 = vmul.f32 %v8107_v19, %v8107_v19  ;;  %v8119_v19 = vld [vmem:[#allocation148_spill] sm:$0xff] }
 0x200   : > { %v2064_v10 = vadd.f32 %v2063_v62, %v8109_v23  ;;  %v2353_v62 = vadd.f32 %v2352_v5, %v2210_v21  ;;  %v2216_v5 = vmul.f32 %v8108_v32, %v8108_v32  ;;  %v8120_v32 = vld [vmem:[#allocation150_spill] sm:$0xff] }
 0x202   : > { %v2065_v15 = vadd.f32 %v2064_v10, %v8110_v37  ;;  %v2354_v10 = vadd.f32 %v2353_v62, %v2211_v45  ;;  %v2217_v62 = vmul.f32 %v8109_v23, %v8109_v23  ;;  %v8121_v23 = vld [vmem:[#allocation145_spill] sm:$0xff] }
 0x204   : > { %v2066_v24 = vadd.f32 %v2065_v15, %v8111_v12  ;;  %v2355_v15 = vadd.f32 %v2354_v10, %v2212_v35  ;;  %v2218_v10 = vmul.f32 %v8110_v37, %v8110_v37  ;;  %v8122_v37 = vld [vmem:[#allocation146_spill] sm:$0xff] }
 0x206   : > { %v2067_v48 = vadd.f32 %v2066_v24, %v8112_v33  ;;  %v2356_v24 = vadd.f32 %v2355_v15, %v2213_v63  ;;  %v2219_v15 = vmul.f32 %v8111_v12, %v8111_v12  ;;  %v8123_v12 = vld [vmem:[#allocation158_spill] sm:$0xff] }
 0x208   : > { %v2068_v1 = vadd.f32 %v2067_v48, %v8113_v27  ;;  %v2357_v48 = vadd.f32 %v2356_v24, %v2214_v41  ;;  %v2220_v24 = vmul.f32 %v8112_v33, %v8112_v33  ;;  %v8124_v33 = vld [vmem:[#allocation160_spill] sm:$0xff] }
 0x20a   : > { %v2069_v38 = vadd.f32 %v2068_v1, %v8114_v30  ;;  %v2358_v1 = vadd.f32 %v2357_v48, %v2215_v42  ;;  %v2221_v48 = vmul.f32 %v8113_v27, %v8113_v27  ;;  %v8125_v27 = vld [vmem:[#allocation155_spill] sm:$0xff] }
 0x20c   : > { %v2070_v59 = vadd.f32 %v2069_v38, %v8115_v52  ;;  %v2359_v38 = vadd.f32 %v2358_v1, %v2216_v5  ;;  %v2222_v1 = vmul.f32 %v8114_v30, %v8114_v30  ;;  %v8126_v30 = vld [vmem:[#allocation156_spill] sm:$0xff] }
 0x20e   : > { %v2071_v21 = vadd.f32 %v2070_v59, %v8116_v2  ;;  %v2360_v59 = vadd.f32 %v2359_v38, %v2217_v62  ;;  %v2223_v38 = vmul.f32 %v8115_v52, %v8115_v52  ;;  %v8127_v52 = vld [vmem:[#allocation168_spill] sm:$0xff] }
 0x210   : > { %v2072_v45 = vadd.f32 %v2071_v21, %v8117_v26  ;;  %v2361_v21 = vadd.f32 %v2360_v59, %v2218_v10  ;;  %v2224_v59 = vmul.f32 %v8116_v2, %v8116_v2  ;;  %v8128_v2 = vld [vmem:[#allocation170_spill] sm:$0xff] }
 0x212   : > { %v2073_v35 = vadd.f32 %v2072_v45, %v8118_v11  ;;  %v2362_v45 = vadd.f32 %v2361_v21, %v2219_v15  ;;  %v2225_v21 = vmul.f32 %v8117_v26, %v8117_v26  ;;  %v8129_v26 = vld [vmem:[#allocation165_spill] sm:$0xff] }
 0x214   : > { %v2074_v63 = vadd.f32 %v2073_v35, %v8119_v19  ;;  %v2363_v35 = vadd.f32 %v2362_v45, %v2220_v24  ;;  %v2226_v45 = vmul.f32 %v8118_v11, %v8118_v11  ;;  %v8130_v11 = vld [vmem:[#allocation166_spill] sm:$0xff] }
 0x216   : > { %v2075_v41 = vadd.f32 %v2074_v63, %v8120_v32  ;;  %v2364_v63 = vadd.f32 %v2363_v35, %v2221_v48  ;;  %v2227_v35 = vmul.f32 %v8119_v19, %v8119_v19  ;;  %v8131_v19 = vld [vmem:[#allocation178_spill] sm:$0xff] }
 0x218   : > { %v2076_v42 = vadd.f32 %v2075_v41, %v8121_v23  ;;  %v2365_v41 = vadd.f32 %v2364_v63, %v2222_v1  ;;  %v2228_v63 = vmul.f32 %v8120_v32, %v8120_v32  ;;  %v8132_v32 = vld [vmem:[#allocation180_spill] sm:$0xff] }
 0x21a   : > { %v2077_v5 = vadd.f32 %v2076_v42, %v8122_v37  ;;  %v2366_v42 = vadd.f32 %v2365_v41, %v2223_v38  ;;  %v2229_v41 = vmul.f32 %v8121_v23, %v8121_v23  ;;  %v8133_v23 = vld [vmem:[#allocation175_spill] sm:$0xff] }
 0x21c   : > { %v2078_v62 = vadd.f32 %v2077_v5, %v8123_v12  ;;  %v2367_v5 = vadd.f32 %v2366_v42, %v2224_v59  ;;  %v2230_v42 = vmul.f32 %v8122_v37, %v8122_v37  ;;  %v8134_v37 = vld [vmem:[#allocation176_spill] sm:$0xff] }
 0x21e   : > { %v2079_v10 = vadd.f32 %v2078_v62, %v8124_v33  ;;  %v2368_v62 = vadd.f32 %v2367_v5, %v2225_v21  ;;  %v2231_v5 = vmul.f32 %v8123_v12, %v8123_v12  ;;  %v8135_v12 = vld [vmem:[#allocation12_spill] sm:$0xff] }
 0x220   : > { %v2080_v15 = vadd.f32 %v2079_v10, %v8125_v27  ;;  %v2369_v10 = vadd.f32 %v2368_v62, %v2226_v45  ;;  %v2232_v62 = vmul.f32 %v8124_v33, %v8124_v33  ;;  %v8136_v33 = vld [vmem:[#allocation13_spill] sm:$0xff] }
 0x222   : > { %v2081_v24 = vadd.f32 %v2080_v15, %v8126_v30  ;;  %v2370_v15 = vadd.f32 %v2369_v10, %v2227_v35  ;;  %v2233_v10 = vmul.f32 %v8125_v27, %v8125_v27  ;;  %v8137_v27 = vld [vmem:[#allocation8_spill] sm:$0xff] }
 0x224   : > { %v2082_v48 = vadd.f32 %v2081_v24, %v8127_v52  ;;  %v2371_v24 = vadd.f32 %v2370_v15, %v2228_v63  ;;  %v2234_v15 = vmul.f32 %v8126_v30, %v8126_v30  ;;  %v8138_v30 = vld [vmem:[#allocation10_spill] sm:$0xff] }
 0x226   : > { %v2083_v1 = vadd.f32 %v2082_v48, %v8128_v2  ;;  %v2372_v48 = vadd.f32 %v2371_v24, %v2229_v41  ;;  %v2235_v24 = vmul.f32 %v8127_v52, %v8127_v52  ;;  %v8139_v52 = vld [vmem:[#allocation21_spill] sm:$0xff] }
 0x228   : > { %v2084_v38 = vadd.f32 %v2083_v1, %v8129_v26  ;;  %v2373_v1 = vadd.f32 %v2372_v48, %v2230_v42  ;;  %v2236_v48 = vmul.f32 %v8128_v2, %v8128_v2  ;;  %v8140_v2 = vld [vmem:[#allocation22_spill] sm:$0xff] }
 0x22a   : > { %v2085_v59 = vadd.f32 %v2084_v38, %v8130_v11  ;;  %v2374_v38 = vadd.f32 %v2373_v1, %v2231_v5  ;;  %v2237_v1 = vmul.f32 %v8129_v26, %v8129_v26  ;;  %v8141_v26 = vld [vmem:[#allocation17_spill] sm:$0xff] }
 0x22c   : > { %v2086_v21 = vadd.f32 %v2085_v59, %v8131_v19  ;;  %v2375_v59 = vadd.f32 %v2374_v38, %v2232_v62  ;;  %v2238_v38 = vmul.f32 %v8130_v11, %v8130_v11  ;;  %v8142_v11 = vld [vmem:[#allocation19_spill] sm:$0xff] }
 0x22e   : > { %v2087_v45 = vadd.f32 %v2086_v21, %v8132_v32  ;;  %v2376_v21 = vadd.f32 %v2375_v59, %v2233_v10  ;;  %v2239_v59 = vmul.f32 %v8131_v19, %v8131_v19  ;;  %v8143_v19 = vld [vmem:[#allocation31_spill] sm:$0xff] }
 0x230   : > { %v2088_v35 = vadd.f32 %v2087_v45, %v8133_v23  ;;  %v2377_v45 = vadd.f32 %v2376_v21, %v2234_v15  ;;  %v2240_v21 = vmul.f32 %v8132_v32, %v8132_v32  ;;  %v8144_v32 = vld [vmem:[#allocation32_spill] sm:$0xff] }
 0x232   : > { %v2089_v63 = vadd.f32 %v2088_v35, %v8134_v37  ;;  %v2378_v35 = vadd.f32 %v2377_v45, %v2235_v24  ;;  %v2241_v45 = vmul.f32 %v8133_v23, %v8133_v23  ;;  %v8145_v23 = vld [vmem:[#allocation27_spill] sm:$0xff] }
 0x234   : > { %v2090_v41 = vadd.f32 %v2089_v63, %v8135_v12  ;;  %v2379_v63 = vadd.f32 %v2378_v35, %v2236_v48  ;;  %v2242_v35 = vmul.f32 %v8134_v37, %v8134_v37  ;;  %v8146_v37 = vld [vmem:[#allocation29_spill] sm:$0xff] }
 0x236   : > { %v2091_v42 = vadd.f32 %v2090_v41, %v8136_v33  ;;  %v2380_v41 = vadd.f32 %v2379_v63, %v2237_v1  ;;  %v2243_v63 = vmul.f32 %v8135_v12, %v8135_v12  ;;  %v8147_v12 = vld [vmem:[#allocation41_spill] sm:$0xff] }
 0x238   : > { %v2092_v5 = vadd.f32 %v2091_v42, %v8137_v27  ;;  %v2381_v42 = vadd.f32 %v2380_v41, %v2238_v38  ;;  %v2244_v41 = vmul.f32 %v8136_v33, %v8136_v33  ;;  %v8148_v33 = vld [vmem:[#allocation42_spill] sm:$0xff] }
 0x23a   : > { %v2093_v62 = vadd.f32 %v2092_v5, %v8138_v30  ;;  %v2382_v5 = vadd.f32 %v2381_v42, %v2239_v59  ;;  %v2245_v42 = vmul.f32 %v8137_v27, %v8137_v27  ;;  %v8149_v27 = vld [vmem:[#allocation37_spill] sm:$0xff] }
 0x23c   : > { %v2094_v10 = vadd.f32 %v2093_v62, %v8139_v52  ;;  %v2383_v62 = vadd.f32 %v2382_v5, %v2240_v21  ;;  %v2246_v5 = vmul.f32 %v8138_v30, %v8138_v30  ;;  %v8150_v30 = vld [vmem:[#allocation39_spill] sm:$0xff] }
 0x23e   : > { %v2095_v15 = vadd.f32 %v2094_v10, %v8140_v2  ;;  %v2384_v10 = vadd.f32 %v2383_v62, %v2241_v45  ;;  %v2247_v62 = vmul.f32 %v8139_v52, %v8139_v52  ;;  %v8151_v52 = vld [vmem:[#allocation51_spill] sm:$0xff] }
 0x240   : > { %v2096_v24 = vadd.f32 %v2095_v15, %v8141_v26  ;;  %v2385_v15 = vadd.f32 %v2384_v10, %v2242_v35  ;;  %v2248_v10 = vmul.f32 %v8140_v2, %v8140_v2  ;;  %v8152_v2 = vld [vmem:[#allocation52_spill] sm:$0xff] }
 0x242   : > { %v2097_v48 = vadd.f32 %v2096_v24, %v8142_v11  ;;  %v2386_v24 = vadd.f32 %v2385_v15, %v2243_v63  ;;  %v2249_v15 = vmul.f32 %v8141_v26, %v8141_v26  ;;  %v8153_v26 = vld [vmem:[#allocation47_spill] sm:$0xff] }
 0x244   : > { %v2098_v1 = vadd.f32 %v2097_v48, %v8143_v19  ;;  %v2387_v48 = vadd.f32 %v2386_v24, %v2244_v41  ;;  %v2250_v24 = vmul.f32 %v8142_v11, %v8142_v11  ;;  %v8154_v11 = vld [vmem:[#allocation49_spill] sm:$0xff] }
 0x246   : > { %v2099_v38 = vadd.f32 %v2098_v1, %v8144_v32  ;;  %v2388_v1 = vadd.f32 %v2387_v48, %v2245_v42  ;;  %v2251_v48 = vmul.f32 %v8143_v19, %v8143_v19  ;;  %v8155_v19 = vld [vmem:[#allocation61_spill] sm:$0xff] }
 0x248   : > { %v2100_v59 = vadd.f32 %v2099_v38, %v8145_v23  ;;  %v2389_v38 = vadd.f32 %v2388_v1, %v2246_v5  ;;  %v2252_v1 = vmul.f32 %v8144_v32, %v8144_v32  ;;  %v8156_v32 = vld [vmem:[#allocation62_spill] sm:$0xff] }
 0x24a   : > { %v2101_v21 = vadd.f32 %v2100_v59, %v8146_v37  ;;  %v2390_v59 = vadd.f32 %v2389_v38, %v2247_v62  ;;  %v2253_v38 = vmul.f32 %v8145_v23, %v8145_v23  ;;  %v8157_v23 = vld [vmem:[#allocation57_spill] sm:$0xff] }
 0x24c   : > { %v2102_v45 = vadd.f32 %v2101_v21, %v8147_v12  ;;  %v2391_v21 = vadd.f32 %v2390_v59, %v2248_v10  ;;  %v2254_v59 = vmul.f32 %v8146_v37, %v8146_v37  ;;  %v8158_v37 = vld [vmem:[#allocation59_spill] sm:$0xff] }
 0x24e   : > { %v2103_v35 = vadd.f32 %v2102_v45, %v8148_v33  ;;  %v2392_v45 = vadd.f32 %v2391_v21, %v2249_v15  ;;  %v2255_v21 = vmul.f32 %v8147_v12, %v8147_v12  ;;  %v8159_v12 = vld [vmem:[#allocation71_spill] sm:$0xff] }
 0x250   : > { %v2104_v63 = vadd.f32 %v2103_v35, %v8149_v27  ;;  %v2393_v35 = vadd.f32 %v2392_v45, %v2250_v24  ;;  %v2256_v45 = vmul.f32 %v8148_v33, %v8148_v33  ;;  %v8160_v33 = vld [vmem:[#allocation72_spill] sm:$0xff] }
 0x252   : > { %v2105_v41 = vadd.f32 %v2104_v63, %v8150_v30  ;;  %v2394_v63 = vadd.f32 %v2393_v35, %v2251_v48  ;;  %v2257_v35 = vmul.f32 %v8149_v27, %v8149_v27  ;;  %v8161_v27 = vld [vmem:[#allocation67_spill] sm:$0xff] }
 0x254   : > { %v2106_v42 = vadd.f32 %v2105_v41, %v8151_v52  ;;  %v2395_v41 = vadd.f32 %v2394_v63, %v2252_v1  ;;  %v2258_v63 = vmul.f32 %v8150_v30, %v8150_v30  ;;  %v8162_v30 = vld [vmem:[#allocation69_spill] sm:$0xff] }
 0x256   : > { %v2107_v5 = vadd.f32 %v2106_v42, %v8152_v2  ;;  %v2396_v42 = vadd.f32 %v2395_v41, %v2253_v38  ;;  %v2259_v41 = vmul.f32 %v8151_v52, %v8151_v52  ;;  %v8163_v52 = vld [vmem:[#allocation81_spill] sm:$0xff] }
 0x258   : > { %v2108_v62 = vadd.f32 %v2107_v5, %v8153_v26  ;;  %v2397_v5 = vadd.f32 %v2396_v42, %v2254_v59  ;;  %v2260_v42 = vmul.f32 %v8152_v2, %v8152_v2  ;;  %v8164_v2 = vld [vmem:[#allocation82_spill] sm:$0xff] }
 0x25a   : > { %v2109_v10 = vadd.f32 %v2108_v62, %v8154_v11  ;;  %v2398_v62 = vadd.f32 %v2397_v5, %v2255_v21  ;;  %v2261_v5 = vmul.f32 %v8153_v26, %v8153_v26  ;;  %v8165_v26 = vld [vmem:[#allocation77_spill] sm:$0xff] }
 0x25c   : > { %v2110_v15 = vadd.f32 %v2109_v10, %v8155_v19  ;;  %v2399_v10 = vadd.f32 %v2398_v62, %v2256_v45  ;;  %v2262_v62 = vmul.f32 %v8154_v11, %v8154_v11  ;;  %v8166_v11 = vld [vmem:[#allocation79_spill] sm:$0xff] }
 0x25e   : > { %v2111_v24 = vadd.f32 %v2110_v15, %v8156_v32  ;;  %v2400_v15 = vadd.f32 %v2399_v10, %v2257_v35  ;;  %v2263_v10 = vmul.f32 %v8155_v19, %v8155_v19  ;;  %v8167_v19 = vld [vmem:[#allocation91_spill] sm:$0xff] }
 0x260   : > { %v2112_v48 = vadd.f32 %v2111_v24, %v8157_v23  ;;  %v2401_v24 = vadd.f32 %v2400_v15, %v2258_v63  ;;  %v2264_v15 = vmul.f32 %v8156_v32, %v8156_v32  ;;  %v8168_v32 = vld [vmem:[#allocation92_spill] sm:$0xff] }
 0x262   : > { %v2113_v1 = vadd.f32 %v2112_v48, %v8158_v37  ;;  %v2402_v48 = vadd.f32 %v2401_v24, %v2259_v41  ;;  %v2265_v24 = vmul.f32 %v8157_v23, %v8157_v23  ;;  %v8169_v23 = vld [vmem:[#allocation87_spill] sm:$0xff] }
 0x264   : > { %v2114_v38 = vadd.f32 %v2113_v1, %v8159_v12  ;;  %v2403_v1 = vadd.f32 %v2402_v48, %v2260_v42  ;;  %v2266_v48 = vmul.f32 %v8158_v37, %v8158_v37  ;;  %v8170_v37 = vld [vmem:[#allocation89_spill] sm:$0xff] }
 0x266   : > { %v2115_v59 = vadd.f32 %v2114_v38, %v8160_v33  ;;  %v2404_v38 = vadd.f32 %v2403_v1, %v2261_v5  ;;  %v2267_v1 = vmul.f32 %v8159_v12, %v8159_v12  ;;  %v8171_v12 = vld [vmem:[#allocation101_spill] sm:$0xff] }
 0x268   : > { %v2116_v21 = vadd.f32 %v2115_v59, %v8161_v27  ;;  %v2405_v59 = vadd.f32 %v2404_v38, %v2262_v62  ;;  %v2268_v38 = vmul.f32 %v8160_v33, %v8160_v33  ;;  %v8172_v33 = vld [vmem:[#allocation102_spill] sm:$0xff] }
 0x26a   : > { %v2117_v45 = vadd.f32 %v2116_v21, %v8162_v30  ;;  %v2406_v21 = vadd.f32 %v2405_v59, %v2263_v10  ;;  %v2269_v59 = vmul.f32 %v8161_v27, %v8161_v27  ;;  %v8173_v27 = vld [vmem:[#allocation97_spill] sm:$0xff] }
 0x26c   : > { %v2118_v35 = vadd.f32 %v2117_v45, %v8163_v52  ;;  %v2407_v45 = vadd.f32 %v2406_v21, %v2264_v15  ;;  %v2270_v21 = vmul.f32 %v8162_v30, %v8162_v30  ;;  %v8174_v30 = vld [vmem:[#allocation99_spill] sm:$0xff] }
 0x26e   : > { %v2119_v63 = vadd.f32 %v2118_v35, %v8164_v2  ;;  %v2408_v35 = vadd.f32 %v2407_v45, %v2265_v24  ;;  %v2271_v45 = vmul.f32 %v8163_v52, %v8163_v52  ;;  %v8175_v52 = vld [vmem:[#allocation111_spill] sm:$0xff] }
 0x270   : > { %v2120_v41 = vadd.f32 %v2119_v63, %v8165_v26  ;;  %v2409_v63 = vadd.f32 %v2408_v35, %v2266_v48  ;;  %v2272_v35 = vmul.f32 %v8164_v2, %v8164_v2  ;;  %v8176_v2 = vld [vmem:[#allocation112_spill] sm:$0xff] }
 0x272   : > { %v2121_v42 = vadd.f32 %v2120_v41, %v8166_v11  ;;  %v2410_v41 = vadd.f32 %v2409_v63, %v2267_v1  ;;  %v2273_v63 = vmul.f32 %v8165_v26, %v8165_v26  ;;  %v8177_v26 = vld [vmem:[#allocation107_spill] sm:$0xff] }
 0x274   : > { %v2122_v5 = vadd.f32 %v2121_v42, %v8167_v19  ;;  %v2411_v42 = vadd.f32 %v2410_v41, %v2268_v38  ;;  %v2274_v41 = vmul.f32 %v8166_v11, %v8166_v11  ;;  %v8178_v11 = vld [vmem:[#allocation109_spill] sm:$0xff] }
 0x276   : > { %v2123_v62 = vadd.f32 %v2122_v5, %v8168_v32  ;;  %v2412_v5 = vadd.f32 %v2411_v42, %v2269_v59  ;;  %v2275_v42 = vmul.f32 %v8167_v19, %v8167_v19  ;;  %v8179_v19 = vld [vmem:[#allocation121_spill] sm:$0xff] }
 0x278   : > { %v2124_v10 = vadd.f32 %v2123_v62, %v8169_v23  ;;  %v2413_v62 = vadd.f32 %v2412_v5, %v2270_v21  ;;  %v2276_v5 = vmul.f32 %v8168_v32, %v8168_v32  ;;  %v8180_v32 = vld [vmem:[#allocation122_spill] sm:$0xff] }
 0x27a   : > { %v2125_v15 = vadd.f32 %v2124_v10, %v8170_v37  ;;  %v2414_v10 = vadd.f32 %v2413_v62, %v2271_v45  ;;  %v2277_v62 = vmul.f32 %v8169_v23, %v8169_v23  ;;  %v8181_v23 = vld [vmem:[#allocation117_spill] sm:$0xff] }
 0x27c   : > { %v2126_v24 = vadd.f32 %v2125_v15, %v8171_v12  ;;  %v2415_v15 = vadd.f32 %v2414_v10, %v2272_v35  ;;  %v2278_v10 = vmul.f32 %v8170_v37, %v8170_v37  ;;  %v8182_v37 = vld [vmem:[#allocation119_spill] sm:$0xff] }
 0x27e   : > { %v2127_v48 = vadd.f32 %v2126_v24, %v8172_v33  ;;  %v2416_v24 = vadd.f32 %v2415_v15, %v2273_v63  ;;  %v2279_v15 = vmul.f32 %v8171_v12, %v8171_v12  ;;  %v8183_v12 = vld [vmem:[#allocation131_spill] sm:$0xff] }
 0x280   : > { %v2128_v1 = vadd.f32 %v2127_v48, %v8173_v27  ;;  %v2417_v48 = vadd.f32 %v2416_v24, %v2274_v41  ;;  %v2280_v24 = vmul.f32 %v8172_v33, %v8172_v33  ;;  %v8184_v33 = vld [vmem:[#allocation132_spill] sm:$0xff] }
 0x282   : > { %v2129_v38 = vadd.f32 %v2128_v1, %v8174_v30  ;;  %v2418_v1 = vadd.f32 %v2417_v48, %v2275_v42  ;;  %v2281_v48 = vmul.f32 %v8173_v27, %v8173_v27  ;;  %v8185_v27 = vld [vmem:[#allocation127_spill] sm:$0xff] }
 0x284   : > { %v2130_v59 = vadd.f32 %v2129_v38, %v8175_v52  ;;  %v2419_v38 = vadd.f32 %v2418_v1, %v2276_v5  ;;  %v2282_v1 = vmul.f32 %v8174_v30, %v8174_v30  ;;  %v8186_v30 = vld [vmem:[#allocation129_spill] sm:$0xff] }
 0x286   : > { %v2131_v21 = vadd.f32 %v2130_v59, %v8176_v2  ;;  %v2420_v59 = vadd.f32 %v2419_v38, %v2277_v62  ;;  %v2283_v38 = vmul.f32 %v8175_v52, %v8175_v52  ;;  %v8187_v52 = vld [vmem:[#allocation141_spill] sm:$0xff] }
 0x288   : > { %v2132_v45 = vadd.f32 %v2131_v21, %v8177_v26  ;;  %v2421_v21 = vadd.f32 %v2420_v59, %v2278_v10  ;;  %v2284_v59 = vmul.f32 %v8176_v2, %v8176_v2  ;;  %v8188_v2 = vld [vmem:[#allocation142_spill] sm:$0xff] }
 0x28a   : > { %v2133_v35 = vadd.f32 %v2132_v45, %v8178_v11  ;;  %v2422_v45 = vadd.f32 %v2421_v21, %v2279_v15  ;;  %v2285_v21 = vmul.f32 %v8177_v26, %v8177_v26  ;;  %v8189_v26 = vld [vmem:[#allocation137_spill] sm:$0xff] }
 0x28c   : > { %v2134_v63 = vadd.f32 %v2133_v35, %v8179_v19  ;;  %v2423_v35 = vadd.f32 %v2422_v45, %v2280_v24  ;;  %v2286_v45 = vmul.f32 %v8178_v11, %v8178_v11  ;;  %v8190_v11 = vld [vmem:[#allocation139_spill] sm:$0xff] }
 0x28e   : > { %v2135_v41 = vadd.f32 %v2134_v63, %v8180_v32  ;;  %v2424_v63 = vadd.f32 %v2423_v35, %v2281_v48  ;;  %v2287_v35 = vmul.f32 %v8179_v19, %v8179_v19  ;;  %v8191_v19 = vld [vmem:[#allocation151_spill] sm:$0xff] }
 0x290   : > { %v2136_v42 = vadd.f32 %v2135_v41, %v8181_v23  ;;  %v2425_v41 = vadd.f32 %v2424_v63, %v2282_v1  ;;  %v2288_v63 = vmul.f32 %v8180_v32, %v8180_v32  ;;  %v8192_v32 = vld [vmem:[#allocation152_spill] sm:$0xff] }
 0x292   : > { %v2137_v5 = vadd.f32 %v2136_v42, %v8182_v37  ;;  %v2426_v42 = vadd.f32 %v2425_v41, %v2283_v38  ;;  %v2289_v41 = vmul.f32 %v8181_v23, %v8181_v23  ;;  %v8193_v23 = vld [vmem:[#allocation147_spill] sm:$0xff] }
 0x294   : > { %v2138_v62 = vadd.f32 %v2137_v5, %v8183_v12  ;;  %v2427_v5 = vadd.f32 %v2426_v42, %v2284_v59  ;;  %v2290_v42 = vmul.f32 %v8182_v37, %v8182_v37  ;;  %v8194_v37 = vld [vmem:[#allocation149_spill] sm:$0xff] }
 0x296   : > { %v2139_v10 = vadd.f32 %v2138_v62, %v8184_v33  ;;  %v2428_v62 = vadd.f32 %v2427_v5, %v2285_v21  ;;  %v2291_v5 = vmul.f32 %v8183_v12, %v8183_v12  ;;  %v8195_v12 = vld [vmem:[#allocation161_spill] sm:$0xff] }
 0x298   : > { %v2140_v15 = vadd.f32 %v2139_v10, %v8185_v27  ;;  %v2429_v10 = vadd.f32 %v2428_v62, %v2286_v45  ;;  %v2292_v62 = vmul.f32 %v8184_v33, %v8184_v33  ;;  %v8196_v33 = vld [vmem:[#allocation162_spill] sm:$0xff] }
 0x29a   : > { %v2141_v24 = vadd.f32 %v2140_v15, %v8186_v30  ;;  %v2430_v15 = vadd.f32 %v2429_v10, %v2287_v35  ;;  %v2293_v10 = vmul.f32 %v8185_v27, %v8185_v27  ;;  %v8197_v27 = vld [vmem:[#allocation157_spill] sm:$0xff] }
 0x29c   : > { %v2142_v48 = vadd.f32 %v2141_v24, %v8187_v52  ;;  %v2431_v24 = vadd.f32 %v2430_v15, %v2288_v63  ;;  %v2294_v15 = vmul.f32 %v8186_v30, %v8186_v30  ;;  %v8198_v30 = vld [vmem:[#allocation159_spill] sm:$0xff] }
 0x29e   : > { %v2143_v1 = vadd.f32 %v2142_v48, %v8188_v2  ;;  %v2432_v48 = vadd.f32 %v2431_v24, %v2289_v41  ;;  %v2295_v24 = vmul.f32 %v8187_v52, %v8187_v52  ;;  %v8199_v52 = vld [vmem:[#allocation171_spill] sm:$0xff] }
 0x2a0   : > { %v2144_v38 = vadd.f32 %v2143_v1, %v8189_v26  ;;  %v2433_v1 = vadd.f32 %v2432_v48, %v2290_v42  ;;  %v2296_v48 = vmul.f32 %v8188_v2, %v8188_v2  ;;  %v8200_v2 = vld [vmem:[#allocation172_spill] sm:$0xff] }
 0x2a2   : > { %v2145_v59 = vadd.f32 %v2144_v38, %v8190_v11  ;;  %v2434_v38 = vadd.f32 %v2433_v1, %v2291_v5  ;;  %v2297_v1 = vmul.f32 %v8189_v26, %v8189_v26  ;;  %v8201_v26 = vld [vmem:[#allocation167_spill] sm:$0xff] }
 0x2a4   : > { %v2146_v21 = vadd.f32 %v2145_v59, %v8191_v19  ;;  %v2435_v59 = vadd.f32 %v2434_v38, %v2292_v62  ;;  %v2298_v38 = vmul.f32 %v8190_v11, %v8190_v11  ;;  %v8202_v11 = vld [vmem:[#allocation169_spill] sm:$0xff] }
 0x2a6   : > { %v2147_v45 = vadd.f32 %v2146_v21, %v8192_v32  ;;  %v2436_v21 = vadd.f32 %v2435_v59, %v2293_v10  ;;  %v2299_v59 = vmul.f32 %v8191_v19, %v8191_v19  ;;  %v8203_v19 = vld [vmem:[#allocation181_spill] sm:$0xff] }
 0x2a8   : > { %v2148_v35 = vadd.f32 %v2147_v45, %v8193_v23  ;;  %v2437_v45 = vadd.f32 %v2436_v21, %v2294_v15  ;;  %v2300_v21 = vmul.f32 %v8192_v32, %v8192_v32  ;;  %v8204_v32 = vld [vmem:[#allocation182_spill] sm:$0xff] }
 0x2aa   : > { %v2149_v63 = vadd.f32 %v2148_v35, %v8194_v37  ;;  %v2438_v35 = vadd.f32 %v2437_v45, %v2295_v24  ;;  %v2301_v45 = vmul.f32 %v8193_v23, %v8193_v23  ;;  %v8205_v23 = vld [vmem:[#allocation177_spill] sm:$0xff] }
 0x2ac   : > { %v2150_v41 = vadd.f32 %v2149_v63, %v8195_v12  ;;  %v2439_v63 = vadd.f32 %v2438_v35, %v2296_v48  ;;  %v2302_v35 = vmul.f32 %v8194_v37, %v8194_v37  ;;  %v8206_v37 = vld [vmem:[#allocation179_spill] sm:$0xff] }
 0x2ae   : > { %v2151_v42 = vadd.f32 %v2150_v41, %v8196_v33  ;;  %v2440_v41 = vadd.f32 %v2439_v63, %v2297_v1  ;;  %v2303_v63 = vmul.f32 %v8195_v12, %v8195_v12 }
 0x2b0   : > { %v2152_v5 = vadd.f32 %v2151_v42, %v8197_v27  ;;  %v2441_v42 = vadd.f32 %v2440_v41, %v2298_v38  ;;  %v2304_v41 = vmul.f32 %v8196_v33, %v8196_v33  ;;  %v2308_v33 = vmul.f32 %v8200_v2, %v8200_v2 }
 0x2b2   : > { %v2153_v62 = vadd.f32 %v2152_v5, %v8198_v30  ;;  %v2442_v5 = vadd.f32 %v2441_v42, %v2299_v59  ;;  %v2305_v42 = vmul.f32 %v8197_v27, %v8197_v27  ;;  %v2309_v27 = vmul.f32 %v8201_v26, %v8201_v26 }
 0x2b4   : > { %v2154_v10 = vadd.f32 %v2153_v62, %v8199_v52  ;;  %v2443_v62 = vadd.f32 %v2442_v5, %v2300_v21  ;;  %v2306_v5 = vmul.f32 %v8198_v30, %v8198_v30  ;;  %v2310_v30 = vmul.f32 %v8202_v11, %v8202_v11 }
 0x2b6   : > { %v2155_v15 = vadd.f32 %v2154_v10, %v8200_v2  ;;  %v2444_v10 = vadd.f32 %v2443_v62, %v2301_v45  ;;  %v2307_v45 = vmul.f32 %v8199_v52, %v8199_v52  ;;  %v2311_v52 = vmul.f32 %v8203_v19, %v8203_v19 }
 0x2b7   : > { %v2312_v2 = vmul.f32 %v8204_v32, %v8204_v32 }
 0x2b8   : > { %v2156_v24 = vadd.f32 %v2155_v15, %v8201_v26  ;;  %v2445_v15 = vadd.f32 %v2444_v10, %v2302_v35  ;;  %v2313_v26 = vmul.f32 %v8205_v23, %v8205_v23 }
 0x2ba   : > { %v2157_v48 = vadd.f32 %v2156_v24, %v8202_v11  ;;  %v2446_v24 = vadd.f32 %v2445_v15, %v2303_v63  ;;  %v2314_v11 = vmul.f32 %v8206_v37, %v8206_v37 }
 0x2bc   : > { %v2158_v1 = vadd.f32 %v2157_v48, %v8203_v19  ;;  %v2447_v48 = vadd.f32 %v2446_v24, %v2304_v41 }
 0x2be   : > { %v2159_v38 = vadd.f32 %v2158_v1, %v8204_v32  ;;  %v2448_v62 = vadd.f32 %v2447_v48, %v2305_v42 }
 0x2c0   : > { %v2160_v59 = vadd.f32 %v2159_v38, %v8205_v23  ;;  %v2449_v35 = vadd.f32 %v2448_v62, %v2306_v5  ;;  %v2470_v23 = vld [vmem:[#allocation2] sm:$0xff] (!%p4124_p5) }
 0x2c2   : > { %v2161_v21 = vadd.f32 %v2160_v59, %v8206_v37  ;;  %v2450_v63 = vadd.f32 %v2449_v35, %v2307_v45  ;;  %v2018_v59 = vld [vmem:[#allocation4] sm:$0x1]  ;;  %v2542_v37 = vmax.bf16 (!%p4124_p5), %v2470_v23, %v4679_v49 }
 0x2c4   : > { %v2162_v12 = vrot.slane %v2161_v21, 4  ;;  %v2451_v41 = vadd.f32 %v2450_v63, %v2308_v33  ;;  %2614 = vst [vmem:[#allocation2] sm:$0xff] (!%p4124_p5), %v2542_v37  ;;  %v2485_v37 = vld [vmem:[#allocation2 + $0x78] sm:$0xff] (!%p4124_p5) }
 0x2c6   : > { %v2163_v1 = vadd.f32 %v2162_v12, %v2161_v21  ;;  %v2452_v42 = vadd.f32 %v2451_v41, %v2309_v27  ;;  %v2170_v27 = vld [vmem:[#allocation5] sm:$0x1] }
 0x2c8   : > { %v2164_v10 = vrot.slane %v2163_v1, 2  ;;  %v2453_v21 = vadd.f32 %v2452_v42, %v2310_v30  ;;  %v2472_v30 = vld [vmem:[#allocation2 + $0x10] sm:$0xff] (!%p4124_p5)  ;;  %v2475_v42 = vld [vmem:[#allocation2 + $0x28] sm:$0xff] (!%p4124_p5) }
 0x2ca   : > { %v2165_v38 = vadd.f32 %v2164_v10, %v2163_v1  ;;  %v2454_v48 = vadd.f32 %v2453_v21, %v2311_v52  ;;  %v2474_v52 = vld [vmem:[#allocation2 + $0x20] sm:$0xff] (!%p4124_p5)  ;;  %v2547_v21 = vmax.bf16 (!%p4124_p5), %v2475_v42, %v4748_v0 }
 0x2cc   : > { %v2166_v15 = vrot.slane %v2165_v38, 1  ;;  %v2455_v12 = vadd.f32 %v2454_v48, %v2312_v2  ;;  %v2546_v2 = vmax.bf16 (!%p4124_p5), %v2474_v52, %v4759_v8  ;;  %v2478_v48 = vld [vmem:[#allocation2 + $0x40] sm:$0xff] (!%p4124_p5)  ;;  %2619 = vst [vmem:[#allocation2 + $0x28] sm:$0xff] (!%p4124_p5), %v2547_v21 }
 0x2cd   : > { %v2490_v21 = vld [vmem:[#allocation2 + $0xa0] sm:$0xff] (!%p4124_p5) }
 0x2ce   : > { %v2167_v24 = vadd.f32 %v2166_v15, %v2165_v38  ;;  %v2456_v45 = vadd.f32 %v2455_v12, %v2313_v26  ;;  %v2471_v38 = vld [vmem:[#allocation2 + $0x8] sm:$0xff] (!%p4124_p5)  ;;  %v2544_v15 = vmax.bf16 (!%p4124_p5), %v2472_v30, %v4719_v22  ;;  %v2477_v26 = vld [vmem:[#allocation2 + $0x38] sm:$0xff] (!%p4124_p5)  ;;  %2618 = vst [vmem:[#allocation2 + $0x20] sm:$0xff] (!%p4124_p5), %v2546_v2 }
 0x2cf   : > { %v2543_v41 = vmax.bf16 (!%p4124_p5), %v2471_v38, %v4668_v43  ;;  %v2549_v12 = vmax.bf16 (!%p4124_p5), %v2477_v26, %v4788_v28  ;;  %v2489_v2 = vld [vmem:[#allocation2 + $0x98] sm:$0xff] (!%p4124_p5) }
 0x2d0   : > { %v2168_v5 = vadd.f32 %v2167_v24, %v2018_v59  ;;  %v2457_v62 = vadd.f32 %v2456_v45, %v2314_v11  ;;  %v2473_v59 = vld [vmem:[#allocation2 + $0x18] sm:$0xff] (!%p4124_p5)  ;;  %2616 = vst [vmem:[#allocation2 + $0x10] sm:$0xff] (!%p4124_p5), %v2544_v15  ;;  %v2550_v45 = vmax.bf16 (!%p4124_p5), %v2478_v48, %v4839_v20  ;;  %v2487_v15 = vld [vmem:[#allocation2 + $0x88] sm:$0xff] (!%p4124_p5)  ;;  %v2561_v26 = vmax.bf16 (!%p4124_p5), %v2489_v2, %v5028_v46 }
 0x2d1   : > { %v2545_v24 = vmax.bf16 (!%p4124_p5), %v2473_v59, %v4708_v16  ;;  %2615 = vst [vmem:[#allocation2 + $0x8] sm:$0xff] (!%p4124_p5), %v2543_v41  ;;  %2621 = vst [vmem:[#allocation2 + $0x38] sm:$0xff] (!%p4124_p5), %v2549_v12  ;;  %v2486_v41 = vld [vmem:[#allocation2 + $0x80] sm:$0xff] (!%p4124_p5)  ;;  %v2557_v59 = vmax.bf16 (!%p4124_p5), %v2485_v37, %v4948_v17  ;;  %v2559_v42 = vmax.bf16 (!%p4124_p5), %v2487_v15, %v4988_v58  ;;  %v2492_v12 = vld [vmem:[#allocation2 + $0xb0] sm:$0xff] (!%p4124_p5) }
 0x2d2   : > { %2169 = vst [vmem:[#allocation4] sm:$0x1] %v2168_v5  ;;  %v2458_v1 = vrot.slane %v2457_v62, 4  ;;  %v2476_v5 = vld [vmem:[#allocation2 + $0x30] sm:$0xff] (!%p4124_p5)  ;;  %2622 = vst [vmem:[#allocation2 + $0x40] sm:$0xff] (!%p4124_p5), %v2550_v45  ;;  %v2558_v52 = vmax.bf16 (!%p4124_p5), %v2486_v41, %v4999_v55  ;;  %v2562_v48 = vmax.bf16 (!%p4124_p5), %v2490_v21, %v5079_v34  ;;  %v2493_v45 = vld [vmem:[#allocation2 + $0xb8] sm:$0xff] (!%p4124_p5) }
 0x2d3   : > { %v2548_v11 = vmax.bf16 (!%p4124_p5), %v2476_v5, %v4799_v29  ;;  %2617 = vst [vmem:[#allocation2 + $0x18] sm:$0xff] (!%p4124_p5), %v2545_v24  ;;  %v2488_v24 = vld [vmem:[#allocation2 + $0x90] sm:$0xff] (!%p4124_p5)  ;;  %2629 = vst [vmem:[#allocation2 + $0x78] sm:$0xff] (!%p4124_p5), %v2557_v59 }
 0x2d4   : > { %v2459_v19 = vadd.f32 %v2458_v1, %v2457_v62  ;;  %v2479_v62 = vld [vmem:[#allocation2 + $0x48] sm:$0xff] (!%p4124_p5)  ;;  %v2480_v1 = vld [vmem:[#allocation2 + $0x50] sm:$0xff] (!%p4124_p5)  ;;  %v2560_v5 = vmax.bf16 (!%p4124_p5), %v2488_v24, %v5039_v6  ;;  %2630 = vst [vmem:[#allocation2 + $0x80] sm:$0xff] (!%p4124_p5), %v2558_v52  ;;  %2631 = vst [vmem:[#allocation2 + $0x88] sm:$0xff] (!%p4124_p5), %v2559_v42 }
 0x2d5   : > { %2620 = vst [vmem:[#allocation2 + $0x30] sm:$0xff] (!%p4124_p5), %v2548_v11  ;;  %v2491_v11 = vld [vmem:[#allocation2 + $0xa8] sm:$0xff] (!%p4124_p5)  ;;  %2633 = vst [vmem:[#allocation2 + $0x98] sm:$0xff] (!%p4124_p5), %v2561_v26  ;;  %v2500_v59 = vld [vmem:[#allocation2 + $0xf0] sm:$0xff] (!%p4124_p5) }
 0x2d6   : > { %v2460_v33 = vrot.slane %v2459_v19, 2  ;;  %2632 = vst [vmem:[#allocation2 + $0x90] sm:$0xff] (!%p4124_p5), %v2560_v5  ;;  %2634 = vst [vmem:[#allocation2 + $0xa0] sm:$0xff] (!%p4124_p5), %v2562_v48  ;;  %v2501_v52 = vld [vmem:[#allocation2 + $0xf8] sm:$0xff] (!%p4124_p5)  ;;  %v2502_v42 = vld [vmem:[#allocation2 + $0x100] sm:$0xff] (!%p4124_p5)  ;;  %v2572_v24 = vmax.bf16 (!%p4124_p5), %v2500_v59, %v5284_v39 }
 0x2d7   : > { %v2573_v2 = vmax.bf16 (!%p4124_p5), %v2501_v52, %v5273_v7  ;;  %v2574_v21 = vmax.bf16 (!%p4124_p5), %v2502_v42, %v5324_v60  ;;  %v2503_v5 = vld [vmem:[#allocation2 + $0x108] sm:$0xff] (!%p4124_p5)  ;;  %v2504_v26 = vld [vmem:[#allocation2 + $0x110] sm:$0xff] (!%p4124_p5)  ;;  %v2505_v48 = vld [vmem:[#allocation2 + $0x118] sm:$0xff] (!%p4124_p5) }
 0x2d8   : > { %v2461_v35 = vadd.f32 %v2460_v33, %v2459_v19  ;;  %v2481_v19 = vld [vmem:[#allocation2 + $0x58] sm:$0xff] (!%p4124_p5)  ;;  %v2551_v33 = vmax.bf16 (!%p4124_p5), %v2479_v62, %v4828_v14  ;;  %v2563_v62 = vmax.bf16 (!%p4124_p5), %v2491_v11, %v5068_v4  ;;  %v2575_v11 = vmax.bf16 (!%p4124_p5), %v2503_v5, %v5313_v47  ;;  %2644 = vst [vmem:[#allocation2 + $0xf0] sm:$0xff] (!%p4124_p5), %v2572_v24  ;;  %v2512_v42 = vld [vmem:[#allocation2 + $0x150] sm:$0xff] (!%p4124_p5) }
 0x2d9   : > { %2645 = vst [vmem:[#allocation2 + $0xf8] sm:$0xff] (!%p4124_p5), %v2573_v2  ;;  %2646 = vst [vmem:[#allocation2 + $0x100] sm:$0xff] (!%p4124_p5), %v2574_v21  ;;  %v8211_v59 = vld [vmem:[#allocation33_spill] sm:$0xff] (!%p4124_p5)  ;;  %v8212_v21 = vld [vmem:[#allocation44_spill] sm:$0xff] (!%p4124_p5) }
 0x2da   : > { %v2462_v10 = vrot.slane %v2461_v35, 1  ;;  %2469 = sbr.rel (%p4124_p5) target bundleno = 809 (0x329), region = 40  ;;  %2623 = vst [vmem:[#allocation2 + $0x48] sm:$0xff] (!%p4124_p5), %v2551_v33  ;;  %v2494_v33 = vld [vmem:[#allocation2 + $0xc0] sm:$0xff] (!%p4124_p5)  ;;  %2635 = vst [vmem:[#allocation2 + $0xa8] sm:$0xff] (!%p4124_p5), %v2563_v62  ;;  %v2513_v24 = vld [vmem:[#allocation2 + $0x158] sm:$0xff] (!%p4124_p5)  ;;  %v2584_v5 = vmax.bf16 (!%p4124_p5), %v2512_v42, %v8212_v21 }
 0x2db   : > { %v2506_v62 = vld [vmem:[#allocation2 + $0x120] sm:$0xff] (!%p4124_p5)  ;;  %2647 = vst [vmem:[#allocation2 + $0x108] sm:$0xff] (!%p4124_p5), %v2575_v11  ;;  %v2523_v21 = vld [vmem:[#allocation2 + $0x1a8] sm:$0xff] (!%p4124_p5) }
 0x2dc   : > { %v2463_v32 = vadd.f32 %v2462_v10, %v2461_v35  ;;  %v2552_v35 = vmax.bf16 (!%p4124_p5), %v2480_v1, %v4879_v9  ;;  %v2553_v10 = vmax.bf16 (!%p4124_p5), %v2481_v19, %v4868_v25  ;;  %v2564_v1 = vmax.bf16 (!%p4124_p5), %v2492_v12, %v5119_v40  ;;  %v2514_v2 = vld [vmem:[#allocation2 + $0x160] sm:$0xff] (!%p4124_p5)  ;;  %2656 = vst [vmem:[#allocation2 + $0x150] sm:$0xff] (!%p4124_p5), %v2584_v5 }
 0x2dd   : > { %v2565_v19 = vmax.bf16 (!%p4124_p5), %v2493_v45, %v5108_v61  ;;  %v2576_v12 = vmax.bf16 (!%p4124_p5), %v2504_v26, %v5363_v18  ;;  %v2577_v45 = vmax.bf16 (!%p4124_p5), %v2505_v48, %v5353_v57  ;;  %v8213_v26 = vld [vmem:[#allocation43_spill] sm:$0xff] (!%p4124_p5)  ;;  %v8218_v42 = vld [vmem:[#allocation74_spill] sm:$0xff] (!%p4124_p5) }
 0x2de   : > { %v2464_v63 = vadd.f32 %v2463_v32, %v2170_v27  ;;  %v2482_v27 = vld [vmem:[#allocation2 + $0x60] sm:$0xff] (!%p4124_p5)  ;;  %v2483_v32 = vld [vmem:[#allocation2 + $0x68] sm:$0xff] (!%p4124_p5)  ;;  %2624 = vst [vmem:[#allocation2 + $0x50] sm:$0xff] (!%p4124_p5), %v2552_v35  ;;  %2625 = vst [vmem:[#allocation2 + $0x58] sm:$0xff] (!%p4124_p5), %v2553_v10  ;;  %v2585_v48 = vmax.bf16 (!%p4124_p5), %v2513_v24, %v8213_v26 }
 0x2df   : > { %v2554_v23 = vmax.bf16 (!%p4124_p5), %v2482_v27, %v4919_v44  ;;  %v2555_v38 = vmax.bf16 (!%p4124_p5), %v2483_v32, %v4908_v3  ;;  %v2495_v35 = vld [vmem:[#allocation2 + $0xc8] sm:$0xff] (!%p4124_p5)  ;;  %v2496_v10 = vld [vmem:[#allocation2 + $0xd0] sm:$0xff] (!%p4124_p5)  ;;  %v2566_v27 = vmax.bf16 (!%p4124_p5), %v2494_v33, %v5159_v50  ;;  %2636 = vst [vmem:[#allocation2 + $0xb0] sm:$0xff] (!%p4124_p5), %v2564_v1  ;;  %2637 = vst [vmem:[#allocation2 + $0xb8] sm:$0xff] (!%p4124_p5), %v2565_v19 }
 0x2e0   : > { %2465 = vst [vmem:[#allocation5] sm:$0x1] %v2464_v63  ;;  %v2484_v63 = vld [vmem:[#allocation2 + $0x70] sm:$0xff] (!%p4124_p5)  ;;  %v2567_v32 = vmax.bf16 (!%p4124_p5), %v2495_v35, %v5148_v13  ;;  %v2507_v1 = vld [vmem:[#allocation2 + $0x128] sm:$0xff] (!%p4124_p5)  ;;  %v2578_v33 = vmax.bf16 (!%p4124_p5), %v2506_v62, %v4685_v54  ;;  %2648 = vst [vmem:[#allocation2 + $0x110] sm:$0xff] (!%p4124_p5), %v2576_v12 }
 0x2e1   : > { %v2556_v30 = vmax.bf16 %v2484_v63, %v4959_v51  ;;  %2626 = vst [vmem:[#allocation2 + $0x60] sm:$0xff] %v2554_v23  ;;  %2627 = vst [vmem:[#allocation2 + $0x68] sm:$0xff] %v2555_v38  ;;  %v2568_v63 = vmax.bf16 %v2496_v10, %v5199_v36  ;;  %v2497_v23 = vld [vmem:[#allocation2 + $0xd8] sm:$0xff]  ;;  %v2498_v38 = vld [vmem:[#allocation2 + $0xe0] sm:$0xff] }
 0x2e2   : > { %v2569_v37 = vmax.bf16 %v2497_v23, %v5188_v53  ;;  %v2570_v41 = vmax.bf16 %v2498_v38, %v5244_v31  ;;  %2638 = vst [vmem:[#allocation2 + $0xc0] sm:$0xff] %v2566_v27  ;;  %2639 = vst [vmem:[#allocation2 + $0xc8] sm:$0xff] %v2567_v32  ;;  %v2508_v19 = vld [vmem:[#allocation2 + $0x130] sm:$0xff]  ;;  %v8207_v35 = vld [vmem:[#allocation14_spill] sm:$0xff] }
 0x2e3   : > { %2628 = vst [vmem:[#allocation2 + $0x70] sm:$0xff] %v2556_v30  ;;  %v2499_v30 = vld [vmem:[#allocation2 + $0xe8] sm:$0xff]  ;;  %2640 = vst [vmem:[#allocation2 + $0xd0] sm:$0xff] %v2568_v63  ;;  %v2579_v10 = vmax.bf16 %v2507_v1, %v8207_v35  ;;  %v8208_v27 = vld [vmem:[#allocation24_spill] sm:$0xff] }
 0x2e4   : > { %v2571_v15 = vmax.bf16 %v2499_v30, %v5233_v56  ;;  %2641 = vst [vmem:[#allocation2 + $0xd8] sm:$0xff] %v2569_v37  ;;  %2642 = vst [vmem:[#allocation2 + $0xe0] sm:$0xff] %v2570_v41  ;;  %v2580_v32 = vmax.bf16 %v2508_v19, %v8208_v27  ;;  %v2509_v63 = vld [vmem:[#allocation2 + $0x138] sm:$0xff]  ;;  %v2510_v23 = vld [vmem:[#allocation2 + $0x140] sm:$0xff] }
 0x2e5   : > { %v2511_v38 = vld [vmem:[#allocation2 + $0x148] sm:$0xff]  ;;  %2649 = vst [vmem:[#allocation2 + $0x118] sm:$0xff] %v2577_v45  ;;  %2650 = vst [vmem:[#allocation2 + $0x120] sm:$0xff] %v2578_v33  ;;  %v2516_v45 = vld [vmem:[#allocation2 + $0x170] sm:$0xff] }
 0x2e6   : > { %2643 = vst [vmem:[#allocation2 + $0xe8] sm:$0xff] %v2571_v15  ;;  %v8209_v30 = vld [vmem:[#allocation23_spill] sm:$0xff]  ;;  %v8210_v41 = vld [vmem:[#allocation34_spill] sm:$0xff]  ;;  %v2583_v52 = vmax.bf16 %v2511_v38, %v8211_v59  ;;  %2651 = vst [vmem:[#allocation2 + $0x128] sm:$0xff] %v2579_v10 }
 0x2e7   : > { %v2581_v37 = vmax.bf16 %v2509_v63, %v8209_v30  ;;  %v2582_v15 = vmax.bf16 %v2510_v23, %v8210_v41  ;;  %2652 = vst [vmem:[#allocation2 + $0x130] sm:$0xff] %v2580_v32  ;;  %v8214_v62 = vld [vmem:[#allocation54_spill] sm:$0xff]  ;;  %v2517_v1 = vld [vmem:[#allocation2 + $0x178] sm:$0xff]  ;;  %v8217_v59 = vld [vmem:[#allocation63_spill] sm:$0xff] }
 0x2e8   : > { %v2586_v11 = vmax.bf16 %v2514_v2, %v8214_v62  ;;  %v2515_v12 = vld [vmem:[#allocation2 + $0x168] sm:$0xff]  ;;  %2655 = vst [vmem:[#allocation2 + $0x148] sm:$0xff] %v2583_v52  ;;  %v8215_v19 = vld [vmem:[#allocation53_spill] sm:$0xff]  ;;  %v8216_v23 = vld [vmem:[#allocation64_spill] sm:$0xff]  ;;  %v2589_v33 = vmax.bf16 %v2517_v1, %v8217_v59 }
 0x2e9   : > { %2653 = vst [vmem:[#allocation2 + $0x138] sm:$0xff] %v2581_v37  ;;  %2654 = vst [vmem:[#allocation2 + $0x140] sm:$0xff] %v2582_v15  ;;  %v2587_v63 = vmax.bf16 %v2515_v12, %v8215_v19  ;;  %v2588_v38 = vmax.bf16 %v2516_v45, %v8216_v23  ;;  %v2518_v10 = vld [vmem:[#allocation2 + $0x180] sm:$0xff]  ;;  %v2519_v32 = vld [vmem:[#allocation2 + $0x188] sm:$0xff] }
 0x2ea   : > { %v2520_v41 = vld [vmem:[#allocation2 + $0x190] sm:$0xff]  ;;  %2657 = vst [vmem:[#allocation2 + $0x158] sm:$0xff] %v2585_v48  ;;  %2658 = vst [vmem:[#allocation2 + $0x160] sm:$0xff] %v2586_v11  ;;  %v2590_v24 = vmax.bf16 %v2518_v10, %v8218_v42  ;;  %v8219_v2 = vld [vmem:[#allocation73_spill] sm:$0xff] }
 0x2eb   : > { %v2591_v62 = vmax.bf16 %v2519_v32, %v8219_v2  ;;  %v8220_v26 = vld [vmem:[#allocation84_spill] sm:$0xff]  ;;  %v2522_v52 = vld [vmem:[#allocation2 + $0x1a0] sm:$0xff]  ;;  %2659 = vst [vmem:[#allocation2 + $0x168] sm:$0xff] %v2587_v63  ;;  %2660 = vst [vmem:[#allocation2 + $0x170] sm:$0xff] %v2588_v38 }
 0x2ec   : > { %v2592_v37 = vmax.bf16 %v2520_v41, %v8220_v26  ;;  %v2521_v15 = vld [vmem:[#allocation2 + $0x198] sm:$0xff]  ;;  %2661 = vst [vmem:[#allocation2 + $0x178] sm:$0xff] %v2589_v33  ;;  %v8221_v12 = vld [vmem:[#allocation83_spill] sm:$0xff]  ;;  %v8222_v1 = vld [vmem:[#allocation94_spill] sm:$0xff] }
 0x2ed   : > { %v2593_v45 = vmax.bf16 %v2521_v15, %v8221_v12  ;;  %v2594_v59 = vmax.bf16 %v2522_v52, %v8222_v1  ;;  %v8223_v23 = vld [vmem:[#allocation93_spill] sm:$0xff]  ;;  %v2524_v48 = vld [vmem:[#allocation2 + $0x1b0] sm:$0xff]  ;;  %2662 = vst [vmem:[#allocation2 + $0x180] sm:$0xff] %v2590_v24  ;;  %2663 = vst [vmem:[#allocation2 + $0x188] sm:$0xff] %v2591_v62 }
 0x2ee   : > { %v2595_v5 = vmax.bf16 %v2523_v21, %v8223_v23  ;;  %v2525_v11 = vld [vmem:[#allocation2 + $0x1b8] sm:$0xff]  ;;  %v2526_v19 = vld [vmem:[#allocation2 + $0x1c0] sm:$0xff]  ;;  %2664 = vst [vmem:[#allocation2 + $0x190] sm:$0xff] %v2592_v37  ;;  %v8225_v32 = vld [vmem:[#allocation103_spill] sm:$0xff] }
 0x2ef   : > { %v8224_v10 = vld [vmem:[#allocation104_spill] sm:$0xff]  ;;  %v2597_v26 = vmax.bf16 %v2525_v11, %v8225_v32  ;;  %v8226_v2 = vld [vmem:[#allocation114_spill] sm:$0xff]  ;;  %2665 = vst [vmem:[#allocation2 + $0x198] sm:$0xff] %v2593_v45  ;;  %2666 = vst [vmem:[#allocation2 + $0x1a0] sm:$0xff] %v2594_v59 }
 0x2f0   : > { %v2596_v41 = vmax.bf16 %v2524_v48, %v8224_v10  ;;  %v2598_v63 = vmax.bf16 %v2526_v19, %v8226_v2  ;;  %v2527_v38 = vld [vmem:[#allocation2 + $0x1c8] sm:$0xff]  ;;  %v2528_v33 = vld [vmem:[#allocation2 + $0x1d0] sm:$0xff]  ;;  %v2529_v42 = vld [vmem:[#allocation2 + $0x1d8] sm:$0xff]  ;;  %2667 = vst [vmem:[#allocation2 + $0x1a8] sm:$0xff] %v2595_v5 }
 0x2f1   : > { %v8227_v15 = vld [vmem:[#allocation113_spill] sm:$0xff]  ;;  %v8228_v52 = vld [vmem:[#allocation124_spill] sm:$0xff]  ;;  %v8229_v1 = vld [vmem:[#allocation123_spill] sm:$0xff]  ;;  %2669 = vst [vmem:[#allocation2 + $0x1b8] sm:$0xff] %v2597_v26 }
 0x2f2   : > { %v2599_v21 = vmax.bf16 %v2527_v38, %v8227_v15  ;;  %v2600_v23 = vmax.bf16 %v2528_v33, %v8228_v52  ;;  %v2601_v24 = vmax.bf16 %v2529_v42, %v8229_v1  ;;  %v2530_v62 = vld [vmem:[#allocation2 + $0x1e0] sm:$0xff]  ;;  %v2531_v37 = vld [vmem:[#allocation2 + $0x1e8] sm:$0xff]  ;;  %v2532_v12 = vld [vmem:[#allocation2 + $0x1f0] sm:$0xff]  ;;  %2668 = vst [vmem:[#allocation2 + $0x1b0] sm:$0xff] %v2596_v41 }
 0x2f3   : > { %2670 = vst [vmem:[#allocation2 + $0x1c0] sm:$0xff] %v2598_v63  ;;  %v8230_v48 = vld [vmem:[#allocation134_spill] sm:$0xff]  ;;  %v8231_v11 = vld [vmem:[#allocation133_spill] sm:$0xff]  ;;  %v8232_v32 = vld [vmem:[#allocation144_spill] sm:$0xff] }
 0x2f4   : > { %v2602_v19 = vmax.bf16 %v2530_v62, %v8230_v48  ;;  %v2603_v2 = vmax.bf16 %v2531_v37, %v8231_v11  ;;  %v2604_v45 = vmax.bf16 %v2532_v12, %v8232_v32  ;;  %v2533_v59 = vld [vmem:[#allocation2 + $0x1f8] sm:$0xff]  ;;  %v2534_v5 = vld [vmem:[#allocation2 + $0x200] sm:$0xff]  ;;  %v2535_v10 = vld [vmem:[#allocation2 + $0x208] sm:$0xff]  ;;  %2671 = vst [vmem:[#allocation2 + $0x1c8] sm:$0xff] %v2599_v21 }
 0x2f5   : > { %2672 = vst [vmem:[#allocation2 + $0x1d0] sm:$0xff] %v2600_v23  ;;  %2673 = vst [vmem:[#allocation2 + $0x1d8] sm:$0xff] %v2601_v24  ;;  %v8233_v38 = vld [vmem:[#allocation143_spill] sm:$0xff]  ;;  %v8234_v33 = vld [vmem:[#allocation154_spill] sm:$0xff] }
 0x2f6   : > { %v2605_v42 = vmax.bf16 %v2533_v59, %v8233_v38  ;;  %v2606_v1 = vmax.bf16 %v2534_v5, %v8234_v33  ;;  %v8235_v52 = vld [vmem:[#allocation153_spill] sm:$0xff]  ;;  %v2536_v26 = vld [vmem:[#allocation2 + $0x210] sm:$0xff]  ;;  %2674 = vst [vmem:[#allocation2 + $0x1e0] sm:$0xff] %v2602_v19  ;;  %2675 = vst [vmem:[#allocation2 + $0x1e8] sm:$0xff] %v2603_v2 }
 0x2f7   : > { %v2607_v41 = vmax.bf16 %v2535_v10, %v8235_v52  ;;  %v2537_v63 = vld [vmem:[#allocation2 + $0x218] sm:$0xff]  ;;  %v2538_v15 = vld [vmem:[#allocation2 + $0x220] sm:$0xff]  ;;  %2676 = vst [vmem:[#allocation2 + $0x1f0] sm:$0xff] %v2604_v45  ;;  %v8237_v37 = vld [vmem:[#allocation163_spill] sm:$0xff] }
 0x2f8   : > { %v8236_v62 = vld [vmem:[#allocation164_spill] sm:$0xff]  ;;  %v2609_v32 = vmax.bf16 %v2537_v63, %v8237_v37  ;;  %v8238_v11 = vld [vmem:[#allocation174_spill] sm:$0xff]  ;;  %2677 = vst [vmem:[#allocation2 + $0x1f8] sm:$0xff] %v2605_v42  ;;  %2678 = vst [vmem:[#allocation2 + $0x200] sm:$0xff] %v2606_v1 }
 0x2f9   : > { %v2608_v12 = vmax.bf16 %v2536_v26, %v8236_v62  ;;  %v2610_v21 = vmax.bf16 %v2538_v15, %v8238_v11  ;;  %v2539_v23 = vld [vmem:[#allocation2 + $0x228] sm:$0xff]  ;;  %v2540_v24 = vld [vmem:[#allocation2 + $0x230] sm:$0xff]  ;;  %v2541_v48 = vld [vmem:[#allocation2 + $0x238] sm:$0xff]  ;;  %2679 = vst [vmem:[#allocation2 + $0x208] sm:$0xff] %v2607_v41 }
 0x2fa   : > { %v8239_v59 = vld [vmem:[#allocation173_spill] sm:$0xff]  ;;  %v8240_v5 = vld [vmem:[#allocation184_spill] sm:$0xff]  ;;  %v8241_v33 = vld [vmem:[#allocation183_spill] sm:$0xff]  ;;  %2681 = vst [vmem:[#allocation2 + $0x218] sm:$0xff] %v2609_v32 }
 0x2fb   : > { %v2611_v10 = vmax.bf16 %v2539_v23, %v8239_v59  ;;  %v2612_v52 = vmax.bf16 %v2540_v24, %v8240_v5  ;;  %v2613_v19 = vmax.bf16 %v2541_v48, %v8241_v33  ;;  %v2686_v2 = vld [vmem:[#allocation3] sm:$0xff]  ;;  %v2687_v45 = vld [vmem:[#allocation3 + $0x8] sm:$0xff]  ;;  %v2688_v38 = vld [vmem:[#allocation3 + $0x10] sm:$0xff]  ;;  %2680 = vst [vmem:[#allocation2 + $0x210] sm:$0xff] %v2608_v12 }
 0x2fc   : > { %2682 = vst [vmem:[#allocation2 + $0x220] sm:$0xff] %v2610_v21  ;;  %v2758_v15 = vmin.bf16 %v2686_v2, %v4679_v49  ;;  %v2759_v26 = vmin.bf16 %v2687_v45, %v4668_v43  ;;  %v2760_v42 = vmin.bf16 %v2688_v38, %v4719_v22  ;;  %v2689_v1 = vld [vmem:[#allocation3 + $0x18] sm:$0xff]  ;;  %v2690_v41 = vld [vmem:[#allocation3 + $0x20] sm:$0xff]  ;;  %v2691_v63 = vld [vmem:[#allocation3 + $0x28] sm:$0xff] }
 0x2fd   : > { %2683 = vst [vmem:[#allocation2 + $0x228] sm:$0xff] %v2611_v10  ;;  %2684 = vst [vmem:[#allocation2 + $0x230] sm:$0xff] %v2612_v52  ;;  %v2761_v48 = vmin.bf16 %v2689_v1, %v4708_v16  ;;  %v2762_v23 = vmin.bf16 %v2690_v41, %v4759_v8  ;;  %v2763_v12 = vmin.bf16 %v2691_v63, %v4748_v0  ;;  %v2692_v32 = vld [vmem:[#allocation3 + $0x30] sm:$0xff]  ;;  %v2693_v21 = vld [vmem:[#allocation3 + $0x38] sm:$0xff] }
 0x2fe   : > { %2685 = vst [vmem:[#allocation2 + $0x238] sm:$0xff] %v2613_v19  ;;  %v2694_v24 = vld [vmem:[#allocation3 + $0x40] sm:$0xff]  ;;  %2830 = vst [vmem:[#allocation3] sm:$0xff] %v2758_v15  ;;  %v2764_v43 = vmin.bf16 %v2692_v32, %v4799_v29  ;;  %v2765_v49 = vmin.bf16 %v2693_v21, %v4788_v28  ;;  %v2695_v52 = vld [vmem:[#allocation3 + $0x48] sm:$0xff] }
 0x2ff   : > { %2831 = vst [vmem:[#allocation3 + $0x8] sm:$0xff] %v2759_v26  ;;  %2832 = vst [vmem:[#allocation3 + $0x10] sm:$0xff] %v2760_v42  ;;  %v2766_v22 = vmin.bf16 %v2694_v24, %v4839_v20  ;;  %v2696_v38 = vld [vmem:[#allocation3 + $0x50] sm:$0xff]  ;;  %v2697_v10 = vld [vmem:[#allocation3 + $0x58] sm:$0xff]  ;;  %v2767_v16 = vmin.bf16 %v2695_v52, %v4828_v14 }
 0x300   : > { %2833 = vst [vmem:[#allocation3 + $0x18] sm:$0xff] %v2761_v48  ;;  %2834 = vst [vmem:[#allocation3 + $0x20] sm:$0xff] %v2762_v23  ;;  %v2768_v0 = vmin.bf16 %v2696_v38, %v4879_v9  ;;  %v2769_v8 = vmin.bf16 %v2697_v10, %v4868_v25  ;;  %v2698_v19 = vld [vmem:[#allocation3 + $0x60] sm:$0xff]  ;;  %v2699_v2 = vld [vmem:[#allocation3 + $0x68] sm:$0xff] }
 0x301   : > { %2835 = vst [vmem:[#allocation3 + $0x28] sm:$0xff] %v2763_v12  ;;  %v2700_v45 = vld [vmem:[#allocation3 + $0x70] sm:$0xff]  ;;  %2836 = vst [vmem:[#allocation3 + $0x30] sm:$0xff] %v2764_v43  ;;  %v2770_v28 = vmin.bf16 %v2698_v19, %v4919_v44  ;;  %v2771_v29 = vmin.bf16 %v2699_v2, %v4908_v3  ;;  %v2701_v15 = vld [vmem:[#allocation3 + $0x78] sm:$0xff] }
 0x302   : > { %2837 = vst [vmem:[#allocation3 + $0x38] sm:$0xff] %v2765_v49  ;;  %2838 = vst [vmem:[#allocation3 + $0x40] sm:$0xff] %v2766_v22  ;;  %v2772_v20 = vmin.bf16 %v2700_v45, %v4959_v51  ;;  %v2702_v26 = vld [vmem:[#allocation3 + $0x80] sm:$0xff]  ;;  %v2703_v42 = vld [vmem:[#allocation3 + $0x88] sm:$0xff]  ;;  %v2773_v14 = vmin.bf16 %v2701_v15, %v4948_v17 }
 0x303   : > { %2839 = vst [vmem:[#allocation3 + $0x48] sm:$0xff] %v2767_v16  ;;  %2840 = vst [vmem:[#allocation3 + $0x50] sm:$0xff] %v2768_v0  ;;  %v2774_v25 = vmin.bf16 %v2702_v26, %v4999_v55  ;;  %v2775_v9 = vmin.bf16 %v2703_v42, %v4988_v58  ;;  %v2704_v1 = vld [vmem:[#allocation3 + $0x90] sm:$0xff]  ;;  %v2705_v41 = vld [vmem:[#allocation3 + $0x98] sm:$0xff] }
 0x304   : > { %2841 = vst [vmem:[#allocation3 + $0x58] sm:$0xff] %v2769_v8  ;;  %v2706_v63 = vld [vmem:[#allocation3 + $0xa0] sm:$0xff]  ;;  %2842 = vst [vmem:[#allocation3 + $0x60] sm:$0xff] %v2770_v28  ;;  %v2776_v3 = vmin.bf16 %v2704_v1, %v5039_v6  ;;  %v2777_v44 = vmin.bf16 %v2705_v41, %v5028_v46  ;;  %v2707_v48 = vld [vmem:[#allocation3 + $0xa8] sm:$0xff] }
 0x305   : > { %2843 = vst [vmem:[#allocation3 + $0x68] sm:$0xff] %v2771_v29  ;;  %2844 = vst [vmem:[#allocation3 + $0x70] sm:$0xff] %v2772_v20  ;;  %v2778_v51 = vmin.bf16 %v2706_v63, %v5079_v34  ;;  %v2708_v23 = vld [vmem:[#allocation3 + $0xb0] sm:$0xff]  ;;  %v2709_v12 = vld [vmem:[#allocation3 + $0xb8] sm:$0xff]  ;;  %v2779_v17 = vmin.bf16 %v2707_v48, %v5068_v4 }
 0x306   : > { %2845 = vst [vmem:[#allocation3 + $0x78] sm:$0xff] %v2773_v14  ;;  %2846 = vst [vmem:[#allocation3 + $0x80] sm:$0xff] %v2774_v25  ;;  %v2780_v58 = vmin.bf16 %v2708_v23, %v5119_v40  ;;  %v2781_v55 = vmin.bf16 %v2709_v12, %v5108_v61  ;;  %v2710_v32 = vld [vmem:[#allocation3 + $0xc0] sm:$0xff]  ;;  %v2711_v21 = vld [vmem:[#allocation3 + $0xc8] sm:$0xff] }
 0x307   : > { %2847 = vst [vmem:[#allocation3 + $0x88] sm:$0xff] %v2775_v9  ;;  %v2712_v24 = vld [vmem:[#allocation3 + $0xd0] sm:$0xff]  ;;  %2848 = vst [vmem:[#allocation3 + $0x90] sm:$0xff] %v2776_v3  ;;  %v2782_v46 = vmin.bf16 %v2710_v32, %v5159_v50  ;;  %v2783_v6 = vmin.bf16 %v2711_v21, %v5148_v13  ;;  %v2713_v43 = vld [vmem:[#allocation3 + $0xd8] sm:$0xff] }
 0x308   : > { %2849 = vst [vmem:[#allocation3 + $0x98] sm:$0xff] %v2777_v44  ;;  %2850 = vst [vmem:[#allocation3 + $0xa0] sm:$0xff] %v2778_v51  ;;  %v2784_v34 = vmin.bf16 %v2712_v24, %v5199_v36  ;;  %v2714_v49 = vld [vmem:[#allocation3 + $0xe0] sm:$0xff]  ;;  %v2715_v22 = vld [vmem:[#allocation3 + $0xe8] sm:$0xff]  ;;  %v2785_v4 = vmin.bf16 %v2713_v43, %v5188_v53 }
 0x309   : > { %2851 = vst [vmem:[#allocation3 + $0xa8] sm:$0xff] %v2779_v17  ;;  %2852 = vst [vmem:[#allocation3 + $0xb0] sm:$0xff] %v2780_v58  ;;  %v2786_v61 = vmin.bf16 %v2714_v49, %v5244_v31  ;;  %v2787_v40 = vmin.bf16 %v2715_v22, %v5233_v56  ;;  %v2716_v52 = vld [vmem:[#allocation3 + $0xf0] sm:$0xff]  ;;  %v2717_v38 = vld [vmem:[#allocation3 + $0xf8] sm:$0xff] }
 0x30a   : > { %2853 = vst [vmem:[#allocation3 + $0xb8] sm:$0xff] %v2781_v55  ;;  %v2718_v10 = vld [vmem:[#allocation3 + $0x100] sm:$0xff]  ;;  %2854 = vst [vmem:[#allocation3 + $0xc0] sm:$0xff] %v2782_v46  ;;  %v2788_v13 = vmin.bf16 %v2716_v52, %v5284_v39  ;;  %v2789_v50 = vmin.bf16 %v2717_v38, %v5273_v7  ;;  %v2719_v16 = vld [vmem:[#allocation3 + $0x108] sm:$0xff] }
 0x30b   : > { %2855 = vst [vmem:[#allocation3 + $0xc8] sm:$0xff] %v2783_v6  ;;  %2856 = vst [vmem:[#allocation3 + $0xd0] sm:$0xff] %v2784_v34  ;;  %v2790_v36 = vmin.bf16 %v2718_v10, %v5324_v60  ;;  %v2720_v0 = vld [vmem:[#allocation3 + $0x110] sm:$0xff]  ;;  %v2721_v8 = vld [vmem:[#allocation3 + $0x118] sm:$0xff]  ;;  %v2791_v53 = vmin.bf16 %v2719_v16, %v5313_v47 }
 0x30c   : > { %2857 = vst [vmem:[#allocation3 + $0xd8] sm:$0xff] %v2785_v4  ;;  %2858 = vst [vmem:[#allocation3 + $0xe0] sm:$0xff] %v2786_v61  ;;  %v2792_v56 = vmin.bf16 %v2720_v0, %v5363_v18  ;;  %v2793_v31 = vmin.bf16 %v2721_v8, %v5353_v57  ;;  %v2722_v19 = vld [vmem:[#allocation3 + $0x120] sm:$0xff]  ;;  %v2723_v2 = vld [vmem:[#allocation3 + $0x128] sm:$0xff] }
 0x30d   : > { %2859 = vst [vmem:[#allocation3 + $0xe8] sm:$0xff] %v2787_v40  ;;  %v2724_v45 = vld [vmem:[#allocation3 + $0x130] sm:$0xff]  ;;  %2860 = vst [vmem:[#allocation3 + $0xf0] sm:$0xff] %v2788_v13  ;;  %v2794_v7 = vmin.bf16 %v2722_v19, %v4685_v54  ;;  %v2795_v39 = vmin.bf16 %v2723_v2, %v8207_v35  ;;  %v2725_v28 = vld [vmem:[#allocation3 + $0x138] sm:$0xff] }
 0x30e   : > { %2861 = vst [vmem:[#allocation3 + $0xf8] sm:$0xff] %v2789_v50  ;;  %2862 = vst [vmem:[#allocation3 + $0x100] sm:$0xff] %v2790_v36  ;;  %v2796_v60 = vmin.bf16 %v2724_v45, %v8208_v27  ;;  %v2726_v29 = vld [vmem:[#allocation3 + $0x140] sm:$0xff]  ;;  %v2727_v20 = vld [vmem:[#allocation3 + $0x148] sm:$0xff]  ;;  %v2797_v47 = vmin.bf16 %v2725_v28, %v8209_v30 }
 0x30f   : > { %2863 = vst [vmem:[#allocation3 + $0x108] sm:$0xff] %v2791_v53  ;;  %2864 = vst [vmem:[#allocation3 + $0x110] sm:$0xff] %v2792_v56  ;;  %v8242_v57 = vld [vmem:[#allocation34_spill] sm:$0xff]  ;;  %v8243_v15 = vld [vmem:[#allocation33_spill] sm:$0xff] }
 0x310   : > { %2865 = vst [vmem:[#allocation3 + $0x118] sm:$0xff] %v2793_v31  ;;  %v2798_v18 = vmin.bf16 %v2726_v29, %v8242_v57  ;;  %v2799_v26 = vmin.bf16 %v2727_v20, %v8243_v15  ;;  %v2728_v42 = vld [vmem:[#allocation3 + $0x150] sm:$0xff]  ;;  %v2729_v14 = vld [vmem:[#allocation3 + $0x158] sm:$0xff]  ;;  %v2730_v25 = vld [vmem:[#allocation3 + $0x160] sm:$0xff] }
 0x311   : > { %2866 = vst [vmem:[#allocation3 + $0x120] sm:$0xff] %v2794_v7  ;;  %2867 = vst [vmem:[#allocation3 + $0x128] sm:$0xff] %v2795_v39  ;;  %v8244_v54 = vld [vmem:[#allocation44_spill] sm:$0xff]  ;;  %v8245_v27 = vld [vmem:[#allocation43_spill] sm:$0xff] }
 0x312   : > { %2868 = vst [vmem:[#allocation3 + $0x130] sm:$0xff] %v2796_v60  ;;  %v2800_v35 = vmin.bf16 %v2728_v42, %v8244_v54  ;;  %v2801_v9 = vmin.bf16 %v2729_v14, %v8245_v27  ;;  %v8246_v1 = vld [vmem:[#allocation54_spill] sm:$0xff]  ;;  %v2732_v3 = vld [vmem:[#allocation3 + $0x170] sm:$0xff]  ;;  %v2733_v44 = vld [vmem:[#allocation3 + $0x178] sm:$0xff] }
 0x313   : > { %v2802_v41 = vmin.bf16 %v2730_v25, %v8246_v1  ;;  %v2731_v63 = vld [vmem:[#allocation3 + $0x168] sm:$0xff]  ;;  %2869 = vst [vmem:[#allocation3 + $0x138] sm:$0xff] %v2797_v47  ;;  %2870 = vst [vmem:[#allocation3 + $0x140] sm:$0xff] %v2798_v18  ;;  %v8247_v30 = vld [vmem:[#allocation53_spill] sm:$0xff] }
 0x314   : > { %2871 = vst [vmem:[#allocation3 + $0x148] sm:$0xff] %v2799_v26  ;;  %v2803_v51 = vmin.bf16 %v2731_v63, %v8247_v30  ;;  %v8248_v48 = vld [vmem:[#allocation64_spill] sm:$0xff]  ;;  %v8249_v12 = vld [vmem:[#allocation63_spill] sm:$0xff]  ;;  %v2734_v58 = vld [vmem:[#allocation3 + $0x180] sm:$0xff] }
 0x315   : > { %v2804_v23 = vmin.bf16 %v2732_v3, %v8248_v48  ;;  %v2805_v17 = vmin.bf16 %v2733_v44, %v8249_v12  ;;  %v2735_v55 = vld [vmem:[#allocation3 + $0x188] sm:$0xff]  ;;  %v2736_v32 = vld [vmem:[#allocation3 + $0x190] sm:$0xff]  ;;  %2872 = vst [vmem:[#allocation3 + $0x150] sm:$0xff] %v2800_v35  ;;  %2873 = vst [vmem:[#allocation3 + $0x158] sm:$0xff] %v2801_v9 }
 0x316   : > { %2874 = vst [vmem:[#allocation3 + $0x160] sm:$0xff] %v2802_v41  ;;  %v8250_v21 = vld [vmem:[#allocation74_spill] sm:$0xff]  ;;  %v8251_v46 = vld [vmem:[#allocation73_spill] sm:$0xff]  ;;  %v8252_v34 = vld [vmem:[#allocation84_spill] sm:$0xff] }
 0x317   : > { %v2806_v24 = vmin.bf16 %v2734_v58, %v8250_v21  ;;  %v2807_v6 = vmin.bf16 %v2735_v55, %v8251_v46  ;;  %v2808_v43 = vmin.bf16 %v2736_v32, %v8252_v34  ;;  %v2737_v49 = vld [vmem:[#allocation3 + $0x198] sm:$0xff]  ;;  %v2738_v22 = vld [vmem:[#allocation3 + $0x1a0] sm:$0xff]  ;;  %v2739_v4 = vld [vmem:[#allocation3 + $0x1a8] sm:$0xff]  ;;  %2875 = vst [vmem:[#allocation3 + $0x168] sm:$0xff] %v2803_v51 }
 0x318   : > { %2876 = vst [vmem:[#allocation3 + $0x170] sm:$0xff] %v2804_v23  ;;  %2877 = vst [vmem:[#allocation3 + $0x178] sm:$0xff] %v2805_v17  ;;  %v8253_v61 = vld [vmem:[#allocation83_spill] sm:$0xff]  ;;  %v8254_v52 = vld [vmem:[#allocation94_spill] sm:$0xff] }
 0x319   : > { %v2809_v40 = vmin.bf16 %v2737_v49, %v8253_v61  ;;  %v2810_v38 = vmin.bf16 %v2738_v22, %v8254_v52  ;;  %v8255_v10 = vld [vmem:[#allocation93_spill] sm:$0xff]  ;;  %v2740_v50 = vld [vmem:[#allocation3 + $0x1b0] sm:$0xff]  ;;  %2878 = vst [vmem:[#allocation3 + $0x180] sm:$0xff] %v2806_v24  ;;  %2879 = vst [vmem:[#allocation3 + $0x188] sm:$0xff] %v2807_v6 }
 0x31a   : > { %v2811_v13 = vmin.bf16 %v2739_v4, %v8255_v10  ;;  %v2741_v36 = vld [vmem:[#allocation3 + $0x1b8] sm:$0xff]  ;;  %v2742_v16 = vld [vmem:[#allocation3 + $0x1c0] sm:$0xff]  ;;  %2880 = vst [vmem:[#allocation3 + $0x190] sm:$0xff] %v2808_v43  ;;  %v8257_v53 = vld [vmem:[#allocation103_spill] sm:$0xff] }
 0x31b   : > { %v8256_v0 = vld [vmem:[#allocation104_spill] sm:$0xff]  ;;  %v2813_v56 = vmin.bf16 %v2741_v36, %v8257_v53  ;;  %v8258_v31 = vld [vmem:[#allocation114_spill] sm:$0xff]  ;;  %2881 = vst [vmem:[#allocation3 + $0x198] sm:$0xff] %v2809_v40  ;;  %2882 = vst [vmem:[#allocation3 + $0x1a0] sm:$0xff] %v2810_v38 }
 0x31c   : > { %v2812_v8 = vmin.bf16 %v2740_v50, %v8256_v0  ;;  %v2814_v19 = vmin.bf16 %v2742_v16, %v8258_v31  ;;  %v2743_v2 = vld [vmem:[#allocation3 + $0x1c8] sm:$0xff]  ;;  %v2744_v45 = vld [vmem:[#allocation3 + $0x1d0] sm:$0xff]  ;;  %v2745_v7 = vld [vmem:[#allocation3 + $0x1d8] sm:$0xff]  ;;  %2883 = vst [vmem:[#allocation3 + $0x1a8] sm:$0xff] %v2811_v13 }
 0x31d   : > { %v8259_v39 = vld [vmem:[#allocation113_spill] sm:$0xff]  ;;  %v8260_v28 = vld [vmem:[#allocation124_spill] sm:$0xff]  ;;  %v8261_v20 = vld [vmem:[#allocation123_spill] sm:$0xff]  ;;  %2885 = vst [vmem:[#allocation3 + $0x1b8] sm:$0xff] %v2813_v56 }
 0x31e   : > { %v2815_v60 = vmin.bf16 %v2743_v2, %v8259_v39  ;;  %v2816_v29 = vmin.bf16 %v2744_v45, %v8260_v28  ;;  %v2817_v47 = vmin.bf16 %v2745_v7, %v8261_v20  ;;  %v2746_v57 = vld [vmem:[#allocation3 + $0x1e0] sm:$0xff]  ;;  %v2747_v18 = vld [vmem:[#allocation3 + $0x1e8] sm:$0xff]  ;;  %v2748_v15 = vld [vmem:[#allocation3 + $0x1f0] sm:$0xff]  ;;  %2884 = vst [vmem:[#allocation3 + $0x1b0] sm:$0xff] %v2812_v8 }
 0x31f   : > { %2886 = vst [vmem:[#allocation3 + $0x1c0] sm:$0xff] %v2814_v19  ;;  %v8262_v26 = vld [vmem:[#allocation134_spill] sm:$0xff]  ;;  %v8263_v14 = vld [vmem:[#allocation133_spill] sm:$0xff]  ;;  %v8264_v54 = vld [vmem:[#allocation144_spill] sm:$0xff] }
 0x320   : > { %v2818_v42 = vmin.bf16 %v2746_v57, %v8262_v26  ;;  %v2819_v25 = vmin.bf16 %v2747_v18, %v8263_v14  ;;  %v2820_v35 = vmin.bf16 %v2748_v15, %v8264_v54  ;;  %v2749_v27 = vld [vmem:[#allocation3 + $0x1f8] sm:$0xff]  ;;  %v2750_v9 = vld [vmem:[#allocation3 + $0x200] sm:$0xff]  ;;  %v2751_v1 = vld [vmem:[#allocation3 + $0x208] sm:$0xff]  ;;  %2887 = vst [vmem:[#allocation3 + $0x1c8] sm:$0xff] %v2815_v60 }
 0x321   : > { %2888 = vst [vmem:[#allocation3 + $0x1d0] sm:$0xff] %v2816_v29  ;;  %2889 = vst [vmem:[#allocation3 + $0x1d8] sm:$0xff] %v2817_v47  ;;  %v8265_v41 = vld [vmem:[#allocation143_spill] sm:$0xff]  ;;  %v8266_v3 = vld [vmem:[#allocation154_spill] sm:$0xff] }
 0x322   : > { %v2821_v63 = vmin.bf16 %v2749_v27, %v8265_v41  ;;  %v2822_v44 = vmin.bf16 %v2750_v9, %v8266_v3  ;;  %v8267_v30 = vld [vmem:[#allocation153_spill] sm:$0xff]  ;;  %v2752_v48 = vld [vmem:[#allocation3 + $0x210] sm:$0xff]  ;;  %2890 = vst [vmem:[#allocation3 + $0x1e0] sm:$0xff] %v2818_v42  ;;  %2891 = vst [vmem:[#allocation3 + $0x1e8] sm:$0xff] %v2819_v25 }
 0x323   : > { %v2823_v51 = vmin.bf16 %v2751_v1, %v8267_v30  ;;  %v2753_v23 = vld [vmem:[#allocation3 + $0x218] sm:$0xff]  ;;  %v2754_v12 = vld [vmem:[#allocation3 + $0x220] sm:$0xff]  ;;  %2892 = vst [vmem:[#allocation3 + $0x1f0] sm:$0xff] %v2820_v35  ;;  %v2824_v17 = vmin.bf16 %v2752_v48, %v8236_v62  ;;  %v2755_v32 = vld [vmem:[#allocation3 + $0x228] sm:$0xff] }
 0x324   : > { %v2825_v58 = vmin.bf16 %v2753_v23, %v8237_v37  ;;  %v2826_v55 = vmin.bf16 %v2754_v12, %v8238_v11  ;;  %v2756_v21 = vld [vmem:[#allocation3 + $0x230] sm:$0xff]  ;;  %v2757_v24 = vld [vmem:[#allocation3 + $0x238] sm:$0xff]  ;;  %2893 = vst [vmem:[#allocation3 + $0x1f8] sm:$0xff] %v2821_v63  ;;  %2894 = vst [vmem:[#allocation3 + $0x200] sm:$0xff] %v2822_v44  ;;  %v2827_v46 = vmin.bf16 %v2755_v32, %v8239_v59 }
 0x325   : > { %2895 = vst [vmem:[#allocation3 + $0x208] sm:$0xff] %v2823_v51  ;;  %v2828_v6 = vmin.bf16 %v2756_v21, %v8240_v5  ;;  %v2829_v34 = vmin.bf16 %v2757_v24, %v8241_v33  ;;  %2896 = vst [vmem:[#allocation3 + $0x210] sm:$0xff] %v2824_v17 }
 0x326   : > { %2897 = vst [vmem:[#allocation3 + $0x218] sm:$0xff] %v2825_v58  ;;  %2898 = vst [vmem:[#allocation3 + $0x220] sm:$0xff] %v2826_v55 }
 0x327   : > { %2899 = vst [vmem:[#allocation3 + $0x228] sm:$0xff] %v2827_v46  ;;  %2900 = vst [vmem:[#allocation3 + $0x230] sm:$0xff] %v2828_v6 }
 0x328   : > { %2901 = vst [vmem:[#allocation3 + $0x238] sm:$0xff] %v2829_v34 }
 0x329 PF: > { %p4125_p6 = scmp.ne.s32.totalorder %s4478_s13, 3 }
 0x32a   : > { %v2906_v11 = vld [vmem:[#allocation4] sm:$0x1] (!%p4125_p6)  ;;  %v2922_v37 = vlaneseq (!%p4125_p6)  ;;  %v6098_v22 = vld [vmem:[#allocation2 + $0x8] sm:$0xff] (!%p4125_p6)  ;;  %v6107_v10 = vld [vmem:[#allocation2 + $0x10] sm:$0xff] (!%p4125_p6) }
 0x32b   : > { %2905 = sbr.rel (%p4125_p6) target bundleno = 1024 (0x400), region = 44  ;;  %v6092_v43 = vmul.f32 (!%p4125_p6), 0.00021701389, %v2906_v11  ;;  %v6094_v5 = vld [vmem:[#allocation2] sm:$0xff] (!%p4125_p6)  ;;  %v6105_v38 = vld [vmem:[#allocation3 + $0x8] sm:$0xff] (!%p4125_p6)  ;;  %v6109_v13 = vld [vmem:[#allocation3 + $0x10] sm:$0xff] (!%p4125_p6) }
 0x32c   : > { %v2923_v49 = vshrl.u32 (!%p4125_p6), %v2922_v37, 7  ;;  %v6096_v33 = vld [vmem:[#allocation3] sm:$0xff] (!%p4125_p6)  ;;  %v2999_v61 = vunpack.c.l.bf16 (!%p4125_p6), %v6094_v5  ;;  %v3000_v52 = vunpack.c.h.bf16 (!%p4125_p6), %v6094_v5  ;;  %v6116_v8 = vld [vmem:[#allocation2 + $0x18] sm:$0xff] (!%p4125_p6)  ;;  %v6131_v20 = vld [vmem:[#allocation2 + $0x28] sm:$0xff] (!%p4125_p6)  ;;  %v4451_v37 = vmov (!%p4125_p6), 0  }
 0x32d   : > { %v2910_v4 = vmul.f32 (!%p4125_p6), %v6092_v43, %v6092_v43  ;;  %v3215_v40 = vunpack.c.l.bf16 (!%p4125_p6), %v6096_v33  ;;  %v3216_v36 = vunpack.c.h.bf16 (!%p4125_p6), %v6096_v33  ;;  %v6118_v53 = vld [vmem:[#allocation3 + $0x18] sm:$0xff] (!%p4125_p6)  ;;  %v6123_v45 = vld [vmem:[#allocation2 + $0x20] sm:$0xff] (!%p4125_p6)  ;;  %v6133_v47 = vld [vmem:[#allocation3 + $0x28] sm:$0xff] (!%p4125_p6)  ;;  %v8272_v29 = vunpack.c.h.bf16 (!%p4125_p6), %v6105_v38 }
 0x32e   : > { %v6111_v50 = vsub.s32 (!%p4125_p6), 0, %v2923_v49  ;;  %v6125_v7 = vld [vmem:[#allocation3 + $0x20] sm:$0xff] (!%p4125_p6)  ;;  %v6138_v42 = vld [vmem:[#allocation2 + $0x30] sm:$0xff] (!%p4125_p6)  ;;  %v6146_v9 = vld [vmem:[#allocation2 + $0x38] sm:$0xff] (!%p4125_p6) }
 0x32f   : > { %v2908_v62 = vld [vmem:[#allocation5] sm:$0x1] (!%p4125_p6)  ;;  %v6140_v14 = vld [vmem:[#allocation3 + $0x30] sm:$0xff] (!%p4125_p6)  ;;  %v6148_v1 = vld [vmem:[#allocation3 + $0x38] sm:$0xff] (!%p4125_p6) }
 0x330   : > { %v2909_v59 = vmul.f32 (!%p4125_p6), 0.00021701389, %v2908_v62  ;;  %v6153_v30 = vld [vmem:[#allocation2 + $0x40] sm:$0xff] (!%p4125_p6)  ;;  %v6161_v58 = vld [vmem:[#allocation2 + $0x48] sm:$0xff] (!%p4125_p6)  ;;  %v6168_v46 = vld [vmem:[#allocation2 + $0x50] sm:$0xff] (!%p4125_p6) }
 0x331   : > { %v6155_v51 = vld [vmem:[#allocation3 + $0x40] sm:$0xff] (!%p4125_p6)  ;;  %v6163_v55 = vld [vmem:[#allocation3 + $0x48] sm:$0xff] (!%p4125_p6)  ;;  %v6170_v6 = vld [vmem:[#allocation3 + $0x50] sm:$0xff] (!%p4125_p6) }
 0x332   : > { %v2911_v56 = vsub.f32 %v2909_v59, %v2910_v4  ;;  %v6176_v59 = vld [vmem:[#allocation2 + $0x58] sm:$0xff]  ;;  %v6184_v21 = vld [vmem:[#allocation2 + $0x60] sm:$0xff]  ;;  %v6192_v17 = vld [vmem:[#allocation2 + $0x68] sm:$0xff] }
 0x333   : > { %v6178_v49 = vld [vmem:[#allocation3 + $0x58] sm:$0xff]  ;;  %v6186_v34 = vld [vmem:[#allocation3 + $0x60] sm:$0xff]  ;;  %v6194_v4 = vld [vmem:[#allocation3 + $0x68] sm:$0xff] }
 0x334   : > { %v2912_v57 = vmax.f32 %v2911_v56, 0.0  ;;  %v6200_v23 = vld [vmem:[#allocation2 + $0x70] sm:$0xff]  ;;  %v6208_v44 = vld [vmem:[#allocation2 + $0x78] sm:$0xff]  ;;  %v6216_v63 = vld [vmem:[#allocation2 + $0x80] sm:$0xff] }
 0x335   : > { %v6202_v62 = vld [vmem:[#allocation3 + $0x70] sm:$0xff]  ;;  %v6218_v11 = vld [vmem:[#allocation3 + $0x80] sm:$0xff]  ;;  %v6224_v35 = vld [vmem:[#allocation2 + $0x88] sm:$0xff] }
 0x336   : > { %v2914_v41 = vadd.f32 1e-05, %v2912_v57  ;;  %v6210_v57 = vld [vmem:[#allocation3 + $0x78] sm:$0xff]  ;;  %v6226_v56 = vld [vmem:[#allocation3 + $0x88] sm:$0xff]  ;;  %v6235_v27 = vld [vmem:[#allocation2 + $0x90] sm:$0xff] }
 0x337   : > { %v6241_v15 = vld [vmem:[#allocation3 + $0x90] sm:$0xff]  ;;  %v6243_v26 = vld [vmem:[#allocation2 + $0x98] sm:$0xff]  ;;  %v6254_v60 = vld [vmem:[#allocation2 + $0xa0] sm:$0xff] }
 0x338   : > { %4440 = vrsqrt.f32 %v2914_v41  ;;  %v2913_v41 = vld [vmem:[%s7487_s2 + $0x1] sm:$0x1]  ;;  %v6249_v24 = vld [vmem:[#allocation3 + $0x98] sm:$0xff]  ;;  %v2917_v32 = vld [vmem:[%s7487_s2 + $0x2] sm:$0x1]  ;;  %v3039_v39 = vunpack.c.l.bf16 %v6254_v60  ;;  %v3040_v54 = vunpack.c.h.bf16 %v6254_v60 }
 0x339   : > { %v6270_v28 = vld [vmem:[#allocation2 + $0xa8] sm:$0xff]  ;;  %v6277_v31 = vld [vmem:[#allocation2 + $0xb0] sm:$0xff] }
 0x33a   : > { %v6272_v2 = vld [vmem:[#allocation3 + $0xa8] sm:$0xff] }
 0x342   : > { %v4441_v48 = vpop.eup %4440 }
 0x343   : > { %v2916_v3 = vmul.f32 %v4441_v48, %v2913_v41  ;;  %v6263_v41 = vld [vmem:[#allocation3 + $0xa0] sm:$0xff] }
 0x344   : > { %v3255_v19 = vunpack.c.l.bf16 %v6263_v41  ;;  %v3256_v16 = vunpack.c.h.bf16 %v6263_v41  ;;  %v2950_v41 = vld [vmem:[#allocation2 + $0xb8] sm:$0xff] }
 0x345   : > { %v2918_v25 = vmul.f32 %v2916_v3, %v6092_v43  ;;  %vm2920_vm1 = vcmp.ge.f32.partialorder %v2916_v3, 0.0  ;;  %v6267_v18 = vrot.slane %v2916_v3, %v6111_v50 }
 0x346   : > { %v2921_v12 = vsel %vm2920_vm1, 1, %v4451_v37  ;;  %v8275_v37 = vunpack.c.l.bf16 %v6107_v10 }
 0x347   : > { %v2919_v43 = vsub.f32 %v2917_v32, %v2918_v25  ;;  %v2925_v3 = vrot.slane %v2921_v12, %v6111_v50  ;;  %v8273_v12 = vunpack.c.h.bf16 %v6098_v22 }
 0x349   : > { %vm6286_vm2 = vcmp.eq.s32.totalorder %v2925_v3, 1  ;;  %v6291_v25 = vrot.slane %v2919_v43, %v6111_v50  ;;  %v8270_v50 = vunpack.c.l.bf16 %v6105_v38  ;;  %v8271_v43 = vunpack.c.l.bf16 %v6098_v22 }
 0x34a   : > { %v3359_v0 = vsel %vm6286_vm2, %v2999_v61, %v3215_v40  ;;  %v3360_v3 = vsel %vm6286_vm2, %v3000_v52, %v3216_v36  ;;  %v3362_v61 = vsel %vm6286_vm2, %v8273_v12, %v8272_v29  ;;  %v8274_v36 = vunpack.c.l.bf16 %v6109_v13 }
 0x34b   : > { %v3361_v32 = vsel %vm6286_vm2, %v8271_v43, %v8270_v50  ;;  %v3507_v33 = vmul.f32 %v6267_v18, %v3359_v0  ;;  %v3508_v5 = vmul.f32 %v6267_v18, %v3360_v3  ;;  %v3510_v52 = vmul.f32 %v6267_v18, %v3362_v61 }
 0x34c   : > { %v3509_v40 = vmul.f32 %v6267_v18, %v3361_v32  ;;  %v3363_v38 = vsel %vm6286_vm2, %v8275_v37, %v8274_v36  ;;  %v8276_v22 = vunpack.c.h.bf16 %v6109_v13  ;;  %v8277_v50 = vunpack.c.h.bf16 %v6107_v10 }
 0x34d   : > { %v8278_v29 = vunpack.c.l.bf16 %v6118_v53  ;;  %v8279_v12 = vunpack.c.l.bf16 %v6116_v8  ;;  %v8280_v3 = vunpack.c.h.bf16 %v6118_v53  ;;  %v8281_v43 = vunpack.c.h.bf16 %v6116_v8 }
 0x34e   : > { %v3364_v0 = vsel %vm6286_vm2, %v8277_v50, %v8276_v22  ;;  %v3655_v13 = vadd.f32 %v6291_v25, %v3507_v33  ;;  %v3656_v10 = vadd.f32 %v6291_v25, %v3508_v5  ;;  %v3657_v61 = vadd.f32 %v6291_v25, %v3509_v40 }
 0x34f   : > { %v3365_v32 = vsel %vm6286_vm2, %v8279_v12, %v8278_v29  ;;  %v3366_v37 = vsel %vm6286_vm2, %v8281_v43, %v8280_v3  ;;  %v3658_v36 = vadd.f32 %v6291_v25, %v3510_v52  ;;  %v3511_v22 = vmul.f32 %v6267_v18, %v3363_v38 }
 0x350   : > { %v3512_v50 = vmul.f32 %v6267_v18, %v3364_v0  ;;  %v3513_v29 = vmul.f32 %v6267_v18, %v3365_v32  ;;  %v3514_v53 = vmul.f32 %v6267_v18, %v3366_v37  ;;  %3799 = vst [vmem:[%s7488_s3] sm:$0xff] %v3655_v13  ;;  %3800 = vst [vmem:[%s7488_s3 + $0x8] sm:$0xff] %v3656_v10  ;;  %v8282_v8 = vunpack.c.l.bf16 %v6125_v7 }
 0x351   : > { %3801 = vst [vmem:[%s7488_s3 + $0x10] sm:$0xff] %v3657_v61  ;;  %3802 = vst [vmem:[%s7488_s3 + $0x18] sm:$0xff] %v3658_v36  ;;  %v8283_v33 = vunpack.c.l.bf16 %v6123_v45  ;;  %v8284_v40 = vunpack.c.h.bf16 %v6125_v7  ;;  %v8285_v52 = vunpack.c.h.bf16 %v6123_v45  ;;  %v8286_v0 = vunpack.c.l.bf16 %v6133_v47 }
 0x352   : > { %v8287_v12 = vunpack.c.l.bf16 %v6131_v20  ;;  %v8288_v3 = vunpack.c.h.bf16 %v6133_v47  ;;  %v8289_v43 = vunpack.c.h.bf16 %v6131_v20  ;;  %v3659_v7 = vadd.f32 %v6291_v25, %v3511_v22 }
 0x353   : > { %v3367_v5 = vsel %vm6286_vm2, %v8283_v33, %v8282_v8  ;;  %v3368_v38 = vsel %vm6286_vm2, %v8285_v52, %v8284_v40  ;;  %v3660_v45 = vadd.f32 %v6291_v25, %v3512_v50  ;;  %v3661_v13 = vadd.f32 %v6291_v25, %v3513_v29 }
 0x354   : > { %v3369_v32 = vsel %vm6286_vm2, %v8287_v12, %v8286_v0  ;;  %v3370_v37 = vsel %vm6286_vm2, %v8289_v43, %v8288_v3  ;;  %v3662_v10 = vadd.f32 %v6291_v25, %v3514_v53  ;;  %v3515_v61 = vmul.f32 %v6267_v18, %v3367_v5  ;;  %3803 = vst [vmem:[%s7488_s3 + $0x20] sm:$0xff] %v3659_v7 }
 0x355   : > { %v3516_v36 = vmul.f32 %v6267_v18, %v3368_v38  ;;  %v3517_v8 = vmul.f32 %v6267_v18, %v3369_v32  ;;  %v3518_v47 = vmul.f32 %v6267_v18, %v3370_v37  ;;  %3804 = vst [vmem:[%s7488_s3 + $0x28] sm:$0xff] %v3660_v45  ;;  %3805 = vst [vmem:[%s7488_s3 + $0x30] sm:$0xff] %v3661_v13  ;;  %v8290_v20 = vunpack.c.l.bf16 %v6140_v14 }
 0x356   : > { %3806 = vst [vmem:[%s7488_s3 + $0x38] sm:$0xff] %v3662_v10  ;;  %v8291_v22 = vunpack.c.l.bf16 %v6138_v42  ;;  %v8292_v29 = vunpack.c.h.bf16 %v6140_v14  ;;  %v8293_v53 = vunpack.c.h.bf16 %v6138_v42  ;;  %v8294_v5 = vunpack.c.l.bf16 %v6148_v1 }
 0x357   : > { %v8295_v40 = vunpack.c.l.bf16 %v6146_v9  ;;  %v8296_v38 = vunpack.c.h.bf16 %v6148_v1  ;;  %v8297_v0 = vunpack.c.h.bf16 %v6146_v9  ;;  %v3663_v14 = vadd.f32 %v6291_v25, %v3515_v61 }
 0x358   : > { %v3371_v50 = vsel %vm6286_vm2, %v8291_v22, %v8290_v20  ;;  %v3372_v33 = vsel %vm6286_vm2, %v8293_v53, %v8292_v29  ;;  %v3664_v42 = vadd.f32 %v6291_v25, %v3516_v36  ;;  %v3665_v32 = vadd.f32 %v6291_v25, %v3517_v8 }
 0x359   : > { %v3373_v52 = vsel %vm6286_vm2, %v8295_v40, %v8294_v5  ;;  %v3374_v12 = vsel %vm6286_vm2, %v8297_v0, %v8296_v38  ;;  %v3666_v3 = vadd.f32 %v6291_v25, %v3518_v47  ;;  %v3519_v43 = vmul.f32 %v6267_v18, %v3371_v50  ;;  %3807 = vst [vmem:[%s7488_s3 + $0x40] sm:$0xff] %v3663_v14 }
 0x35a   : > { %v3520_v37 = vmul.f32 %v6267_v18, %v3372_v33  ;;  %v3521_v7 = vmul.f32 %v6267_v18, %v3373_v52  ;;  %v3522_v1 = vmul.f32 %v6267_v18, %v3374_v12  ;;  %3808 = vst [vmem:[%s7488_s3 + $0x48] sm:$0xff] %v3664_v42  ;;  %3809 = vst [vmem:[%s7488_s3 + $0x50] sm:$0xff] %v3665_v32  ;;  %v8298_v9 = vunpack.c.l.bf16 %v6155_v51 }
 0x35b   : > { %3810 = vst [vmem:[%s7488_s3 + $0x58] sm:$0xff] %v3666_v3  ;;  %v8299_v45 = vunpack.c.l.bf16 %v6153_v30  ;;  %v8300_v10 = vunpack.c.h.bf16 %v6155_v51  ;;  %v8301_v61 = vunpack.c.h.bf16 %v6153_v30  ;;  %v8302_v8 = vunpack.c.l.bf16 %v6163_v55 }
 0x35c   : > { %v8303_v47 = vunpack.c.l.bf16 %v6161_v58  ;;  %v8304_v22 = vunpack.c.h.bf16 %v6163_v55  ;;  %v8305_v50 = vunpack.c.h.bf16 %v6161_v58  ;;  %v3667_v51 = vadd.f32 %v6291_v25, %v3519_v43 }
 0x35d   : > { %v3375_v13 = vsel %vm6286_vm2, %v8299_v45, %v8298_v9  ;;  %v3376_v36 = vsel %vm6286_vm2, %v8301_v61, %v8300_v10  ;;  %v3668_v30 = vadd.f32 %v6291_v25, %v3520_v37  ;;  %v3669_v53 = vadd.f32 %v6291_v25, %v3521_v7 }
 0x35e   : > { %v3377_v20 = vsel %vm6286_vm2, %v8303_v47, %v8302_v8  ;;  %v3378_v29 = vsel %vm6286_vm2, %v8305_v50, %v8304_v22  ;;  %v3670_v33 = vadd.f32 %v6291_v25, %v3522_v1  ;;  %v3523_v5 = vmul.f32 %v6267_v18, %v3375_v13  ;;  %3811 = vst [vmem:[%s7488_s3 + $0x60] sm:$0xff] %v3667_v51 }
 0x35f   : > { %v3524_v40 = vmul.f32 %v6267_v18, %v3376_v36  ;;  %v3525_v52 = vmul.f32 %v6267_v18, %v3377_v20  ;;  %v3526_v55 = vmul.f32 %v6267_v18, %v3378_v29  ;;  %3812 = vst [vmem:[%s7488_s3 + $0x68] sm:$0xff] %v3668_v30  ;;  %3813 = vst [vmem:[%s7488_s3 + $0x70] sm:$0xff] %v3669_v53  ;;  %v8306_v58 = vunpack.c.l.bf16 %v6170_v6 }
 0x360   : > { %3814 = vst [vmem:[%s7488_s3 + $0x78] sm:$0xff] %v3670_v33  ;;  %v8307_v38 = vunpack.c.l.bf16 %v6168_v46  ;;  %v8308_v12 = vunpack.c.h.bf16 %v6170_v6  ;;  %v8309_v14 = vunpack.c.h.bf16 %v6168_v46  ;;  %v8310_v32 = vunpack.c.l.bf16 %v6178_v49 }
 0x361   : > { %v8311_v3 = vunpack.c.l.bf16 %v6176_v59  ;;  %v8312_v37 = vunpack.c.h.bf16 %v6178_v49  ;;  %v8313_v7 = vunpack.c.h.bf16 %v6176_v59  ;;  %v3671_v6 = vadd.f32 %v6291_v25, %v3523_v5 }
 0x362   : > { %v3379_v0 = vsel %vm6286_vm2, %v8307_v38, %v8306_v58  ;;  %v3380_v42 = vsel %vm6286_vm2, %v8309_v14, %v8308_v12  ;;  %v3672_v46 = vadd.f32 %v6291_v25, %v3524_v40  ;;  %v3673_v9 = vadd.f32 %v6291_v25, %v3525_v52 }
 0x363   : > { %v3381_v43 = vsel %vm6286_vm2, %v8311_v3, %v8310_v32  ;;  %v3382_v1 = vsel %vm6286_vm2, %v8313_v7, %v8312_v37  ;;  %v3674_v45 = vadd.f32 %v6291_v25, %v3526_v55  ;;  %v3527_v13 = vmul.f32 %v6267_v18, %v3379_v0  ;;  %3815 = vst [vmem:[%s7488_s3 + $0x80] sm:$0xff] %v3671_v6 }
 0x364   : > { %v3528_v10 = vmul.f32 %v6267_v18, %v3380_v42  ;;  %v3529_v61 = vmul.f32 %v6267_v18, %v3381_v43  ;;  %v3530_v49 = vmul.f32 %v6267_v18, %v3382_v1  ;;  %3816 = vst [vmem:[%s7488_s3 + $0x88] sm:$0xff] %v3672_v46  ;;  %3817 = vst [vmem:[%s7488_s3 + $0x90] sm:$0xff] %v3673_v9  ;;  %v8314_v59 = vunpack.c.l.bf16 %v6186_v34 }
 0x365   : > { %3818 = vst [vmem:[%s7488_s3 + $0x98] sm:$0xff] %v3674_v45  ;;  %v8315_v36 = vunpack.c.l.bf16 %v6184_v21  ;;  %v8316_v47 = vunpack.c.h.bf16 %v6186_v34  ;;  %v8317_v20 = vunpack.c.h.bf16 %v6184_v21  ;;  %v8318_v50 = vunpack.c.l.bf16 %v6194_v4 }
 0x366   : > { %v8319_v29 = vunpack.c.l.bf16 %v6192_v17  ;;  %v8320_v30 = vunpack.c.h.bf16 %v6194_v4  ;;  %v8321_v53 = vunpack.c.h.bf16 %v6192_v17  ;;  %v3675_v34 = vadd.f32 %v6291_v25, %v3527_v13 }
 0x367   : > { %v3383_v8 = vsel %vm6286_vm2, %v8315_v36, %v8314_v59  ;;  %v3384_v22 = vsel %vm6286_vm2, %v8317_v20, %v8316_v47  ;;  %v3676_v21 = vadd.f32 %v6291_v25, %v3528_v10  ;;  %v3677_v5 = vadd.f32 %v6291_v25, %v3529_v61 }
 0x368   : > { %v3385_v51 = vsel %vm6286_vm2, %v8319_v29, %v8318_v50  ;;  %v3386_v33 = vsel %vm6286_vm2, %v8321_v53, %v8320_v30  ;;  %v3678_v40 = vadd.f32 %v6291_v25, %v3530_v49  ;;  %v3531_v52 = vmul.f32 %v6267_v18, %v3383_v8  ;;  %3819 = vst [vmem:[%s7488_s3 + $0xa0] sm:$0xff] %v3675_v34 }
 0x369   : > { %v3532_v55 = vmul.f32 %v6267_v18, %v3384_v22  ;;  %v3533_v58 = vmul.f32 %v6267_v18, %v3385_v51  ;;  %v3534_v4 = vmul.f32 %v6267_v18, %v3386_v33  ;;  %3820 = vst [vmem:[%s7488_s3 + $0xa8] sm:$0xff] %v3676_v21  ;;  %3821 = vst [vmem:[%s7488_s3 + $0xb0] sm:$0xff] %v3677_v5  ;;  %v8322_v17 = vunpack.c.l.bf16 %v6202_v62 }
 0x36a   : > { %3822 = vst [vmem:[%s7488_s3 + $0xb8] sm:$0xff] %v3678_v40  ;;  %v8323_v38 = vunpack.c.l.bf16 %v6200_v23  ;;  %v8324_v12 = vunpack.c.h.bf16 %v6202_v62  ;;  %v8325_v14 = vunpack.c.h.bf16 %v6200_v23  ;;  %v8326_v32 = vunpack.c.l.bf16 %v6210_v57 }
 0x36b   : > { %v8327_v3 = vunpack.c.l.bf16 %v6208_v44  ;;  %v8328_v37 = vunpack.c.h.bf16 %v6210_v57  ;;  %v8329_v7 = vunpack.c.h.bf16 %v6208_v44  ;;  %v3679_v62 = vadd.f32 %v6291_v25, %v3531_v52 }
 0x36c   : > { %v3387_v0 = vsel %vm6286_vm2, %v8323_v38, %v8322_v17  ;;  %v3388_v42 = vsel %vm6286_vm2, %v8325_v14, %v8324_v12  ;;  %v3680_v23 = vadd.f32 %v6291_v25, %v3532_v55  ;;  %v3681_v6 = vadd.f32 %v6291_v25, %v3533_v58 }
 0x36d   : > { %v3389_v43 = vsel %vm6286_vm2, %v8327_v3, %v8326_v32  ;;  %v3390_v1 = vsel %vm6286_vm2, %v8329_v7, %v8328_v37  ;;  %v3682_v46 = vadd.f32 %v6291_v25, %v3534_v4  ;;  %v3535_v9 = vmul.f32 %v6267_v18, %v3387_v0  ;;  %3823 = vst [vmem:[%s7488_s3 + $0xc0] sm:$0xff] %v3679_v62 }
 0x36e   : > { %v3536_v45 = vmul.f32 %v6267_v18, %v3388_v42  ;;  %v3537_v13 = vmul.f32 %v6267_v18, %v3389_v43  ;;  %v3538_v57 = vmul.f32 %v6267_v18, %v3390_v1  ;;  %3824 = vst [vmem:[%s7488_s3 + $0xc8] sm:$0xff] %v3680_v23  ;;  %3825 = vst [vmem:[%s7488_s3 + $0xd0] sm:$0xff] %v3681_v6  ;;  %v8330_v44 = vunpack.c.l.bf16 %v6218_v11 }
 0x36f   : > { %3826 = vst [vmem:[%s7488_s3 + $0xd8] sm:$0xff] %v3682_v46  ;;  %v8331_v10 = vunpack.c.l.bf16 %v6216_v63  ;;  %v8332_v49 = vunpack.c.h.bf16 %v6218_v11  ;;  %v8333_v59 = vunpack.c.h.bf16 %v6216_v63  ;;  %v8334_v8 = vunpack.c.l.bf16 %v6226_v56 }
 0x370   : > { %v8335_v47 = vunpack.c.l.bf16 %v6224_v35  ;;  %v8336_v22 = vunpack.c.h.bf16 %v6226_v56  ;;  %v8337_v50 = vunpack.c.h.bf16 %v6224_v35  ;;  %v3683_v11 = vadd.f32 %v6291_v25, %v3535_v9 }
 0x371   : > { %v3391_v61 = vsel %vm6286_vm2, %v8331_v10, %v8330_v44  ;;  %v3392_v36 = vsel %vm6286_vm2, %v8333_v59, %v8332_v49  ;;  %v3684_v63 = vadd.f32 %v6291_v25, %v3536_v45  ;;  %v3685_v51 = vadd.f32 %v6291_v25, %v3537_v13  ;;  %v3166_v13 = vld [vmem:[#allocation3 + $0xb8] sm:$0xff]  ;;  %v2951_v49 = vld [vmem:[#allocation2 + $0xc0] sm:$0xff] }
 0x372   : > { %v3393_v20 = vsel %vm6286_vm2, %v8335_v47, %v8334_v8  ;;  %v3394_v29 = vsel %vm6286_vm2, %v8337_v50, %v8336_v22  ;;  %v3686_v30 = vadd.f32 %v6291_v25, %v3538_v57  ;;  %v3539_v53 = vmul.f32 %v6267_v18, %v3391_v61  ;;  %3827 = vst [vmem:[%s7488_s3 + $0xe0] sm:$0xff] %v3683_v11 }
 0x373   : > { %v3540_v33 = vmul.f32 %v6267_v18, %v3392_v36  ;;  %v3541_v34 = vmul.f32 %v6267_v18, %v3393_v20  ;;  %v3542_v56 = vmul.f32 %v6267_v18, %v3394_v29  ;;  %3828 = vst [vmem:[%s7488_s3 + $0xe8] sm:$0xff] %v3684_v63  ;;  %3829 = vst [vmem:[%s7488_s3 + $0xf0] sm:$0xff] %v3685_v51  ;;  %v8338_v35 = vunpack.c.l.bf16 %v6241_v15  ;;  %v3167_v20 = vld [vmem:[#allocation3 + $0xc0] sm:$0xff] }
 0x374   : > { %3830 = vst [vmem:[%s7488_s3 + $0xf8] sm:$0xff] %v3686_v30  ;;  %v8339_v21 = vunpack.c.l.bf16 %v6235_v27  ;;  %v8340_v40 = vunpack.c.h.bf16 %v6241_v15  ;;  %v8341_v52 = vunpack.c.h.bf16 %v6235_v27  ;;  %v8342_v58 = vunpack.c.l.bf16 %v6249_v24 }
 0x375   : > { %v8343_v4 = vunpack.c.l.bf16 %v6243_v26  ;;  %v8344_v38 = vunpack.c.h.bf16 %v6249_v24  ;;  %v8345_v0 = vunpack.c.h.bf16 %v6243_v26  ;;  %v3687_v15 = vadd.f32 %v6291_v25, %v3539_v53 }
 0x376   : > { %v3395_v5 = vsel %vm6286_vm2, %v8339_v21, %v8338_v35  ;;  %v3396_v55 = vsel %vm6286_vm2, %v8341_v52, %v8340_v40  ;;  %v3688_v27 = vadd.f32 %v6291_v25, %v3540_v33  ;;  %v3689_v14 = vadd.f32 %v6291_v25, %v3541_v34  ;;  %v2952_v33 = vld [vmem:[#allocation2 + $0xc8] sm:$0xff] }
 0x377   : > { %v3397_v17 = vsel %vm6286_vm2, %v8343_v4, %v8342_v58  ;;  %v3398_v12 = vsel %vm6286_vm2, %v8345_v0, %v8344_v38  ;;  %v3690_v42 = vadd.f32 %v6291_v25, %v3542_v56  ;;  %v3543_v32 = vmul.f32 %v6267_v18, %v3395_v5  ;;  %3831 = vst [vmem:[%s7488_s3 + $0x100] sm:$0xff] %v3687_v15  ;;  %v3168_v5 = vld [vmem:[#allocation3 + $0xc8] sm:$0xff]  ;;  %v2953_v4 = vld [vmem:[#allocation2 + $0xd0] sm:$0xff] }
 0x378   : > { %v3544_v3 = vmul.f32 %v6267_v18, %v3396_v55  ;;  %v3545_v43 = vmul.f32 %v6267_v18, %v3397_v17  ;;  %v3546_v24 = vmul.f32 %v6267_v18, %v3398_v12  ;;  %3832 = vst [vmem:[%s7488_s3 + $0x108] sm:$0xff] %v3688_v27  ;;  %3833 = vst [vmem:[%s7488_s3 + $0x110] sm:$0xff] %v3689_v14  ;;  %v8346_v7 = vunpack.c.l.bf16 %v6272_v2  ;;  %v3169_v15 = vld [vmem:[#allocation3 + $0xd0] sm:$0xff] }
 0x379   : > { %3834 = vst [vmem:[%s7488_s3 + $0x118] sm:$0xff] %v3690_v42  ;;  %v3399_v26 = vsel %vm6286_vm2, %v3039_v39, %v3255_v19  ;;  %v3400_v37 = vsel %vm6286_vm2, %v3040_v54, %v3256_v16  ;;  %v8347_v1 = vunpack.c.l.bf16 %v6270_v28  ;;  %v8348_v23 = vunpack.c.h.bf16 %v6272_v2  ;;  %v3165_v39 = vld [vmem:[#allocation3 + $0xb0] sm:$0xff] }
 0x37a   : > { %v8349_v6 = vunpack.c.h.bf16 %v6270_v28  ;;  %v3691_v60 = vadd.f32 %v6291_v25, %v3543_v32  ;;  %v3692_v16 = vadd.f32 %v6291_v25, %v3544_v3  ;;  %v3693_v54 = vadd.f32 %v6291_v25, %v3545_v43 }
 0x37b   : > { %v3401_v62 = vsel %vm6286_vm2, %v8347_v1, %v8346_v7  ;;  %v3694_v46 = vadd.f32 %v6291_v25, %v3546_v24  ;;  %v3547_v9 = vmul.f32 %v6267_v18, %v3399_v26  ;;  %v3548_v45 = vmul.f32 %v6267_v18, %v3400_v37  ;;  %v2954_v37 = vld [vmem:[#allocation2 + $0xd8] sm:$0xff] }
 0x37c   : > { %v3402_v19 = vsel %vm6286_vm2, %v8349_v6, %v8348_v23  ;;  %v3549_v2 = vmul.f32 %v6267_v18, %v3401_v62  ;;  %3835 = vst [vmem:[%s7488_s3 + $0x120] sm:$0xff] %v3691_v60  ;;  %3836 = vst [vmem:[%s7488_s3 + $0x128] sm:$0xff] %v3692_v16  ;;  %v3259_v57 = vunpack.c.l.bf16 %v3165_v39  ;;  %v3044_v44 = vunpack.c.h.bf16 %v6277_v31  ;;  %v3170_v7 = vld [vmem:[#allocation3 + $0xd8] sm:$0xff] }
 0x37d   : > { %v3550_v28 = vmul.f32 %v6267_v18, %v3402_v19  ;;  %3837 = vst [vmem:[%s7488_s3 + $0x130] sm:$0xff] %v3693_v54  ;;  %3838 = vst [vmem:[%s7488_s3 + $0x138] sm:$0xff] %v3694_v46  ;;  %v3260_v10 = vunpack.c.h.bf16 %v3165_v39  ;;  %v3045_v61 = vunpack.c.l.bf16 %v2950_v41  ;;  %v3695_v59 = vadd.f32 %v6291_v25, %v3547_v9 }
 0x37e   : > { %v3696_v36 = vadd.f32 %v6291_v25, %v3548_v45  ;;  %v3697_v8 = vadd.f32 %v6291_v25, %v3549_v2  ;;  %v8350_v22 = vunpack.c.l.bf16 %v6277_v31  ;;  %v3261_v11 = vunpack.c.l.bf16 %v3166_v13  ;;  %v2955_v45 = vld [vmem:[#allocation2 + $0xe0] sm:$0xff] }
 0x37f   : > { %v3698_v47 = vadd.f32 %v6291_v25, %v3550_v28  ;;  %v3404_v29 = vsel %vm6286_vm2, %v3044_v44, %v3260_v10  ;;  %v3046_v63 = vunpack.c.h.bf16 %v2950_v41  ;;  %3839 = vst [vmem:[%s7488_s3 + $0x140] sm:$0xff] %v3695_v59  ;;  %v3262_v30 = vunpack.c.h.bf16 %v3166_v13  ;;  %v3171_v2 = vld [vmem:[#allocation3 + $0xe0] sm:$0xff] }
 0x380   : > { %v3403_v50 = vsel %vm6286_vm2, %v8350_v22, %v3259_v57  ;;  %3840 = vst [vmem:[%s7488_s3 + $0x148] sm:$0xff] %v3696_v36  ;;  %3841 = vst [vmem:[%s7488_s3 + $0x150] sm:$0xff] %v3697_v8  ;;  %v3552_v51 = vmul.f32 %v6267_v18, %v3404_v29  ;;  %v3047_v53 = vunpack.c.l.bf16 %v2951_v49  ;;  %v3405_v34 = vsel %vm6286_vm2, %v3045_v61, %v3261_v11  ;;  %v2956_v36 = vld [vmem:[#allocation2 + $0xe8] sm:$0xff] }
 0x381   : > { %3842 = vst [vmem:[%s7488_s3 + $0x158] sm:$0xff] %v3698_v47  ;;  %v3551_v31 = vmul.f32 %v6267_v18, %v3403_v50  ;;  %v3263_v56 = vunpack.c.l.bf16 %v3167_v20  ;;  %v3048_v35 = vunpack.c.h.bf16 %v2951_v49  ;;  %v3264_v21 = vunpack.c.h.bf16 %v3167_v20  ;;  %v3172_v50 = vld [vmem:[#allocation3 + $0xe8] sm:$0xff] }
 0x382   : > { %v3700_v52 = vadd.f32 %v6291_v25, %v3552_v51  ;;  %v3553_v55 = vmul.f32 %v6267_v18, %v3405_v34  ;;  %v3406_v58 = vsel %vm6286_vm2, %v3046_v63, %v3262_v30  ;;  %v3049_v12 = vunpack.c.l.bf16 %v2952_v33  ;;  %v2957_v51 = vld [vmem:[#allocation2 + $0xf0] sm:$0xff] }
 0x383   : > { %v3699_v40 = vadd.f32 %v6291_v25, %v3551_v31  ;;  %v3554_v17 = vmul.f32 %v6267_v18, %v3406_v58  ;;  %v3407_v38 = vsel %vm6286_vm2, %v3047_v53, %v3263_v56  ;;  %v3408_v0 = vsel %vm6286_vm2, %v3048_v35, %v3264_v21  ;;  %v3173_v56 = vld [vmem:[#allocation3 + $0xf0] sm:$0xff] }
 0x384   : > { %3844 = vst [vmem:[%s7488_s3 + $0x168] sm:$0xff] %v3700_v52  ;;  %v3701_v27 = vadd.f32 %v6291_v25, %v3553_v55  ;;  %v3555_v14 = vmul.f32 %v6267_v18, %v3407_v38  ;;  %v3556_v42 = vmul.f32 %v6267_v18, %v3408_v0  ;;  %v3265_v32 = vunpack.c.l.bf16 %v3168_v5  ;;  %v3174_v38 = vld [vmem:[#allocation3 + $0xf8] sm:$0xff] }
 0x385   : > { %3843 = vst [vmem:[%s7488_s3 + $0x160] sm:$0xff] %v3699_v40  ;;  %v3702_v3 = vadd.f32 %v6291_v25, %v3554_v17  ;;  %v3050_v43 = vunpack.c.h.bf16 %v2952_v33  ;;  %v3266_v24 = vunpack.c.h.bf16 %v3168_v5  ;;  %v3051_v26 = vunpack.c.l.bf16 %v2953_v4  ;;  %v2958_v17 = vld [vmem:[#allocation2 + $0xf8] sm:$0xff] }
 0x386   : > { %3845 = vst [vmem:[%s7488_s3 + $0x170] sm:$0xff] %v3701_v27  ;;  %v3703_v1 = vadd.f32 %v6291_v25, %v3555_v14  ;;  %v3704_v62 = vadd.f32 %v6291_v25, %v3556_v42  ;;  %v3409_v23 = vsel %vm6286_vm2, %v3049_v12, %v3265_v32  ;;  %v3267_v6 = vunpack.c.l.bf16 %v3169_v15 }
 0x387   : > { %3846 = vst [vmem:[%s7488_s3 + $0x178] sm:$0xff] %v3702_v3  ;;  %v3557_v19 = vmul.f32 %v6267_v18, %v3409_v23  ;;  %v3410_v39 = vsel %vm6286_vm2, %v3050_v43, %v3266_v24  ;;  %v3052_v41 = vunpack.c.h.bf16 %v2953_v4  ;;  %v3268_v60 = vunpack.c.h.bf16 %v3169_v15 }
 0x388   : > { %3847 = vst [vmem:[%s7488_s3 + $0x180] sm:$0xff] %v3703_v1  ;;  %3848 = vst [vmem:[%s7488_s3 + $0x188] sm:$0xff] %v3704_v62  ;;  %v3558_v16 = vmul.f32 %v6267_v18, %v3410_v39  ;;  %v3411_v54 = vsel %vm6286_vm2, %v3051_v26, %v3267_v6  ;;  %v3053_v46 = vunpack.c.l.bf16 %v2954_v37  ;;  %v3269_v9 = vunpack.c.l.bf16 %v3170_v7  ;;  %v3175_v1 = vld [vmem:[#allocation3 + $0x100] sm:$0xff] }
 0x389   : > { %v3705_v28 = vadd.f32 %v6291_v25, %v3557_v19  ;;  %v3559_v13 = vmul.f32 %v6267_v18, %v3411_v54  ;;  %v3412_v57 = vsel %vm6286_vm2, %v3052_v41, %v3268_v60  ;;  %v3054_v44 = vunpack.c.h.bf16 %v2954_v37  ;;  %v2960_v54 = vld [vmem:[#allocation2 + $0x108] sm:$0xff] }
 0x38a   : > { %v3706_v10 = vadd.f32 %v6291_v25, %v3558_v16  ;;  %v3560_v61 = vmul.f32 %v6267_v18, %v3412_v57  ;;  %v3413_v49 = vsel %vm6286_vm2, %v3053_v46, %v3269_v9  ;;  %v3270_v59 = vunpack.c.h.bf16 %v3170_v7  ;;  %v2959_v7 = vld [vmem:[#allocation2 + $0x100] sm:$0xff] }
 0x38b   : > { %3849 = vst [vmem:[%s7488_s3 + $0x190] sm:$0xff] %v3705_v28  ;;  %v3707_v8 = vadd.f32 %v6291_v25, %v3559_v13  ;;  %v3561_v47 = vmul.f32 %v6267_v18, %v3413_v49  ;;  %v3055_v20 = vunpack.c.l.bf16 %v2955_v45  ;;  %v3271_v22 = vunpack.c.l.bf16 %v3171_v2  ;;  %v3176_v28 = vld [vmem:[#allocation3 + $0x108] sm:$0xff] }
 0x38c   : > { %3850 = vst [vmem:[%s7488_s3 + $0x198] sm:$0xff] %v3706_v10  ;;  %v3708_v29 = vadd.f32 %v6291_v25, %v3560_v61  ;;  %v3414_v11 = vsel %vm6286_vm2, %v3054_v44, %v3270_v59  ;;  %v3056_v63 = vunpack.c.h.bf16 %v2955_v45  ;;  %v3272_v31 = vunpack.c.h.bf16 %v3171_v2  ;;  %v2961_v61 = vld [vmem:[#allocation2 + $0x110] sm:$0xff] }
 0x38d   : > { %3851 = vst [vmem:[%s7488_s3 + $0x1a0] sm:$0xff] %v3707_v8  ;;  %v3709_v30 = vadd.f32 %v6291_v25, %v3561_v47  ;;  %v3562_v53 = vmul.f32 %v6267_v18, %v3414_v11  ;;  %v3415_v33 = vsel %vm6286_vm2, %v3055_v20, %v3271_v22  ;;  %v3057_v34 = vunpack.c.l.bf16 %v2956_v36  ;;  %v3177_v47 = vld [vmem:[#allocation3 + $0x110] sm:$0xff] }
 0x38e   : > { %3852 = vst [vmem:[%s7488_s3 + $0x1a8] sm:$0xff] %v3708_v29  ;;  %v3563_v35 = vmul.f32 %v6267_v18, %v3415_v33  ;;  %v3416_v21 = vsel %vm6286_vm2, %v3056_v63, %v3272_v31  ;;  %v3273_v5 = vunpack.c.l.bf16 %v3172_v50  ;;  %v3058_v40 = vunpack.c.h.bf16 %v2956_v36 }
 0x38f   : > { %3853 = vst [vmem:[%s7488_s3 + $0x1b0] sm:$0xff] %v3709_v30  ;;  %v3710_v52 = vadd.f32 %v6291_v25, %v3562_v53  ;;  %v3564_v55 = vmul.f32 %v6267_v18, %v3416_v21  ;;  %v3274_v58 = vunpack.c.h.bf16 %v3172_v50  ;;  %v3059_v4 = vunpack.c.l.bf16 %v2957_v51  ;;  %v2962_v30 = vld [vmem:[#allocation2 + $0x118] sm:$0xff] }
 0x390   : > { %v3711_v0 = vadd.f32 %v6291_v25, %v3563_v35  ;;  %v3417_v12 = vsel %vm6286_vm2, %v3057_v34, %v3273_v5  ;;  %v3275_v15 = vunpack.c.l.bf16 %v3173_v56  ;;  %v3060_v27 = vunpack.c.h.bf16 %v2957_v51  ;;  %v3178_v53 = vld [vmem:[#allocation3 + $0x118] sm:$0xff] }
 0x391   : > { %3854 = vst [vmem:[%s7488_s3 + $0x1b8] sm:$0xff] %v3710_v52  ;;  %v3712_v14 = vadd.f32 %v6291_v25, %v3564_v55  ;;  %v3565_v42 = vmul.f32 %v6267_v18, %v3417_v12  ;;  %v3418_v32 = vsel %vm6286_vm2, %v3058_v40, %v3274_v58  ;;  %v3276_v3 = vunpack.c.h.bf16 %v3173_v56 }
 0x392   : > { %3855 = vst [vmem:[%s7488_s3 + $0x1c0] sm:$0xff] %v3711_v0  ;;  %v3566_v43 = vmul.f32 %v6267_v18, %v3418_v32  ;;  %v3419_v24 = vsel %vm6286_vm2, %v3059_v4, %v3275_v15  ;;  %v3061_v26 = vunpack.c.l.bf16 %v2958_v17  ;;  %v3277_v37 = vunpack.c.l.bf16 %v3174_v38  ;;  %v3179_v0 = vld [vmem:[#allocation3 + $0x120] sm:$0xff] }
 0x393   : > { %3856 = vst [vmem:[%s7488_s3 + $0x1c8] sm:$0xff] %v3712_v14  ;;  %v3713_v62 = vadd.f32 %v6291_v25, %v3565_v42  ;;  %v3567_v23 = vmul.f32 %v6267_v18, %v3419_v24  ;;  %v3420_v6 = vsel %vm6286_vm2, %v3060_v27, %v3276_v3  ;;  %v3062_v19 = vunpack.c.h.bf16 %v2958_v17  ;;  %v2964_v24 = vld [vmem:[#allocation2 + $0x128] sm:$0xff] }
 0x394   : > { %v3714_v39 = vadd.f32 %v6291_v25, %v3566_v43  ;;  %v3568_v41 = vmul.f32 %v6267_v18, %v3420_v6  ;;  %v3421_v60 = vsel %vm6286_vm2, %v3061_v26, %v3277_v37  ;;  %v3278_v16 = vunpack.c.h.bf16 %v3174_v38  ;;  %v2963_v38 = vld [vmem:[#allocation2 + $0x120] sm:$0xff] }
 0x395   : > { %3857 = vst [vmem:[%s7488_s3 + $0x1d0] sm:$0xff] %v3713_v62  ;;  %v3715_v46 = vadd.f32 %v6291_v25, %v3567_v23  ;;  %v3569_v9 = vmul.f32 %v6267_v18, %v3421_v60  ;;  %v3063_v45 = vunpack.c.l.bf16 %v2959_v7  ;;  %v3279_v2 = vunpack.c.l.bf16 %v3175_v1  ;;  %v3180_v62 = vld [vmem:[#allocation3 + $0x128] sm:$0xff] }
 0x396   : > { %3858 = vst [vmem:[%s7488_s3 + $0x1d8] sm:$0xff] %v3714_v39  ;;  %v3716_v13 = vadd.f32 %v6291_v25, %v3568_v41  ;;  %v3422_v57 = vsel %vm6286_vm2, %v3062_v19, %v3278_v16  ;;  %v3064_v44 = vunpack.c.h.bf16 %v2959_v7  ;;  %v3280_v10 = vunpack.c.h.bf16 %v3175_v1  ;;  %v2965_v41 = vld [vmem:[#allocation2 + $0x130] sm:$0xff] }
 0x397   : > { %3859 = vst [vmem:[%s7488_s3 + $0x1e0] sm:$0xff] %v3715_v46  ;;  %v3717_v49 = vadd.f32 %v6291_v25, %v3569_v9  ;;  %v3570_v59 = vmul.f32 %v6267_v18, %v3422_v57  ;;  %v3423_v36 = vsel %vm6286_vm2, %v3063_v45, %v3279_v2  ;;  %v3065_v8 = vunpack.c.l.bf16 %v2960_v54  ;;  %v3181_v9 = vld [vmem:[#allocation3 + $0x130] sm:$0xff] }
 0x398   : > { %3860 = vst [vmem:[%s7488_s3 + $0x1e8] sm:$0xff] %v3716_v13  ;;  %v3571_v20 = vmul.f32 %v6267_v18, %v3423_v36  ;;  %v3424_v22 = vsel %vm6286_vm2, %v3064_v44, %v3280_v10  ;;  %v3281_v50 = vunpack.c.l.bf16 %v3176_v28  ;;  %v3066_v29 = vunpack.c.h.bf16 %v2960_v54 }
 0x399   : > { %3861 = vst [vmem:[%s7488_s3 + $0x1f0] sm:$0xff] %v3717_v49  ;;  %v3718_v11 = vadd.f32 %v6291_v25, %v3570_v59  ;;  %v3572_v63 = vmul.f32 %v6267_v18, %v3424_v22  ;;  %v3282_v31 = vunpack.c.h.bf16 %v3176_v28  ;;  %v3067_v51 = vunpack.c.l.bf16 %v2961_v61  ;;  %v2966_v49 = vld [vmem:[#allocation2 + $0x138] sm:$0xff] }
 0x39a   : > { %v3719_v33 = vadd.f32 %v6291_v25, %v3571_v20  ;;  %v3425_v34 = vsel %vm6286_vm2, %v3065_v8, %v3281_v50  ;;  %v3283_v56 = vunpack.c.l.bf16 %v3177_v47  ;;  %v3068_v35 = vunpack.c.h.bf16 %v2961_v61  ;;  %v3182_v59 = vld [vmem:[#allocation3 + $0x138] sm:$0xff] }
 0x39b   : > { %3862 = vst [vmem:[%s7488_s3 + $0x1f8] sm:$0xff] %v3718_v11  ;;  %v3720_v21 = vadd.f32 %v6291_v25, %v3572_v63  ;;  %v3573_v5 = vmul.f32 %v6267_v18, %v3425_v34  ;;  %v3426_v40 = vsel %vm6286_vm2, %v3066_v29, %v3282_v31  ;;  %v3284_v52 = vunpack.c.h.bf16 %v3177_v47 }
 0x39c   : > { %3863 = vst [vmem:[%s7488_s3 + $0x200] sm:$0xff] %v3719_v33  ;;  %v3574_v55 = vmul.f32 %v6267_v18, %v3426_v40  ;;  %v3427_v58 = vsel %vm6286_vm2, %v3067_v51, %v3283_v56  ;;  %v3069_v4 = vunpack.c.l.bf16 %v2962_v30  ;;  %v3285_v17 = vunpack.c.l.bf16 %v3178_v53  ;;  %v3183_v33 = vld [vmem:[#allocation3 + $0x140] sm:$0xff] }
 0x39d   : > { %3864 = vst [vmem:[%s7488_s3 + $0x208] sm:$0xff] %v3720_v21  ;;  %v3721_v12 = vadd.f32 %v6291_v25, %v3573_v5  ;;  %v3575_v15 = vmul.f32 %v6267_v18, %v3427_v58  ;;  %v3428_v27 = vsel %vm6286_vm2, %v3068_v35, %v3284_v52  ;;  %v3070_v14 = vunpack.c.h.bf16 %v2962_v30  ;;  %v2968_v58 = vld [vmem:[#allocation2 + $0x148] sm:$0xff] }
 0x39e   : > { %v3722_v42 = vadd.f32 %v6291_v25, %v3574_v55  ;;  %v3576_v32 = vmul.f32 %v6267_v18, %v3428_v27  ;;  %v3429_v3 = vsel %vm6286_vm2, %v3069_v4, %v3285_v17  ;;  %v3286_v43 = vunpack.c.h.bf16 %v3178_v53  ;;  %v2967_v53 = vld [vmem:[#allocation2 + $0x140] sm:$0xff] }
 0x39f   : > { %3865 = vst [vmem:[%s7488_s3 + $0x210] sm:$0xff] %v3721_v12  ;;  %v3723_v26 = vadd.f32 %v6291_v25, %v3575_v15  ;;  %v3577_v37 = vmul.f32 %v6267_v18, %v3429_v3  ;;  %v3071_v7 = vunpack.c.l.bf16 %v2963_v38  ;;  %v3287_v1 = vunpack.c.l.bf16 %v3179_v0  ;;  %v3184_v12 = vld [vmem:[#allocation3 + $0x148] sm:$0xff] }
 0x3a0   : > { %3866 = vst [vmem:[%s7488_s3 + $0x218] sm:$0xff] %v3722_v42  ;;  %v3724_v23 = vadd.f32 %v6291_v25, %v3576_v32  ;;  %v3430_v6 = vsel %vm6286_vm2, %v3070_v14, %v3286_v43  ;;  %v3072_v19 = vunpack.c.h.bf16 %v2963_v38  ;;  %v3288_v39 = vunpack.c.h.bf16 %v3179_v0  ;;  %v2969_v32 = vld [vmem:[#allocation2 + $0x150] sm:$0xff] }
 0x3a1   : > { %3867 = vst [vmem:[%s7488_s3 + $0x220] sm:$0xff] %v3723_v26  ;;  %v3725_v60 = vadd.f32 %v6291_v25, %v3577_v37  ;;  %v3578_v16 = vmul.f32 %v6267_v18, %v3430_v6  ;;  %v3431_v54 = vsel %vm6286_vm2, %v3071_v7, %v3287_v1  ;;  %v3073_v46 = vunpack.c.l.bf16 %v2964_v24  ;;  %v3185_v37 = vld [vmem:[#allocation3 + $0x150] sm:$0xff] }
 0x3a2   : > { %3868 = vst [vmem:[%s7488_s3 + $0x228] sm:$0xff] %v3724_v23  ;;  %v3579_v45 = vmul.f32 %v6267_v18, %v3431_v54  ;;  %v3432_v2 = vsel %vm6286_vm2, %v3072_v19, %v3288_v39  ;;  %v3289_v28 = vunpack.c.l.bf16 %v3180_v62  ;;  %v3074_v13 = vunpack.c.h.bf16 %v2964_v24 }
 0x3a3   : > { %3869 = vst [vmem:[%s7488_s3 + $0x230] sm:$0xff] %v3725_v60  ;;  %v3726_v57 = vadd.f32 %v6291_v25, %v3578_v16  ;;  %v3580_v44 = vmul.f32 %v6267_v18, %v3432_v2  ;;  %v3290_v10 = vunpack.c.h.bf16 %v3180_v62  ;;  %v3075_v61 = vunpack.c.l.bf16 %v2965_v41  ;;  %v2970_v60 = vld [vmem:[#allocation2 + $0x158] sm:$0xff] }
 0x3a4   : > { %v3727_v36 = vadd.f32 %v6291_v25, %v3579_v45  ;;  %v3433_v8 = vsel %vm6286_vm2, %v3073_v46, %v3289_v28  ;;  %v3291_v47 = vunpack.c.l.bf16 %v3181_v9  ;;  %v3076_v20 = vunpack.c.h.bf16 %v2965_v41  ;;  %v3186_v16 = vld [vmem:[#allocation3 + $0x158] sm:$0xff] }
 0x3a5   : > { %3870 = vst [vmem:[%s7488_s3 + $0x238] sm:$0xff] %v3726_v57  ;;  %v3728_v22 = vadd.f32 %v6291_v25, %v3580_v44  ;;  %v3581_v50 = vmul.f32 %v6267_v18, %v3433_v8  ;;  %v3434_v29 = vsel %vm6286_vm2, %v3074_v13, %v3290_v10  ;;  %v3292_v11 = vunpack.c.h.bf16 %v3181_v9 }
 0x3a6   : > { %3871 = vst [vmem:[%s7488_s3 + $0x240] sm:$0xff] %v3727_v36  ;;  %v3582_v63 = vmul.f32 %v6267_v18, %v3434_v29  ;;  %v3435_v31 = vsel %vm6286_vm2, %v3075_v61, %v3291_v47  ;;  %v3077_v51 = vunpack.c.l.bf16 %v2966_v49  ;;  %v3293_v30 = vunpack.c.l.bf16 %v3182_v59  ;;  %v3187_v36 = vld [vmem:[#allocation3 + $0x160] sm:$0xff] }
 0x3a7   : > { %3872 = vst [vmem:[%s7488_s3 + $0x248] sm:$0xff] %v3728_v22  ;;  %v3729_v34 = vadd.f32 %v6291_v25, %v3581_v50  ;;  %v3583_v56 = vmul.f32 %v6267_v18, %v3435_v31  ;;  %v3436_v35 = vsel %vm6286_vm2, %v3076_v20, %v3292_v11  ;;  %v3078_v21 = vunpack.c.h.bf16 %v2966_v49  ;;  %v2972_v31 = vld [vmem:[#allocation2 + $0x168] sm:$0xff] }
 0x3a8   : > { %v3730_v5 = vadd.f32 %v6291_v25, %v3582_v63  ;;  %v3584_v40 = vmul.f32 %v6267_v18, %v3436_v35  ;;  %v3437_v52 = vsel %vm6286_vm2, %v3077_v51, %v3293_v30  ;;  %v3294_v55 = vunpack.c.h.bf16 %v3182_v59  ;;  %v2971_v59 = vld [vmem:[#allocation2 + $0x160] sm:$0xff] }
 0x3a9   : > { %3873 = vst [vmem:[%s7488_s3 + $0x250] sm:$0xff] %v3729_v34  ;;  %v3731_v4 = vadd.f32 %v6291_v25, %v3583_v56  ;;  %v3585_v17 = vmul.f32 %v6267_v18, %v3437_v52  ;;  %v3079_v38 = vunpack.c.l.bf16 %v2967_v53  ;;  %v3295_v0 = vunpack.c.l.bf16 %v3183_v33  ;;  %v3188_v34 = vld [vmem:[#allocation3 + $0x168] sm:$0xff] }
 0x3aa   : > { %3874 = vst [vmem:[%s7488_s3 + $0x258] sm:$0xff] %v3730_v5  ;;  %v3732_v15 = vadd.f32 %v6291_v25, %v3584_v40  ;;  %v3438_v27 = vsel %vm6286_vm2, %v3078_v21, %v3294_v55  ;;  %v3080_v14 = vunpack.c.h.bf16 %v2967_v53  ;;  %v3296_v42 = vunpack.c.h.bf16 %v3183_v33  ;;  %v2973_v40 = vld [vmem:[#allocation2 + $0x170] sm:$0xff] }
 0x3ab   : > { %3875 = vst [vmem:[%s7488_s3 + $0x260] sm:$0xff] %v3731_v4  ;;  %v3733_v3 = vadd.f32 %v6291_v25, %v3585_v17  ;;  %v3586_v43 = vmul.f32 %v6267_v18, %v3438_v27  ;;  %v3439_v24 = vsel %vm6286_vm2, %v3079_v38, %v3295_v0  ;;  %v3081_v26 = vunpack.c.l.bf16 %v2968_v58  ;;  %v3189_v17 = vld [vmem:[#allocation3 + $0x170] sm:$0xff] }
 0x3ac   : > { %3876 = vst [vmem:[%s7488_s3 + $0x268] sm:$0xff] %v3732_v15  ;;  %v3587_v7 = vmul.f32 %v6267_v18, %v3439_v24  ;;  %v3440_v1 = vsel %vm6286_vm2, %v3080_v14, %v3296_v42  ;;  %v3297_v62 = vunpack.c.l.bf16 %v3184_v12  ;;  %v3082_v23 = vunpack.c.h.bf16 %v2968_v58 }
 0x3ad   : > { %3877 = vst [vmem:[%s7488_s3 + $0x270] sm:$0xff] %v3733_v3  ;;  %v3734_v6 = vadd.f32 %v6291_v25, %v3586_v43  ;;  %v3588_v19 = vmul.f32 %v6267_v18, %v3440_v1  ;;  %v3298_v39 = vunpack.c.h.bf16 %v3184_v12  ;;  %v3083_v41 = vunpack.c.l.bf16 %v2969_v32  ;;  %v2974_v3 = vld [vmem:[#allocation2 + $0x178] sm:$0xff] }
 0x3ae   : > { %v3735_v54 = vadd.f32 %v6291_v25, %v3587_v7  ;;  %v3441_v46 = vsel %vm6286_vm2, %v3081_v26, %v3297_v62  ;;  %v3299_v9 = vunpack.c.l.bf16 %v3185_v37  ;;  %v3084_v45 = vunpack.c.h.bf16 %v2969_v32  ;;  %v3190_v43 = vld [vmem:[#allocation3 + $0x178] sm:$0xff] }
 0x3af   : > { %3878 = vst [vmem:[%s7488_s3 + $0x278] sm:$0xff] %v3734_v6  ;;  %v3736_v2 = vadd.f32 %v6291_v25, %v3588_v19  ;;  %v3589_v28 = vmul.f32 %v6267_v18, %v3441_v46  ;;  %v3442_v13 = vsel %vm6286_vm2, %v3082_v23, %v3298_v39  ;;  %v3300_v57 = vunpack.c.h.bf16 %v3185_v37 }
 0x3b0   : > { %3879 = vst [vmem:[%s7488_s3 + $0x280] sm:$0xff] %v3735_v54  ;;  %v3590_v44 = vmul.f32 %v6267_v18, %v3442_v13  ;;  %v3443_v10 = vsel %vm6286_vm2, %v3083_v41, %v3299_v9  ;;  %v3085_v61 = vunpack.c.l.bf16 %v2970_v60  ;;  %v3301_v49 = vunpack.c.l.bf16 %v3186_v16  ;;  %v3191_v54 = vld [vmem:[#allocation3 + $0x180] sm:$0xff] }
 0x3b1   : > { %3880 = vst [vmem:[%s7488_s3 + $0x288] sm:$0xff] %v3736_v2  ;;  %v3737_v8 = vadd.f32 %v6291_v25, %v3589_v28  ;;  %v3591_v47 = vmul.f32 %v6267_v18, %v3443_v10  ;;  %v3444_v20 = vsel %vm6286_vm2, %v3084_v45, %v3300_v57  ;;  %v3086_v22 = vunpack.c.h.bf16 %v2970_v60  ;;  %v2976_v10 = vld [vmem:[#allocation2 + $0x188] sm:$0xff] }
 0x3b2   : > { %v3738_v50 = vadd.f32 %v6291_v25, %v3590_v44  ;;  %v3592_v29 = vmul.f32 %v6267_v18, %v3444_v20  ;;  %v3445_v11 = vsel %vm6286_vm2, %v3085_v61, %v3301_v49  ;;  %v3302_v63 = vunpack.c.h.bf16 %v3186_v16  ;;  %v2975_v16 = vld [vmem:[#allocation2 + $0x180] sm:$0xff] }
 0x3b3   : > { %3881 = vst [vmem:[%s7488_s3 + $0x290] sm:$0xff] %v3737_v8  ;;  %v3739_v51 = vadd.f32 %v6291_v25, %v3591_v47  ;;  %v3593_v30 = vmul.f32 %v6267_v18, %v3445_v11  ;;  %v3087_v53 = vunpack.c.l.bf16 %v2971_v59  ;;  %v3303_v33 = vunpack.c.l.bf16 %v3187_v36  ;;  %v3192_v8 = vld [vmem:[#allocation3 + $0x188] sm:$0xff] }
 0x3b4   : > { %3882 = vst [vmem:[%s7488_s3 + $0x298] sm:$0xff] %v3738_v50  ;;  %v3740_v56 = vadd.f32 %v6291_v25, %v3592_v29  ;;  %v3446_v35 = vsel %vm6286_vm2, %v3086_v22, %v3302_v63  ;;  %v3088_v21 = vunpack.c.h.bf16 %v2971_v59  ;;  %v3304_v5 = vunpack.c.h.bf16 %v3187_v36  ;;  %v2977_v29 = vld [vmem:[#allocation2 + $0x190] sm:$0xff] }
 0x3b5   : > { %3883 = vst [vmem:[%s7488_s3 + $0x2a0] sm:$0xff] %v3739_v51  ;;  %v3741_v52 = vadd.f32 %v6291_v25, %v3593_v30  ;;  %v3594_v55 = vmul.f32 %v6267_v18, %v3446_v35  ;;  %v3447_v58 = vsel %vm6286_vm2, %v3087_v53, %v3303_v33  ;;  %v3089_v4 = vunpack.c.l.bf16 %v2972_v31  ;;  %v3193_v30 = vld [vmem:[#allocation3 + $0x190] sm:$0xff] }
 0x3b6   : > { %3884 = vst [vmem:[%s7488_s3 + $0x2a8] sm:$0xff] %v3740_v56  ;;  %v3595_v38 = vmul.f32 %v6267_v18, %v3447_v58  ;;  %v3448_v0 = vsel %vm6286_vm2, %v3088_v21, %v3304_v5  ;;  %v3305_v12 = vunpack.c.l.bf16 %v3188_v34  ;;  %v3090_v15 = vunpack.c.h.bf16 %v2972_v31 }
 0x3b7   : > { %3885 = vst [vmem:[%s7488_s3 + $0x2b0] sm:$0xff] %v3741_v52  ;;  %v3742_v27 = vadd.f32 %v6291_v25, %v3594_v55  ;;  %v3596_v14 = vmul.f32 %v6267_v18, %v3448_v0  ;;  %v3306_v42 = vunpack.c.h.bf16 %v3188_v34  ;;  %v3091_v32 = vunpack.c.l.bf16 %v2973_v40  ;;  %v2978_v52 = vld [vmem:[#allocation2 + $0x198] sm:$0xff] }
 0x3b8   : > { %v3743_v24 = vadd.f32 %v6291_v25, %v3595_v38  ;;  %v3449_v26 = vsel %vm6286_vm2, %v3089_v4, %v3305_v12  ;;  %v3307_v37 = vunpack.c.l.bf16 %v3189_v17  ;;  %v3092_v7 = vunpack.c.h.bf16 %v2973_v40  ;;  %v3194_v55 = vld [vmem:[#allocation3 + $0x198] sm:$0xff] }
 0x3b9   : > { %3886 = vst [vmem:[%s7488_s3 + $0x2b8] sm:$0xff] %v3742_v27  ;;  %v3744_v1 = vadd.f32 %v6291_v25, %v3596_v14  ;;  %v3597_v62 = vmul.f32 %v6267_v18, %v3449_v26  ;;  %v3450_v23 = vsel %vm6286_vm2, %v3090_v15, %v3306_v42  ;;  %v3308_v6 = vunpack.c.h.bf16 %v3189_v17 }
 0x3ba   : > { %3887 = vst [vmem:[%s7488_s3 + $0x2c0] sm:$0xff] %v3743_v24  ;;  %v3598_v19 = vmul.f32 %v6267_v18, %v3450_v23  ;;  %v3451_v39 = vsel %vm6286_vm2, %v3091_v32, %v3307_v37  ;;  %v3093_v41 = vunpack.c.l.bf16 %v2974_v3  ;;  %v3309_v60 = vunpack.c.l.bf16 %v3190_v43  ;;  %v3195_v24 = vld [vmem:[#allocation3 + $0x1a0] sm:$0xff] }
 0x3bb   : > { %3888 = vst [vmem:[%s7488_s3 + $0x2c8] sm:$0xff] %v3744_v1  ;;  %v3745_v46 = vadd.f32 %v6291_v25, %v3597_v62  ;;  %v3599_v9 = vmul.f32 %v6267_v18, %v3451_v39  ;;  %v3452_v45 = vsel %vm6286_vm2, %v3092_v7, %v3308_v6  ;;  %v3094_v2 = vunpack.c.h.bf16 %v2974_v3  ;;  %v2980_v39 = vld [vmem:[#allocation2 + $0x1a8] sm:$0xff] }
 0x3bc   : > { %v3746_v28 = vadd.f32 %v6291_v25, %v3598_v19  ;;  %v3600_v13 = vmul.f32 %v6267_v18, %v3452_v45  ;;  %v3453_v57 = vsel %vm6286_vm2, %v3093_v41, %v3309_v60  ;;  %v3310_v44 = vunpack.c.h.bf16 %v3190_v43  ;;  %v2979_v43 = vld [vmem:[#allocation2 + $0x1a0] sm:$0xff] }
 0x3bd   : > { %3889 = vst [vmem:[%s7488_s3 + $0x2d0] sm:$0xff] %v3745_v46  ;;  %v3747_v61 = vadd.f32 %v6291_v25, %v3599_v9  ;;  %v3601_v49 = vmul.f32 %v6267_v18, %v3453_v57  ;;  %v3095_v59 = vunpack.c.l.bf16 %v2975_v16  ;;  %v3311_v36 = vunpack.c.l.bf16 %v3191_v54  ;;  %v3196_v46 = vld [vmem:[#allocation3 + $0x1a8] sm:$0xff] }
 0x3be   : > { %3890 = vst [vmem:[%s7488_s3 + $0x2d8] sm:$0xff] %v3746_v28  ;;  %v3748_v47 = vadd.f32 %v6291_v25, %v3600_v13  ;;  %v3454_v20 = vsel %vm6286_vm2, %v3094_v2, %v3310_v44  ;;  %v3096_v22 = vunpack.c.h.bf16 %v2975_v16  ;;  %v3312_v50 = vunpack.c.h.bf16 %v3191_v54  ;;  %v2981_v13 = vld [vmem:[#allocation2 + $0x1b0] sm:$0xff] }
 0x3bf   : > { %3891 = vst [vmem:[%s7488_s3 + $0x2e0] sm:$0xff] %v3747_v61  ;;  %v3749_v11 = vadd.f32 %v6291_v25, %v3601_v49  ;;  %v3602_v63 = vmul.f32 %v6267_v18, %v3454_v20  ;;  %v3455_v31 = vsel %vm6286_vm2, %v3095_v59, %v3311_v36  ;;  %v3097_v51 = vunpack.c.l.bf16 %v2976_v10  ;;  %v3197_v49 = vld [vmem:[#allocation3 + $0x1b0] sm:$0xff] }
 0x3c0   : > { %3892 = vst [vmem:[%s7488_s3 + $0x2e8] sm:$0xff] %v3748_v47  ;;  %v3603_v53 = vmul.f32 %v6267_v18, %v3455_v31  ;;  %v3456_v33 = vsel %vm6286_vm2, %v3096_v22, %v3312_v50  ;;  %v3313_v34 = vunpack.c.l.bf16 %v3192_v8  ;;  %v3098_v56 = vunpack.c.h.bf16 %v2976_v10 }
 0x3c1   : > { %3893 = vst [vmem:[%s7488_s3 + $0x2f0] sm:$0xff] %v3749_v11  ;;  %v3750_v35 = vadd.f32 %v6291_v25, %v3602_v63  ;;  %v3604_v21 = vmul.f32 %v6267_v18, %v3456_v33  ;;  %v3314_v5 = vunpack.c.h.bf16 %v3192_v8  ;;  %v3099_v40 = vunpack.c.l.bf16 %v2977_v29  ;;  %v2982_v11 = vld [vmem:[#allocation2 + $0x1b8] sm:$0xff] }
 0x3c2   : > { %v3751_v58 = vadd.f32 %v6291_v25, %v3603_v53  ;;  %v3457_v4 = vsel %vm6286_vm2, %v3097_v51, %v3313_v34  ;;  %v3315_v17 = vunpack.c.l.bf16 %v3193_v30  ;;  %v3100_v38 = vunpack.c.h.bf16 %v2977_v29  ;;  %v3198_v63 = vld [vmem:[#allocation3 + $0x1b8] sm:$0xff] }
 0x3c3   : > { %3894 = vst [vmem:[%s7488_s3 + $0x2f8] sm:$0xff] %v3750_v35  ;;  %v3752_v0 = vadd.f32 %v6291_v25, %v3604_v21  ;;  %v3605_v12 = vmul.f32 %v6267_v18, %v3457_v4  ;;  %v3458_v15 = vsel %vm6286_vm2, %v3098_v56, %v3314_v5  ;;  %v3316_v27 = vunpack.c.h.bf16 %v3193_v30 }
 0x3c4   : > { %3895 = vst [vmem:[%s7488_s3 + $0x300] sm:$0xff] %v3751_v58  ;;  %v3606_v14 = vmul.f32 %v6267_v18, %v3458_v15  ;;  %v3459_v42 = vsel %vm6286_vm2, %v3099_v40, %v3315_v17  ;;  %v3101_v32 = vunpack.c.l.bf16 %v2978_v52  ;;  %v3317_v3 = vunpack.c.l.bf16 %v3194_v55  ;;  %v3199_v58 = vld [vmem:[#allocation3 + $0x1c0] sm:$0xff] }
 0x3c5   : > { %3896 = vst [vmem:[%s7488_s3 + $0x308] sm:$0xff] %v3752_v0  ;;  %v3753_v26 = vadd.f32 %v6291_v25, %v3605_v12  ;;  %v3607_v37 = vmul.f32 %v6267_v18, %v3459_v42  ;;  %v3460_v7 = vsel %vm6286_vm2, %v3100_v38, %v3316_v27  ;;  %v3102_v1 = vunpack.c.h.bf16 %v2978_v52  ;;  %v2984_v42 = vld [vmem:[#allocation2 + $0x1c8] sm:$0xff] }
 0x3c6   : > { %v3754_v62 = vadd.f32 %v6291_v25, %v3606_v14  ;;  %v3608_v23 = vmul.f32 %v6267_v18, %v3460_v7  ;;  %v3461_v6 = vsel %vm6286_vm2, %v3101_v32, %v3317_v3  ;;  %v3318_v19 = vunpack.c.h.bf16 %v3194_v55  ;;  %v2983_v55 = vld [vmem:[#allocation2 + $0x1c0] sm:$0xff] }
 0x3c7   : > { %3897 = vst [vmem:[%s7488_s3 + $0x310] sm:$0xff] %v3753_v26  ;;  %v3755_v41 = vadd.f32 %v6291_v25, %v3607_v37  ;;  %v3609_v60 = vmul.f32 %v6267_v18, %v3461_v6  ;;  %v3103_v16 = vunpack.c.l.bf16 %v2979_v43  ;;  %v3319_v54 = vunpack.c.l.bf16 %v3195_v24  ;;  %v3200_v26 = vld [vmem:[#allocation3 + $0x1c8] sm:$0xff] }
 0x3c8   : > { %3898 = vst [vmem:[%s7488_s3 + $0x318] sm:$0xff] %v3754_v62  ;;  %v3756_v9 = vadd.f32 %v6291_v25, %v3608_v23  ;;  %v3462_v45 = vsel %vm6286_vm2, %v3102_v1, %v3318_v19  ;;  %v3104_v2 = vunpack.c.h.bf16 %v2979_v43  ;;  %v3320_v28 = vunpack.c.h.bf16 %v3195_v24  ;;  %v2985_v23 = vld [vmem:[#allocation2 + $0x1d0] sm:$0xff] }
 0x3c9   : > { %3899 = vst [vmem:[%s7488_s3 + $0x320] sm:$0xff] %v3755_v41  ;;  %v3757_v57 = vadd.f32 %v6291_v25, %v3609_v60  ;;  %v3610_v44 = vmul.f32 %v6267_v18, %v3462_v45  ;;  %v3463_v10 = vsel %vm6286_vm2, %v3103_v16, %v3319_v54  ;;  %v3105_v61 = vunpack.c.l.bf16 %v2980_v39  ;;  %v3201_v60 = vld [vmem:[#allocation3 + $0x1d0] sm:$0xff] }
 0x3ca   : > { %3900 = vst [vmem:[%s7488_s3 + $0x328] sm:$0xff] %v3756_v9  ;;  %v3611_v59 = vmul.f32 %v6267_v18, %v3463_v10  ;;  %v3464_v36 = vsel %vm6286_vm2, %v3104_v2, %v3320_v28  ;;  %v3321_v8 = vunpack.c.l.bf16 %v3196_v46  ;;  %v3106_v47 = vunpack.c.h.bf16 %v2980_v39 }
 0x3cb   : > { %3901 = vst [vmem:[%s7488_s3 + $0x330] sm:$0xff] %v3757_v57  ;;  %v3758_v20 = vadd.f32 %v6291_v25, %v3610_v44  ;;  %v3612_v22 = vmul.f32 %v6267_v18, %v3464_v36  ;;  %v3322_v50 = vunpack.c.h.bf16 %v3196_v46  ;;  %v3107_v29 = vunpack.c.l.bf16 %v2981_v13  ;;  %v2986_v57 = vld [vmem:[#allocation2 + $0x1d8] sm:$0xff] }
 0x3cc   : > { %v3759_v31 = vadd.f32 %v6291_v25, %v3611_v59  ;;  %v3465_v51 = vsel %vm6286_vm2, %v3105_v61, %v3321_v8  ;;  %v3323_v30 = vunpack.c.l.bf16 %v3197_v49  ;;  %v3108_v53 = vunpack.c.h.bf16 %v2981_v13  ;;  %v3202_v44 = vld [vmem:[#allocation3 + $0x1d8] sm:$0xff] }
 0x3cd   : > { %3902 = vst [vmem:[%s7488_s3 + $0x338] sm:$0xff] %v3758_v20  ;;  %v3760_v33 = vadd.f32 %v6291_v25, %v3612_v22  ;;  %v3613_v34 = vmul.f32 %v6267_v18, %v3465_v51  ;;  %v3466_v56 = vsel %vm6286_vm2, %v3106_v47, %v3322_v50  ;;  %v3324_v35 = vunpack.c.h.bf16 %v3197_v49 }
 0x3ce   : > { %3903 = vst [vmem:[%s7488_s3 + $0x340] sm:$0xff] %v3759_v31  ;;  %v3614_v21 = vmul.f32 %v6267_v18, %v3466_v56  ;;  %v3467_v5 = vsel %vm6286_vm2, %v3107_v29, %v3323_v30  ;;  %v3109_v40 = vunpack.c.l.bf16 %v2982_v11  ;;  %v3325_v52 = vunpack.c.l.bf16 %v3198_v63  ;;  %v3203_v31 = vld [vmem:[#allocation3 + $0x1e0] sm:$0xff] }
 0x3cf   : > { %3904 = vst [vmem:[%s7488_s3 + $0x348] sm:$0xff] %v3760_v33  ;;  %v3761_v4 = vadd.f32 %v6291_v25, %v3613_v34  ;;  %v3615_v17 = vmul.f32 %v6267_v18, %v3467_v5  ;;  %v3468_v38 = vsel %vm6286_vm2, %v3108_v53, %v3324_v35  ;;  %v3110_v0 = vunpack.c.h.bf16 %v2982_v11  ;;  %v2988_v5 = vld [vmem:[#allocation2 + $0x1e8] sm:$0xff] }
 0x3d0   : > { %v3762_v12 = vadd.f32 %v6291_v25, %v3614_v21  ;;  %v3616_v15 = vmul.f32 %v6267_v18, %v3468_v38  ;;  %v3469_v27 = vsel %vm6286_vm2, %v3109_v40, %v3325_v52  ;;  %v3326_v14 = vunpack.c.h.bf16 %v3198_v63  ;;  %v2987_v63 = vld [vmem:[#allocation2 + $0x1e0] sm:$0xff] }
 0x3d1   : > { %3905 = vst [vmem:[%s7488_s3 + $0x350] sm:$0xff] %v3761_v4  ;;  %v3763_v32 = vadd.f32 %v6291_v25, %v3615_v17  ;;  %v3617_v3 = vmul.f32 %v6267_v18, %v3469_v27  ;;  %v3111_v43 = vunpack.c.l.bf16 %v2983_v55  ;;  %v3327_v24 = vunpack.c.l.bf16 %v3199_v58  ;;  %v3204_v4 = vld [vmem:[#allocation3 + $0x1e8] sm:$0xff] }
 0x3d2   : > { %3906 = vst [vmem:[%s7488_s3 + $0x358] sm:$0xff] %v3762_v12  ;;  %v3764_v37 = vadd.f32 %v6291_v25, %v3616_v15  ;;  %v3470_v7 = vsel %vm6286_vm2, %v3110_v0, %v3326_v14  ;;  %v3112_v1 = vunpack.c.h.bf16 %v2983_v55  ;;  %v3328_v62 = vunpack.c.h.bf16 %v3199_v58  ;;  %v2989_v15 = vld [vmem:[#allocation2 + $0x1f0] sm:$0xff] }
 0x3d3   : > { %3907 = vst [vmem:[%s7488_s3 + $0x360] sm:$0xff] %v3763_v32  ;;  %v3765_v6 = vadd.f32 %v6291_v25, %v3617_v3  ;;  %v3618_v19 = vmul.f32 %v6267_v18, %v3470_v7  ;;  %v3471_v39 = vsel %vm6286_vm2, %v3111_v43, %v3327_v24  ;;  %v3113_v41 = vunpack.c.l.bf16 %v2984_v42  ;;  %v3205_v3 = vld [vmem:[#allocation3 + $0x1f0] sm:$0xff] }
 0x3d4   : > { %3908 = vst [vmem:[%s7488_s3 + $0x368] sm:$0xff] %v3764_v37  ;;  %v3619_v16 = vmul.f32 %v6267_v18, %v3471_v39  ;;  %v3472_v54 = vsel %vm6286_vm2, %v3112_v1, %v3328_v62  ;;  %v3329_v46 = vunpack.c.l.bf16 %v3200_v26  ;;  %v3114_v9 = vunpack.c.h.bf16 %v2984_v42 }
 0x3d5   : > { %3909 = vst [vmem:[%s7488_s3 + $0x370] sm:$0xff] %v3765_v6  ;;  %v3766_v45 = vadd.f32 %v6291_v25, %v3618_v19  ;;  %v3620_v2 = vmul.f32 %v6267_v18, %v3472_v54  ;;  %v3330_v28 = vunpack.c.h.bf16 %v3200_v26  ;;  %v3115_v13 = vunpack.c.l.bf16 %v2985_v23  ;;  %v2990_v6 = vld [vmem:[#allocation2 + $0x1f8] sm:$0xff] }
 0x3d6   : > { %v3767_v10 = vadd.f32 %v6291_v25, %v3619_v16  ;;  %v3473_v61 = vsel %vm6286_vm2, %v3113_v41, %v3329_v46  ;;  %v3331_v49 = vunpack.c.l.bf16 %v3201_v60  ;;  %v3116_v59 = vunpack.c.h.bf16 %v2985_v23  ;;  %v3206_v19 = vld [vmem:[#allocation3 + $0x1f8] sm:$0xff] }
 0x3d7   : > { %3910 = vst [vmem:[%s7488_s3 + $0x378] sm:$0xff] %v3766_v45  ;;  %v3768_v36 = vadd.f32 %v6291_v25, %v3620_v2  ;;  %v3621_v8 = vmul.f32 %v6267_v18, %v3473_v61  ;;  %v3474_v47 = vsel %vm6286_vm2, %v3114_v9, %v3330_v28  ;;  %v3332_v20 = vunpack.c.h.bf16 %v3201_v60 }
 0x3d8   : > { %3911 = vst [vmem:[%s7488_s3 + $0x380] sm:$0xff] %v3767_v10  ;;  %v3622_v22 = vmul.f32 %v6267_v18, %v3474_v47  ;;  %v3475_v50 = vsel %vm6286_vm2, %v3115_v13, %v3331_v49  ;;  %v3117_v29 = vunpack.c.l.bf16 %v2986_v57  ;;  %v3333_v11 = vunpack.c.l.bf16 %v3202_v44  ;;  %v3207_v10 = vld [vmem:[#allocation3 + $0x200] sm:$0xff] }
 0x3d9   : > { %3912 = vst [vmem:[%s7488_s3 + $0x388] sm:$0xff] %v3768_v36  ;;  %v3769_v51 = vadd.f32 %v6291_v25, %v3621_v8  ;;  %v3623_v30 = vmul.f32 %v6267_v18, %v3475_v50  ;;  %v3476_v53 = vsel %vm6286_vm2, %v3116_v59, %v3332_v20  ;;  %v3118_v33 = vunpack.c.h.bf16 %v2986_v57  ;;  %v2992_v50 = vld [vmem:[#allocation2 + $0x208] sm:$0xff] }
 0x3da   : > { %v3770_v34 = vadd.f32 %v6291_v25, %v3622_v22  ;;  %v3624_v56 = vmul.f32 %v6267_v18, %v3476_v53  ;;  %v3477_v35 = vsel %vm6286_vm2, %v3117_v29, %v3333_v11  ;;  %v3334_v21 = vunpack.c.h.bf16 %v3202_v44  ;;  %v2991_v44 = vld [vmem:[#allocation2 + $0x200] sm:$0xff] }
 0x3db   : > { %3913 = vst [vmem:[%s7488_s3 + $0x390] sm:$0xff] %v3769_v51  ;;  %v3771_v40 = vadd.f32 %v6291_v25, %v3623_v30  ;;  %v3625_v52 = vmul.f32 %v6267_v18, %v3477_v35  ;;  %v3119_v55 = vunpack.c.l.bf16 %v2987_v63  ;;  %v3335_v58 = vunpack.c.l.bf16 %v3203_v31  ;;  %v3208_v51 = vld [vmem:[#allocation3 + $0x208] sm:$0xff] }
 0x3dc   : > { %3914 = vst [vmem:[%s7488_s3 + $0x398] sm:$0xff] %v3770_v34  ;;  %v3772_v17 = vadd.f32 %v6291_v25, %v3624_v56  ;;  %v3478_v38 = vsel %vm6286_vm2, %v3118_v33, %v3334_v21  ;;  %v3120_v0 = vunpack.c.h.bf16 %v2987_v63  ;;  %v3336_v12 = vunpack.c.h.bf16 %v3203_v31  ;;  %v2993_v56 = vld [vmem:[#allocation2 + $0x210] sm:$0xff] }
 0x3dd   : > { %3915 = vst [vmem:[%s7488_s3 + $0x3a0] sm:$0xff] %v3771_v40  ;;  %v3773_v27 = vadd.f32 %v6291_v25, %v3625_v52  ;;  %v3626_v14 = vmul.f32 %v6267_v18, %v3478_v38  ;;  %v3479_v42 = vsel %vm6286_vm2, %v3119_v55, %v3335_v58  ;;  %v3121_v32 = vunpack.c.l.bf16 %v2988_v5  ;;  %v3209_v52 = vld [vmem:[#allocation3 + $0x210] sm:$0xff] }
 0x3de   : > { %3916 = vst [vmem:[%s7488_s3 + $0x3a8] sm:$0xff] %v3772_v17  ;;  %v3627_v43 = vmul.f32 %v6267_v18, %v3479_v42  ;;  %v3480_v24 = vsel %vm6286_vm2, %v3120_v0, %v3336_v12  ;;  %v3337_v26 = vunpack.c.l.bf16 %v3204_v4  ;;  %v3122_v37 = vunpack.c.h.bf16 %v2988_v5 }
 0x3df   : > { %3917 = vst [vmem:[%s7488_s3 + $0x3b0] sm:$0xff] %v3773_v27  ;;  %v3774_v7 = vadd.f32 %v6291_v25, %v3626_v14  ;;  %v3628_v1 = vmul.f32 %v6267_v18, %v3480_v24  ;;  %v3338_v62 = vunpack.c.h.bf16 %v3204_v4  ;;  %v3123_v23 = vunpack.c.l.bf16 %v2989_v15  ;;  %v2994_v27 = vld [vmem:[#allocation2 + $0x218] sm:$0xff] }
 0x3e0   : > { %v3775_v39 = vadd.f32 %v6291_v25, %v3627_v43  ;;  %v3481_v41 = vsel %vm6286_vm2, %v3121_v32, %v3337_v26  ;;  %v3339_v60 = vunpack.c.l.bf16 %v3205_v3  ;;  %v3124_v16 = vunpack.c.h.bf16 %v2989_v15  ;;  %v3210_v14 = vld [vmem:[#allocation3 + $0x218] sm:$0xff] }
 0x3e1   : > { %3918 = vst [vmem:[%s7488_s3 + $0x3b8] sm:$0xff] %v3774_v7  ;;  %v3776_v54 = vadd.f32 %v6291_v25, %v3628_v1  ;;  %v3629_v46 = vmul.f32 %v6267_v18, %v3481_v41  ;;  %v3482_v9 = vsel %vm6286_vm2, %v3122_v37, %v3338_v62  ;;  %v3340_v45 = vunpack.c.h.bf16 %v3205_v3 }
 0x3e2   : > { %3919 = vst [vmem:[%s7488_s3 + $0x3c0] sm:$0xff] %v3775_v39  ;;  %v3630_v2 = vmul.f32 %v6267_v18, %v3482_v9  ;;  %v3483_v28 = vsel %vm6286_vm2, %v3123_v23, %v3339_v60  ;;  %v3125_v13 = vunpack.c.l.bf16 %v2990_v6  ;;  %v3341_v57 = vunpack.c.l.bf16 %v3206_v19  ;;  %v3211_v39 = vld [vmem:[#allocation3 + $0x220] sm:$0xff] }
 0x3e3   : > { %3920 = vst [vmem:[%s7488_s3 + $0x3c8] sm:$0xff] %v3776_v54  ;;  %v3777_v61 = vadd.f32 %v6291_v25, %v3629_v46  ;;  %v3631_v49 = vmul.f32 %v6267_v18, %v3483_v28  ;;  %v3484_v59 = vsel %vm6286_vm2, %v3124_v16, %v3340_v45  ;;  %v3126_v36 = vunpack.c.h.bf16 %v2990_v6  ;;  %v2996_v28 = vld [vmem:[#allocation2 + $0x228] sm:$0xff] }
 0x3e4   : > { %v3778_v8 = vadd.f32 %v6291_v25, %v3630_v2  ;;  %v3632_v47 = vmul.f32 %v6267_v18, %v3484_v59  ;;  %v3485_v20 = vsel %vm6286_vm2, %v3125_v13, %v3341_v57  ;;  %v3342_v22 = vunpack.c.h.bf16 %v3206_v19  ;;  %v2995_v19 = vld [vmem:[#allocation2 + $0x220] sm:$0xff] }
 0x3e5   : > { %3921 = vst [vmem:[%s7488_s3 + $0x3d0] sm:$0xff] %v3777_v61  ;;  %v3779_v29 = vadd.f32 %v6291_v25, %v3631_v49  ;;  %v3633_v11 = vmul.f32 %v6267_v18, %v3485_v20  ;;  %v3127_v63 = vunpack.c.l.bf16 %v2991_v44  ;;  %v3343_v31 = vunpack.c.l.bf16 %v3207_v10  ;;  %v3212_v61 = vld [vmem:[#allocation3 + $0x228] sm:$0xff] }
 0x3e6   : > { %3922 = vst [vmem:[%s7488_s3 + $0x3d8] sm:$0xff] %v3778_v8  ;;  %v3780_v30 = vadd.f32 %v6291_v25, %v3632_v47  ;;  %v3486_v53 = vsel %vm6286_vm2, %v3126_v36, %v3342_v22  ;;  %v3128_v33 = vunpack.c.h.bf16 %v2991_v44  ;;  %v3344_v34 = vunpack.c.h.bf16 %v3207_v10  ;;  %v2997_v47 = vld [vmem:[#allocation2 + $0x230] sm:$0xff] }
 0x3e7   : > { %3923 = vst [vmem:[%s7488_s3 + $0x3e0] sm:$0xff] %v3779_v29  ;;  %v3781_v35 = vadd.f32 %v6291_v25, %v3633_v11  ;;  %v3634_v21 = vmul.f32 %v6267_v18, %v3486_v53  ;;  %v3487_v5 = vsel %vm6286_vm2, %v3127_v63, %v3343_v31  ;;  %v3129_v40 = vunpack.c.l.bf16 %v2992_v50  ;;  %v3213_v11 = vld [vmem:[#allocation3 + $0x230] sm:$0xff] }
 0x3e8   : > { %3924 = vst [vmem:[%s7488_s3 + $0x3e8] sm:$0xff] %v3780_v30  ;;  %v3635_v55 = vmul.f32 %v6267_v18, %v3487_v5  ;;  %v3488_v58 = vsel %vm6286_vm2, %v3128_v33, %v3344_v34  ;;  %v3345_v4 = vunpack.c.l.bf16 %v3208_v51  ;;  %v3130_v17 = vunpack.c.h.bf16 %v2992_v50 }
 0x3e9   : > { %3925 = vst [vmem:[%s7488_s3 + $0x3f0] sm:$0xff] %v3781_v35  ;;  %v3782_v38 = vadd.f32 %v6291_v25, %v3634_v21  ;;  %v3636_v0 = vmul.f32 %v6267_v18, %v3488_v58  ;;  %v3346_v12 = vunpack.c.h.bf16 %v3208_v51  ;;  %v3131_v15 = vunpack.c.l.bf16 %v2993_v56  ;;  %v2998_v35 = vld [vmem:[#allocation2 + $0x238] sm:$0xff] }
 0x3ea   : > { %v3783_v42 = vadd.f32 %v6291_v25, %v3635_v55  ;;  %v3489_v32 = vsel %vm6286_vm2, %v3129_v40, %v3345_v4  ;;  %v3347_v3 = vunpack.c.l.bf16 %v3209_v52  ;;  %v3132_v43 = vunpack.c.h.bf16 %v2993_v56  ;;  %v3214_v21 = vld [vmem:[#allocation3 + $0x238] sm:$0xff] }
 0x3eb   : > { %3926 = vst [vmem:[%s7488_s3 + $0x3f8] sm:$0xff] %v3782_v38  ;;  %v3784_v24 = vadd.f32 %v6291_v25, %v3636_v0  ;;  %v3637_v26 = vmul.f32 %v6267_v18, %v3489_v32  ;;  %v3490_v37 = vsel %vm6286_vm2, %v3130_v17, %v3346_v12  ;;  %v3348_v7 = vunpack.c.h.bf16 %v3209_v52 }
 0x3ec   : > { %3927 = vst [vmem:[%s7488_s3 + $0x400] sm:$0xff] %v3783_v42  ;;  %v3638_v1 = vmul.f32 %v6267_v18, %v3490_v37  ;;  %v3491_v62 = vsel %vm6286_vm2, %v3131_v15, %v3347_v3  ;;  %v3133_v23 = vunpack.c.l.bf16 %v2994_v27  ;;  %v3349_v6 = vunpack.c.l.bf16 %v3210_v14 }
 0x3ed   : > { %3928 = vst [vmem:[%s7488_s3 + $0x408] sm:$0xff] %v3784_v24  ;;  %v3785_v41 = vadd.f32 %v6291_v25, %v3637_v26  ;;  %v3639_v60 = vmul.f32 %v6267_v18, %v3491_v62  ;;  %v3492_v16 = vsel %vm6286_vm2, %v3132_v43, %v3348_v7  ;;  %v3134_v54 = vunpack.c.h.bf16 %v2994_v27 }
 0x3ee   : > { %v3786_v46 = vadd.f32 %v6291_v25, %v3638_v1  ;;  %v3640_v9 = vmul.f32 %v6267_v18, %v3492_v16  ;;  %v3493_v45 = vsel %vm6286_vm2, %v3133_v23, %v3349_v6  ;;  %v3350_v2 = vunpack.c.h.bf16 %v3210_v14 }
 0x3ef   : > { %3929 = vst [vmem:[%s7488_s3 + $0x410] sm:$0xff] %v3785_v41  ;;  %v3787_v13 = vadd.f32 %v6291_v25, %v3639_v60  ;;  %v3641_v57 = vmul.f32 %v6267_v18, %v3493_v45  ;;  %v3135_v44 = vunpack.c.l.bf16 %v2995_v19  ;;  %v3351_v10 = vunpack.c.l.bf16 %v3211_v39 }
 0x3f0   : > { %3930 = vst [vmem:[%s7488_s3 + $0x418] sm:$0xff] %v3786_v46  ;;  %v3788_v49 = vadd.f32 %v6291_v25, %v3640_v9  ;;  %v3494_v59 = vsel %vm6286_vm2, %v3134_v54, %v3350_v2  ;;  %v3136_v36 = vunpack.c.h.bf16 %v2995_v19  ;;  %v3352_v8 = vunpack.c.h.bf16 %v3211_v39 }
 0x3f1   : > { %3931 = vst [vmem:[%s7488_s3 + $0x420] sm:$0xff] %v3787_v13  ;;  %v3789_v20 = vadd.f32 %v6291_v25, %v3641_v57  ;;  %v3642_v22 = vmul.f32 %v6267_v18, %v3494_v59  ;;  %v3495_v50 = vsel %vm6286_vm2, %v3135_v44, %v3351_v10  ;;  %v3137_v29 = vunpack.c.l.bf16 %v2996_v28 }
 0x3f2   : > { %3932 = vst [vmem:[%s7488_s3 + $0x428] sm:$0xff] %v3788_v49  ;;  %v3643_v63 = vmul.f32 %v6267_v18, %v3495_v50  ;;  %v3496_v31 = vsel %vm6286_vm2, %v3136_v36, %v3352_v8  ;;  %v3353_v51 = vunpack.c.l.bf16 %v3212_v61  ;;  %v3138_v30 = vunpack.c.h.bf16 %v2996_v28 }
 0x3f3   : > { %3933 = vst [vmem:[%s7488_s3 + $0x430] sm:$0xff] %v3789_v20  ;;  %v3790_v53 = vadd.f32 %v6291_v25, %v3642_v22  ;;  %v3644_v33 = vmul.f32 %v6267_v18, %v3496_v31  ;;  %v3354_v34 = vunpack.c.h.bf16 %v3212_v61  ;;  %v3139_v56 = vunpack.c.l.bf16 %v2997_v47 }
 0x3f4   : > { %v3791_v5 = vadd.f32 %v6291_v25, %v3643_v63  ;;  %v3497_v40 = vsel %vm6286_vm2, %v3137_v29, %v3353_v51  ;;  %v3355_v52 = vunpack.c.l.bf16 %v3213_v11  ;;  %v3140_v55 = vunpack.c.h.bf16 %v2997_v47 }
 0x3f5   : > { %3934 = vst [vmem:[%s7488_s3 + $0x438] sm:$0xff] %v3790_v53  ;;  %v3792_v58 = vadd.f32 %v6291_v25, %v3644_v33  ;;  %v3645_v4 = vmul.f32 %v6267_v18, %v3497_v40  ;;  %v3498_v17 = vsel %vm6286_vm2, %v3138_v30, %v3354_v34  ;;  %v3356_v38 = vunpack.c.h.bf16 %v3213_v11 }
 0x3f6   : > { %3935 = vst [vmem:[%s7488_s3 + $0x440] sm:$0xff] %v3791_v5  ;;  %v3646_v0 = vmul.f32 %v6267_v18, %v3498_v17  ;;  %v3499_v12 = vsel %vm6286_vm2, %v3139_v56, %v3355_v52  ;;  %v3141_v15 = vunpack.c.l.bf16 %v2998_v35  ;;  %v3357_v27 = vunpack.c.l.bf16 %v3214_v21 }
 0x3f7   : > { %3936 = vst [vmem:[%s7488_s3 + $0x448] sm:$0xff] %v3792_v58  ;;  %v3793_v14 = vadd.f32 %v6291_v25, %v3645_v4  ;;  %v3647_v42 = vmul.f32 %v6267_v18, %v3499_v12  ;;  %v3500_v32 = vsel %vm6286_vm2, %v3140_v55, %v3356_v38  ;;  %v3142_v3 = vunpack.c.h.bf16 %v2998_v35 }
 0x3f8   : > { %v3794_v43 = vadd.f32 %v6291_v25, %v3646_v0  ;;  %v3648_v24 = vmul.f32 %v6267_v18, %v3500_v32  ;;  %v3501_v26 = vsel %vm6286_vm2, %v3141_v15, %v3357_v27  ;;  %v3358_v37 = vunpack.c.h.bf16 %v3214_v21 }
 0x3f9   : > { %3937 = vst [vmem:[%s7488_s3 + $0x450] sm:$0xff] %v3793_v14  ;;  %v3795_v7 = vadd.f32 %v6291_v25, %v3647_v42  ;;  %v3649_v1 = vmul.f32 %v6267_v18, %v3501_v26 }
 0x3fa   : > { %3938 = vst [vmem:[%s7488_s3 + $0x458] sm:$0xff] %v3794_v43  ;;  %v3796_v62 = vadd.f32 %v6291_v25, %v3648_v24  ;;  %v3502_v23 = vsel %vm6286_vm2, %v3142_v3, %v3358_v37 }
 0x3fb   : > { %3939 = vst [vmem:[%s7488_s3 + $0x460] sm:$0xff] %v3795_v7  ;;  %v3797_v6 = vadd.f32 %v6291_v25, %v3649_v1  ;;  %v3650_v19 = vmul.f32 %v6267_v18, %v3502_v23 }
 0x3fc   : > { %3940 = vst [vmem:[%s7488_s3 + $0x468] sm:$0xff] %v3796_v62 }
 0x3fd   : > { %3941 = vst [vmem:[%s7488_s3 + $0x470] sm:$0xff] %v3797_v6  ;;  %v3798_v39 = vadd.f32 %v6291_v25, %v3650_v19 }
 0x3ff   : > { %3942 = vst [vmem:[%s7488_s3 + $0x478] sm:$0xff] %v3798_v39 }
 0x400 PF: > { %s13_s12 = sadd.s32 1, %s4448_s12  }
 0x401   : > { %p10_p7 = scmp.ge.s32.totalorder %s13_s12, 6  }
 0x403   :  { %12 = sbr.rel (!%p10_p7) target bundleno = 1 (0x1), region = 70 }

// kernel: _lambda_.6
= control target key start
LH: loop header
LB: loop body
LE: loop exit
PB: predicated region body
PF: predicated region fallthrough
CT: control target
= control target key end

     0   :  { %s2066_s12 = smov 0   ;;  %s3209_s0 = inlined_call_operand.vmem [shape: bf16[4,288,288], index: 0, kind: input, shape index: {}]   ;;  %s3210_s1 = inlined_call_operand.vmem [shape: bf16[288,128], index: 1, kind: input, shape index: {}]   ;;  %s3211_s2 = inlined_call_operand.vmem [shape: f32[8,128], index: 2, kind: input, shape index: {}]   ;;  %s3212_s3 = inlined_call_operand.vmem [shape: f32[288,128], index: 3, kind: output, shape index: {}]  }
   0x1 LB: > { %s2072_s13 = sadd.s32 4294967295, %s2041_s12   ;;  %p1741_p0 = scmp.ge.s32.totalorder %s2041_s12, 1  ;;  %s2041_s12 = sphi %s2066_s12, %s13_s12  }
   0x2   : > { %p132_p1 = scmp.lt.s32.totalorder %s2041_s12, 5 }
   0x4   : > { %p133_p2 = pnand %p1741_p0, %p132_p1 }
   0x6   : > { %136 = sbr.rel (%p133_p2) target bundleno = 578 (0x242), region = 32 }
   0xd   : > { %v1943_v0 = vld [vmem:[%s3210_s1] sm:$0xff]   ;;  %v2043_v1 = vmov 0   ;;  %v1944_v2 = vld [vmem:[%s3210_s1 + $0x8] sm:$0xff]   ;;  %p151_p3 = scmp.lt.s32.totalorder %s2072_s13, 3  ;;  %v1945_v3 = vld [vmem:[%s3210_s1 + $0x10] sm:$0xff]   ;;  %vm648_vm0 = vcmask 261120  }
   0xe   : > { %703 = vmatprep.subr.bf16.mxu0 %v2043_v1  ;;  %1899 = vmatprep.subr.bf16.mxu1 %v2043_v1  ;;  %v1946_v4 = vld [vmem:[%s3210_s1 + $0x18] sm:$0xff]   ;;  %v1947_v5 = vld [vmem:[%s3210_s1 + $0x20] sm:$0xff]   ;;  %v1948_v7 = vld [vmem:[%s3210_s1 + $0x28] sm:$0xff]   ;;  %p1834_p4 = scmp.ne.s32.totalorder %s2072_s13, 0 }
   0xf   : > { %704 = vmatpush1.bf16.msra.mxu0 %v1943_v0  ;;  %1915 = vmatpush1.bf16.msra.mxu1 %v1943_v0  ;;  %s152_s20 = scalar_select %p151_p3, %s2072_s13, 3  ;;  %v1949_v9 = vld [vmem:[%s3210_s1 + $0x30] sm:$0xff]   ;;  %v1950_v10 = vld [vmem:[%s3210_s1 + $0x38] sm:$0xff]   ;;  %v1951_v11 = vld [vmem:[%s3210_s1 + $0x40] sm:$0xff]  }
  0x10   : > { %705 = vmatprep.subr.bf16.mxu0 %v2043_v1  ;;  %1900 = vmatprep.subr.bf16.mxu1 %v2043_v1  ;;  %v1952_v12 = vld [vmem:[%s3210_s1 + $0x48] sm:$0xff]   ;;  %v1953_v13 = vld [vmem:[%s3210_s1 + $0x50] sm:$0xff]   ;;  %v1954_v14 = vld [vmem:[%s3210_s1 + $0x58] sm:$0xff]  }
  0x11   : > { %s1931_s23 = smul.u32 432, %s152_s20  ;;  %v1955_v15 = vld [vmem:[%s3210_s1 + $0x60] sm:$0xff]   ;;  %v1956_v16 = vld [vmem:[%s3210_s1 + $0x68] sm:$0xff]   ;;  %v1957_v17 = vld [vmem:[%s3210_s1 + $0x70] sm:$0xff]  }
  0x12   : > { %v1958_v18 = vld [vmem:[%s3210_s1 + $0x78] sm:$0xff]   ;;  %v1971_v19 = vld [vmem:[%s3210_s1 + $0x80] sm:$0xff]   ;;  %v1984_v24 = vld [vmem:[%s3210_s1 + $0x88] sm:$0xff]  }
  0x13   : > { %706 = vmatpush1.bf16.msra.mxu0 %v1944_v2  ;;  %1916 = vmatpush1.bf16.msra.mxu1 %v1944_v2  ;;  %s2104_s28 = scalar_lea.vmem %s3209_s0, %s1931_s23 }
  0x14   : > { %707 = vmatprep.subr.bf16.mxu0 %v2043_v1  ;;  %1901 = vmatprep.subr.bf16.mxu1 %v2043_v1  ;;  %v1961_v6 = vld [vmem:[%s2104_s28 + $0x4] ss:$12 sps:$4 sm:$0xff]   ;;  %v1964_v8 = vld [vmem:[%s2104_s28 + $0x154] ss:$12 sps:$4 sm:$0xff]   ;;  %v1965_v22 = vld [vmem:[%s2104_s28 + $0x1c] ss:$12 sps:$4 sm:$0xff]  }
  0x15   : > { %735 = vmatprep.mubr.bf16.mxu0 %v1961_v6  ;;  %847 = vmatprep.mubr.bf16.mxu1 %v1964_v8  ;;  %v1959_v20 = vld [vmem:[%s2104_s28] ss:$12 sps:$4 sm:$0xff]   ;;  %v1962_v21 = vld [vmem:[%s2104_s28 + $0x150] ss:$12 sps:$4 sm:$0xff]   ;;  %v1969_v25 = vld [vmem:[%s2104_s28 + $0x18] ss:$12 sps:$4 sm:$0xff]  }
  0x16   : > { %v1967_v23 = vld [vmem:[%s2104_s28 + $0x16c] ss:$12 sps:$4 sm:$0xff]   ;;  %v1970_v26 = vld [vmem:[%s2104_s28 + $0x168] ss:$12 sps:$4 sm:$0xff]   ;;  %v1974_v28 = vld [vmem:[%s2104_s28 + $0x184] ss:$12 sps:$4 sm:$0xff]  }
  0x17   : > { %708 = vmatpush1.bf16.msra.mxu0 %v1945_v3  ;;  %1917 = vmatpush1.bf16.msra.mxu1 %v1945_v3  ;;  %v1972_v27 = vld [vmem:[%s2104_s28 + $0x34] ss:$12 sps:$4 sm:$0xff]   ;;  %v1976_v29 = vld [vmem:[%s2104_s28 + $0x30] ss:$12 sps:$4 sm:$0xff]   ;;  %v1978_v31 = vld [vmem:[%s2104_s28 + $0x4c] ss:$12 sps:$4 sm:$0xff]  }
  0x18   : > { %709 = vmatprep.subr.bf16.mxu0 %v2043_v1  ;;  %1902 = vmatprep.subr.bf16.mxu1 %v2043_v1  ;;  %v1977_v30 = vld [vmem:[%s2104_s28 + $0x180] ss:$12 sps:$4 sm:$0xff]   ;;  %v1980_v32 = vld [vmem:[%s2104_s28 + $0x19c] ss:$12 sps:$4 sm:$0xff]   ;;  %v1983_v34 = vld [vmem:[%s2104_s28 + $0x198] ss:$12 sps:$4 sm:$0xff]  }
  0x19   : > { %v1982_v33 = vld [vmem:[%s2104_s28 + $0x48] ss:$12 sps:$4 sm:$0xff]   ;;  %v1985_v35 = vld [vmem:[%s2104_s28 + $0x64] ss:$12 sps:$4 sm:$0xff]   ;;  %v1988_v37 = vld [vmem:[%s2104_s28 + $0x60] ss:$12 sps:$4 sm:$0xff]  }
  0x1a   : > { %v1987_v36 = vld [vmem:[%s2104_s28 + $0x8] ss:$12 sps:$4 sm:$0xff]   ;;  %v1989_v38 = vld [vmem:[%s2104_s28 + $0x20] ss:$12 sps:$4 sm:$0xff]   ;;  %v1992_v40 = vld [vmem:[%s2104_s28 + $0x38] ss:$12 sps:$4 sm:$0xff]  }
  0x1b   : > { %710 = vmatpush1.bf16.msra.mxu0 %v1946_v4  ;;  %1918 = vmatpush1.bf16.msra.mxu1 %v1946_v4  ;;  %v1990_v39 = vld [vmem:[%s2104_s28 + $0x7c] ss:$12 sps:$4 sm:$0xff]   ;;  %v1993_v41 = vld [vmem:[%s2104_s28 + $0x78] ss:$12 sps:$4 sm:$0xff]   ;;  %v1995_v43 = vld [vmem:[%s2104_s28 + $0x94] ss:$12 sps:$4 sm:$0xff]  }
  0x1c   : > { %711 = vmatprep.subr.bf16.mxu0 %v2043_v1  ;;  %1903 = vmatprep.subr.bf16.mxu1 %v2043_v1  ;;  %v1994_v42 = vld [vmem:[%s2104_s28 + $0x50] ss:$12 sps:$4 sm:$0xff]   ;;  %v1997_v44 = vld [vmem:[%s2104_s28 + $0x68] ss:$12 sps:$4 sm:$0xff]   ;;  %v1999_v46 = vld [vmem:[%s2104_s28 + $0x80] ss:$12 sps:$4 sm:$0xff]  }
  0x1d   : > { %v1998_v45 = vld [vmem:[%s2104_s28 + $0x90] ss:$12 sps:$4 sm:$0xff]   ;;  %v2000_v47 = vld [vmem:[%s2104_s28 + $0xac] ss:$12 sps:$4 sm:$0xff]   ;;  %v2003_v49 = vld [vmem:[%s2104_s28 + $0xa8] ss:$12 sps:$4 sm:$0xff]  }
  0x1e   : > { %v2002_v48 = vld [vmem:[%s2104_s28 + $0x98] ss:$12 sps:$4 sm:$0xff]   ;;  %v2004_v50 = vld [vmem:[%s2104_s28 + $0xb0] ss:$12 sps:$4 sm:$0xff]   ;;  %v2007_v52 = vld [vmem:[%s2104_s28 + $0xc8] ss:$12 sps:$4 sm:$0xff]  }
  0x1f   : > { %712 = vmatpush1.bf16.msra.mxu0 %v1947_v5  ;;  %1919 = vmatpush1.bf16.msra.mxu1 %v1947_v5  ;;  %v2005_v51 = vld [vmem:[%s2104_s28 + $0xc4] ss:$12 sps:$4 sm:$0xff]   ;;  %v2008_v53 = vld [vmem:[%s2104_s28 + $0xc0] ss:$12 sps:$4 sm:$0xff]   ;;  %v2010_v55 = vld [vmem:[%s2104_s28 + $0xdc] ss:$12 sps:$4 sm:$0xff]  }
  0x20   : > { %713 = vmatprep.subr.bf16.mxu0 %v2043_v1  ;;  %1904 = vmatprep.subr.bf16.mxu1 %v2043_v1  ;;  %v2009_v54 = vld [vmem:[%s2104_s28 + $0xe0] ss:$12 sps:$4 sm:$0xff]   ;;  %v2012_v56 = vld [vmem:[%s2104_s28 + $0xf8] ss:$12 sps:$4 sm:$0xff]   ;;  %v2014_v58 = vld [vmem:[%s2104_s28 + $0x110] ss:$12 sps:$4 sm:$0xff]  }
  0x21   : > { %v2013_v57 = vld [vmem:[%s2104_s28 + $0xd8] ss:$12 sps:$4 sm:$0xff]   ;;  %v2015_v59 = vld [vmem:[%s2104_s28 + $0xf4] ss:$12 sps:$4 sm:$0xff]   ;;  %v2018_v61 = vld [vmem:[%s2104_s28 + $0xf0] ss:$12 sps:$4 sm:$0xff]  }
  0x22   : > { %v2017_v60 = vld [vmem:[%s2104_s28 + $0x128] ss:$12 sps:$4 sm:$0xff]   ;;  %v2019_v62 = vld [vmem:[%s2104_s28 + $0x140] ss:$12 sps:$4 sm:$0xff]   ;;  %v2022_v0 = vld [vmem:[%s2104_s28 + $0x158] ss:$12 sps:$4 sm:$0xff]  }
  0x23   : > { %714 = vmatpush1.bf16.msra.mxu0 %v1948_v7  ;;  %1920 = vmatpush1.bf16.msra.mxu1 %v1948_v7  ;;  %v2020_v63 = vld [vmem:[%s2104_s28 + $0x10c] ss:$12 sps:$4 sm:$0xff]   ;;  %v2024_v2 = vld [vmem:[%s2104_s28 + $0x170] ss:$12 sps:$4 sm:$0xff]   ;;  %v2027_v4 = vld [vmem:[%s2104_s28 + $0x188] ss:$12 sps:$4 sm:$0xff]  }
  0x24   : > { %715 = vmatprep.subr.bf16.mxu0 %v2043_v1  ;;  %1905 = vmatprep.subr.bf16.mxu1 %v2043_v1  ;;  %v2025_v3 = vld [vmem:[%s2104_s28 + $0x124] ss:$12 sps:$4 sm:$0xff]   ;;  %v2028_v5 = vld [vmem:[%s2104_s28 + $0x120] ss:$12 sps:$4 sm:$0xff]   ;;  %v2030_v7 = vld [vmem:[%s2104_s28 + $0x13c] ss:$12 sps:$4 sm:$0xff]  }
  0x25   : > { %v2029_v6 = vld [vmem:[%s2104_s28 + $0x1a0] ss:$12 sps:$4 sm:$0xff]   ;;  %v2032_v8 = vld [vmem:[%s2104_s28 + $0x138] ss:$12 sps:$4 sm:$0xff]  }
  0x27   : > { %716 = vmatpush1.bf16.msra.mxu0 %v1949_v9  ;;  %1921 = vmatpush1.bf16.msra.mxu1 %v1949_v9 }
  0x28   : > { %717 = vmatprep.subr.bf16.mxu0 %v2043_v1  ;;  %1906 = vmatprep.subr.bf16.mxu1 %v2043_v1 }
  0x2b   : > { %718 = vmatpush1.bf16.msra.mxu0 %v1950_v10  ;;  %1922 = vmatpush1.bf16.msra.mxu1 %v1950_v10 }
  0x2c   : > { %719 = vmatprep.subr.bf16.mxu0 %v2043_v1  ;;  %1907 = vmatprep.subr.bf16.mxu1 %v2043_v1 }
  0x2f   : > { %720 = vmatpush1.bf16.msra.mxu0 %v1951_v11  ;;  %1923 = vmatpush1.bf16.msra.mxu1 %v1951_v11 }
  0x30   : > { %721 = vmatprep.subr.bf16.mxu0 %v2043_v1  ;;  %1908 = vmatprep.subr.bf16.mxu1 %v2043_v1 }
  0x33   : > { %722 = vmatpush1.bf16.msra.mxu0 %v1952_v12  ;;  %1924 = vmatpush1.bf16.msra.mxu1 %v1952_v12 }
  0x34   : > { %723 = vmatprep.subr.bf16.mxu0 %v2043_v1  ;;  %1909 = vmatprep.subr.bf16.mxu1 %v2043_v1 }
  0x37   : > { %724 = vmatpush1.bf16.msra.mxu0 %v1953_v13  ;;  %1925 = vmatpush1.bf16.msra.mxu1 %v1953_v13 }
  0x38   : > { %725 = vmatprep.subr.bf16.mxu0 %v2043_v1  ;;  %1910 = vmatprep.subr.bf16.mxu1 %v2043_v1 }
  0x3b   : > { %726 = vmatpush1.bf16.msra.mxu0 %v1954_v14  ;;  %1926 = vmatpush1.bf16.msra.mxu1 %v1954_v14 }
  0x3c   : > { %727 = vmatprep.subr.bf16.mxu0 %v2043_v1  ;;  %1911 = vmatprep.subr.bf16.mxu1 %v2043_v1 }
  0x3f   : > { %728 = vmatpush1.bf16.msra.mxu0 %v1955_v15  ;;  %1927 = vmatpush1.bf16.msra.mxu1 %v1955_v15 }
  0x40   : > { %729 = vmatprep.subr.bf16.mxu0 %v2043_v1  ;;  %1912 = vmatprep.subr.bf16.mxu1 %v2043_v1 }
  0x43   : > { %730 = vmatpush1.bf16.msra.mxu0 %v1956_v16  ;;  %1928 = vmatpush1.bf16.msra.mxu1 %v1956_v16 }
  0x44   : > { %731 = vmatprep.subr.bf16.mxu0 %v2043_v1  ;;  %1913 = vmatprep.subr.bf16.mxu1 %v2043_v1 }
  0x47   : > { %732 = vmatpush1.bf16.msra.mxu0 %v1957_v17  ;;  %1929 = vmatpush1.bf16.msra.mxu1 %v1957_v17 }
  0x48   : > { %733 = vmatprep.subr.bf16.mxu0 %v2043_v1  ;;  %1914 = vmatprep.subr.bf16.mxu1 %v2043_v1  ;;  %v2023_v1 = vld [vmem:[%s2104_s28 + $0x108] ss:$12 sps:$4 sm:$0xff]  }
  0x4b   : > { %734 = vmatpush1.bf16.msra.mxu0 %v1958_v18  ;;  %1930 = vmatpush1.bf16.msra.mxu1 %v1958_v18 }
  0x4c   : > { %1859 = vmatprep.subr.bf16.mxu1 %v1971_v19 }
  0x4e   : > { %736 = vmatmul.mubr.bf16.vlgmr.msra.gmra.mrb[0].mxu0 %v1959_v20  ;;  %848 = vmatmul.mubr.bf16.vlgmr.msra.gmra.mrb[0].mxu1 %v1962_v21 }
  0x4f   : > { %743 = vmatprep.mubr.bf16.mxu0 %v1965_v22  ;;  %855 = vmatprep.mubr.bf16.mxu1 %v1967_v23 }
  0x50   : > { %1860 = vmatpush3.bf16.msra.mxu1 %v1971_v19 }
  0x51   : > { %1861 = vmatprep.subr.bf16.mxu1 %v1984_v24 }
  0x54   : > { %1862 = vmatpush3.bf16.msra.mxu1 %v1984_v24 }
  0x56   : > { %744 = vmatmul.mubr.bf16.gmra.mrb[4].mxu0 %v1969_v25  ;;  %856 = vmatmul.mubr.bf16.gmra.mrb[4].mxu1 %v1970_v26 }
  0x57   : > { %751 = vmatprep.mubr.bf16.mxu0 %v1972_v27  ;;  %863 = vmatprep.mubr.bf16.mxu1 %v1974_v28 }
  0x5e   : > { %752 = vmatmul.mubr.bf16.gmra.mrb[8].mxu0 %v1976_v29  ;;  %864 = vmatmul.mubr.bf16.gmra.mrb[8].mxu1 %v1977_v30 }
  0x5f   : > { %759 = vmatprep.mubr.bf16.mxu0 %v1978_v31  ;;  %871 = vmatprep.mubr.bf16.mxu1 %v1980_v32 }
  0x66   : > { %760 = vmatmul.mubr.bf16.gmra.mrb[12].mxu0 %v1982_v33  ;;  %872 = vmatmul.mubr.bf16.gmra.mrb[12].mxu1 %v1983_v34 }
  0x67   : > { %767 = vmatprep.mubr.bf16.mxu0 %v1985_v35  ;;  %1863 = vmatprep.mubr.msk.bf16.mxu1 %vm648_vm0, %v1987_v36 }
  0x6e   : > { %768 = vmatmul.mubr.bf16.gmra.mrb[16].mxu0 %v1988_v37  ;;  %1864 = vmatmul.mubr.msk.bf16.vlgmr.msra.gmra.mrb[16].mxu1 %vm648_vm0, %v1989_v38 }
  0x6f   : > { %775 = vmatprep.mubr.bf16.mxu0 %v1990_v39  ;;  %1867 = vmatprep.mubr.msk.bf16.mxu1 %vm648_vm0, %v1992_v40 }
  0x76   : > { %776 = vmatmul.mubr.bf16.gmra.mrb[20].mxu0 %v1993_v41  ;;  %1868 = vmatmul.mubr.msk.bf16.gmra.mrb[20].mxu1 %vm648_vm0, %v1994_v42  ;;  %v2260_v41 = vld [vmem:[%s3211_s2] ss:$0 sm:$0xff] }
  0x77   : > { %783 = vmatprep.mubr.bf16.mxu0 %v1995_v43  ;;  %1871 = vmatprep.mubr.msk.bf16.mxu1 %vm648_vm0, %v1997_v44 }
  0x7e   : > { %784 = vmatmul.mubr.bf16.gmra.mrb[24].mxu0 %v1998_v45  ;;  %1872 = vmatmul.mubr.msk.bf16.gmra.mrb[24].mxu1 %vm648_vm0, %v1999_v46 }
  0x7f   : > { %791 = vmatprep.mubr.bf16.mxu0 %v2000_v47  ;;  %1875 = vmatprep.mubr.msk.bf16.mxu1 %vm648_vm0, %v2002_v48 }
  0x86   : > { %792 = vmatmul.mubr.bf16.gmra.mrb[28].mxu0 %v2003_v49  ;;  %1876 = vmatmul.mubr.msk.bf16.gmra.mrb[28].mxu1 %vm648_vm0, %v2004_v50 }
  0x87   : > { %799 = vmatprep.mubr.bf16.mxu0 %v2005_v51  ;;  %1879 = vmatprep.mubr.msk.bf16.mxu1 %vm648_vm0, %v2007_v52 }
  0x8e   : > { %800 = vmatmul.mubr.bf16.gmra.mrb[32].mxu0 %v2008_v53  ;;  %1880 = vmatmul.mubr.msk.bf16.gmra.mrb[32].mxu1 %vm648_vm0, %v2009_v54 }
  0x8f   : > { %807 = vmatprep.mubr.bf16.mxu0 %v2010_v55  ;;  %1883 = vmatprep.mubr.msk.bf16.mxu1 %vm648_vm0, %v2012_v56 }
  0x96   : > { %808 = vmatmul.mubr.bf16.gmra.mrb[36].mxu0 %v2013_v57  ;;  %1884 = vmatmul.mubr.msk.bf16.gmra.mrb[36].mxu1 %vm648_vm0, %v2014_v58 }
  0x97   : > { %815 = vmatprep.mubr.bf16.mxu0 %v2015_v59  ;;  %1887 = vmatprep.mubr.msk.bf16.mxu1 %vm648_vm0, %v2017_v60 }
  0x9e   : > { %816 = vmatmul.mubr.bf16.gmra.mrb[40].mxu0 %v2018_v61  ;;  %1888 = vmatmul.mubr.msk.bf16.gmra.mrb[40].mxu1 %vm648_vm0, %v2019_v62 }
  0x9f   : > { %823 = vmatprep.mubr.bf16.mxu0 %v2020_v63  ;;  %1891 = vmatprep.mubr.msk.bf16.mxu1 %vm648_vm0, %v2022_v0 }
  0xa6   : > { %824 = vmatmul.mubr.bf16.gmra.mrb[44].mxu0 %v2023_v1  ;;  %1892 = vmatmul.mubr.msk.bf16.gmra.mrb[44].mxu1 %vm648_vm0, %v2024_v2 }
  0xa7   : > { %831 = vmatprep.mubr.bf16.mxu0 %v2025_v3  ;;  %1895 = vmatprep.mubr.msk.bf16.mxu1 %vm648_vm0, %v2027_v4 }
  0xae   : > { %832 = vmatmul.mubr.bf16.gmra.mrb[48].mxu0 %v2028_v5  ;;  %1896 = vmatmul.mubr.msk.bf16.gmra.mrb[48].mxu1 %vm648_vm0, %v2029_v6 }
  0xaf   : > { %839 = vmatprep.mubr.bf16.mxu0 %v2030_v7 }
  0xb6   : > { %840 = vmatmul.mubr.bf16.gmra.mrb[52].mxu0 %v2032_v8 }
 0x121   : > { %v737_v9 = vpop.f32.mrb[0].mxu0  ;;  %v2241_v10 = vpop.f32.mrb[0].mxu1 }
 0x122   : > { %v739_v11 = vpop.f32.mrb[1].mxu0  ;;  %v851_v12 = vpop.f32.mrb[1].mxu1  ;;  %v738_v43 = vadd.f32 %v2260_v41, %v737_v9 }
 0x123   : > { %v740_v13 = vpop.f32.mrb[2].mxu0  ;;  %v2243_v14 = vpop.f32.mrb[2].mxu1 }
 0x124   : > { %v742_v15 = vpop.f32.mrb[3].mxu0  ;;  %v854_v16 = vpop.f32.mrb[3].mxu1  ;;  %v741_v50 = vadd.f32 %v2260_v41, %v740_v13 }
 0x129   : > { %v745_v17 = vpop.f32.mrb[4].mxu0  ;;  %v2245_v18 = vpop.f32.mrb[4].mxu1 }
 0x12a   : > { %v747_v19 = vpop.f32.mrb[5].mxu0  ;;  %v859_v20 = vpop.f32.mrb[5].mxu1  ;;  %v746_v42 = vadd.f32 %v2260_v41, %v745_v17 }
 0x12b   : > { %v748_v21 = vpop.f32.mrb[6].mxu0  ;;  %v2247_v22 = vpop.f32.mrb[6].mxu1 }
 0x12c   : > { %v750_v23 = vpop.f32.mrb[7].mxu0  ;;  %v862_v24 = vpop.f32.mrb[7].mxu1  ;;  %v749_v46 = vadd.f32 %v2260_v41, %v748_v21 }
 0x131   : > { %v753_v25 = vpop.f32.mrb[8].mxu0  ;;  %v2249_v26 = vpop.f32.mrb[8].mxu1 }
 0x132   : > { %v755_v27 = vpop.f32.mrb[9].mxu0  ;;  %v867_v28 = vpop.f32.mrb[9].mxu1  ;;  %v754_v1 = vadd.f32 %v2260_v41, %v753_v25 }
 0x133   : > { %v756_v29 = vpop.f32.mrb[10].mxu0  ;;  %v2251_v30 = vpop.f32.mrb[10].mxu1 }
 0x134   : > { %v758_v31 = vpop.f32.mrb[11].mxu0  ;;  %v870_v32 = vpop.f32.mrb[11].mxu1  ;;  %v757_v12 = vadd.f32 %v2260_v41, %v756_v29 }
 0x139   : > { %v761_v33 = vpop.f32.mrb[12].mxu0  ;;  %v2253_v34 = vpop.f32.mrb[12].mxu1 }
 0x13a   : > { %v763_v35 = vpop.f32.mrb[13].mxu0  ;;  %v875_v36 = vpop.f32.mrb[13].mxu1  ;;  %v762_v62 = vadd.f32 %v2260_v41, %v761_v33 }
 0x13b   : > { %v764_v37 = vpop.f32.mrb[14].mxu0  ;;  %v2255_v38 = vpop.f32.mrb[14].mxu1 }
 0x13c   : > { %v766_v39 = vpop.f32.mrb[15].mxu0  ;;  %v878_v40 = vpop.f32.mrb[15].mxu1  ;;  %v765_v6 = vadd.f32 %v2260_v41, %v764_v37 }
 0x141   : > { %v769_v44 = vpop.f32.mrb[16].mxu0  ;;  %v1865_v45 = vpop.f32.mrb[16].mxu1 }
 0x142   : > { %v923_v47 = vadd.f32 %v1865_v45, %v746_v42  ;;  %v771_v48 = vpop.f32.mrb[17].mxu0  ;;  %v914_v49 = vpop.f32.mrb[17].mxu1  ;;  %v770_v33 = vadd.f32 %v2260_v41, %v769_v44 }
 0x143   : > { %v915_v51 = vadd.f32 %v914_v49, %v738_v43  ;;  %v772_v52 = vpop.f32.mrb[18].mxu0  ;;  %v1866_v53 = vpop.f32.mrb[18].mxu1 }
 0x144   : > { %v1059_v54 = vmul.f32 0.05, %v923_v47  ;;  %v926_v55 = vadd.f32 %v1866_v53, %v749_v46  ;;  %v774_v56 = vpop.f32.mrb[19].mxu0  ;;  %v917_v57 = vpop.f32.mrb[19].mxu1 }
 0x145   : > { %v1057_v58 = vmul.f32 0.05, %v915_v51  ;;  %v918_v59 = vadd.f32 %v917_v57, %v741_v50 }
 0x146   : > { %v1060_v60 = vmul.f32 0.05, %v926_v55  ;;  %v2267_v63 = vmax.f32 %v923_v47, %v1059_v54  ;;  %v773_v47 = vadd.f32 %v2260_v41, %v772_v52 }
 0x147   : > { %v1058_v61 = vmul.f32 0.05, %v918_v59  ;;  %v2272_v2 = vmax.f32 %v915_v51, %v1057_v58 }
 0x148   : > { %v2269_v0 = vmax.f32 %v926_v55, %v1060_v60 }
 0x149   : > { %v2274_v3 = vmax.f32 %v918_v59, %v1058_v61  ;;  %v777_v4 = vpop.f32.mrb[20].mxu0  ;;  %v1869_v5 = vpop.f32.mrb[20].mxu1 }
 0x14a   : > { %v2279_v7 = vpack.c.bf16 %v2269_v0, %v2267_v63  ;;  %v939_v8 = vadd.f32 %v1869_v5, %v762_v62  ;;  %v779_v9 = vpop.f32.mrb[21].mxu0  ;;  %v930_v11 = vpop.f32.mrb[21].mxu1  ;;  %v778_v31 = vadd.f32 %v2260_v41, %v777_v4 }
 0x14b   : > { %v2284_v13 = vpack.c.bf16 %v2274_v3, %v2272_v2  ;;  %v931_v15 = vadd.f32 %v930_v11, %v754_v1  ;;  %v780_v16 = vpop.f32.mrb[22].mxu0  ;;  %v1870_v17 = vpop.f32.mrb[22].mxu1 }
 0x14c   : > { %v1063_v19 = vmul.f32 0.05, %v939_v8  ;;  %v942_v20 = vadd.f32 %v1870_v17, %v765_v6  ;;  %v782_v21 = vpop.f32.mrb[23].mxu0  ;;  %v933_v23 = vpop.f32.mrb[23].mxu1  ;;  %v781_v40 = vadd.f32 %v2260_v41, %v780_v16  ;;  %1154 = vst [vmem:[#allocation2 + $0x8] sm:$0xff] (!%p1834_p4), %v2279_v7  ;;  %1172 = vst [vmem:[#allocation3 + $0x8] sm:$0xff] (!%p1834_p4), %v2279_v7 }
 0x14d   : > { %v1061_v24 = vmul.f32 0.05, %v931_v15  ;;  %v934_v25 = vadd.f32 %v933_v23, %v757_v12  ;;  %1153 = vst [vmem:[#allocation2] sm:$0xff] (!%p1834_p4), %v2284_v13  ;;  %1171 = vst [vmem:[#allocation3] sm:$0xff] (!%p1834_p4), %v2284_v13 }
 0x14e   : > { %v1064_v27 = vmul.f32 0.05, %v942_v20  ;;  %v2287_v32 = vmax.f32 %v939_v8, %v1063_v19 }
 0x14f   : > { %v1062_v28 = vmul.f32 0.05, %v934_v25  ;;  %v2292_v35 = vmax.f32 %v931_v15, %v1061_v24 }
 0x150   : > { %v2289_v29 = vmax.f32 %v942_v20, %v1064_v27 }
 0x151   : > { %v2294_v36 = vmax.f32 %v934_v25, %v1062_v28  ;;  %v785_v37 = vpop.f32.mrb[24].mxu0  ;;  %v1873_v39 = vpop.f32.mrb[24].mxu1 }
 0x152   : > { %v2299_v42 = vpack.c.bf16 %v2289_v29, %v2287_v32  ;;  %v955_v43 = vadd.f32 %v1873_v39, %v778_v31  ;;  %v787_v45 = vpop.f32.mrb[25].mxu0  ;;  %v946_v46 = vpop.f32.mrb[25].mxu1  ;;  %v786_v52 = vadd.f32 %v2260_v41, %v785_v37 }
 0x153   : > { %v2304_v44 = vpack.c.bf16 %v2294_v36, %v2292_v35  ;;  %v947_v48 = vadd.f32 %v946_v46, %v770_v33  ;;  %v788_v49 = vpop.f32.mrb[26].mxu0  ;;  %v1874_v50 = vpop.f32.mrb[26].mxu1 }
 0x154   : > { %v1067_v51 = vmul.f32 0.05, %v955_v43  ;;  %v958_v53 = vadd.f32 %v1874_v50, %v781_v40  ;;  %v790_v54 = vpop.f32.mrb[27].mxu0  ;;  %v949_v55 = vpop.f32.mrb[27].mxu1  ;;  %v789_v12 = vadd.f32 %v2260_v41, %v788_v49  ;;  %1156 = vst [vmem:[#allocation2 + $0x18] sm:$0xff] (!%p1834_p4), %v2299_v42  ;;  %1174 = vst [vmem:[#allocation3 + $0x18] sm:$0xff] (!%p1834_p4), %v2299_v42 }
 0x155   : > { %v1065_v56 = vmul.f32 0.05, %v947_v48  ;;  %v950_v57 = vadd.f32 %v949_v55, %v773_v47  ;;  %1155 = vst [vmem:[#allocation2 + $0x10] sm:$0xff] (!%p1834_p4), %v2304_v44  ;;  %1173 = vst [vmem:[#allocation3 + $0x10] sm:$0xff] (!%p1834_p4), %v2304_v44 }
 0x156   : > { %v1068_v58 = vmul.f32 0.05, %v958_v53  ;;  %v2306_v60 = vmax.f32 %v955_v43, %v1067_v51 }
 0x157   : > { %v1066_v59 = vmul.f32 0.05, %v950_v57  ;;  %v2311_v62 = vmax.f32 %v947_v48, %v1065_v56 }
 0x158   : > { %v2308_v61 = vmax.f32 %v958_v53, %v1068_v58 }
 0x159   : > { %v2313_v1 = vmax.f32 %v950_v57, %v1066_v59  ;;  %v793_v4 = vpop.f32.mrb[28].mxu0  ;;  %v1877_v5 = vpop.f32.mrb[28].mxu1 }
 0x15a   : > { %v2317_v6 = vpack.c.bf16 %v2308_v61, %v2306_v60  ;;  %v794_v8 = vadd.f32 %v2260_v41, %v793_v4  ;;  %v795_v9 = vpop.f32.mrb[29].mxu0  ;;  %v962_v11 = vpop.f32.mrb[29].mxu1 }
 0x15b   : > { %v2323_v15 = vpack.c.bf16 %v2313_v1, %v2311_v62  ;;  %v963_v16 = vadd.f32 %v962_v11, %v786_v52  ;;  %v796_v17 = vpop.f32.mrb[30].mxu0  ;;  %v1878_v19 = vpop.f32.mrb[30].mxu1 }
 0x15c   : > { %v971_v20 = vadd.f32 %v1877_v5, %v794_v8  ;;  %v797_v21 = vadd.f32 %v2260_v41, %v796_v17  ;;  %v798_v23 = vpop.f32.mrb[31].mxu0  ;;  %v965_v24 = vpop.f32.mrb[31].mxu1  ;;  %1158 = vst [vmem:[#allocation2 + $0x28] sm:$0xff] (!%p1834_p4), %v2317_v6  ;;  %1176 = vst [vmem:[#allocation3 + $0x28] sm:$0xff] (!%p1834_p4), %v2317_v6 }
 0x15d   : > { %v1069_v25 = vmul.f32 0.05, %v963_v16  ;;  %v966_v27 = vadd.f32 %v965_v24, %v789_v12  ;;  %1157 = vst [vmem:[#allocation2 + $0x20] sm:$0xff] (!%p1834_p4), %v2323_v15  ;;  %1175 = vst [vmem:[#allocation3 + $0x20] sm:$0xff] (!%p1834_p4), %v2323_v15 }
 0x15e   : > { %v1071_v28 = vmul.f32 0.05, %v971_v20  ;;  %v974_v31 = vadd.f32 %v1878_v19, %v797_v21 }
 0x15f   : > { %v1070_v33 = vmul.f32 0.05, %v966_v27  ;;  %v2326_v39 = vmax.f32 %v963_v16, %v1069_v25 }
 0x160   : > { %v1072_v37 = vmul.f32 0.05, %v974_v31  ;;  %v2330_v46 = vmax.f32 %v971_v20, %v1071_v28 }
 0x161   : > { %v2328_v40 = vmax.f32 %v966_v27, %v1070_v33  ;;  %v801_v43 = vpop.f32.mrb[32].mxu0  ;;  %v1881_v45 = vpop.f32.mrb[32].mxu1 }
 0x162   : > { %v2332_v47 = vmax.f32 %v974_v31, %v1072_v37  ;;  %v802_v48 = vadd.f32 %v2260_v41, %v801_v43  ;;  %v803_v49 = vpop.f32.mrb[33].mxu0  ;;  %v978_v50 = vpop.f32.mrb[33].mxu1 }
 0x163   : > { %v2337_v51 = vpack.c.bf16 %v2328_v40, %v2326_v39  ;;  %v804_v53 = vpop.f32.mrb[34].mxu0  ;;  %v1882_v54 = vpop.f32.mrb[34].mxu1 }
 0x164   : > { %v2341_v55 = vpack.c.bf16 %v2332_v47, %v2330_v46  ;;  %v805_v56 = vadd.f32 %v2260_v41, %v804_v53  ;;  %v979_v57 = vadd.f32 %v978_v50, %v802_v48  ;;  %v806_v58 = vpop.f32.mrb[35].mxu0  ;;  %v981_v59 = vpop.f32.mrb[35].mxu1 }
 0x165   : > { %1159 = vst [vmem:[#allocation2 + $0x30] sm:$0xff] (!%p1834_p4), %v2337_v51  ;;  %1177 = vst [vmem:[#allocation3 + $0x30] sm:$0xff] (!%p1834_p4), %v2337_v51 }
 0x166   : > { %v1073_v52 = vmul.f32 0.05, %v979_v57  ;;  %v982_v4 = vadd.f32 %v981_v59, %v805_v56  ;;  %1160 = vst [vmem:[#allocation2 + $0x38] sm:$0xff] (!%p1834_p4), %v2341_v55  ;;  %1178 = vst [vmem:[#allocation3 + $0x38] sm:$0xff] (!%p1834_p4), %v2341_v55 }
 0x168   : > { %v1074_v5 = vmul.f32 0.05, %v982_v4  ;;  %v2344_v11 = vmax.f32 %v979_v57, %v1073_v52 }
 0x169   : > { %v809_v8 = vpop.f32.mrb[36].mxu0  ;;  %v1885_v9 = vpop.f32.mrb[36].mxu1 }
 0x16a   : > { %v2346_v12 = vmax.f32 %v982_v4, %v1074_v5  ;;  %v810_v16 = vadd.f32 %v2260_v41, %v809_v8  ;;  %v811_v17 = vpop.f32.mrb[37].mxu0  ;;  %v994_v19 = vpop.f32.mrb[37].mxu1 }
 0x16b   : > { %v812_v20 = vpop.f32.mrb[38].mxu0  ;;  %v1886_v21 = vpop.f32.mrb[38].mxu1  ;;  %v858_v17 = vadd.f32 %v2260_v41, %v2245_v18  ;;  %v861_v18 = vadd.f32 %v2260_v41, %v2247_v22 }
 0x16c   : > { %v2351_v23 = vpack.c.bf16 %v2346_v12, %v2344_v11  ;;  %v987_v24 = vadd.f32 %v1881_v45, %v810_v16  ;;  %v813_v25 = vadd.f32 %v2260_v41, %v812_v20  ;;  %v814_v27 = vpop.f32.mrb[39].mxu0  ;;  %v997_v28 = vpop.f32.mrb[39].mxu1 }
 0x16e   : > { %v1075_v31 = vmul.f32 0.05, %v987_v24  ;;  %v990_v33 = vadd.f32 %v1882_v54, %v813_v25  ;;  %1161 = vst [vmem:[#allocation2 + $0x40] sm:$0xff] (!%p1834_p4), %v2351_v23  ;;  %1179 = vst [vmem:[#allocation3 + $0x40] sm:$0xff] (!%p1834_p4), %v2351_v23 }
 0x170   : > { %v1076_v37 = vmul.f32 0.05, %v990_v33  ;;  %v2356_v49 = vmax.f32 %v987_v24, %v1075_v31  ;;  %v850_v24 = vadd.f32 %v2260_v41, %v2241_v10 }
 0x171   : > { %v817_v43 = vpop.f32.mrb[40].mxu0  ;;  %v2354_v48 = vpop.f32.mrb[40].mxu1 }
 0x172   : > { %v2358_v50 = vmax.f32 %v990_v33, %v1076_v37  ;;  %v818_v53 = vadd.f32 %v2260_v41, %v817_v43  ;;  %v819_v56 = vpop.f32.mrb[41].mxu0  ;;  %v1010_v57 = vpop.f32.mrb[41].mxu1 }
 0x173   : > { %v820_v58 = vpop.f32.mrb[42].mxu0  ;;  %v2361_v45 = vpop.f32.mrb[42].mxu1 }
 0x174   : > { %3225 = vst [vmem:[#allocation6_spill] sm:$0xff] %v2358_v50  ;;  %v2365_v59 = vpack.c.bf16 %v2358_v50, %v2356_v49  ;;  %v995_v54 = vadd.f32 %v994_v19, %v818_v53  ;;  %v821_v52 = vadd.f32 %v2260_v41, %v820_v58  ;;  %v822_v4 = vpop.f32.mrb[43].mxu0  ;;  %v2368_v5 = vpop.f32.mrb[43].mxu1 }
 0x176   : > { %v1077_v8 = vmul.f32 0.05, %v995_v54  ;;  %v998_v16 = vadd.f32 %v997_v28, %v821_v52  ;;  %v853_v28 = vadd.f32 %v2260_v41, %v2243_v14  ;;  %1162 = vst [vmem:[#allocation2 + $0x48] sm:$0xff] (!%p1834_p4), %v2365_v59  ;;  %1180 = vst [vmem:[#allocation3 + $0x48] sm:$0xff] (!%p1834_p4), %v2365_v59 }
 0x178   : > { %v1078_v20 = vmul.f32 0.05, %v998_v16  ;;  %v2374_v31 = vmax.f32 %v995_v54, %v1077_v8 }
 0x179   : > { %v825_v25 = vpop.f32.mrb[44].mxu0  ;;  %v1893_v27 = vpop.f32.mrb[44].mxu1 }
 0x17a   : > { %v2376_v33 = vmax.f32 %v998_v16, %v1078_v20  ;;  %v826_v19 = vadd.f32 %v2260_v41, %v825_v25  ;;  %v1035_v37 = vadd.f32 %v1893_v27, %v858_v17  ;;  %v827_v43 = vpop.f32.mrb[45].mxu0  ;;  %v1026_v53 = vpop.f32.mrb[45].mxu1 }
 0x17b   : > { %v1027_v56 = vadd.f32 %v1026_v53, %v850_v24  ;;  %v828_v58 = vpop.f32.mrb[46].mxu0  ;;  %v1894_v10 = vpop.f32.mrb[46].mxu1  ;;  %v866_v24 = vadd.f32 %v2260_v41, %v2249_v26  ;;  %v869_v53 = vadd.f32 %v2260_v41, %v2251_v30 }
 0x17c   : > { %3226 = vst [vmem:[#allocation7_spill] sm:$0xff] %v2376_v33  ;;  %v2385_v54 = vpack.c.bf16 %v2376_v33, %v2374_v31  ;;  %v1003_v52 = vadd.f32 %v1885_v9, %v826_v19  ;;  %v829_v4 = vadd.f32 %v2260_v41, %v828_v58  ;;  %v830_v8 = vpop.f32.mrb[47].mxu0  ;;  %v1029_v16 = vpop.f32.mrb[47].mxu1  ;;  %v1087_v17 = vmul.f32 0.05, %v1035_v37 }
 0x17d   : > { %v1085_v20 = vmul.f32 0.05, %v1027_v56  ;;  %v1038_v25 = vadd.f32 %v1894_v10, %v861_v18  ;;  %v1030_v27 = vadd.f32 %v1029_v16, %v853_v28  ;;  %v874_v9 = vadd.f32 %v2260_v41, %v2253_v34 }
 0x17e   : > { %v1079_v14 = vmul.f32 0.05, %v1003_v52  ;;  %v1006_v43 = vadd.f32 %v1886_v21, %v829_v4  ;;  %v2394_v58 = vmax.f32 %v1035_v37, %v1087_v17  ;;  %v877_v37 = vadd.f32 %v2260_v41, %v2255_v38  ;;  %1163 = vst [vmem:[#allocation2 + $0x50] sm:$0xff] (!%p1834_p4), %v2385_v54  ;;  %1181 = vst [vmem:[#allocation3 + $0x50] sm:$0xff] (!%p1834_p4), %v2385_v54 }
 0x17f   : > { %v1088_v50 = vmul.f32 0.05, %v1038_v25  ;;  %v1086_v22 = vmul.f32 0.05, %v1030_v27  ;;  %v2396_v8 = vmax.f32 %v1027_v56, %v1085_v20 }
 0x180   : > { %v1080_v19 = vmul.f32 0.05, %v1006_v43  ;;  %3227 = vst [vmem:[#allocation8_spill] sm:$0xff] %v2394_v58  ;;  %v2402_v4 = vmax.f32 %v1003_v52, %v1079_v14 }
 0x181   : > { %3228 = vst [vmem:[#allocation9_spill] sm:$0xff] %v2396_v8  ;;  %v2398_v18 = vmax.f32 %v1038_v25, %v1088_v50  ;;  %v2400_v28 = vmax.f32 %v1030_v27, %v1086_v22  ;;  %v833_v21 = vpop.f32.mrb[48].mxu0  ;;  %v1897_v10 = vpop.f32.mrb[48].mxu1 }
 0x182   : > { %v2404_v26 = vmax.f32 %v1006_v43, %v1080_v19  ;;  %v834_v30 = vadd.f32 %v2260_v41, %v833_v21  ;;  %v1051_v16 = vadd.f32 %v1897_v10, %v874_v9  ;;  %v835_v33 = vpop.f32.mrb[49].mxu0  ;;  %v1042_v34 = vpop.f32.mrb[49].mxu1 }
 0x183   : > { %3229 = vst [vmem:[#allocation10_spill] sm:$0xff] %v2398_v18  ;;  %3230 = vst [vmem:[#allocation11_spill] sm:$0xff] %v2400_v28  ;;  %v2411_v50 = vpack.c.bf16 %v2398_v18, %v2394_v58  ;;  %v2415_v56 = vpack.c.bf16 %v2400_v28, %v2396_v8  ;;  %v1043_v52 = vadd.f32 %v1042_v34, %v866_v24  ;;  %v836_v17 = vpop.f32.mrb[50].mxu0  ;;  %v1898_v20 = vpop.f32.mrb[50].mxu1 }
 0x184   : > { %v2419_v25 = vpack.c.bf16 %v2404_v26, %v2402_v4  ;;  %v1011_v33 = vadd.f32 %v1010_v57, %v834_v30  ;;  %v837_v27 = vadd.f32 %v2260_v41, %v836_v17  ;;  %v838_v14 = vpop.f32.mrb[51].mxu0  ;;  %v1045_v38 = vpop.f32.mrb[51].mxu1  ;;  %v1091_v43 = vmul.f32 0.05, %v1051_v16 }
 0x185   : > { %v1089_v22 = vmul.f32 0.05, %v1043_v52  ;;  %v1054_v9 = vadd.f32 %v1898_v20, %v877_v37  ;;  %v1046_v19 = vadd.f32 %v1045_v38, %v869_v53  ;;  %1167 = vst [vmem:[#allocation2 + $0x70] sm:$0xff] (!%p1834_p4), %v2415_v56  ;;  %1168 = vst [vmem:[#allocation2 + $0x78] sm:$0xff] (!%p1834_p4), %v2411_v50 }
 0x186   : > { %v1081_v21 = vmul.f32 0.05, %v1011_v33  ;;  %v1014_v10 = vadd.f32 %v2368_v5, %v837_v27  ;;  %v2423_v58 = vmax.f32 %v1051_v16, %v1091_v43  ;;  %1164 = vst [vmem:[#allocation2 + $0x58] sm:$0xff] (!%p1834_p4), %v2419_v25  ;;  %1182 = vst [vmem:[#allocation3 + $0x58] sm:$0xff] (!%p1834_p4), %v2419_v25 }
 0x187   : > { %v1092_v18 = vmul.f32 0.05, %v1054_v9  ;;  %v1090_v24 = vmul.f32 0.05, %v1046_v19  ;;  %v2425_v28 = vmax.f32 %v1043_v52, %v1089_v22  ;;  %1185 = vst [vmem:[#allocation3 + $0x70] sm:$0xff] (!%p1834_p4), %v2415_v56  ;;  %1186 = vst [vmem:[#allocation3 + $0x78] sm:$0xff] (!%p1834_p4), %v2411_v50 }
 0x188   : > { %v1082_v34 = vmul.f32 0.05, %v1014_v10  ;;  %v2431_v17 = vmax.f32 %v1011_v33, %v1081_v21 }
 0x189   : > { %v2427_v8 = vmax.f32 %v1054_v9, %v1092_v18  ;;  %v2429_v57 = vmax.f32 %v1046_v19, %v1090_v24  ;;  %v841_v30 = vpop.f32.mrb[52].mxu0 }
 0x18a   : > { %v2433_v14 = vmax.f32 %v1014_v10, %v1082_v34  ;;  %v842_v53 = vadd.f32 %v2260_v41, %v841_v30  ;;  %v843_v37 = vpop.f32.mrb[53].mxu0 }
 0x18b   : > { %v2438_v5 = vpack.c.bf16 %v2427_v8, %v2423_v58  ;;  %v2442_v16 = vpack.c.bf16 %v2429_v57, %v2425_v28  ;;  %v844_v18 = vpop.f32.mrb[54].mxu0 }
 0x18c   : > { %v2446_v52 = vpack.c.bf16 %v2433_v14, %v2431_v17  ;;  %v1019_v20 = vadd.f32 %v2354_v48, %v842_v53  ;;  %v845_v33 = vadd.f32 %v2260_v41, %v844_v18  ;;  %v846_v27 = vpop.f32.mrb[55].mxu0  ;;  %v2044_v41 = vmov (!%p1834_p4), 0.0  }
 0x18d   : > { %1169 = vst [vmem:[#allocation2 + $0x80] sm:$0xff] (!%p1834_p4), %v2442_v16  ;;  %1170 = vst [vmem:[#allocation2 + $0x88] sm:$0xff] (!%p1834_p4), %v2438_v5 }
 0x18e   : > { %v1083_v38 = vmul.f32 0.05, %v1019_v20  ;;  %v1022_v43 = vadd.f32 %v2361_v45, %v845_v33  ;;  %1150 = sbr.rel (%p1834_p4) target bundleno = 407 (0x197), region = 36  ;;  %1165 = vst [vmem:[#allocation2 + $0x60] sm:$0xff] (!%p1834_p4), %v2446_v52  ;;  %1183 = vst [vmem:[#allocation3 + $0x60] sm:$0xff] (!%p1834_p4), %v2446_v52 }
 0x18f   : > { %1187 = vst [vmem:[#allocation3 + $0x80] sm:$0xff] (!%p1834_p4), %v2442_v16  ;;  %1188 = vst [vmem:[#allocation3 + $0x88] sm:$0xff] (!%p1834_p4), %v2438_v5 }
 0x190   : > { %v1084_v22 = vmul.f32 0.05, %v1022_v43  ;;  %v2451_v9 = vmax.f32 %v1019_v20, %v1083_v38  ;;  %1151 = vst [vmem:[#allocation4] sm:$0x1] (!%p1834_p4), %v2044_v41  ;;  %1152 = vst [vmem:[#allocation5] sm:$0x1] (!%p1834_p4), %v2044_v41 }
 0x192   : > { %v2453_v19 = vmax.f32 %v1022_v43, %v1084_v22 }
 0x194   : > { %v2457_v21 = vpack.c.bf16 %v2453_v19, %v2451_v9 }
 0x196   : > { %1166 = vst [vmem:[#allocation2 + $0x68] sm:$0xff] %v2457_v21  ;;  %1184 = vst [vmem:[#allocation3 + $0x68] sm:$0xff] %v2457_v21 }
 0x197 PF: > { %v1190_v48 = vadd.f32 %v2274_v3, %v2272_v2  ;;  %v1234_v34 = vmul.f32 %v2272_v2, %v2272_v2  ;;  %v1235_v30 = vmul.f32 %v2274_v3, %v2274_v3  ;;  %v1236_v37 = vmul.f32 %v2267_v63, %v2267_v63  ;;  %p1835_p5 = scmp.le.s32.totalorder %s2072_s13, 0 }
 0x198   : > { %v1237_v20 = vmul.f32 %v2269_v0, %v2269_v0  ;;  %v1238_v38 = vmul.f32 %v2292_v35, %v2292_v35  ;;  %v1239_v3 = vmul.f32 %v2294_v36, %v2294_v36  ;;  %v1240_v41 = vmul.f32 %v2287_v32, %v2287_v32 }
 0x199   : > { %v1191_v45 = vadd.f32 %v1190_v48, %v2267_v63  ;;  %v1270_v33 = vadd.f32 %v1235_v30, %v1234_v34  ;;  %v1243_v30 = vmul.f32 %v2313_v1, %v2313_v1 }
 0x19b   : > { %v1192_v10 = vadd.f32 %v1191_v45, %v2269_v0  ;;  %v1271_v2 = vadd.f32 %v1270_v33, %v1236_v37  ;;  %v1241_v45 = vmul.f32 %v2289_v29, %v2289_v29  ;;  %v1244_v37 = vmul.f32 %v2306_v60, %v2306_v60 }
 0x19d   : > { %v1193_v24 = vadd.f32 %v1192_v10, %v2292_v35  ;;  %v1272_v22 = vadd.f32 %v1271_v2, %v1237_v20  ;;  %v1245_v20 = vmul.f32 %v2308_v61, %v2308_v61  ;;  %v1247_v2 = vmul.f32 %v2328_v40, %v2328_v40 }
 0x19f   : > { %v1194_v53 = vadd.f32 %v1193_v24, %v2294_v36  ;;  %v1273_v48 = vadd.f32 %v1272_v22, %v1238_v38  ;;  %v1242_v24 = vmul.f32 %v2311_v62, %v2311_v62 }
 0x1a1   : > { %v1195_v18 = vadd.f32 %v1194_v53, %v2287_v32  ;;  %v1274_v10 = vadd.f32 %v1273_v48, %v1239_v3  ;;  %v1248_v3 = vmul.f32 %v2330_v46, %v2330_v46 }
 0x1a3   : > { %v1196_v27 = vadd.f32 %v1195_v18, %v2289_v29  ;;  %v1275_v34 = vadd.f32 %v1274_v10, %v1240_v41  ;;  %v1251_v10 = vmul.f32 %v2346_v12, %v2346_v12 }
 0x1a5   : > { %v1197_v43 = vadd.f32 %v1196_v27, %v2311_v62  ;;  %v1276_v53 = vadd.f32 %v1275_v34, %v1241_v45  ;;  %v1246_v27 = vmul.f32 %v2326_v39, %v2326_v39  ;;  %v1252_v34 = vmul.f32 %v2356_v49, %v2356_v49 }
 0x1a7   : > { %v1198_v63 = vadd.f32 %v1197_v43, %v2313_v1  ;;  %v1277_v18 = vadd.f32 %v1276_v53, %v1242_v24 }
 0x1a9   : > { %v1199_v0 = vadd.f32 %v1198_v63, %v2306_v60  ;;  %v1278_v33 = vadd.f32 %v1277_v18, %v1243_v30  ;;  %v1249_v63 = vmul.f32 %v2332_v47, %v2332_v47 }
 0x1ab   : > { %v1200_v35 = vadd.f32 %v1199_v0, %v2308_v61  ;;  %v1279_v38 = vadd.f32 %v1278_v33, %v1244_v37  ;;  %v1250_v0 = vmul.f32 %v2344_v11, %v2344_v11 }
 0x1ad   : > { %v1201_v36 = vadd.f32 %v1200_v35, %v2326_v39  ;;  %v1280_v43 = vadd.f32 %v1279_v38, %v1245_v20  ;;  %v3231_v39 = vld [vmem:[#allocation6_spill] sm:$0xff]  ;;  %v1256_v20 = vmul.f32 %v2402_v4, %v2402_v4 }
 0x1ae   : > { %v1253_v30 = vmul.f32 %v3231_v39, %v3231_v39 }
 0x1af   : > { %v1202_v32 = vadd.f32 %v1201_v36, %v2328_v40  ;;  %v1281_v22 = vadd.f32 %v1280_v43, %v1246_v27  ;;  %v1257_v27 = vmul.f32 %v2404_v26, %v2404_v26  ;;  %v3233_v43 = vld [vmem:[#allocation9_spill] sm:$0xff] }
 0x1b1   : > { %v1203_v29 = vadd.f32 %v1202_v32, %v2330_v46  ;;  %v1282_v41 = vadd.f32 %v1281_v22, %v1247_v2  ;;  %v3232_v46 = vld [vmem:[#allocation7_spill] sm:$0xff]  ;;  %v1254_v32 = vmul.f32 %v2374_v31, %v2374_v31 }
 0x1b2   : > { %v1255_v18 = vmul.f32 %v3232_v46, %v3232_v46 }
 0x1b3   : > { %v1204_v62 = vadd.f32 %v1203_v29, %v2332_v47  ;;  %v1283_v45 = vadd.f32 %v1282_v41, %v1248_v3  ;;  %v1259_v3 = vmul.f32 %v2433_v14, %v2433_v14 }
 0x1b5   : > { %v1205_v1 = vadd.f32 %v1204_v62, %v2344_v11  ;;  %v1284_v35 = vadd.f32 %v1283_v45, %v1249_v63  ;;  %v1260_v63 = vmul.f32 %v2451_v9, %v2451_v9 }
 0x1b7   : > { %v1206_v60 = vadd.f32 %v1205_v1, %v2346_v12  ;;  %v1285_v36 = vadd.f32 %v1284_v35, %v1250_v0  ;;  %v1258_v1 = vmul.f32 %v2431_v17, %v2431_v17 }
 0x1b9   : > { %v1207_v61 = vadd.f32 %v1206_v60, %v2356_v49  ;;  %v1286_v53 = vadd.f32 %v1285_v36, %v1251_v10 }
 0x1bb   : > { %v1208_v48 = vadd.f32 %v1207_v61, %v3231_v39  ;;  %v1287_v37 = vadd.f32 %v1286_v53, %v1252_v34  ;;  %v1266_v53 = vmul.f32 %v2425_v28, %v2425_v28 }
 0x1bd   : > { %v1209_v40 = vadd.f32 %v1208_v48, %v2374_v31  ;;  %v1288_v29 = vadd.f32 %v1287_v37, %v1253_v30  ;;  %v1261_v48 = vmul.f32 %v2453_v19, %v2453_v19  ;;  %v1267_v37 = vmul.f32 %v2429_v57, %v2429_v57 }
 0x1bf   : > { %v1210_v24 = vadd.f32 %v1209_v40, %v3232_v46  ;;  %v1289_v33 = vadd.f32 %v1288_v29, %v1254_v32  ;;  %v1262_v40 = vmul.f32 %v3233_v43, %v3233_v43  ;;  %v1268_v29 = vmul.f32 %v2423_v58, %v2423_v58 }
 0x1c1   : > { %v1211_v47 = vadd.f32 %v1210_v24, %v2402_v4  ;;  %v1290_v38 = vadd.f32 %v1289_v33, %v1255_v18  ;;  %v3234_v4 = vld [vmem:[#allocation11_spill] sm:$0xff]  ;;  %v1269_v33 = vmul.f32 %v2427_v8, %v2427_v8 }
 0x1c2   : > { %v1263_v35 = vmul.f32 %v3234_v4, %v3234_v4 }
 0x1c3   : > { %v1212_v11 = vadd.f32 %v1211_v47, %v2404_v26  ;;  %v1291_v2 = vadd.f32 %v1290_v38, %v1256_v20  ;;  %v3235_v26 = vld [vmem:[#allocation8_spill] sm:$0xff] }
 0x1c4   : > { %v1264_v24 = vmul.f32 %v3235_v26, %v3235_v26 }
 0x1c5   : > { %v1213_v12 = vadd.f32 %v1212_v11, %v2431_v17  ;;  %v1292_v22 = vadd.f32 %v1291_v2, %v1257_v27  ;;  %v3236_v17 = vld [vmem:[#allocation10_spill] sm:$0xff] }
 0x1c6   : > { %v1265_v36 = vmul.f32 %v3236_v17, %v3236_v17 }
 0x1c7   : > { %v1214_v49 = vadd.f32 %v1213_v12, %v2433_v14  ;;  %v1293_v41 = vadd.f32 %v1292_v22, %v1258_v1  ;;  %v1189_v1 = vld [vmem:[#allocation4] sm:$0x1] }
 0x1c9   : > { %v1215_v62 = vadd.f32 %v1214_v49, %v2451_v9  ;;  %v1294_v0 = vadd.f32 %v1293_v41, %v1259_v3  ;;  %v1318_v41 = vld [vmem:[#allocation2 + $0x8] sm:$0xff] (!%p1835_p5) }
 0x1cb   : > { %v1216_v31 = vadd.f32 %v1215_v62, %v2453_v19  ;;  %v1295_v10 = vadd.f32 %v1294_v0, %v1260_v63 }
 0x1cd   : > { %v1217_v60 = vadd.f32 %v1216_v31, %v3233_v43  ;;  %v1296_v46 = vadd.f32 %v1295_v10, %v1261_v48  ;;  %v1336_v48 = vmax.bf16 (!%p1835_p5), %v1318_v41, %v2279_v7 }
 0x1cf   : > { %v1218_v61 = vadd.f32 %v1217_v60, %v3234_v4  ;;  %v1297_v34 = vadd.f32 %v1296_v46, %v1262_v40  ;;  %v1322_v40 = vld [vmem:[#allocation2 + $0x28] sm:$0xff] (!%p1835_p5)  ;;  %v1323_v46 = vld [vmem:[#allocation2 + $0x30] sm:$0xff] (!%p1835_p5)  ;;  %1354 = vst [vmem:[#allocation2 + $0x8] sm:$0xff] (!%p1835_p5), %v1336_v48 }
 0x1d0   : > { %v1379_v48 = vld [vmem:[#allocation3 + $0x40] sm:$0xff] (!%p1835_p5) }
 0x1d1   : > { %v1219_v39 = vadd.f32 %v1218_v61, %v3235_v26  ;;  %v1298_v47 = vadd.f32 %v1297_v34, %v1263_v35  ;;  %v1319_v26 = vld [vmem:[#allocation2 + $0x10] sm:$0xff] (!%p1835_p5)  ;;  %v1340_v35 = vmax.bf16 (!%p1835_p5), %v1322_v40, %v2317_v6  ;;  %v1341_v34 = vmax.bf16 (!%p1835_p5), %v1323_v46, %v2337_v51 }
 0x1d2   : > { %v1337_v0 = vmax.bf16 (!%p1835_p5), %v1319_v26, %v2304_v44  ;;  %v1377_v26 = vld [vmem:[#allocation3 + $0x30] sm:$0xff] (!%p1835_p5)  ;;  %v1383_v40 = vld [vmem:[#allocation3 + $0x60] sm:$0xff] (!%p1835_p5) }
 0x1d3   : > { %v1220_v45 = vadd.f32 %v1219_v39, %v3236_v17  ;;  %v1299_v11 = vadd.f32 %v1298_v47, %v1264_v24  ;;  %v1320_v17 = vld [vmem:[#allocation2 + $0x18] sm:$0xff] (!%p1835_p5)  ;;  %v1325_v24 = vld [vmem:[#allocation2 + $0x40] sm:$0xff] (!%p1835_p5)  ;;  %v1326_v47 = vld [vmem:[#allocation2 + $0x48] sm:$0xff] (!%p1835_p5)  ;;  %1358 = vst [vmem:[#allocation2 + $0x28] sm:$0xff] (!%p1835_p5), %v1340_v35 }
 0x1d4   : > { %v1338_v10 = vmax.bf16 (!%p1835_p5), %v1320_v17, %v2299_v42  ;;  %1355 = vst [vmem:[#allocation2 + $0x10] sm:$0xff] (!%p1835_p5), %v1337_v0  ;;  %1359 = vst [vmem:[#allocation2 + $0x30] sm:$0xff] (!%p1835_p5), %v1341_v34  ;;  %v1380_v0 = vld [vmem:[#allocation3 + $0x48] sm:$0xff] (!%p1835_p5)  ;;  %v1381_v17 = vld [vmem:[#allocation3 + $0x50] sm:$0xff] (!%p1835_p5) }
 0x1d5   : > { %v1221_v14 = vadd.f32 %v1220_v45, %v2425_v28  ;;  %v1300_v12 = vadd.f32 %v1299_v11, %v1265_v36  ;;  %v1321_v45 = vld [vmem:[#allocation2 + $0x20] sm:$0xff] (!%p1835_p5)  ;;  %v1343_v36 = vmax.bf16 (!%p1835_p5), %v1325_v24, %v2351_v23  ;;  %v1344_v11 = vmax.bf16 (!%p1835_p5), %v1326_v47, %v2365_v59  ;;  %v1386_v35 = vld [vmem:[#allocation3 + $0x78] sm:$0xff] (!%p1835_p5)  ;;  %v1387_v46 = vld [vmem:[#allocation3 + $0x80] sm:$0xff] (!%p1835_p5) }
 0x1d6   : > { %1356 = vst [vmem:[#allocation2 + $0x18] sm:$0xff] (!%p1835_p5), %v1338_v10  ;;  %v1384_v10 = vld [vmem:[#allocation3 + $0x68] sm:$0xff] (!%p1835_p5) }
 0x1d7   : > { %v1222_v9 = vadd.f32 %v1221_v14, %v2429_v57  ;;  %v1301_v49 = vadd.f32 %v1300_v12, %v1266_v53  ;;  %v1339_v14 = vmax.bf16 (!%p1835_p5), %v1321_v45, %v2323_v15  ;;  %v1328_v53 = vld [vmem:[#allocation2 + $0x58] sm:$0xff] (!%p1835_p5)  ;;  %v1329_v12 = vld [vmem:[#allocation2 + $0x60] sm:$0xff] (!%p1835_p5)  ;;  %1361 = vst [vmem:[#allocation2 + $0x40] sm:$0xff] (!%p1835_p5), %v1343_v36  ;;  %1362 = vst [vmem:[#allocation2 + $0x48] sm:$0xff] (!%p1835_p5), %v1344_v11 }
 0x1d8   : > { %v1382_v45 = vld [vmem:[#allocation3 + $0x58] sm:$0xff] (!%p1835_p5) }
 0x1d9   : > { %v1223_v19 = vadd.f32 %v1222_v9, %v2423_v58  ;;  %v1302_v62 = vadd.f32 %v1301_v49, %v1267_v37  ;;  %v1233_v58 = vld [vmem:[#allocation5] sm:$0x1]  ;;  %v1324_v9 = vld [vmem:[#allocation2 + $0x38] sm:$0xff] (!%p1835_p5)  ;;  %1357 = vst [vmem:[#allocation2 + $0x20] sm:$0xff] (!%p1835_p5), %v1339_v14  ;;  %v1346_v37 = vmax.bf16 (!%p1835_p5), %v1328_v53, %v2419_v25  ;;  %v1347_v49 = vmax.bf16 (!%p1835_p5), %v1329_v12, %v2446_v52 }
 0x1da   : > { %v1385_v14 = vld [vmem:[#allocation3 + $0x70] sm:$0xff] (!%p1835_p5) }
 0x1db   : > { %v1224_v30 = vadd.f32 %v1223_v19, %v2427_v8  ;;  %v1303_v38 = vadd.f32 %v1302_v62, %v1268_v29  ;;  %v1317_v8 = vld [vmem:[#allocation2] sm:$0xff] (!%p1835_p5)  ;;  %v1342_v19 = vmax.bf16 (!%p1835_p5), %v1324_v9, %v2341_v55  ;;  %v1331_v29 = vld [vmem:[#allocation2 + $0x70] sm:$0xff] (!%p1835_p5)  ;;  %v1332_v62 = vld [vmem:[#allocation2 + $0x78] sm:$0xff] (!%p1835_p5)  ;;  %1364 = vst [vmem:[#allocation2 + $0x58] sm:$0xff] (!%p1835_p5), %v1346_v37 }
 0x1dc   : > { %v1335_v39 = vmax.bf16 (!%p1835_p5), %v1317_v8, %v2284_v13  ;;  %1365 = vst [vmem:[#allocation2 + $0x60] sm:$0xff] (!%p1835_p5), %v1347_v49  ;;  %v1388_v9 = vld [vmem:[#allocation3 + $0x88] sm:$0xff] (!%p1835_p5) }
 0x1dd   : > { %v1225_v32 = vrot.slane %v1224_v30, 4  ;;  %v1304_v28 = vadd.f32 %v1303_v38, %v1269_v33  ;;  %1360 = vst [vmem:[#allocation2 + $0x38] sm:$0xff] (!%p1835_p5), %v1342_v19  ;;  %v1349_v33 = vmax.bf16 (!%p1835_p5), %v1331_v29, %v2415_v56  ;;  %v1334_v38 = vld [vmem:[#allocation2 + $0x88] sm:$0xff] (!%p1835_p5) }
 0x1de   : > { %1353 = vst [vmem:[#allocation2] sm:$0xff] (!%p1835_p5), %v1335_v39  ;;  %v1378_v39 = vld [vmem:[#allocation3 + $0x38] sm:$0xff] (!%p1835_p5) }
 0x1df   : > { %v1226_v18 = vadd.f32 %v1225_v32, %v1224_v30  ;;  %v1305_v43 = vrot.slane %v1304_v28, 4  ;;  %v1327_v30 = vld [vmem:[#allocation2 + $0x50] sm:$0xff] (!%p1835_p5)  ;;  %1367 = vst [vmem:[#allocation2 + $0x70] sm:$0xff] (!%p1835_p5), %v1349_v33 }
 0x1e0   : > { %v1345_v32 = vmax.bf16 (!%p1835_p5), %v1327_v30, %v2385_v54 }
 0x1e1   : > { %v1227_v20 = vrot.slane %v1226_v18, 2  ;;  %v1306_v57 = vadd.f32 %v1305_v43, %v1304_v28  ;;  %v1372_v43 = vld [vmem:[#allocation3 + $0x8] sm:$0xff] (!%p1835_p5) }
 0x1e2   : > { %1363 = vst [vmem:[#allocation2 + $0x50] sm:$0xff] (!%p1835_p5), %v1345_v32 }
 0x1e3   : > { %v1228_v27 = vadd.f32 %v1227_v20, %v1226_v18  ;;  %v1307_v3 = vrot.slane %v1306_v57, 2  ;;  %v1330_v18 = vld [vmem:[#allocation2 + $0x68] sm:$0xff] (!%p1835_p5) }
 0x1e4   : > { %v1348_v20 = vmax.bf16 (!%p1835_p5), %v1330_v18, %v2457_v21 }
 0x1e5   : > { %v1229_v31 = vrot.slane %v1228_v27, 1  ;;  %v1308_v22 = vadd.f32 %v1307_v3, %v1306_v57  ;;  %v1390_v3 = vmin.bf16 (!%p1835_p5), %v1372_v43, %v2279_v7  ;;  %v1395_v7 = vmin.bf16 (!%p1835_p5), %v1377_v26, %v2337_v51 }
 0x1e6   : > { %1366 = vst [vmem:[#allocation2 + $0x68] sm:$0xff] (!%p1835_p5), %v1348_v20  ;;  %v1401_v51 = vmin.bf16 (!%p1835_p5), %v1383_v40, %v2446_v52 }
 0x1e7   : > { %v1230_v2 = vadd.f32 %v1229_v31, %v1228_v27  ;;  %v1309_v4 = vrot.slane %v1308_v22, 1  ;;  %1316 = sbr.rel (%p1835_p5) target bundleno = 501 (0x1f5), region = 40  ;;  %v1333_v27 = vld [vmem:[#allocation2 + $0x80] sm:$0xff] (!%p1835_p5)  ;;  %v1350_v31 = vmax.bf16 (!%p1835_p5), %v1332_v62, %v2411_v50  ;;  %1408 = vst [vmem:[#allocation3 + $0x8] sm:$0xff] (!%p1835_p5), %v1390_v3  ;;  %1413 = vst [vmem:[#allocation3 + $0x30] sm:$0xff] (!%p1835_p5), %v1395_v7 }
 0x1e8   : > { %v1351_v28 = vmax.bf16 (!%p1835_p5), %v1333_v27, %v2442_v16  ;;  %1419 = vst [vmem:[#allocation3 + $0x60] sm:$0xff] (!%p1835_p5), %v1401_v51 }
 0x1e9   : > { %v1231_v60 = vadd.f32 %v1230_v2, %v1189_v1  ;;  %v1310_v61 = vadd.f32 %v1309_v4, %v1308_v22  ;;  %v1352_v1 = vmax.bf16 (!%p1835_p5), %v1334_v38, %v2438_v5  ;;  %v1371_v2 = vld [vmem:[#allocation3] sm:$0xff] (!%p1835_p5)  ;;  %v1374_v4 = vld [vmem:[#allocation3 + $0x18] sm:$0xff] (!%p1835_p5)  ;;  %1368 = vst [vmem:[#allocation2 + $0x78] sm:$0xff] (!%p1835_p5), %v1350_v31 }
 0x1ea   : > { %v1389_v57 = vmin.bf16 (!%p1835_p5), %v1371_v2, %v2284_v13  ;;  %1369 = vst [vmem:[#allocation2 + $0x80] sm:$0xff] (!%p1835_p5), %v1351_v28  ;;  %v1396_v13 = vmin.bf16 (!%p1835_p5), %v1378_v39, %v2341_v55  ;;  %v1402_v55 = vmin.bf16 (!%p1835_p5), %v1384_v10, %v2457_v21 }
 0x1eb   : > { %1232 = vst [vmem:[#allocation4] sm:$0x1] %v1231_v60  ;;  %v1311_v63 = vadd.f32 %v1310_v61, %v1233_v58  ;;  %v1373_v60 = vld [vmem:[#allocation3 + $0x10] sm:$0xff] (!%p1835_p5)  ;;  %v1375_v58 = vld [vmem:[#allocation3 + $0x20] sm:$0xff] (!%p1835_p5)  ;;  %v1376_v61 = vld [vmem:[#allocation3 + $0x28] sm:$0xff] (!%p1835_p5) }
 0x1ec   : > { %v1391_v22 = vmin.bf16 (!%p1835_p5), %v1373_v60, %v2304_v44  ;;  %1370 = vst [vmem:[#allocation2 + $0x88] sm:$0xff] (!%p1835_p5), %v1352_v1  ;;  %v1393_v8 = vmin.bf16 (!%p1835_p5), %v1375_v58, %v2323_v15  ;;  %v1394_v41 = vmin.bf16 (!%p1835_p5), %v1376_v61, %v2317_v6  ;;  %1407 = vst [vmem:[#allocation3] sm:$0xff] (!%p1835_p5), %v1389_v57 }
 0x1ed   : > { %1312 = vst [vmem:[#allocation5] sm:$0x1] %v1311_v63  ;;  %v1392_v63 = vmin.bf16 (!%p1835_p5), %v1374_v4, %v2299_v42  ;;  %v1397_v44 = vmin.bf16 (!%p1835_p5), %v1379_v48, %v2351_v23  ;;  %v1398_v42 = vmin.bf16 (!%p1835_p5), %v1380_v0, %v2365_v59  ;;  %v1399_v6 = vmin.bf16 (!%p1835_p5), %v1381_v17, %v2385_v54 }
 0x1ee   : > { %1409 = vst [vmem:[#allocation3 + $0x10] sm:$0xff] %v1391_v22  ;;  %1411 = vst [vmem:[#allocation3 + $0x20] sm:$0xff] %v1393_v8  ;;  %v1400_v15 = vmin.bf16 %v1382_v45, %v2419_v25  ;;  %v1403_v23 = vmin.bf16 %v1385_v14, %v2415_v56  ;;  %v1404_v59 = vmin.bf16 %v1386_v35, %v2411_v50 }
 0x1ef   : > { %1410 = vst [vmem:[#allocation3 + $0x18] sm:$0xff] %v1392_v63  ;;  %1412 = vst [vmem:[#allocation3 + $0x28] sm:$0xff] %v1394_v41  ;;  %v1405_v54 = vmin.bf16 %v1387_v46, %v2442_v16  ;;  %v1406_v25 = vmin.bf16 %v1388_v9, %v2438_v5 }
 0x1f0   : > { %1414 = vst [vmem:[#allocation3 + $0x38] sm:$0xff] %v1396_v13  ;;  %1415 = vst [vmem:[#allocation3 + $0x40] sm:$0xff] %v1397_v44 }
 0x1f1   : > { %1416 = vst [vmem:[#allocation3 + $0x48] sm:$0xff] %v1398_v42  ;;  %1417 = vst [vmem:[#allocation3 + $0x50] sm:$0xff] %v1399_v6 }
 0x1f2   : > { %1418 = vst [vmem:[#allocation3 + $0x58] sm:$0xff] %v1400_v15  ;;  %1420 = vst [vmem:[#allocation3 + $0x68] sm:$0xff] %v1402_v55 }
 0x1f3   : > { %1421 = vst [vmem:[#allocation3 + $0x70] sm:$0xff] %v1403_v23  ;;  %1422 = vst [vmem:[#allocation3 + $0x78] sm:$0xff] %v1404_v59 }
 0x1f4   : > { %1423 = vst [vmem:[#allocation3 + $0x80] sm:$0xff] %v1405_v54  ;;  %1424 = vst [vmem:[#allocation3 + $0x88] sm:$0xff] %v1406_v25 }
 0x1f5 PF: > { %p1836_p6 = scmp.ne.s32.totalorder %s2072_s13, 3 }
 0x1f6   : > { %v1445_v21 = vlaneseq (!%p1836_p6)  ;;  %v2646_v19 = vld [vmem:[#allocation2] sm:$0xff] (!%p1836_p6)  ;;  %v2650_v47 = vld [vmem:[#allocation2 + $0x8] sm:$0xff] (!%p1836_p6)  ;;  %v2652_v30 = vld [vmem:[#allocation3 + $0x8] sm:$0xff] (!%p1836_p6) }
 0x1f7   : > { %1428 = sbr.rel (%p1836_p6) target bundleno = 578 (0x242), region = 44  ;;  %v2654_v11 = vld [vmem:[#allocation2 + $0x10] sm:$0xff] (!%p1836_p6)  ;;  %v1468_v12 = vunpack.c.l.bf16 (!%p1836_p6), %v2646_v19  ;;  %v1469_v29 = vunpack.c.h.bf16 (!%p1836_p6), %v2646_v19  ;;  %v2663_v49 = vld [vmem:[#allocation2 + $0x18] sm:$0xff] (!%p1836_p6)  ;;  %v1470_v62 = vunpack.c.l.bf16 (!%p1836_p6), %v2650_v47  ;;  %v1524_v27 = vunpack.c.l.bf16 (!%p1836_p6), %v2652_v30  ;;  %v2668_v38 = vld [vmem:[#allocation3 + $0x18] sm:$0xff] (!%p1836_p6) }
 0x1f8   : > { %v1446_v5 = vshrl.u32 (!%p1836_p6), %v1445_v21, 7  ;;  %v2670_v31 = vld [vmem:[#allocation2 + $0x20] sm:$0xff] (!%p1836_p6)  ;;  %v1471_v28 = vunpack.c.h.bf16 (!%p1836_p6), %v2650_v47  ;;  %v1525_v1 = vunpack.c.h.bf16 (!%p1836_p6), %v2652_v30  ;;  %v1472_v2 = vunpack.c.l.bf16 (!%p1836_p6), %v2654_v11  ;;  %v2678_v57 = vld [vmem:[#allocation2 + $0x28] sm:$0xff] (!%p1836_p6)  ;;  %v2683_v58 = vld [vmem:[#allocation3 + $0x28] sm:$0xff] (!%p1836_p6) }
 0x1f9   : > { %v1429_v56 = vld [vmem:[#allocation4] sm:$0x1] (!%p1836_p6)  ;;  %v1473_v3 = vunpack.c.h.bf16 (!%p1836_p6), %v2654_v11  ;;  %v2685_v61 = vld [vmem:[#allocation2 + $0x30] sm:$0xff] (!%p1836_p6)  ;;  %v1528_v63 = vunpack.c.l.bf16 (!%p1836_p6), %v2668_v38  ;;  %v2693_v48 = vld [vmem:[#allocation2 + $0x38] sm:$0xff] (!%p1836_p6) }
 0x1fa   : > { %v2642_v24 = vmul.f32 (!%p1836_p6), 0.00086805556, %v1429_v56  ;;  %v2648_v36 = vld [vmem:[#allocation3] sm:$0xff] (!%p1836_p6)  ;;  %v2658_v37 = vsub.s32 (!%p1836_p6), 0, %v1446_v5  ;;  %v2691_v39 = vld [vmem:[#allocation3 + $0x30] sm:$0xff] (!%p1836_p6)  ;;  %v2699_v17 = vld [vmem:[#allocation3 + $0x38] sm:$0xff] (!%p1836_p6) }
 0x1fb   : > { %v1431_v52 = vld [vmem:[#allocation5] sm:$0x1] (!%p1836_p6)  ;;  %v1522_v18 = vunpack.c.l.bf16 (!%p1836_p6), %v2648_v36  ;;  %v1523_v33 = vunpack.c.h.bf16 (!%p1836_p6), %v2648_v36  ;;  %v2707_v10 = vld [vmem:[#allocation3 + $0x40] sm:$0xff] (!%p1836_p6)  ;;  %v2709_v14 = vld [vmem:[#allocation2 + $0x48] sm:$0xff] (!%p1836_p6)  ;;  %v2045_v56 = vmov (!%p1836_p6), 0  }
 0x1fc   : > { %v1432_v50 = vmul.f32 (!%p1836_p6), 0.00086805556, %v1431_v52  ;;  %v1433_v16 = vmul.f32 (!%p1836_p6), %v2642_v24, %v2642_v24  ;;  %v2656_v32 = vld [vmem:[#allocation3 + $0x10] sm:$0xff] (!%p1836_p6)  ;;  %v2676_v60 = vld [vmem:[#allocation3 + $0x20] sm:$0xff] (!%p1836_p6)  ;;  %v2715_v46 = vld [vmem:[#allocation3 + $0x48] sm:$0xff] (!%p1836_p6) }
 0x1fd   : > { %v1526_v43 = vunpack.c.l.bf16 (!%p1836_p6), %v2656_v32  ;;  %v1527_v22 = vunpack.c.h.bf16 (!%p1836_p6), %v2656_v32  ;;  %v2701_v45 = vld [vmem:[#allocation2 + $0x40] sm:$0xff] (!%p1836_p6)  ;;  %v2717_v9 = vld [vmem:[#allocation2 + $0x50] sm:$0xff] (!%p1836_p6)  ;;  %v2725_v21 = vld [vmem:[#allocation2 + $0x58] sm:$0xff] (!%p1836_p6) }
 0x1fe   : > { %v1434_v34 = vsub.f32 %v1432_v50, %v1433_v16  ;;  %v2723_v52 = vld [vmem:[#allocation3 + $0x50] sm:$0xff]  ;;  %v2739_v59 = vld [vmem:[#allocation3 + $0x60] sm:$0xff]  ;;  %v2741_v50 = vld [vmem:[#allocation2 + $0x68] sm:$0xff] }
 0x1ff   : > { %v2750_v55 = vld [vmem:[#allocation3 + $0x68] sm:$0xff]  ;;  %v2756_v51 = vld [vmem:[#allocation2 + $0x70] sm:$0xff]  ;;  %v2758_v6 = vld [vmem:[#allocation3 + $0x70] sm:$0xff] }
 0x200   : > { %v1435_v53 = vmax.f32 %v1434_v34, 0.0  ;;  %v1436_v34 = vld [vmem:[%s3211_s2 + $0x1] sm:$0x1]  ;;  %v2764_v35 = vld [vmem:[#allocation2 + $0x78] sm:$0xff]  ;;  %v2766_v25 = vld [vmem:[#allocation3 + $0x78] sm:$0xff] }
 0x201   : > { %v2771_v13 = vld [vmem:[#allocation2 + $0x80] sm:$0xff]  ;;  %v2785_v44 = vld [vmem:[#allocation2 + $0x88] sm:$0xff]  ;;  %v2787_v26 = vld [vmem:[#allocation3 + $0x88] sm:$0xff] }
 0x202   : > { %v1437_v20 = vadd.f32 1e-05, %v1435_v53  ;;  %v2731_v53 = vld [vmem:[#allocation3 + $0x58] sm:$0xff]  ;;  %v1440_v54 = vld [vmem:[%s3211_s2 + $0x2] sm:$0x1]  ;;  %v1501_v40 = vunpack.c.h.bf16 %v2771_v13  ;;  %v1556_v15 = vunpack.c.l.bf16 %v2787_v26 }
 0x204   : > { %2033 = vrsqrt.f32 %v1437_v20  ;;  %v2733_v20 = vld [vmem:[#allocation2 + $0x60] sm:$0xff] }
 0x20e   : > { %v2034_v16 = vpop.eup %2033 }
 0x20f   : > { %v1439_v23 = vmul.f32 %v2034_v16, %v1436_v34  ;;  %v2780_v34 = vld [vmem:[#allocation3 + $0x80] sm:$0xff]  ;;  %v1500_v16 = vunpack.c.l.bf16 %v2771_v13 }
 0x210   : > { %v1554_v42 = vunpack.c.l.bf16 %v2780_v34  ;;  %v1555_v4 = vunpack.c.h.bf16 %v2780_v34 }
 0x211   : > { %v1441_v0 = vmul.f32 %v1439_v23, %v2642_v24  ;;  %vm1443_vm1 = vcmp.ge.f32.partialorder %v1439_v23, 0.0  ;;  %v2794_v41 = vrot.slane %v1439_v23, %v2658_v37  ;;  %v1557_v23 = vunpack.c.h.bf16 %v2787_v26 }
 0x212   : > { %v1444_v7 = vsel %vm1443_vm1, 1, %v2045_v56  ;;  %v1502_v56 = vunpack.c.l.bf16 %v2785_v44 }
 0x213   : > { %v1442_v8 = vsub.f32 %v1440_v54, %v1441_v0  ;;  %v1448_v24 = vrot.slane %v1444_v7, %v2658_v37  ;;  %v1503_v7 = vunpack.c.h.bf16 %v2785_v44 }
 0x215   : > { %vm2801_vm2 = vcmp.eq.s32.totalorder %v1448_v24, 1  ;;  %v2806_v0 = vrot.slane %v1442_v8, %v2658_v37  ;;  %v3243_v8 = vunpack.c.l.bf16 %v2670_v31 }
 0x216   : > { %v1558_v54 = vsel %vm2801_vm2, %v1468_v12, %v1522_v18  ;;  %v1559_v24 = vsel %vm2801_vm2, %v1469_v29, %v1523_v33  ;;  %v1560_v37 = vsel %vm2801_vm2, %v1470_v62, %v1524_v27  ;;  %v1561_v12 = vsel %vm2801_vm2, %v1471_v28, %v1525_v1 }
 0x217   : > { %v1598_v36 = vmul.f32 %v2794_v41, %v1558_v54  ;;  %v1599_v19 = vmul.f32 %v2794_v41, %v1559_v24  ;;  %v1600_v18 = vmul.f32 %v2794_v41, %v1560_v37  ;;  %v1601_v29 = vmul.f32 %v2794_v41, %v1561_v12 }
 0x218   : > { %v1562_v30 = vsel %vm2801_vm2, %v1472_v2, %v1526_v43  ;;  %v1563_v47 = vsel %vm2801_vm2, %v1473_v3, %v1527_v22  ;;  %v3239_v33 = vunpack.c.l.bf16 %v2663_v49  ;;  %v3240_v27 = vunpack.c.h.bf16 %v2668_v38 }
 0x219   : > { %v3241_v28 = vunpack.c.h.bf16 %v2663_v49  ;;  %v1638_v32 = vadd.f32 %v2806_v0, %v1598_v36  ;;  %v1639_v11 = vadd.f32 %v2806_v0, %v1599_v19  ;;  %v1640_v2 = vadd.f32 %v2806_v0, %v1600_v18 }
 0x21a   : > { %v1564_v62 = vsel %vm2801_vm2, %v3239_v33, %v1528_v63  ;;  %v1641_v43 = vadd.f32 %v2806_v0, %v1601_v29  ;;  %v1602_v3 = vmul.f32 %v2794_v41, %v1562_v30  ;;  %v1603_v22 = vmul.f32 %v2794_v41, %v1563_v47 }
 0x21b   : > { %v1565_v1 = vsel %vm2801_vm2, %v3241_v28, %v3240_v27  ;;  %v1604_v63 = vmul.f32 %v2794_v41, %v1564_v62  ;;  %1674 = vst [vmem:[%s3212_s3] sm:$0xff] %v1638_v32  ;;  %1675 = vst [vmem:[%s3212_s3 + $0x8] sm:$0xff] %v1639_v11  ;;  %v3242_v49 = vunpack.c.l.bf16 %v2676_v60  ;;  %v3244_v24 = vunpack.c.h.bf16 %v2676_v60 }
 0x21c   : > { %v1605_v38 = vmul.f32 %v2794_v41, %v1565_v1  ;;  %1676 = vst [vmem:[%s3212_s3 + $0x10] sm:$0xff] %v1640_v2  ;;  %1677 = vst [vmem:[%s3212_s3 + $0x18] sm:$0xff] %v1641_v43  ;;  %v3245_v37 = vunpack.c.h.bf16 %v2670_v31  ;;  %v3246_v36 = vunpack.c.l.bf16 %v2683_v58  ;;  %v3247_v19 = vunpack.c.l.bf16 %v2678_v57 }
 0x21d   : > { %v1566_v54 = vsel %vm2801_vm2, %v3243_v8, %v3242_v49  ;;  %v3248_v29 = vunpack.c.h.bf16 %v2683_v58  ;;  %v3249_v30 = vunpack.c.h.bf16 %v2678_v57  ;;  %v1642_v60 = vadd.f32 %v2806_v0, %v1602_v3 }
 0x21e   : > { %v1567_v12 = vsel %vm2801_vm2, %v3245_v37, %v3244_v24  ;;  %v1568_v18 = vsel %vm2801_vm2, %v3247_v19, %v3246_v36  ;;  %v1643_v31 = vadd.f32 %v2806_v0, %v1603_v22  ;;  %v1644_v33 = vadd.f32 %v2806_v0, %v1604_v63 }
 0x21f   : > { %v1569_v47 = vsel %vm2801_vm2, %v3249_v30, %v3248_v29  ;;  %v1645_v62 = vadd.f32 %v2806_v0, %v1605_v38  ;;  %v1606_v27 = vmul.f32 %v2794_v41, %v1566_v54  ;;  %v1607_v28 = vmul.f32 %v2794_v41, %v1567_v12  ;;  %1678 = vst [vmem:[%s3212_s3 + $0x20] sm:$0xff] %v1642_v60 }
 0x220   : > { %v1608_v1 = vmul.f32 %v2794_v41, %v1568_v18  ;;  %v1609_v58 = vmul.f32 %v2794_v41, %v1569_v47  ;;  %1679 = vst [vmem:[%s3212_s3 + $0x28] sm:$0xff] %v1643_v31  ;;  %1680 = vst [vmem:[%s3212_s3 + $0x30] sm:$0xff] %v1644_v33  ;;  %v3250_v57 = vunpack.c.l.bf16 %v2691_v39  ;;  %v3251_v32 = vunpack.c.l.bf16 %v2685_v61 }
 0x221   : > { %1681 = vst [vmem:[%s3212_s3 + $0x38] sm:$0xff] %v1645_v62  ;;  %v3252_v2 = vunpack.c.h.bf16 %v2691_v39  ;;  %v3253_v43 = vunpack.c.h.bf16 %v2685_v61  ;;  %v3254_v22 = vunpack.c.l.bf16 %v2699_v17  ;;  %v3255_v63 = vunpack.c.l.bf16 %v2693_v48 }
 0x222   : > { %v1570_v11 = vsel %vm2801_vm2, %v3251_v32, %v3250_v57  ;;  %v3256_v49 = vunpack.c.h.bf16 %v2699_v17  ;;  %v3257_v8 = vunpack.c.h.bf16 %v2693_v48  ;;  %v1646_v39 = vadd.f32 %v2806_v0, %v1606_v27 }
 0x223   : > { %v1571_v3 = vsel %vm2801_vm2, %v3253_v43, %v3252_v2  ;;  %v1572_v38 = vsel %vm2801_vm2, %v3255_v63, %v3254_v22  ;;  %v1647_v61 = vadd.f32 %v2806_v0, %v1607_v28  ;;  %v1648_v24 = vadd.f32 %v2806_v0, %v1608_v1 }
 0x224   : > { %v1573_v54 = vsel %vm2801_vm2, %v3257_v8, %v3256_v49  ;;  %v1649_v37 = vadd.f32 %v2806_v0, %v1609_v58  ;;  %v1610_v12 = vmul.f32 %v2794_v41, %v1570_v11  ;;  %v1611_v36 = vmul.f32 %v2794_v41, %v1571_v3  ;;  %1682 = vst [vmem:[%s3212_s3 + $0x40] sm:$0xff] %v1646_v39 }
 0x225   : > { %v1612_v19 = vmul.f32 %v2794_v41, %v1572_v38  ;;  %v1613_v17 = vmul.f32 %v2794_v41, %v1573_v54  ;;  %1683 = vst [vmem:[%s3212_s3 + $0x48] sm:$0xff] %v1647_v61  ;;  %1684 = vst [vmem:[%s3212_s3 + $0x50] sm:$0xff] %v1648_v24  ;;  %v3258_v48 = vunpack.c.l.bf16 %v2707_v10  ;;  %v3259_v18 = vunpack.c.l.bf16 %v2701_v45 }
 0x226   : > { %1685 = vst [vmem:[%s3212_s3 + $0x58] sm:$0xff] %v1649_v37  ;;  %v3260_v30 = vunpack.c.h.bf16 %v2707_v10  ;;  %v3261_v47 = vunpack.c.h.bf16 %v2701_v45  ;;  %v3262_v31 = vunpack.c.l.bf16 %v2715_v46  ;;  %v3263_v33 = vunpack.c.l.bf16 %v2709_v14 }
 0x227   : > { %v1574_v29 = vsel %vm2801_vm2, %v3259_v18, %v3258_v48  ;;  %v3264_v27 = vunpack.c.h.bf16 %v2715_v46  ;;  %v3265_v28 = vunpack.c.h.bf16 %v2709_v14  ;;  %v1650_v10 = vadd.f32 %v2806_v0, %v1610_v12 }
 0x228   : > { %v1575_v60 = vsel %vm2801_vm2, %v3261_v47, %v3260_v30  ;;  %v1576_v62 = vsel %vm2801_vm2, %v3263_v33, %v3262_v31  ;;  %v1651_v45 = vadd.f32 %v2806_v0, %v1611_v36  ;;  %v1652_v58 = vadd.f32 %v2806_v0, %v1612_v19 }
 0x229   : > { %v1577_v1 = vsel %vm2801_vm2, %v3265_v28, %v3264_v27  ;;  %v1653_v57 = vadd.f32 %v2806_v0, %v1613_v17  ;;  %v1614_v32 = vmul.f32 %v2794_v41, %v1574_v29  ;;  %v1615_v11 = vmul.f32 %v2794_v41, %v1575_v60  ;;  %1686 = vst [vmem:[%s3212_s3 + $0x60] sm:$0xff] %v1650_v10 }
 0x22a   : > { %v1616_v2 = vmul.f32 %v2794_v41, %v1576_v62  ;;  %v1617_v46 = vmul.f32 %v2794_v41, %v1577_v1  ;;  %1687 = vst [vmem:[%s3212_s3 + $0x68] sm:$0xff] %v1651_v45  ;;  %1688 = vst [vmem:[%s3212_s3 + $0x70] sm:$0xff] %v1652_v58  ;;  %v3266_v14 = vunpack.c.l.bf16 %v2723_v52  ;;  %v3267_v43 = vunpack.c.l.bf16 %v2717_v9 }
 0x22b   : > { %1689 = vst [vmem:[%s3212_s3 + $0x78] sm:$0xff] %v1653_v57  ;;  %v3268_v22 = vunpack.c.h.bf16 %v2723_v52  ;;  %v3269_v63 = vunpack.c.h.bf16 %v2717_v9  ;;  %v3270_v49 = vunpack.c.l.bf16 %v2731_v53  ;;  %v3271_v8 = vunpack.c.l.bf16 %v2725_v21 }
 0x22c   : > { %v1578_v3 = vsel %vm2801_vm2, %v3267_v43, %v3266_v14  ;;  %v3272_v39 = vunpack.c.h.bf16 %v2731_v53  ;;  %v3273_v61 = vunpack.c.h.bf16 %v2725_v21  ;;  %v1654_v52 = vadd.f32 %v2806_v0, %v1614_v32 }
 0x22d   : > { %v1579_v38 = vsel %vm2801_vm2, %v3269_v63, %v3268_v22  ;;  %v1580_v54 = vsel %vm2801_vm2, %v3271_v8, %v3270_v49  ;;  %v1655_v9 = vadd.f32 %v2806_v0, %v1615_v11  ;;  %v1656_v37 = vadd.f32 %v2806_v0, %v1616_v2 }
 0x22e   : > { %v1581_v24 = vsel %vm2801_vm2, %v3273_v61, %v3272_v39  ;;  %v1657_v12 = vadd.f32 %v2806_v0, %v1617_v46  ;;  %v1618_v36 = vmul.f32 %v2794_v41, %v1578_v3  ;;  %v1619_v19 = vmul.f32 %v2794_v41, %v1579_v38  ;;  %1690 = vst [vmem:[%s3212_s3 + $0x80] sm:$0xff] %v1654_v52 }
 0x22f   : > { %v1620_v17 = vmul.f32 %v2794_v41, %v1580_v54  ;;  %v1621_v53 = vmul.f32 %v2794_v41, %v1581_v24  ;;  %1691 = vst [vmem:[%s3212_s3 + $0x88] sm:$0xff] %v1655_v9  ;;  %1692 = vst [vmem:[%s3212_s3 + $0x90] sm:$0xff] %v1656_v37  ;;  %v3274_v21 = vunpack.c.l.bf16 %v2739_v59  ;;  %v3275_v48 = vunpack.c.l.bf16 %v2733_v20 }
 0x230   : > { %1693 = vst [vmem:[%s3212_s3 + $0x98] sm:$0xff] %v1657_v12  ;;  %v3276_v29 = vunpack.c.h.bf16 %v2739_v59  ;;  %v3277_v30 = vunpack.c.h.bf16 %v2733_v20  ;;  %v3278_v60 = vunpack.c.l.bf16 %v2750_v55  ;;  %v3279_v31 = vunpack.c.l.bf16 %v2741_v50 }
 0x231   : > { %v1582_v18 = vsel %vm2801_vm2, %v3275_v48, %v3274_v21  ;;  %v3280_v62 = vunpack.c.h.bf16 %v2750_v55  ;;  %v3281_v27 = vunpack.c.h.bf16 %v2741_v50  ;;  %v1658_v59 = vadd.f32 %v2806_v0, %v1618_v36 }
 0x232   : > { %v1583_v47 = vsel %vm2801_vm2, %v3277_v30, %v3276_v29  ;;  %v1584_v33 = vsel %vm2801_vm2, %v3279_v31, %v3278_v60  ;;  %v1659_v20 = vadd.f32 %v2806_v0, %v1619_v19  ;;  %v1660_v1 = vadd.f32 %v2806_v0, %v1620_v17 }
 0x233   : > { %v1585_v28 = vsel %vm2801_vm2, %v3281_v27, %v3280_v62  ;;  %v1661_v10 = vadd.f32 %v2806_v0, %v1621_v53  ;;  %v1622_v45 = vmul.f32 %v2794_v41, %v1582_v18  ;;  %v1623_v58 = vmul.f32 %v2794_v41, %v1583_v47  ;;  %1694 = vst [vmem:[%s3212_s3 + $0xa0] sm:$0xff] %v1658_v59 }
 0x234   : > { %v1624_v57 = vmul.f32 %v2794_v41, %v1584_v33  ;;  %v1625_v55 = vmul.f32 %v2794_v41, %v1585_v28  ;;  %1695 = vst [vmem:[%s3212_s3 + $0xa8] sm:$0xff] %v1659_v20  ;;  %1696 = vst [vmem:[%s3212_s3 + $0xb0] sm:$0xff] %v1660_v1  ;;  %v3282_v50 = vunpack.c.l.bf16 %v2758_v6  ;;  %v3283_v32 = vunpack.c.l.bf16 %v2756_v51 }
 0x235   : > { %1697 = vst [vmem:[%s3212_s3 + $0xb8] sm:$0xff] %v1661_v10  ;;  %v3284_v2 = vunpack.c.h.bf16 %v2758_v6  ;;  %v3285_v46 = vunpack.c.h.bf16 %v2756_v51  ;;  %v3286_v43 = vunpack.c.l.bf16 %v2766_v25  ;;  %v3287_v3 = vunpack.c.l.bf16 %v2764_v35 }
 0x236   : > { %v1586_v11 = vsel %vm2801_vm2, %v3283_v32, %v3282_v50  ;;  %v3288_v63 = vunpack.c.h.bf16 %v2766_v25  ;;  %v3289_v38 = vunpack.c.h.bf16 %v2764_v35  ;;  %v1662_v6 = vadd.f32 %v2806_v0, %v1622_v45 }
 0x237   : > { %v1587_v14 = vsel %vm2801_vm2, %v3285_v46, %v3284_v2  ;;  %v1588_v22 = vsel %vm2801_vm2, %v3287_v3, %v3286_v43  ;;  %v1663_v51 = vadd.f32 %v2806_v0, %v1623_v58  ;;  %v1664_v8 = vadd.f32 %v2806_v0, %v1624_v57 }
 0x238   : > { %v1589_v49 = vsel %vm2801_vm2, %v3289_v38, %v3288_v63  ;;  %v1665_v54 = vadd.f32 %v2806_v0, %v1625_v55  ;;  %v1626_v39 = vmul.f32 %v2794_v41, %v1586_v11  ;;  %v1627_v61 = vmul.f32 %v2794_v41, %v1587_v14  ;;  %1698 = vst [vmem:[%s3212_s3 + $0xc0] sm:$0xff] %v1662_v6 }
 0x239   : > { %v1628_v24 = vmul.f32 %v2794_v41, %v1588_v22  ;;  %v1629_v25 = vmul.f32 %v2794_v41, %v1589_v49  ;;  %1699 = vst [vmem:[%s3212_s3 + $0xc8] sm:$0xff] %v1663_v51  ;;  %1700 = vst [vmem:[%s3212_s3 + $0xd0] sm:$0xff] %v1664_v8  ;;  %v1590_v35 = vsel %vm2801_vm2, %v1500_v16, %v1554_v42 }
 0x23a   : > { %1701 = vst [vmem:[%s3212_s3 + $0xd8] sm:$0xff] %v1665_v54  ;;  %v1591_v52 = vsel %vm2801_vm2, %v1501_v40, %v1555_v4  ;;  %v1592_v9 = vsel %vm2801_vm2, %v1502_v56, %v1556_v15  ;;  %v1593_v42 = vsel %vm2801_vm2, %v1503_v7, %v1557_v23  ;;  %v1666_v16 = vadd.f32 %v2806_v0, %v1626_v39 }
 0x23b   : > { %v1667_v13 = vadd.f32 %v2806_v0, %v1627_v61  ;;  %v1668_v4 = vadd.f32 %v2806_v0, %v1628_v24  ;;  %v1669_v40 = vadd.f32 %v2806_v0, %v1629_v25  ;;  %v1630_v34 = vmul.f32 %v2794_v41, %v1590_v35 }
 0x23c   : > { %v1631_v37 = vmul.f32 %v2794_v41, %v1591_v52  ;;  %v1632_v15 = vmul.f32 %v2794_v41, %v1592_v9  ;;  %v1633_v26 = vmul.f32 %v2794_v41, %v1593_v42  ;;  %1702 = vst [vmem:[%s3212_s3 + $0xe0] sm:$0xff] %v1666_v16 }
 0x23d   : > { %1703 = vst [vmem:[%s3212_s3 + $0xe8] sm:$0xff] %v1667_v13  ;;  %1704 = vst [vmem:[%s3212_s3 + $0xf0] sm:$0xff] %v1668_v4  ;;  %v1670_v44 = vadd.f32 %v2806_v0, %v1630_v34 }
 0x23e   : > { %1705 = vst [vmem:[%s3212_s3 + $0xf8] sm:$0xff] %v1669_v40  ;;  %v1671_v41 = vadd.f32 %v2806_v0, %v1631_v37  ;;  %v1672_v5 = vadd.f32 %v2806_v0, %v1632_v15  ;;  %v1673_v56 = vadd.f32 %v2806_v0, %v1633_v26 }
 0x23f   : > { %1706 = vst [vmem:[%s3212_s3 + $0x100] sm:$0xff] %v1670_v44 }
 0x240   : > { %1707 = vst [vmem:[%s3212_s3 + $0x108] sm:$0xff] %v1671_v41  ;;  %1708 = vst [vmem:[%s3212_s3 + $0x110] sm:$0xff] %v1672_v5 }
 0x241   : > { %1709 = vst [vmem:[%s3212_s3 + $0x118] sm:$0xff] %v1673_v56 }
 0x242 PF: > { %s13_s12 = sadd.s32 1, %s2041_s12  }
 0x243   : > { %p10_p7 = scmp.ge.s32.totalorder %s13_s12, 6  }
 0x245   :  { %12 = sbr.rel (!%p10_p7) target bundleno = 1 (0x1), region = 70 }

// kernel: _lambda_.7
= control target key start
LH: loop header
LB: loop body
LE: loop exit
PB: predicated region body
PF: predicated region fallthrough
CT: control target
= control target key end

     0   :  { %s1675_s12 = smov 0   ;;  %s2002_s0 = inlined_call_operand.vmem [shape: bf16[4,72,576], index: 0, kind: input, shape index: {}]   ;;  %s2003_s1 = inlined_call_operand.vmem [shape: bf16[576,128], index: 1, kind: input, shape index: {}]   ;;  %s2004_s2 = inlined_call_operand.vmem [shape: f32[8,128], index: 2, kind: input, shape index: {}]   ;;  %s2005_s3 = inlined_call_operand.vmem [shape: f32[72,128], index: 3, kind: output, shape index: {}]  }
   0x1 LB: > { %s1681_s13 = sadd.s32 4294967295, %s1649_s12   ;;  %p1174_p0 = scmp.ge.s32.totalorder %s1649_s12, 1  ;;  %s1649_s12 = sphi %s1675_s12, %s13_s12  }
   0x2   : > { %p132_p1 = scmp.lt.s32.totalorder %s1649_s12, 5 }
   0x4   : > { %p133_p2 = pnand %p1174_p0, %p132_p1 }
   0x5   : > { %v1572_v0 = vld [vmem:[%s2003_s1 + $0x40] sm:$0xff] (!%p133_p2)   ;;  %v1576_v4 = vld [vmem:[%s2003_s1 + $0x48] sm:$0xff] (!%p133_p2)   ;;  %v1580_v8 = vld [vmem:[%s2003_s1 + $0x50] sm:$0xff] (!%p133_p2)   ;;  %p151_p3 = scmp.lt.s32.totalorder (!%p133_p2), %s1681_s13, 3  ;;  %v1651_v34 = vmov (!%p133_p2), 0.0   ;;  %vm1652_vm0 = vmmov (!%p133_p2), 0  }
   0x6   : > { %136 = sbr.rel (%p133_p2) target bundleno = 396 (0x18c), region = 32  ;;  %v1573_v1 = vld [vmem:[%s2003_s1 + $0xc0] sm:$0xff] (!%p133_p2)   ;;  %1422 = vmatprep.subr.bf16.mxu0 (!%p133_p2), %v1572_v0  ;;  %v1577_v5 = vld [vmem:[%s2003_s1 + $0xc8] sm:$0xff] (!%p133_p2)   ;;  %v1581_v9 = vld [vmem:[%s2003_s1 + $0xd0] sm:$0xff] (!%p133_p2)   ;;  %vm594_vm1 = vcmask (!%p133_p2), 523264   ;;  %p1243_p4 = scmp.ne.s32.totalorder (!%p133_p2), %s1681_s13, 0 }
   0x7   : > { %v1574_v2 = vld [vmem:[%s2003_s1] sm:$0xff] (!%p133_p2)   ;;  %1468 = vmatprep.subr.bf16.mxu1 (!%p133_p2), %v1573_v1  ;;  %v1578_v6 = vld [vmem:[%s2003_s1 + $0x8] sm:$0xff] (!%p133_p2)   ;;  %v1582_v10 = vld [vmem:[%s2003_s1 + $0x10] sm:$0xff] (!%p133_p2)  }
   0x8   : > { %v1575_v3 = vld [vmem:[%s2003_s1 + $0x80] sm:$0xff] (!%p133_p2)   ;;  %1423 = vmatpush3.bf16.msra.mxu0 (!%p133_p2), %v1574_v2  ;;  %v1579_v7 = vld [vmem:[%s2003_s1 + $0x88] sm:$0xff] (!%p133_p2)   ;;  %v1583_v11 = vld [vmem:[%s2003_s1 + $0x90] sm:$0xff] (!%p133_p2)  }
   0x9   : > { %1469 = vmatpush3.bf16.msra.mxu1 (!%p133_p2), %v1575_v3  ;;  %1424 = vmatprep.subr.bf16.mxu0 (!%p133_p2), %v1576_v4  ;;  %v1584_v12 = vld [vmem:[%s2003_s1 + $0x58] sm:$0xff] (!%p133_p2)   ;;  %v1588_v16 = vld [vmem:[%s2003_s1 + $0x60] sm:$0xff] (!%p133_p2)   ;;  %v1592_v20 = vld [vmem:[%s2003_s1 + $0x68] sm:$0xff] (!%p133_p2)  }
   0xa   : > { %1470 = vmatprep.subr.bf16.mxu1 (!%p133_p2), %v1577_v5  ;;  %v1585_v13 = vld [vmem:[%s2003_s1 + $0xd8] sm:$0xff] (!%p133_p2)   ;;  %v1589_v17 = vld [vmem:[%s2003_s1 + $0xe0] sm:$0xff] (!%p133_p2)   ;;  %v1593_v21 = vld [vmem:[%s2003_s1 + $0xe8] sm:$0xff] (!%p133_p2)  }
   0xb   : > { %v1586_v14 = vld [vmem:[%s2003_s1 + $0x18] sm:$0xff] (!%p133_p2)   ;;  %v1590_v18 = vld [vmem:[%s2003_s1 + $0x20] sm:$0xff] (!%p133_p2)   ;;  %v1594_v22 = vld [vmem:[%s2003_s1 + $0x28] sm:$0xff] (!%p133_p2)  }
   0xc   : > { %1425 = vmatpush3.bf16.msra.mxu0 (!%p133_p2), %v1578_v6  ;;  %v1587_v15 = vld [vmem:[%s2003_s1 + $0x98] sm:$0xff] (!%p133_p2)   ;;  %v1591_v19 = vld [vmem:[%s2003_s1 + $0xa0] sm:$0xff] (!%p133_p2)   ;;  %v1595_v23 = vld [vmem:[%s2003_s1 + $0xa8] sm:$0xff] (!%p133_p2)  }
   0xd   : > { %1471 = vmatpush3.bf16.msra.mxu1 %v1579_v7  ;;  %1426 = vmatprep.subr.bf16.mxu0 %v1580_v8  ;;  %s152_s6 = scalar_select %p151_p3, %s1681_s13, 3  ;;  %v1596_v24 = vld [vmem:[%s2003_s1 + $0x70] sm:$0xff]   ;;  %v1600_v28 = vld [vmem:[%s2003_s1 + $0x78] sm:$0xff]   ;;  %v1610_v37 = vld [vmem:[%s2003_s1 + $0x100] sm:$0xff]  }
   0xe   : > { %1472 = vmatprep.subr.bf16.mxu1 %v1581_v9  ;;  %v1597_v25 = vld [vmem:[%s2003_s1 + $0xf0] sm:$0xff]   ;;  %v1601_v29 = vld [vmem:[%s2003_s1 + $0xf8] sm:$0xff]   ;;  %v1617_v40 = vld [vmem:[%s2003_s1 + $0x108] sm:$0xff]  }
   0xf   : > { %s1559_s17 = smul.u32 180, %s152_s6  ;;  %v1598_v26 = vld [vmem:[%s2003_s1 + $0x30] sm:$0xff]   ;;  %v1602_v30 = vld [vmem:[%s2003_s1 + $0x38] sm:$0xff]   ;;  %v1839_v1 = vld [vmem:[%s2004_s2] ss:$0 sm:$0xff] }
  0x10   : > { %1427 = vmatpush3.bf16.msra.mxu0 %v1582_v10  ;;  %v1599_v27 = vld [vmem:[%s2003_s1 + $0xb0] sm:$0xff]   ;;  %v1603_v31 = vld [vmem:[%s2003_s1 + $0xb8] sm:$0xff]  }
  0x11   : > { %1473 = vmatpush3.bf16.msra.mxu1 %v1583_v11  ;;  %1428 = vmatprep.subr.bf16.mxu0 %v1584_v12  ;;  %s1780_s28 = scalar_lea.vmem %s2002_s0, %s1559_s17  ;;  %v1624_v45 = vld [vmem:[%s2003_s1 + $0x110] sm:$0xff]   ;;  %v1633_v47 = vld [vmem:[%s2003_s1 + $0x118] sm:$0xff]  }
  0x12   : > { %1474 = vmatprep.subr.bf16.mxu1 %v1585_v13  ;;  %v1604_v32 = vld [vmem:[%s1780_s28] ss:$20 sps:$4 sm:$0xff]   ;;  %v1606_v33 = vld [vmem:[%s1780_s28 + $0x4] ss:$20 sps:$4 sm:$0xff]   ;;  %v1607_v35 = vld [vmem:[%s1780_s28 + $0x8] ss:$20 sps:$4 sm:$0xff]  }
  0x13   : > { %v1609_v36 = vld [vmem:[%s1780_s28 + $0xc] ss:$20 sps:$4 sm:$0xff]   ;;  %642 = vmatprep.mubr.bf16.mxu0 %v1606_v33  ;;  %v1613_v39 = vld [vmem:[%s1780_s28 + $0x34] ss:$20 sps:$4 sm:$0xff]   ;;  %v1616_v42 = vld [vmem:[%s1780_s28 + $0x30] ss:$20 sps:$4 sm:$0xff]  }
  0x14   : > { %1429 = vmatpush3.bf16.msra.mxu0 %v1586_v14  ;;  %714 = vmatprep.mubr.bf16.mxu1 %v1609_v36  ;;  %v1611_v38 = vld [vmem:[%s1780_s28 + $0x2c] ss:$20 sps:$4 sm:$0xff]   ;;  %v1615_v41 = vld [vmem:[%s1780_s28 + $0x28] ss:$20 sps:$4 sm:$0xff]   ;;  %v1622_v46 = vld [vmem:[%s1780_s28 + $0x50] ss:$20 sps:$4 sm:$0xff]  }
  0x15   : > { %1475 = vmatpush3.bf16.msra.mxu1 %v1587_v15  ;;  %1430 = vmatprep.subr.bf16.mxu0 %v1588_v16  ;;  %v1618_v43 = vld [vmem:[%s1780_s28 + $0x54] ss:$20 sps:$4 sm:$0xff]   ;;  %v1620_v44 = vld [vmem:[%s1780_s28 + $0x5c] ss:$20 sps:$4 sm:$0xff]   ;;  %v1623_v48 = vld [vmem:[%s1780_s28 + $0x58] ss:$20 sps:$4 sm:$0xff]  }
  0x16   : > { %1476 = vmatprep.subr.bf16.mxu1 %v1589_v17  ;;  %v1625_v49 = vld [vmem:[%s1780_s28 + $0x7c] ss:$20 sps:$4 sm:$0xff]   ;;  %v1627_v50 = vld [vmem:[%s1780_s28 + $0x84] ss:$20 sps:$4 sm:$0xff]   ;;  %v182_v52 = vld [vmem:[%s1780_s28 + $0xa8] sm:$0xff] }
  0x17   : > { %v181_v51 = vld [vmem:[%s1780_s28 + $0xa0] sm:$0xff]  ;;  %v1629_v53 = vld [vmem:[%s1780_s28 + $0x78] ss:$20 sps:$4 sm:$0xff]   ;;  %v1200_v56 = vcombine.high %v182_v52, %v182_v52  ;;  %v1199_v58 = vcombine.low %v182_v52, %v182_v52  ;;  %v1637_v60 = vld [vmem:[%s1780_s28 + $0x88] ss:$20 sps:$4 sm:$0xff]  }
  0x18   : > { %1431 = vmatpush3.bf16.msra.mxu0 %v1590_v18  ;;  %v1630_v54 = vld [vmem:[%s1780_s28 + $0x80] ss:$20 sps:$4 sm:$0xff]   ;;  %v1198_v55 = vcombine.high %v181_v51, %v181_v51  ;;  %v1197_v57 = vcombine.low %v181_v51, %v181_v51  ;;  %v1636_v59 = vld [vmem:[%s1780_s28 + $0x10] ss:$20 sps:$4 sm:$0xff]   ;;  %v1638_v61 = vld [vmem:[%s1780_s28 + $0x38] ss:$20 sps:$4 sm:$0xff]  }
  0x19   : > { %1477 = vmatpush3.bf16.msra.mxu1 %v1591_v19  ;;  %1432 = vmatprep.subr.bf16.mxu0 %v1592_v20  ;;  %v1639_v62 = vld [vmem:[%s1780_s28 + $0xb0] ss:$0 sps:$4 sm:$0xff]   ;;  %v1640_v63 = vld [vmem:[%s1780_s28 + $0x60] ss:$20 sps:$4 sm:$0xff]  }
  0x1a   : > { %1478 = vmatprep.subr.bf16.mxu1 %v1593_v21 }
  0x1c   : > { %1433 = vmatpush3.bf16.msra.mxu0 %v1594_v22 }
  0x1d   : > { %1479 = vmatpush3.bf16.msra.mxu1 %v1595_v23  ;;  %1434 = vmatprep.subr.bf16.mxu0 %v1596_v24 }
  0x1e   : > { %1480 = vmatprep.subr.bf16.mxu1 %v1597_v25 }
  0x20   : > { %1435 = vmatpush3.bf16.msra.mxu0 %v1598_v26 }
  0x21   : > { %1481 = vmatpush3.bf16.msra.mxu1 %v1599_v27  ;;  %1436 = vmatprep.subr.bf16.mxu0 %v1600_v28 }
  0x22   : > { %1482 = vmatprep.subr.bf16.mxu1 %v1601_v29 }
  0x24   : > { %1437 = vmatpush3.bf16.msra.mxu0 %v1602_v30 }
  0x25   : > { %1483 = vmatpush3.bf16.msra.mxu1 %v1603_v31  ;;  %1523 = vmatprep.subr.bf16.mxu0 %v1651_v34 }
  0x26   : > { %1551 = vmatprep.subr.bf16.mxu1 %v1651_v34 }
  0x27   : > { %643 = vmatmul.mubr.bf16.vlgmr.msra.gmra.mrb[0].mxu0 %v1604_v32 }
  0x28   : > { %715 = vmatmul.mubr.bf16.vlgmr.msra.gmra.mrb[0].mxu1 %v1607_v35  ;;  %1524 = vmatpush3.bf16.msra.mxu0 %v1610_v37 }
  0x29   : > { %650 = vmatprep.mubr.bf16.mxu0 %v1611_v38  ;;  %1525 = vmatprep.subr.bf16.mxu0 %v1651_v34 }
  0x2a   : > { %722 = vmatprep.mubr.bf16.mxu1 %v1613_v39  ;;  %1555 = vmatpush3.bf16.msra.mxu1 %v1610_v37 }
  0x2b   : > { %1552 = vmatprep.subr.bf16.mxu1 %v1651_v34 }
  0x2c   : > { %1526 = vmatpush3.bf16.msra.mxu0 %v1617_v40 }
  0x2d   : > { %1527 = vmatprep.subr.bf16.mxu0 %v1651_v34 }
  0x2e   : > { %1556 = vmatpush3.bf16.msra.mxu1 %v1617_v40 }
  0x2f   : > { %651 = vmatmul.mubr.bf16.gmra.mrb[4].mxu0 %v1615_v41  ;;  %1553 = vmatprep.subr.bf16.mxu1 %v1651_v34 }
  0x30   : > { %723 = vmatmul.mubr.bf16.gmra.mrb[4].mxu1 %v1616_v42  ;;  %658 = vmatprep.mubr.bf16.mxu0 %v1618_v43 }
  0x31   : > { %730 = vmatprep.mubr.bf16.mxu1 %v1620_v44  ;;  %1528 = vmatpush3.bf16.msra.mxu0 %v1624_v45 }
  0x32   : > { %1529 = vmatprep.subr.bf16.mxu0 %v1651_v34  ;;  %1557 = vmatpush3.bf16.msra.mxu1 %v1624_v45 }
  0x33   : > { %1554 = vmatprep.subr.bf16.mxu1 %v1651_v34 }
  0x35   : > { %1530 = vmatpush3.bf16.msra.mxu0 %v1633_v47 }
  0x36   : > { %1558 = vmatpush3.bf16.msra.mxu1 %v1633_v47 }
  0x37   : > { %659 = vmatmul.mubr.bf16.gmra.mrb[8].mxu0 %v1622_v46 }
  0x38   : > { %731 = vmatmul.mubr.bf16.gmra.mrb[8].mxu1 %v1623_v48  ;;  %666 = vmatprep.mubr.bf16.mxu0 %v1625_v49 }
  0x39   : > { %738 = vmatprep.mubr.bf16.mxu1 %v1627_v50 }
  0x3f   : > { %667 = vmatmul.mubr.bf16.gmra.mrb[12].mxu0 %v1629_v53 }
  0x40   : > { %739 = vmatmul.mubr.bf16.gmra.mrb[12].mxu1 %v1630_v54  ;;  %674 = vmatprep.mubr.bf16.mxu0 %v1198_v55 }
  0x41   : > { %746 = vmatprep.mubr.bf16.mxu1 %v1200_v56 }
  0x47   : > { %675 = vmatmul.mubr.bf16.gmra.mrb[16].mxu0 %v1197_v57 }
  0x48   : > { %747 = vmatmul.mubr.bf16.gmra.mrb[16].mxu1 %v1199_v58  ;;  %1531 = vmatprep.mubr.msk.bf16.mxu0 %vm1652_vm0, %v1651_v34 }
  0x49   : > { %1543 = vmatprep.mubr.msk.bf16.mxu1 %vm1652_vm0, %v1651_v34 }
  0x4f   : > { %1532 = vmatmul.mubr.msk.bf16.vlgmr.msra.gmra.mrb[20].mxu0 %vm594_vm1, %v1636_v59 }
  0x50   : > { %1544 = vmatmul.mubr.msk.bf16.vlgmr.msra.gmra.mrb[20].mxu1 %vm594_vm1, %v1637_v60  ;;  %1535 = vmatprep.mubr.msk.bf16.mxu0 %vm1652_vm0, %v1651_v34 }
  0x51   : > { %1547 = vmatprep.mubr.msk.bf16.mxu1 %vm1652_vm0, %v1651_v34 }
  0x57   : > { %1536 = vmatmul.mubr.msk.bf16.gmra.mrb[24].mxu0 %vm594_vm1, %v1638_v61 }
  0x58   : > { %1548 = vmatmul.mubr.msk.bf16.gmra.mrb[24].mxu1 %vm594_vm1, %v1639_v62  ;;  %1539 = vmatprep.mubr.msk.bf16.mxu0 %vm1652_vm0, %v1651_v34 }
  0x5f   : > { %1540 = vmatmul.mubr.msk.bf16.gmra.mrb[28].mxu0 %vm594_vm1, %v1640_v63 }
  0xfa   : > { %v1438_v0 = vpop.f32.mrb[0].mxu0 }
  0xfb   : > { %v1439_v2 = vpop.f32.mrb[1].mxu0  ;;  %v1484_v3 = vpop.f32.mrb[0].mxu1 }
  0xfc   : > { %v1440_v4 = vadd.f32 %v1439_v2, %v1438_v0  ;;  %v1441_v5 = vpop.f32.mrb[2].mxu0  ;;  %v1485_v6 = vpop.f32.mrb[1].mxu1 }
  0xfd   : > { %v1442_v7 = vpop.f32.mrb[3].mxu0  ;;  %v1486_v8 = vadd.f32 %v1485_v6, %v1484_v3  ;;  %v1487_v9 = vpop.f32.mrb[2].mxu1 }
  0xfe   : > { %v645_v10 = vadd.f32 %v1440_v4, %v1839_v1  ;;  %v1443_v11 = vadd.f32 %v1442_v7, %v1441_v5  ;;  %v1488_v12 = vpop.f32.mrb[3].mxu1 }
  0xff   : > { %v1489_v13 = vadd.f32 %v1488_v12, %v1487_v9 }
 0x100   : > { %v648_v14 = vadd.f32 %v1443_v11, %v1839_v1  ;;  %v1843_v15 = vadd.f32 %v1486_v8, %v645_v10 }
 0x102   : > { %v1444_v16 = vpop.f32.mrb[4].mxu0  ;;  %v1845_v17 = vadd.f32 %v1489_v13, %v648_v14 }
 0x103   : > { %v1445_v18 = vpop.f32.mrb[5].mxu0  ;;  %v1490_v19 = vpop.f32.mrb[4].mxu1 }
 0x104   : > { %v1446_v20 = vadd.f32 %v1445_v18, %v1444_v16  ;;  %v1447_v21 = vpop.f32.mrb[6].mxu0  ;;  %v1491_v22 = vpop.f32.mrb[5].mxu1 }
 0x105   : > { %v1448_v23 = vpop.f32.mrb[7].mxu0  ;;  %v1492_v24 = vadd.f32 %v1491_v22, %v1490_v19  ;;  %v1493_v25 = vpop.f32.mrb[6].mxu1 }
 0x106   : > { %v653_v26 = vadd.f32 %v1446_v20, %v1839_v1  ;;  %v1449_v27 = vadd.f32 %v1448_v23, %v1447_v21  ;;  %v1494_v28 = vpop.f32.mrb[7].mxu1 }
 0x107   : > { %v1495_v29 = vadd.f32 %v1494_v28, %v1493_v25 }
 0x108   : > { %v656_v30 = vadd.f32 %v1449_v27, %v1839_v1  ;;  %v1849_v31 = vadd.f32 %v1492_v24, %v653_v26 }
 0x10a   : > { %v1450_v32 = vpop.f32.mrb[8].mxu0  ;;  %v1851_v33 = vadd.f32 %v1495_v29, %v656_v30 }
 0x10b   : > { %v1451_v34 = vpop.f32.mrb[9].mxu0  ;;  %v1496_v35 = vpop.f32.mrb[8].mxu1 }
 0x10c   : > { %v1452_v36 = vadd.f32 %v1451_v34, %v1450_v32  ;;  %v1453_v37 = vpop.f32.mrb[10].mxu0  ;;  %v1497_v38 = vpop.f32.mrb[9].mxu1 }
 0x10d   : > { %v1454_v39 = vpop.f32.mrb[11].mxu0  ;;  %v1498_v40 = vadd.f32 %v1497_v38, %v1496_v35  ;;  %v1499_v41 = vpop.f32.mrb[10].mxu1 }
 0x10e   : > { %v661_v42 = vadd.f32 %v1452_v36, %v1839_v1  ;;  %v1455_v43 = vadd.f32 %v1454_v39, %v1453_v37  ;;  %v1500_v44 = vpop.f32.mrb[11].mxu1 }
 0x10f   : > { %v1501_v45 = vadd.f32 %v1500_v44, %v1499_v41 }
 0x110   : > { %v664_v46 = vadd.f32 %v1455_v43, %v1839_v1  ;;  %v1855_v47 = vadd.f32 %v1498_v40, %v661_v42 }
 0x112   : > { %v1456_v48 = vpop.f32.mrb[12].mxu0  ;;  %v1857_v49 = vadd.f32 %v1501_v45, %v664_v46 }
 0x113   : > { %v1457_v50 = vpop.f32.mrb[13].mxu0  ;;  %v1502_v51 = vpop.f32.mrb[12].mxu1 }
 0x114   : > { %v1458_v52 = vadd.f32 %v1457_v50, %v1456_v48  ;;  %v1459_v53 = vpop.f32.mrb[14].mxu0  ;;  %v1503_v54 = vpop.f32.mrb[13].mxu1 }
 0x115   : > { %v1460_v55 = vpop.f32.mrb[15].mxu0  ;;  %v1504_v56 = vadd.f32 %v1503_v54, %v1502_v51  ;;  %v1505_v57 = vpop.f32.mrb[14].mxu1 }
 0x116   : > { %v669_v58 = vadd.f32 %v1458_v52, %v1839_v1  ;;  %v1461_v59 = vadd.f32 %v1460_v55, %v1459_v53  ;;  %v1506_v60 = vpop.f32.mrb[15].mxu1 }
 0x117   : > { %v1507_v61 = vadd.f32 %v1506_v60, %v1505_v57 }
 0x118   : > { %v672_v62 = vadd.f32 %v1461_v59, %v1839_v1  ;;  %v741_v63 = vadd.f32 %v1504_v56, %v669_v58 }
 0x11a   : > { %v1462_v0 = vpop.f32.mrb[16].mxu0  ;;  %v744_v2 = vadd.f32 %v1507_v61, %v672_v62 }
 0x11b   : > { %v1463_v3 = vpop.f32.mrb[17].mxu0  ;;  %v1508_v4 = vpop.f32.mrb[16].mxu1 }
 0x11c   : > { %v1464_v5 = vadd.f32 %v1463_v3, %v1462_v0  ;;  %v1465_v6 = vpop.f32.mrb[18].mxu0  ;;  %v1509_v7 = vpop.f32.mrb[17].mxu1  ;;  %v1653_v0 = vmov (!%p1243_p4), 0.0  }
 0x11d   : > { %v1466_v8 = vpop.f32.mrb[19].mxu0  ;;  %v1510_v9 = vadd.f32 %v1509_v7, %v1508_v4  ;;  %v1511_v10 = vpop.f32.mrb[18].mxu1  ;;  %853 = vst [vmem:[#allocation4] sm:$0x1] (!%p1243_p4), %v1653_v0  ;;  %854 = vst [vmem:[#allocation5] sm:$0x1] (!%p1243_p4), %v1653_v0 }
 0x11e   : > { %v677_v11 = vadd.f32 %v1464_v5, %v1839_v1  ;;  %v1512_v12 = vpop.f32.mrb[19].mxu1 }
 0x120   : > { %v749_v13 = vadd.f32 %v1510_v9, %v677_v11 }
 0x122   : > { %v788_v14 = vpop.f32.mrb[20].mxu0 }
 0x123   : > { %v789_v16 = vadd.f32 %v788_v14, %v1843_v15  ;;  %v812_v18 = vpop.f32.mrb[20].mxu1  ;;  %v1533_v19 = vpop.f32.mrb[21].mxu0 }
 0x124   : > { %v813_v20 = vadd.f32 %v812_v18, %v741_v63  ;;  %v1545_v21 = vpop.f32.mrb[21].mxu1  ;;  %v791_v22 = vpop.f32.mrb[22].mxu0 }
 0x125   : > { %v826_v23 = vmul.f32 0.05, %v789_v16  ;;  %v792_v24 = vadd.f32 %v791_v22, %v1845_v17  ;;  %v815_v25 = vpop.f32.mrb[22].mxu1  ;;  %v1534_v26 = vpop.f32.mrb[23].mxu0 }
 0x126   : > { %v832_v27 = vmul.f32 0.05, %v813_v20  ;;  %v816_v28 = vadd.f32 %v815_v25, %v744_v2  ;;  %v1546_v29 = vpop.f32.mrb[23].mxu1 }
 0x127   : > { %v1864_v30 = vmax.f32 %v789_v16, %v826_v23  ;;  %v827_v1 = vmul.f32 0.05, %v792_v24 }
 0x128   : > { %v1866_v32 = vmax.f32 %v813_v20, %v832_v27  ;;  %v833_v34 = vmul.f32 0.05, %v816_v28 }
 0x129   : > { %v1868_v15 = vmax.f32 %v792_v24, %v827_v1 }
 0x12a   : > { %v1870_v35 = vmax.f32 %v816_v28, %v833_v34  ;;  %v796_v36 = vpop.f32.mrb[24].mxu0 }
 0x12b   : > { %v797_v37 = vadd.f32 %v796_v36, %v1849_v31  ;;  %v820_v38 = vpop.f32.mrb[24].mxu1  ;;  %v1537_v17 = vpop.f32.mrb[25].mxu0  ;;  %v1287_v62 = vpack.c.bf16 (!%p1243_p4), %v1868_v15, %v1864_v30 }
 0x12c   : > { %v821_v39 = vadd.f32 %v820_v38, %v749_v13  ;;  %v799_v40 = vpop.f32.mrb[26].mxu0  ;;  %v1549_v41 = vpop.f32.mrb[25].mxu1 }
 0x12d   : > { %v828_v42 = vmul.f32 0.05, %v797_v37  ;;  %v800_v43 = vadd.f32 %v799_v40, %v1851_v33  ;;  %v1538_v44 = vpop.f32.mrb[27].mxu0  ;;  %v823_v45 = vpop.f32.mrb[26].mxu1  ;;  %1288 = vst [vmem:[#allocation2] sm:$0xff] (!%p1243_p4), %v1287_v62   ;;  %1308 = vst [vmem:[#allocation3] sm:$0xff] (!%p1243_p4), %v1287_v62  }
 0x12e   : > { %v834_v46 = vmul.f32 0.05, %v821_v39  ;;  %v1550_v48 = vpop.f32.mrb[27].mxu1 }
 0x12f   : > { %v1874_v50 = vmax.f32 %v797_v37, %v828_v42  ;;  %v829_v51 = vmul.f32 0.05, %v800_v43 }
 0x130   : > { %v1876_v52 = vmax.f32 %v821_v39, %v834_v46 }
 0x131   : > { %v1878_v53 = vmax.f32 %v800_v43, %v829_v51 }
 0x132   : > { %v804_v31 = vpop.f32.mrb[28].mxu0  ;;  %v1274_v2 = vpack.c.bf16 (!%p1243_p4), %v1876_v52, %v1876_v52 }
 0x133   : > { %v805_v54 = vadd.f32 %v804_v31, %v1855_v47  ;;  %v1541_v55 = vpop.f32.mrb[29].mxu0  ;;  %852 = sbr.rel (%p1243_p4) target bundleno = 318 (0x13e), region = 36  ;;  %v1292_v47 = vpack.c.bf16 (!%p1243_p4), %v1878_v53, %v1874_v50 }
 0x134   : > { %v807_v56 = vpop.f32.mrb[30].mxu0  ;;  %895 = vst [vmem:[#allocation2 + $0x20] sm:$0xf] (!%p1243_p4), %v1274_v2  ;;  %904 = vst [vmem:[#allocation3 + $0x20] sm:$0xf] (!%p1243_p4), %v1274_v2 }
 0x135   : > { %v830_v57 = vmul.f32 0.05, %v805_v54  ;;  %v808_v58 = vadd.f32 %v807_v56, %v1857_v49  ;;  %v1542_v33 = vpop.f32.mrb[31].mxu0  ;;  %v1302_v49 = vpack.c.bf16 (!%p1243_p4), %v1870_v35, %v1866_v32  ;;  %1396 = vst [vmem:[#allocation2 + $0x8] sm:$0xff] (!%p1243_p4), %v1292_v47   ;;  %1399 = vst [vmem:[#allocation3 + $0x8] sm:$0xff] (!%p1243_p4), %v1292_v47  }
 0x137   : > { %v1882_v59 = vmax.f32 %v805_v54, %v830_v57  ;;  %v831_v60 = vmul.f32 0.05, %v808_v58  ;;  %1398 = vst [vmem:[#allocation2 + $0x18] sm:$0xff] (!%p1243_p4), %v1302_v49   ;;  %1401 = vst [vmem:[#allocation3 + $0x18] sm:$0xff] (!%p1243_p4), %v1302_v49  }
 0x139   : > { %v1884_v61 = vmax.f32 %v808_v58, %v831_v60 }
 0x13b   : > { %v1297_v63 = vpack.c.bf16 %v1884_v61, %v1882_v59 }
 0x13d   : > { %1397 = vst [vmem:[#allocation2 + $0x10] sm:$0xff] %v1297_v63   ;;  %1400 = vst [vmem:[#allocation3 + $0x10] sm:$0xff] %v1297_v63  }
 0x13e PF: > { %v906_v3 = vadd.f32 %v1868_v15, %v1864_v30  ;;  %v923_v4 = vmul.f32 %v1864_v30, %v1864_v30  ;;  %v924_v5 = vmul.f32 %v1868_v15, %v1868_v15  ;;  %v925_v6 = vmul.f32 %v1874_v50, %v1874_v50  ;;  %v905_v42 = vld [vmem:[#allocation4] sm:$0x1]  ;;  %v922_v45 = vld [vmem:[#allocation5] sm:$0x1]  ;;  %p1253_p5 = scmp.le.s32.totalorder %s1681_s13, 0 }
 0x13f   : > { %v926_v8 = vmul.f32 %v1878_v53, %v1878_v53  ;;  %v927_v11 = vmul.f32 %v1882_v59, %v1882_v59  ;;  %v928_v14 = vmul.f32 %v1884_v61, %v1884_v61  ;;  %v929_v19 = vmul.f32 %v1866_v32, %v1866_v32  ;;  %v952_v31 = vld [vmem:[#allocation2] sm:$0xf] (!%p1253_p5)  ;;  %v953_v54 = vld [vmem:[#allocation2 + $0x4] sm:$0xf] (!%p1253_p5) }
 0x140   : > { %v907_v7 = vadd.f32 %v906_v3, %v1874_v50  ;;  %v932_v9 = vadd.f32 %v924_v5, %v923_v4  ;;  %v930_v22 = vmul.f32 %v1870_v35, %v1870_v35  ;;  %v931_v25 = vmul.f32 %v1876_v52, %v1876_v52  ;;  %v954_v57 = vld [vmem:[#allocation2 + $0x8] sm:$0xf] (!%p1253_p5)  ;;  %v955_v60 = vld [vmem:[#allocation2 + $0xc] sm:$0xf] (!%p1253_p5)  ;;  %v960_v5 = vld [vmem:[#allocation2 + $0x20] sm:$0xf] (!%p1253_p5) }
 0x141   : > { %v1275_v55 = vpack.c.bf16 (!%p1253_p5), %v1864_v30, %v1864_v30  ;;  %v1276_v56 = vpack.c.bf16 (!%p1253_p5), %v1868_v15, %v1868_v15  ;;  %v1277_v58 = vpack.c.bf16 (!%p1253_p5), %v1874_v50, %v1874_v50  ;;  %v1278_v33 = vpack.c.bf16 (!%p1253_p5), %v1878_v53, %v1878_v53 }
 0x142   : > { %v908_v10 = vadd.f32 %v907_v7, %v1878_v53  ;;  %v933_v12 = vadd.f32 %v932_v9, %v925_v6  ;;  %v1279_v63 = vpack.c.bf16 (!%p1253_p5), %v1882_v59, %v1882_v59  ;;  %v1280_v0 = vpack.c.bf16 (!%p1253_p5), %v1884_v61, %v1884_v61  ;;  %v958_v53 = vld [vmem:[#allocation2 + $0x18] sm:$0xf] (!%p1253_p5)  ;;  %v959_v4 = vld [vmem:[#allocation2 + $0x1c] sm:$0xf] (!%p1253_p5)  ;;  %v1011_v9 = vld [vmem:[#allocation3] sm:$0xf] (!%p1253_p5) }
 0x143   : > { %v1281_v30 = vpack.c.bf16 (!%p1253_p5), %v1866_v32, %v1866_v32  ;;  %v1282_v15 = vpack.c.bf16 (!%p1253_p5), %v1870_v35, %v1870_v35  ;;  %v993_v49 = vmax.bf16 (!%p1253_p5), %v1275_v55, %v952_v31  ;;  %v994_v50 = vmax.bf16 (!%p1253_p5), %v1276_v56, %v953_v54 }
 0x144   : > { %v909_v13 = vadd.f32 %v908_v10, %v1882_v59  ;;  %v934_v16 = vadd.f32 %v933_v12, %v926_v8  ;;  %v956_v62 = vld [vmem:[#allocation2 + $0x10] sm:$0xf] (!%p1253_p5)  ;;  %v957_v47 = vld [vmem:[#allocation2 + $0x14] sm:$0xf] (!%p1253_p5)  ;;  %v995_v2 = vmax.bf16 (!%p1253_p5), %v1277_v58, %v954_v57  ;;  %v996_v3 = vmax.bf16 (!%p1253_p5), %v1278_v33, %v955_v60  ;;  %v1012_v10 = vld [vmem:[#allocation3 + $0x4] sm:$0xf] (!%p1253_p5) }
 0x145   : > { %v997_v6 = vmax.bf16 (!%p1253_p5), %v1279_v63, %v956_v62  ;;  %v998_v7 = vmax.bf16 (!%p1253_p5), %v1280_v0, %v957_v47  ;;  %v999_v8 = vmax.bf16 (!%p1253_p5), %v1281_v30, %v958_v53  ;;  %v1000_v59 = vmax.bf16 (!%p1253_p5), %v1282_v15, %v959_v4 }
 0x146   : > { %v910_v18 = vadd.f32 %v909_v13, %v1884_v61  ;;  %v935_v20 = vadd.f32 %v934_v16, %v927_v11  ;;  %v1013_v61 = vld [vmem:[#allocation3 + $0x8] sm:$0xf] (!%p1253_p5)  ;;  %v1402_v11 = vcombine.low (!%p1253_p5), %v993_v49, %v994_v50  ;;  %v1403_v12 = vcombine.low (!%p1253_p5), %v995_v2, %v996_v3  ;;  %v1014_v13 = vld [vmem:[#allocation3 + $0xc] sm:$0xf] (!%p1253_p5)  ;;  %v1016_v16 = vld [vmem:[#allocation3 + $0x14] sm:$0xf] (!%p1253_p5) }
 0x148   : > { %v911_v21 = vadd.f32 %v910_v18, %v1866_v32  ;;  %v936_v23 = vadd.f32 %v935_v20, %v928_v14  ;;  %v1283_v32 = vpack.c.bf16 (!%p1253_p5), %v1876_v52, %v1876_v52  ;;  %v1015_v14 = vld [vmem:[#allocation3 + $0x10] sm:$0xf] (!%p1253_p5)  ;;  %v1405_v18 = vcombine.low (!%p1253_p5), %v997_v6, %v998_v7  ;;  %1328 = vst [vmem:[#allocation2] sm:$0xff] (!%p1253_p5), %v1402_v11  }
 0x149   : > { %v1021_v20 = vmin.bf16 (!%p1253_p5), %v1276_v56, %v1012_v10  ;;  %1404 = vst [vmem:[#allocation2 + $0x8] sm:$0xff] (!%p1253_p5), %v1403_v12  }
 0x14a   : > { %v912_v24 = vadd.f32 %v911_v21, %v1870_v35  ;;  %v937_v26 = vadd.f32 %v936_v23, %v929_v19  ;;  %v1020_v35 = vmin.bf16 (!%p1253_p5), %v1275_v55, %v1011_v9  ;;  %v1407_v19 = vcombine.low (!%p1253_p5), %v999_v8, %v1000_v59  ;;  %v1018_v23 = vld [vmem:[#allocation3 + $0x1c] sm:$0xf] (!%p1253_p5)  ;;  %1406 = vst [vmem:[#allocation2 + $0x10] sm:$0xff] (!%p1253_p5), %v1405_v18  }
 0x14b   : > { %v1022_v21 = vmin.bf16 (!%p1253_p5), %v1277_v58, %v1013_v61 }
 0x14c   : > { %v913_v27 = vadd.f32 %v912_v24, %v1876_v52  ;;  %v938_v28 = vadd.f32 %v937_v26, %v930_v22  ;;  %v1017_v22 = vld [vmem:[#allocation3 + $0x18] sm:$0xf] (!%p1253_p5)  ;;  %v1019_v24 = vld [vmem:[#allocation3 + $0x20] sm:$0xf] (!%p1253_p5)  ;;  %v1023_v26 = vmin.bf16 (!%p1253_p5), %v1278_v33, %v1014_v13  ;;  %1408 = vst [vmem:[#allocation2 + $0x18] sm:$0xff] (!%p1253_p5), %v1407_v19   ;;  %v1409_v52 = vcombine.low (!%p1253_p5), %v1020_v35, %v1021_v20 }
 0x14e   : > { %v914_v29 = vrot.slane %v913_v27, 4  ;;  %v939_v1 = vadd.f32 %v938_v28, %v931_v25  ;;  %v1001_v25 = vmax.bf16 (!%p1253_p5), %v1283_v32, %v960_v5  ;;  %v1025_v28 = vmin.bf16 (!%p1253_p5), %v1280_v0, %v1016_v16  ;;  %1348 = vst [vmem:[#allocation3] sm:$0xff] (!%p1253_p5), %v1409_v52  }
 0x150   : > { %v915_v34 = vadd.f32 %v914_v29, %v913_v27  ;;  %v940_v36 = vrot.slane %v939_v1, 4  ;;  %v1024_v27 = vmin.bf16 (!%p1253_p5), %v1279_v63, %v1015_v14  ;;  %v1026_v29 = vmin.bf16 (!%p1253_p5), %v1281_v30, %v1017_v22  ;;  %1010 = vst [vmem:[#allocation2 + $0x20] sm:$0xf] (!%p1253_p5), %v1001_v25 }
 0x152   : > { %v916_v37 = vrot.slane %v915_v34, 2  ;;  %v941_v38 = vadd.f32 %v940_v36, %v939_v1  ;;  %v1027_v1 = vmin.bf16 (!%p1253_p5), %v1282_v15, %v1018_v23  ;;  %v1410_v36 = vcombine.low (!%p1253_p5), %v1022_v21, %v1023_v26 }
 0x154   : > { %v917_v17 = vadd.f32 %v916_v37, %v915_v34  ;;  %v942_v39 = vrot.slane %v941_v38, 2  ;;  %v1028_v34 = vmin.bf16 (!%p1253_p5), %v1283_v32, %v1019_v24  ;;  %v1412_v37 = vcombine.low (!%p1253_p5), %v1024_v27, %v1025_v28  ;;  %1411 = vst [vmem:[#allocation3 + $0x8] sm:$0xff] (!%p1253_p5), %v1410_v36  }
 0x156   : > { %v918_v40 = vrot.slane %v917_v17, 1  ;;  %v943_v41 = vadd.f32 %v942_v39, %v941_v38  ;;  %v1414_v38 = vcombine.low (!%p1253_p5), %v1026_v29, %v1027_v1  ;;  %1037 = vst [vmem:[#allocation3 + $0x20] sm:$0xf] (!%p1253_p5), %v1028_v34  ;;  %1413 = vst [vmem:[#allocation3 + $0x10] sm:$0xff] (!%p1253_p5), %v1412_v37  }
 0x158   : > { %v919_v43 = vadd.f32 %v918_v40, %v917_v17  ;;  %v944_v44 = vrot.slane %v943_v41, 1  ;;  %951 = sbr.rel (%p1253_p5) target bundleno = 351 (0x15f), region = 40  ;;  %1415 = vst [vmem:[#allocation3 + $0x18] sm:$0xff] (!%p1253_p5), %v1414_v38  }
 0x15a   : > { %v920_v46 = vadd.f32 %v919_v43, %v905_v42  ;;  %v945_v48 = vadd.f32 %v944_v44, %v943_v41 }
 0x15c   : > { %921 = vst [vmem:[#allocation4] sm:$0x1] %v920_v46  ;;  %v946_v51 = vadd.f32 %v945_v48, %v922_v45 }
 0x15e   : > { %947 = vst [vmem:[#allocation5] sm:$0x1] %v946_v51 }
 0x15f PF: > { %p1263_p6 = scmp.ne.s32.totalorder %s1681_s13, 3 }
 0x160   : > { %v1058_v46 = vlaneseq (!%p1263_p6)  ;;  %v1049_v51 = vld [vmem:[%s2004_s2 + $0x1] sm:$0x1] (!%p1263_p6)  ;;  %v1381_v54 = vld [vmem:[#allocation3] sm:$0xff] (!%p1263_p6)   ;;  %v1419_v56 = vld [vmem:[#allocation3 + $0x8] sm:$0xff] (!%p1263_p6)   ;;  %v1654_v6 = vmov (!%p1263_p6), 0  }
 0x161   : > { %1041 = sbr.rel (%p1263_p6) target bundleno = 396 (0x18c), region = 44  ;;  %v1365_v31 = vld [vmem:[#allocation2] sm:$0xff] (!%p1263_p6)   ;;  %v1416_v55 = vld [vmem:[#allocation2 + $0x8] sm:$0xff] (!%p1263_p6)   ;;  %v1382_v62 = vunpack.c.l.bf16 (!%p1263_p6), %v1381_v54  ;;  %v1417_v47 = vld [vmem:[#allocation2 + $0x10] sm:$0xff] (!%p1263_p6)   ;;  %v1383_v15 = vunpack.c.h.bf16 (!%p1263_p6), %v1381_v54  ;;  %v1386_v50 = vunpack.c.l.bf16 (!%p1263_p6), %v1419_v56  ;;  %v1387_v53 = vunpack.c.h.bf16 (!%p1263_p6), %v1419_v56 }
 0x162   : > { %v1059_v48 = vshrl.u32 (!%p1263_p6), %v1058_v46, 7  ;;  %v1366_v60 = vunpack.c.l.bf16 (!%p1263_p6), %v1365_v31  ;;  %v1420_v63 = vld [vmem:[#allocation3 + $0x10] sm:$0xff] (!%p1263_p6)   ;;  %v1053_v0 = vld [vmem:[%s2004_s2 + $0x2] sm:$0x1] (!%p1263_p6)  ;;  %v1367_v30 = vunpack.c.h.bf16 (!%p1263_p6), %v1365_v31  ;;  %v1370_v49 = vunpack.c.l.bf16 (!%p1263_p6), %v1416_v55  ;;  %v1089_v61 = vld [vmem:[#allocation3 + $0x20] sm:$0xf] (!%p1263_p6) }
 0x163   : > { %v1042_v17 = vld [vmem:[#allocation4] sm:$0x1] (!%p1263_p6)  ;;  %v1371_v3 = vunpack.c.h.bf16 (!%p1263_p6), %v1416_v55  ;;  %v1418_v4 = vld [vmem:[#allocation2 + $0x18] sm:$0xff] (!%p1263_p6)   ;;  %v1374_v8 = vunpack.c.l.bf16 (!%p1263_p6), %v1417_v47  ;;  %v1390_v59 = vunpack.c.l.bf16 (!%p1263_p6), %v1420_v63  ;;  %v1375_v9 = vunpack.c.h.bf16 (!%p1263_p6), %v1417_v47  ;;  %v1071_v10 = vld [vmem:[#allocation2 + $0x20] sm:$0xf] (!%p1263_p6) }
 0x164   : > { %v1043_v40 = vmul.f32 (!%p1263_p6), 0.0034722222, %v1042_v17  ;;  %v1060_v33 = vsub.s32 (!%p1263_p6), 0, %v1059_v48  ;;  %v1421_v5 = vld [vmem:[#allocation3 + $0x18] sm:$0xff] (!%p1263_p6)   ;;  %v1391_v35 = vunpack.c.h.bf16 (!%p1263_p6), %v1420_v63  ;;  %v1378_v13 = vunpack.c.l.bf16 (!%p1263_p6), %v1418_v4 }
 0x165   : > { %v1044_v39 = vld [vmem:[#allocation5] sm:$0x1] (!%p1263_p6)  ;;  %v1394_v14 = vunpack.c.l.bf16 (!%p1263_p6), %v1421_v5  ;;  %v1379_v16 = vunpack.c.h.bf16 (!%p1263_p6), %v1418_v4  ;;  %v1395_v18 = vunpack.c.h.bf16 (!%p1263_p6), %v1421_v5  ;;  %v1080_v21 = vunpack.c.l.bf16 (!%p1263_p6), %v1071_v10 }
 0x166   : > { %v1045_v41 = vmul.f32 (!%p1263_p6), 0.0034722222, %v1044_v39  ;;  %v1046_v42 = vmul.f32 (!%p1263_p6), %v1043_v40, %v1043_v40  ;;  %v1098_v22 = vunpack.c.l.bf16 (!%p1263_p6), %v1089_v61 }
 0x168   : > { %v1047_v43 = vsub.f32 %v1045_v41, %v1046_v42 }
 0x16a   : > { %v1048_v44 = vmax.f32 %v1047_v43, 0.0 }
 0x16c   : > { %v1050_v45 = vadd.f32 1e-05, %v1048_v44 }
 0x16e   : > { %1641 = vrsqrt.f32 %v1050_v45 }
 0x178   : > { %v1642_v57 = vpop.eup %1641 }
 0x179   : > { %v1052_v58 = vmul.f32 %v1642_v57, %v1049_v51 }
 0x17b   : > { %v1054_v2 = vmul.f32 %v1052_v58, %v1043_v40  ;;  %vm1056_vm2 = vcmp.ge.f32.partialorder %v1052_v58, 0.0  ;;  %v1111_v32 = vrot.slane %v1052_v58, %v1060_v33 }
 0x17c   : > { %v1057_v7 = vsel %vm1056_vm2, 1, %v1654_v6 }
 0x17d   : > { %v1055_v11 = vsub.f32 %v1053_v0, %v1054_v2  ;;  %v1061_v12 = vrot.slane %v1057_v7, %v1060_v33 }
 0x17f   : > { %vm1950_vm3 = vcmp.eq.s32.totalorder %v1061_v12, 1  ;;  %v1124_v20 = vrot.slane %v1055_v11, %v1060_v33 }
 0x180   : > { %v1099_v23 = vsel %vm1950_vm3, %v1366_v60, %v1382_v62  ;;  %v1100_v24 = vsel %vm1950_vm3, %v1367_v30, %v1383_v15  ;;  %v1101_v25 = vsel %vm1950_vm3, %v1370_v49, %v1386_v50  ;;  %v1102_v26 = vsel %vm1950_vm3, %v1371_v3, %v1387_v53 }
 0x181   : > { %v1112_v27 = vmul.f32 %v1111_v32, %v1099_v23  ;;  %v1113_v28 = vmul.f32 %v1111_v32, %v1100_v24  ;;  %v1114_v52 = vmul.f32 %v1111_v32, %v1101_v25  ;;  %v1115_v29 = vmul.f32 %v1111_v32, %v1102_v26 }
 0x182   : > { %v1103_v1 = vsel %vm1950_vm3, %v1374_v8, %v1390_v59  ;;  %v1104_v34 = vsel %vm1950_vm3, %v1375_v9, %v1391_v35  ;;  %v1105_v36 = vsel %vm1950_vm3, %v1378_v13, %v1394_v14  ;;  %v1106_v37 = vsel %vm1950_vm3, %v1379_v16, %v1395_v18 }
 0x183   : > { %v1125_v38 = vadd.f32 %v1124_v20, %v1112_v27  ;;  %v1126_v17 = vadd.f32 %v1124_v20, %v1113_v28  ;;  %v1127_v39 = vadd.f32 %v1124_v20, %v1114_v52  ;;  %v1128_v40 = vadd.f32 %v1124_v20, %v1115_v29 }
 0x184   : > { %v1116_v41 = vmul.f32 %v1111_v32, %v1103_v1  ;;  %v1117_v42 = vmul.f32 %v1111_v32, %v1104_v34  ;;  %v1118_v43 = vmul.f32 %v1111_v32, %v1105_v36  ;;  %v1119_v44 = vmul.f32 %v1111_v32, %v1106_v37 }
 0x185   : > { %1134 = vst [vmem:[%s2005_s3] sm:$0xff] %v1125_v38  ;;  %1135 = vst [vmem:[%s2005_s3 + $0x8] sm:$0xff] %v1126_v17  ;;  %v1107_v45 = vsel %vm1950_vm3, %v1080_v21, %v1098_v22 }
 0x186   : > { %1136 = vst [vmem:[%s2005_s3 + $0x10] sm:$0xff] %v1127_v39  ;;  %1137 = vst [vmem:[%s2005_s3 + $0x18] sm:$0xff] %v1128_v40  ;;  %v1129_v46 = vadd.f32 %v1124_v20, %v1116_v41  ;;  %v1130_v48 = vadd.f32 %v1124_v20, %v1117_v42  ;;  %v1131_v51 = vadd.f32 %v1124_v20, %v1118_v43 }
 0x187   : > { %v1132_v31 = vadd.f32 %v1124_v20, %v1119_v44  ;;  %v1120_v54 = vmul.f32 %v1111_v32, %v1107_v45 }
 0x188   : > { %1138 = vst [vmem:[%s2005_s3 + $0x20] sm:$0xff] %v1129_v46  ;;  %1139 = vst [vmem:[%s2005_s3 + $0x28] sm:$0xff] %v1130_v48 }
 0x189   : > { %1140 = vst [vmem:[%s2005_s3 + $0x30] sm:$0xff] %v1131_v51  ;;  %1141 = vst [vmem:[%s2005_s3 + $0x38] sm:$0xff] %v1132_v31  ;;  %v1133_v55 = vadd.f32 %v1124_v20, %v1120_v54 }
 0x18b   : > { %1142 = vst [vmem:[%s2005_s3 + $0x40] sm:$0xff] %v1133_v55 }
 0x18c PF: > { %s13_s12 = sadd.s32 1, %s1649_s12  }
 0x18d   : > { %p10_p7 = scmp.ge.s32.totalorder %s13_s12, 6  }
 0x18f   :  { %12 = sbr.rel (!%p10_p7) target bundleno = 1 (0x1), region = 70 }

// kernel: _lambda_.8
= control target key start
LH: loop header
LB: loop body
LE: loop exit
PB: predicated region body
PF: predicated region fallthrough
CT: control target
= control target key end

     0   :  { %s1670_s12 = smov 0   ;;  %s1941_s0 = inlined_call_operand.vmem [shape: bf16[4,18,1152], index: 0, kind: input, shape index: {}]   ;;  %s1942_s1 = inlined_call_operand.vmem [shape: bf16[1152,128], index: 1, kind: input, shape index: {}]   ;;  %s1943_s2 = inlined_call_operand.vmem [shape: f32[8,128], index: 2, kind: input, shape index: {}]   ;;  %s1944_s3 = inlined_call_operand.vmem [shape: f32[18,128], index: 3, kind: output, shape index: {}]  }
   0x1 LB: > { %s1676_s13 = sadd.s32 4294967295, %s1646_s12   ;;  %p1251_p0 = scmp.ge.s32.totalorder %s1646_s12, 1  ;;  %s1646_s12 = sphi %s1670_s12, %s13_s12  }
   0x2   : > { %p132_p1 = scmp.lt.s32.totalorder %s1646_s12, 5 }
   0x4   : > { %p133_p2 = pnand %p1251_p0, %p132_p1 }
   0x5   : > { %v1544_v0 = vld [vmem:[%s1942_s1 + $0x40] sm:$0xff] (!%p133_p2)   ;;  %v1548_v4 = vld [vmem:[%s1942_s1 + $0x48] sm:$0xff] (!%p133_p2)   ;;  %v1552_v8 = vld [vmem:[%s1942_s1 + $0x50] sm:$0xff] (!%p133_p2)   ;;  %p151_p3 = scmp.lt.s32.totalorder (!%p133_p2), %s1676_s13, 3  ;;  %p1344_p4 = scmp.ne.s32.totalorder (!%p133_p2), %s1676_s13, 0 }
   0x6   : > { %136 = sbr.rel (%p133_p2) target bundleno = 387 (0x183), region = 32  ;;  %v1545_v1 = vld [vmem:[%s1942_s1] sm:$0xff] (!%p133_p2)   ;;  %1391 = vmatprep.subr.bf16.mxu0 (!%p133_p2), %v1544_v0  ;;  %v1549_v5 = vld [vmem:[%s1942_s1 + $0x8] sm:$0xff] (!%p133_p2)   ;;  %v1553_v9 = vld [vmem:[%s1942_s1 + $0x10] sm:$0xff] (!%p133_p2)  }
   0x7   : > { %v1546_v2 = vld [vmem:[%s1942_s1 + $0xc0] sm:$0xff] (!%p133_p2)   ;;  %1392 = vmatpush3.bf16.msra.mxu0 (!%p133_p2), %v1545_v1  ;;  %v1550_v6 = vld [vmem:[%s1942_s1 + $0xc8] sm:$0xff] (!%p133_p2)   ;;  %v1554_v10 = vld [vmem:[%s1942_s1 + $0xd0] sm:$0xff] (!%p133_p2)  }
   0x8   : > { %v1547_v3 = vld [vmem:[%s1942_s1 + $0x80] sm:$0xff] (!%p133_p2)   ;;  %1419 = vmatprep.subr.bf16.mxu1 (!%p133_p2), %v1546_v2  ;;  %1393 = vmatprep.subr.bf16.mxu0 (!%p133_p2), %v1548_v4  ;;  %v1551_v7 = vld [vmem:[%s1942_s1 + $0x88] sm:$0xff] (!%p133_p2)   ;;  %v1555_v11 = vld [vmem:[%s1942_s1 + $0x90] sm:$0xff] (!%p133_p2)  }
   0x9   : > { %1420 = vmatpush3.bf16.msra.mxu1 (!%p133_p2), %v1547_v3  ;;  %v1556_v12 = vld [vmem:[%s1942_s1 + $0x58] sm:$0xff] (!%p133_p2)   ;;  %v1560_v16 = vld [vmem:[%s1942_s1 + $0x60] sm:$0xff] (!%p133_p2)   ;;  %v1564_v20 = vld [vmem:[%s1942_s1 + $0x68] sm:$0xff] (!%p133_p2)  }
   0xa   : > { %1421 = vmatprep.subr.bf16.mxu1 (!%p133_p2), %v1550_v6  ;;  %v1557_v13 = vld [vmem:[%s1942_s1 + $0x18] sm:$0xff] (!%p133_p2)   ;;  %v1561_v17 = vld [vmem:[%s1942_s1 + $0x20] sm:$0xff] (!%p133_p2)   ;;  %v1565_v21 = vld [vmem:[%s1942_s1 + $0x28] sm:$0xff] (!%p133_p2)  }
   0xb   : > { %1394 = vmatpush3.bf16.msra.mxu0 (!%p133_p2), %v1549_v5  ;;  %v1558_v14 = vld [vmem:[%s1942_s1 + $0xd8] sm:$0xff] (!%p133_p2)   ;;  %v1562_v18 = vld [vmem:[%s1942_s1 + $0xe0] sm:$0xff] (!%p133_p2)   ;;  %v1566_v22 = vld [vmem:[%s1942_s1 + $0xe8] sm:$0xff] (!%p133_p2)  }
   0xc   : > { %1395 = vmatprep.subr.bf16.mxu0 (!%p133_p2), %v1552_v8  ;;  %v1559_v15 = vld [vmem:[%s1942_s1 + $0x98] sm:$0xff] (!%p133_p2)   ;;  %v1563_v19 = vld [vmem:[%s1942_s1 + $0xa0] sm:$0xff] (!%p133_p2)   ;;  %v1567_v23 = vld [vmem:[%s1942_s1 + $0xa8] sm:$0xff] (!%p133_p2)  }
   0xd   : > { %1422 = vmatpush3.bf16.msra.mxu1 %v1551_v7  ;;  %s152_s4 = scalar_select %p151_p3, %s1676_s13, 3  ;;  %v1568_v24 = vld [vmem:[%s1942_s1 + $0x70] sm:$0xff]   ;;  %v1572_v28 = vld [vmem:[%s1942_s1 + $0x78] sm:$0xff]   ;;  %v1579_v34 = vld [vmem:[%s1942_s1 + $0x140] sm:$0xff]  }
   0xe   : > { %1423 = vmatprep.subr.bf16.mxu1 %v1554_v10  ;;  %v1569_v25 = vld [vmem:[%s1942_s1 + $0x30] sm:$0xff]   ;;  %v1573_v29 = vld [vmem:[%s1942_s1 + $0x38] sm:$0xff]   ;;  %v1583_v37 = vld [vmem:[%s1942_s1 + $0x100] sm:$0xff]  }
   0xf   : > { %1396 = vmatpush3.bf16.msra.mxu0 %v1553_v9  ;;  %s1533_s15 = smul.u32 108, %s152_s4  ;;  %v1570_v26 = vld [vmem:[%s1942_s1 + $0xf0] sm:$0xff]   ;;  %v1574_v30 = vld [vmem:[%s1942_s1 + $0xf8] sm:$0xff]   ;;  %v1584_v38 = vld [vmem:[%s1942_s1 + $0x1c0] sm:$0xff]  }
  0x10   : > { %1397 = vmatprep.subr.bf16.mxu0 %v1556_v12  ;;  %v1571_v27 = vld [vmem:[%s1942_s1 + $0xb0] sm:$0xff]   ;;  %v1578_v33 = vld [vmem:[%s1942_s1 + $0xb8] sm:$0xff]   ;;  %v1585_v39 = vld [vmem:[%s1942_s1 + $0x180] sm:$0xff]  }
  0x11   : > { %1424 = vmatpush3.bf16.msra.mxu1 %v1555_v11  ;;  %s1772_s26 = scalar_lea.vmem %s1941_s0, %s1533_s15  ;;  %v1586_v40 = vld [vmem:[%s1942_s1 + $0x148] sm:$0xff]   ;;  %v1590_v44 = vld [vmem:[%s1942_s1 + $0x150] sm:$0xff]   ;;  %v1594_v48 = vld [vmem:[%s1942_s1 + $0x158] sm:$0xff]  }
  0x12   : > { %1425 = vmatprep.subr.bf16.mxu1 %v1558_v14  ;;  %v1575_v31 = vld [vmem:[%s1772_s26] ss:$36 sps:$4 sm:$0xff]   ;;  %v1580_v35 = vld [vmem:[%s1772_s26 + $0x8] ss:$36 sps:$4 sm:$0xff]   ;;  %v1591_v45 = vld [vmem:[%s1942_s1 + $0x110] sm:$0xff]  }
  0x13   : > { %1398 = vmatpush3.bf16.msra.mxu0 %v1557_v13  ;;  %v1577_v32 = vld [vmem:[%s1772_s26 + $0x4] ss:$36 sps:$4 sm:$0xff]   ;;  %v1582_v36 = vld [vmem:[%s1772_s26 + $0xc] ss:$36 sps:$4 sm:$0xff]   ;;  %v1595_v49 = vld [vmem:[%s1942_s1 + $0x118] sm:$0xff]  }
  0x14   : > { %1399 = vmatprep.subr.bf16.mxu0 %v1560_v16  ;;  %863 = vmatprep.mubr.bf16.mxu0 %v1577_v32  ;;  %v1587_v41 = vld [vmem:[%s1942_s1 + $0x108] sm:$0xff]   ;;  %v1592_v46 = vld [vmem:[%s1942_s1 + $0x1d0] sm:$0xff]   ;;  %v1596_v50 = vld [vmem:[%s1942_s1 + $0x1d8] sm:$0xff]  }
  0x15   : > { %1426 = vmatpush3.bf16.msra.mxu1 %v1559_v15  ;;  %911 = vmatprep.mubr.bf16.mxu1 %v1582_v36  ;;  %v1588_v42 = vld [vmem:[%s1942_s1 + $0x1c8] sm:$0xff]   ;;  %v1593_v47 = vld [vmem:[%s1942_s1 + $0x190] sm:$0xff]   ;;  %v1597_v51 = vld [vmem:[%s1942_s1 + $0x198] sm:$0xff]  }
  0x16   : > { %1427 = vmatprep.subr.bf16.mxu1 %v1562_v18  ;;  %v1589_v43 = vld [vmem:[%s1942_s1 + $0x188] sm:$0xff]   ;;  %v1598_v52 = vld [vmem:[%s1942_s1 + $0x160] sm:$0xff]   ;;  %v1608_v63 = vld [vmem:[%s1942_s1 + $0x170] sm:$0xff]  }
  0x17   : > { %1400 = vmatpush3.bf16.msra.mxu0 %v1561_v17  ;;  %v1599_v53 = vld [vmem:[%s1942_s1 + $0x120] sm:$0xff]   ;;  %v1602_v56 = vld [vmem:[%s1942_s1 + $0x168] sm:$0xff]   ;;  %v168_v0 = vld [vmem:[%s1772_s26 + $0x50] sm:$0x11] }
  0x18   : > { %1401 = vmatprep.subr.bf16.mxu0 %v1564_v20  ;;  %v1600_v54 = vld [vmem:[%s1942_s1 + $0x1e0] sm:$0xff]   ;;  %v167_v57 = vld [vmem:[%s1772_s26 + $0x48] sm:$0x11]  ;;  %v1266_v1 = vcombine.high %v168_v0, %v168_v0  ;;  %v1610_v2 = vld [vmem:[%s1942_s1 + $0x130] sm:$0xff]   ;;  %v1265_v3 = vcombine.low %v168_v0, %v168_v0 }
  0x19   : > { %1428 = vmatpush3.bf16.msra.mxu1 %v1563_v19  ;;  %v1601_v55 = vld [vmem:[%s1942_s1 + $0x1a0] sm:$0xff]   ;;  %v1264_v58 = vcombine.high %v167_v57, %v167_v57  ;;  %v1604_v59 = vld [vmem:[%s1942_s1 + $0x128] sm:$0xff]   ;;  %v1263_v60 = vcombine.low %v167_v57, %v167_v57  ;;  %v1612_v4 = vld [vmem:[%s1942_s1 + $0x1f0] sm:$0xff]  }
  0x1a   : > { %1429 = vmatprep.subr.bf16.mxu1 %v1566_v22  ;;  %v1606_v61 = vld [vmem:[%s1942_s1 + $0x1e8] sm:$0xff]   ;;  %v1613_v5 = vld [vmem:[%s1942_s1 + $0x1b0] sm:$0xff]   ;;  %v1614_v6 = vld [vmem:[%s1942_s1 + $0x178] sm:$0xff]  }
  0x1b   : > { %1402 = vmatpush3.bf16.msra.mxu0 %v1565_v21  ;;  %v1607_v62 = vld [vmem:[%s1942_s1 + $0x1a8] sm:$0xff]   ;;  %v1615_v7 = vld [vmem:[%s1942_s1 + $0x138] sm:$0xff]   ;;  %v1617_v9 = vld [vmem:[%s1772_s26 + $0x10] ss:$36 sps:$4 sm:$0xff]  }
  0x1c   : > { %1403 = vmatprep.subr.bf16.mxu0 %v1568_v24  ;;  %v1616_v8 = vld [vmem:[%s1942_s1 + $0x1f8] sm:$0xff]   ;;  %v1621_v12 = vld [vmem:[%s1942_s1 + $0x200] sm:$0xff]   ;;  %v1625_v15 = vld [vmem:[%s1942_s1 + $0x208] sm:$0xff]  }
  0x1d   : > { %1430 = vmatpush3.bf16.msra.mxu1 %v1567_v23  ;;  %v1619_v10 = vld [vmem:[%s1772_s26 + $0x14] ss:$36 sps:$4 sm:$0xff]   ;;  %v1624_v14 = vld [vmem:[%s1772_s26 + $0x1c] ss:$36 sps:$4 sm:$0xff]  }
  0x1e   : > { %1431 = vmatprep.subr.bf16.mxu1 %v1570_v26  ;;  %v1620_v11 = vld [vmem:[%s1942_s1 + $0x1b8] sm:$0xff]   ;;  %v1628_v18 = vld [vmem:[%s1942_s1 + $0x210] sm:$0xff]   ;;  %v170_v19 = vld [vmem:[%s1772_s26 + $0x60] sm:$0x11] }
  0x1f   : > { %1404 = vmatpush3.bf16.msra.mxu0 %v1569_v25  ;;  %v1622_v13 = vld [vmem:[%s1772_s26 + $0x18] ss:$36 sps:$4 sm:$0xff]   ;;  %v1270_v21 = vcombine.high %v170_v19, %v170_v19  ;;  %v1269_v22 = vcombine.low %v170_v19, %v170_v19  ;;  %v1636_v24 = vld [vmem:[%s1772_s26 + $0x20] ss:$36 sps:$4 sm:$0xff]   ;;  %v1633_v26 = vld [vmem:[%s1942_s1 + $0x228] sm:$0xff]  }
  0x20   : > { %1405 = vmatprep.subr.bf16.mxu0 %v1572_v28  ;;  %v169_v16 = vld [vmem:[%s1772_s26 + $0x58] sm:$0x11]  ;;  %v1632_v25 = vld [vmem:[%s1942_s1 + $0x220] sm:$0xff]  }
  0x21   : > { %1432 = vmatpush3.bf16.msra.mxu1 %v1571_v27  ;;  %v1268_v17 = vcombine.high %v169_v16, %v169_v16  ;;  %v1267_v20 = vcombine.low %v169_v16, %v169_v16  ;;  %v1631_v23 = vld [vmem:[%s1942_s1 + $0x218] sm:$0xff]   ;;  %v1634_v27 = vld [vmem:[%s1942_s1 + $0x230] sm:$0xff]  }
  0x22   : > { %1433 = vmatprep.subr.bf16.mxu1 %v1574_v30  ;;  %v1635_v28 = vld [vmem:[%s1942_s1 + $0x238] sm:$0xff]  }
  0x23   : > { %1406 = vmatpush3.bf16.msra.mxu0 %v1573_v29  ;;  %v1637_v29 = vld [vmem:[%s1772_s26 + $0x68] ss:$0 sps:$4 sm:$0x11]  }
  0x24   : > { %1447 = vmatprep.subr.bf16.mxu0 %v1579_v34 }
  0x25   : > { %1434 = vmatpush3.bf16.msra.mxu1 %v1578_v33 }
  0x26   : > { %864 = vmatmul.mubr.bf16.vlgmr.msra.gmra.mrb[0].mxu0 %v1575_v31  ;;  %1475 = vmatprep.subr.bf16.mxu1 %v1584_v38  ;;  %v1253_v31 = vld [vmem:[%s1943_s2] ss:$0 sm:$0xff] }
  0x27   : > { %1448 = vmatpush3.bf16.msra.mxu0 %v1583_v37  ;;  %871 = vmatprep.mubr.bf16.mxu0 %v1264_v58 }
  0x28   : > { %912 = vmatmul.mubr.bf16.vlgmr.msra.gmra.mrb[0].mxu1 %v1580_v35  ;;  %1449 = vmatprep.subr.bf16.mxu0 %v1586_v40 }
  0x29   : > { %1476 = vmatpush3.bf16.msra.mxu1 %v1585_v39  ;;  %919 = vmatprep.mubr.bf16.mxu1 %v1266_v1 }
  0x2a   : > { %1477 = vmatprep.subr.bf16.mxu1 %v1588_v42 }
  0x2b   : > { %1450 = vmatpush3.bf16.msra.mxu0 %v1587_v41 }
  0x2c   : > { %1451 = vmatprep.subr.bf16.mxu0 %v1590_v44 }
  0x2d   : > { %1478 = vmatpush3.bf16.msra.mxu1 %v1589_v43 }
  0x2e   : > { %1479 = vmatprep.subr.bf16.mxu1 %v1592_v46  ;;  %872 = vmatmul.mubr.bf16.gmra.mrb[4].mxu0 %v1263_v60 }
  0x2f   : > { %1452 = vmatpush3.bf16.msra.mxu0 %v1591_v45  ;;  %959 = vmatprep.mubr.bf16.mxu0 %v1619_v10 }
  0x30   : > { %1453 = vmatprep.subr.bf16.mxu0 %v1594_v48  ;;  %920 = vmatmul.mubr.bf16.gmra.mrb[4].mxu1 %v1265_v3 }
  0x31   : > { %1480 = vmatpush3.bf16.msra.mxu1 %v1593_v47  ;;  %1007 = vmatprep.mubr.bf16.mxu1 %v1624_v14 }
  0x32   : > { %1481 = vmatprep.subr.bf16.mxu1 %v1596_v50 }
  0x33   : > { %1454 = vmatpush3.bf16.msra.mxu0 %v1595_v49 }
  0x34   : > { %1455 = vmatprep.subr.bf16.mxu0 %v1598_v52 }
  0x35   : > { %1482 = vmatpush3.bf16.msra.mxu1 %v1597_v51 }
  0x36   : > { %1483 = vmatprep.subr.bf16.mxu1 %v1600_v54 }
  0x37   : > { %1456 = vmatpush3.bf16.msra.mxu0 %v1599_v53 }
  0x38   : > { %1457 = vmatprep.subr.bf16.mxu0 %v1602_v56 }
  0x39   : > { %1484 = vmatpush3.bf16.msra.mxu1 %v1601_v55 }
  0x3a   : > { %1485 = vmatprep.subr.bf16.mxu1 %v1606_v61 }
  0x3b   : > { %1458 = vmatpush3.bf16.msra.mxu0 %v1604_v59 }
  0x3c   : > { %1459 = vmatprep.subr.bf16.mxu0 %v1608_v63 }
  0x3d   : > { %1486 = vmatpush3.bf16.msra.mxu1 %v1607_v62 }
  0x3e   : > { %1487 = vmatprep.subr.bf16.mxu1 %v1612_v4 }
  0x3f   : > { %1460 = vmatpush3.bf16.msra.mxu0 %v1610_v2 }
  0x40   : > { %1461 = vmatprep.subr.bf16.mxu0 %v1614_v6 }
  0x41   : > { %1488 = vmatpush3.bf16.msra.mxu1 %v1613_v5 }
  0x42   : > { %1489 = vmatprep.subr.bf16.mxu1 %v1616_v8 }
  0x43   : > { %1462 = vmatpush3.bf16.msra.mxu0 %v1615_v7 }
  0x44   : > { %1513 = vmatprep.subr.bf16.mxu0 %v1621_v12 }
  0x45   : > { %1490 = vmatpush3.bf16.msra.mxu1 %v1620_v11 }
  0x46   : > { %960 = vmatmul.mubr.bf16.vlgmr.msra.gmra.mrb[8].mxu0 %v1617_v9 }
  0x47   : > { %1514 = vmatpush3.bf16.msra.mxu0 %v1621_v12  ;;  %967 = vmatprep.mubr.bf16.mxu0 %v1268_v17 }
  0x48   : > { %1008 = vmatmul.mubr.bf16.vlgmr.msra.gmra.mrb[8].mxu1 %v1622_v13  ;;  %1515 = vmatprep.subr.bf16.mxu0 %v1625_v15 }
  0x49   : > { %1015 = vmatprep.mubr.bf16.mxu1 %v1270_v21 }
  0x4b   : > { %1516 = vmatpush3.bf16.msra.mxu0 %v1625_v15 }
  0x4c   : > { %1517 = vmatprep.subr.bf16.mxu0 %v1628_v18 }
  0x4e   : > { %968 = vmatmul.mubr.bf16.gmra.mrb[12].mxu0 %v1267_v20 }
  0x4f   : > { %1518 = vmatpush3.bf16.msra.mxu0 %v1628_v18  ;;  %1529 = vmatprep.mubr.bf16.mxu0 %v1636_v24 }
  0x50   : > { %1016 = vmatmul.mubr.bf16.gmra.mrb[12].mxu1 %v1269_v22  ;;  %1519 = vmatprep.subr.bf16.mxu0 %v1631_v23 }
  0x53   : > { %1520 = vmatpush3.bf16.msra.mxu0 %v1631_v23 }
  0x54   : > { %1521 = vmatprep.subr.bf16.mxu0 %v1632_v25 }
  0x57   : > { %1522 = vmatpush3.bf16.msra.mxu0 %v1632_v25 }
  0x58   : > { %1523 = vmatprep.subr.bf16.mxu0 %v1633_v26 }
  0x5b   : > { %1524 = vmatpush3.bf16.msra.mxu0 %v1633_v26 }
  0x5c   : > { %1525 = vmatprep.subr.bf16.mxu0 %v1634_v27 }
  0x5f   : > { %1526 = vmatpush3.bf16.msra.mxu0 %v1634_v27 }
  0x60   : > { %1527 = vmatprep.subr.bf16.mxu0 %v1635_v28 }
  0x63   : > { %1528 = vmatpush3.bf16.msra.mxu0 %v1635_v28 }
  0x66   : > { %1530 = vmatmul.mubr.bf16.vlgmr.msra.gmra.mrb[16].mxu0 %v1637_v29 }
  0xf9   : > { %v1407_v30 = vpop.f32.mrb[0].mxu0 }
  0xfa   : > { %v1408_v32 = vpop.f32.mrb[1].mxu0 }
  0xfb   : > { %v1409_v33 = vadd.f32 %v1408_v32, %v1407_v30  ;;  %v1410_v34 = vpop.f32.mrb[2].mxu0  ;;  %v1435_v35 = vpop.f32.mrb[0].mxu1 }
  0xfc   : > { %v1411_v36 = vpop.f32.mrb[3].mxu0  ;;  %v1436_v39 = vpop.f32.mrb[1].mxu1 }
  0xfd   : > { %v866_v37 = vadd.f32 %v1409_v33, %v1253_v31  ;;  %v1412_v38 = vadd.f32 %v1411_v36, %v1410_v34  ;;  %v1437_v40 = vadd.f32 %v1436_v39, %v1435_v35  ;;  %v1438_v41 = vpop.f32.mrb[2].mxu1 }
  0xfe   : > { %v1439_v43 = vpop.f32.mrb[3].mxu1 }
  0xff   : > { %v869_v42 = vadd.f32 %v1412_v38, %v1253_v31  ;;  %v914_v44 = vadd.f32 %v1437_v40, %v866_v37  ;;  %v1440_v45 = vadd.f32 %v1439_v43, %v1438_v41  ;;  %v1648_v38 = vmov (!%p1344_p4), 0.0  }
 0x100   : > { %1083 = vst [vmem:[#allocation4] sm:$0x1] (!%p1344_p4), %v1648_v38  ;;  %1084 = vst [vmem:[#allocation5] sm:$0x1] (!%p1344_p4), %v1648_v38 }
 0x101   : > { %v917_v46 = vadd.f32 %v1440_v45, %v869_v42  ;;  %v1413_v47 = vpop.f32.mrb[4].mxu0 }
 0x102   : > { %v1414_v48 = vpop.f32.mrb[5].mxu0 }
 0x103   : > { %v1415_v49 = vadd.f32 %v1414_v48, %v1413_v47  ;;  %v1416_v50 = vpop.f32.mrb[6].mxu0  ;;  %v1441_v53 = vpop.f32.mrb[4].mxu1 }
 0x104   : > { %v1417_v51 = vpop.f32.mrb[7].mxu0  ;;  %v1442_v54 = vpop.f32.mrb[5].mxu1 }
 0x105   : > { %v874_v52 = vadd.f32 %v1415_v49, %v1253_v31  ;;  %v1443_v55 = vadd.f32 %v1442_v54, %v1441_v53  ;;  %v1444_v56 = vpop.f32.mrb[6].mxu1 }
 0x106   : > { %v1445_v57 = vpop.f32.mrb[7].mxu1 }
 0x107   : > { %v922_v58 = vadd.f32 %v1443_v55, %v874_v52 }
 0x119   : > { %v1463_v59 = vpop.f32.mrb[8].mxu0 }
 0x11a   : > { %v1464_v60 = vpop.f32.mrb[9].mxu0 }
 0x11b   : > { %v1465_v61 = vadd.f32 %v1464_v60, %v1463_v59  ;;  %v1466_v62 = vpop.f32.mrb[10].mxu0  ;;  %v1491_v63 = vpop.f32.mrb[8].mxu1 }
 0x11c   : > { %v1467_v0 = vpop.f32.mrb[11].mxu0  ;;  %v1492_v3 = vpop.f32.mrb[9].mxu1 }
 0x11d   : > { %v962_v1 = vadd.f32 %v1465_v61, %v914_v44  ;;  %v1468_v2 = vadd.f32 %v1467_v0, %v1466_v62  ;;  %v1493_v4 = vadd.f32 %v1492_v3, %v1491_v63  ;;  %v1494_v5 = vpop.f32.mrb[10].mxu1 }
 0x11e   : > { %v1495_v7 = vpop.f32.mrb[11].mxu1 }
 0x11f   : > { %v965_v6 = vadd.f32 %v1468_v2, %v917_v46  ;;  %v1496_v8 = vadd.f32 %v1495_v7, %v1494_v5  ;;  %v1010_v9 = vadd.f32 %v1493_v4, %v962_v1 }
 0x121   : > { %v1469_v10 = vpop.f32.mrb[12].mxu0  ;;  %v1013_v12 = vadd.f32 %v1496_v8, %v965_v6 }
 0x122   : > { %v1470_v11 = vpop.f32.mrb[13].mxu0 }
 0x123   : > { %v1471_v13 = vadd.f32 %v1470_v11, %v1469_v10  ;;  %v1472_v14 = vpop.f32.mrb[14].mxu0  ;;  %v1497_v15 = vpop.f32.mrb[12].mxu1 }
 0x124   : > { %v1473_v16 = vpop.f32.mrb[15].mxu0  ;;  %v1498_v18 = vpop.f32.mrb[13].mxu1 }
 0x125   : > { %v970_v17 = vadd.f32 %v1471_v13, %v922_v58  ;;  %v1499_v19 = vadd.f32 %v1498_v18, %v1497_v15  ;;  %v1500_v20 = vpop.f32.mrb[14].mxu1 }
 0x126   : > { %v1501_v21 = vpop.f32.mrb[15].mxu1 }
 0x127   : > { %v1018_v22 = vadd.f32 %v1499_v19, %v970_v17 }
 0x139   : > { %v1531_v23 = vpop.f32.mrb[16].mxu0 }
 0x13a   : > { %v1066_v24 = vadd.f32 %v1531_v23, %v1018_v22  ;;  %v1057_v25 = vpop.f32.mrb[17].mxu0 }
 0x13b   : > { %v1058_v26 = vadd.f32 %v1057_v25, %v1010_v9  ;;  %v1532_v27 = vpop.f32.mrb[18].mxu0  ;;  %1082 = sbr.rel (%p1344_p4) target bundleno = 326 (0x146), region = 36 }
 0x13c   : > { %v1073_v28 = vmul.f32 0.05, %v1066_v24  ;;  %v1060_v29 = vpop.f32.mrb[19].mxu0 }
 0x13d   : > { %v1071_v30 = vmul.f32 0.05, %v1058_v26  ;;  %v1061_v31 = vadd.f32 %v1060_v29, %v1013_v12 }
 0x13e   : > { %v1076_v32 = vmax.f32 %v1066_v24, %v1073_v28 }
 0x13f   : > { %v1074_v33 = vmax.f32 %v1058_v26, %v1071_v30  ;;  %v1072_v34 = vmul.f32 0.05, %v1061_v31 }
 0x140   : > { %v1357_v37 = vpack.c.bf16 (!%p1344_p4), %v1076_v32, %v1076_v32 }
 0x141   : > { %v1075_v35 = vmax.f32 %v1061_v31, %v1072_v34 }
 0x142   : > { %1098 = vst [vmem:[#allocation2 + $0x8] sm:$0x1] %v1357_v37  ;;  %1101 = vst [vmem:[#allocation3 + $0x8] sm:$0x1] %v1357_v37 }
 0x143   : > { %v1364_v36 = vpack.c.bf16 %v1075_v35, %v1074_v33 }
 0x145   : > { %1365 = vst [vmem:[#allocation2] sm:$0xff] %v1364_v36   ;;  %1370 = vst [vmem:[#allocation3] sm:$0xff] %v1364_v36  }
 0x146 PF: > { %v1103_v39 = vadd.f32 %v1075_v35, %v1074_v33  ;;  %vm1104_vm0 = vcmask 1041408   ;;  %v1116_v40 = vmul.f32 %v1074_v33, %v1074_v33  ;;  %v1117_v41 = vmul.f32 %v1075_v35, %v1075_v35  ;;  %v1102_v57 = vld [vmem:[#allocation4] sm:$0x1]  ;;  %v1115_v60 = vld [vmem:[#allocation5] sm:$0x1]  ;;  %p1348_p5 = scmp.le.s32.totalorder %s1676_s13, 0 }
 0x147   : > { %v1105_v42 = vsel %vm1104_vm0, %v1076_v32, 0.0  ;;  %v1118_v43 = vmul.f32 %v1076_v32, %v1076_v32  ;;  %v1358_v2 = vpack.c.bf16 (!%p1348_p5), %v1074_v33, %v1074_v33  ;;  %v1359_v3 = vpack.c.bf16 (!%p1348_p5), %v1075_v35, %v1075_v35 }
 0x148   : > { %v1106_v44 = vadd.f32 %v1105_v42, %v1103_v39  ;;  %v1119_v45 = vadd.f32 %v1117_v41, %v1116_v40  ;;  %v1360_v5 = vpack.c.bf16 (!%p1348_p5), %v1076_v32, %v1076_v32 }
 0x149   : > { %v1120_v46 = vsel %vm1104_vm0, %v1118_v43, 0.0 }
 0x14a   : > { %v1107_v47 = vrot.slane %v1106_v44, 4  ;;  %v1121_v48 = vadd.f32 %v1120_v46, %v1119_v45 }
 0x14c   : > { %v1108_v49 = vadd.f32 %v1107_v47, %v1106_v44  ;;  %v1122_v50 = vrot.slane %v1121_v48, 4  ;;  %v1134_v0 = vld [vmem:[#allocation2] sm:$0xf] (!%p1348_p5)  ;;  %v1135_v1 = vld [vmem:[#allocation2 + $0x4] sm:$0xf] (!%p1348_p5) }
 0x14d   : > { %v1136_v4 = vld [vmem:[#allocation2 + $0x8] sm:$0x1] (!%p1348_p5)  ;;  %v1154_v6 = vld [vmem:[#allocation3] sm:$0xf] (!%p1348_p5)  ;;  %v1155_v7 = vld [vmem:[#allocation3 + $0x4] sm:$0xf] (!%p1348_p5)  ;;  %v1148_v9 = vmax.bf16 (!%p1348_p5), %v1358_v2, %v1134_v0  ;;  %v1149_v10 = vmax.bf16 (!%p1348_p5), %v1359_v3, %v1135_v1 }
 0x14e   : > { %v1109_v51 = vrot.slane %v1108_v49, 2  ;;  %v1123_v52 = vadd.f32 %v1122_v50, %v1121_v48  ;;  %v1156_v8 = vld [vmem:[#allocation3 + $0x8] sm:$0x1] (!%p1348_p5)  ;;  %v1150_v11 = vmax.bf16 (!%p1348_p5), %v1360_v5, %v1136_v4  ;;  %v1157_v12 = vmin.bf16 (!%p1348_p5), %v1358_v2, %v1154_v6 }
 0x14f   : > { %v1158_v13 = vmin.bf16 (!%p1348_p5), %v1359_v3, %v1155_v7  ;;  %v1159_v14 = vmin.bf16 (!%p1348_p5), %v1360_v5, %v1156_v8  ;;  %v1389_v15 = vcombine.low (!%p1348_p5), %v1148_v9, %v1149_v10 }
 0x150   : > { %v1110_v53 = vadd.f32 %v1109_v51, %v1108_v49  ;;  %v1124_v54 = vrot.slane %v1123_v52, 2  ;;  %1153 = vst [vmem:[#allocation2 + $0x8] sm:$0x1] (!%p1348_p5), %v1150_v11 }
 0x151   : > { %v1390_v16 = vcombine.low (!%p1348_p5), %v1157_v12, %v1158_v13  ;;  %1162 = vst [vmem:[#allocation3 + $0x8] sm:$0x1] (!%p1348_p5), %v1159_v14  ;;  %1375 = vst [vmem:[#allocation2] sm:$0xff] (!%p1348_p5), %v1389_v15  }
 0x152   : > { %v1111_v55 = vrot.slane %v1110_v53, 1  ;;  %v1125_v56 = vadd.f32 %v1124_v54, %v1123_v52 }
 0x153   : > { %1380 = vst [vmem:[#allocation3] sm:$0xff] (!%p1348_p5), %v1390_v16  }
 0x154   : > { %v1112_v58 = vadd.f32 %v1111_v55, %v1110_v53  ;;  %v1126_v59 = vrot.slane %v1125_v56, 1  ;;  %1133 = sbr.rel (%p1348_p5) target bundleno = 347 (0x15b), region = 40 }
 0x156   : > { %v1113_v61 = vadd.f32 %v1112_v58, %v1102_v57  ;;  %v1127_v62 = vadd.f32 %v1126_v59, %v1125_v56 }
 0x158   : > { %1114 = vst [vmem:[#allocation4] sm:$0x1] %v1113_v61  ;;  %v1128_v63 = vadd.f32 %v1127_v62, %v1115_v60 }
 0x15a   : > { %1129 = vst [vmem:[#allocation5] sm:$0x1] %v1128_v63 }
 0x15b PF: > { %p1352_p6 = scmp.ne.s32.totalorder %s1676_s13, 3 }
 0x15c   : > { %v1183_v25 = vlaneseq (!%p1352_p6)  ;;  %v1174_v27 = vld [vmem:[%s1943_s2 + $0x1] sm:$0x1] (!%p1352_p6)  ;;  %v1386_v30 = vld [vmem:[#allocation3] sm:$0xff] (!%p1352_p6)   ;;  %v1190_v33 = vld [vmem:[#allocation2 + $0x8] sm:$0x1] (!%p1352_p6)  ;;  %v1649_v40 = vmov (!%p1352_p6), 0  }
 0x15d   : > { %1166 = sbr.rel (%p1352_p6) target bundleno = 387 (0x183), region = 44  ;;  %v1382_v28 = vld [vmem:[#allocation2] sm:$0xff] (!%p1352_p6)   ;;  %v1196_v34 = vld [vmem:[#allocation3 + $0x8] sm:$0x1] (!%p1352_p6)  ;;  %v1387_v38 = vunpack.c.l.bf16 (!%p1352_p6), %v1386_v30  ;;  %v1388_v42 = vunpack.c.h.bf16 (!%p1352_p6), %v1386_v30  ;;  %v1193_v43 = vunpack.c.l.bf16 (!%p1352_p6), %v1190_v33 }
 0x15e   : > { %v1184_v26 = vshrl.u32 (!%p1352_p6), %v1183_v25, 7  ;;  %v1178_v35 = vld [vmem:[%s1943_s2 + $0x2] sm:$0x1] (!%p1352_p6)  ;;  %v1383_v36 = vunpack.c.l.bf16 (!%p1352_p6), %v1382_v28  ;;  %v1384_v39 = vunpack.c.h.bf16 (!%p1352_p6), %v1382_v28  ;;  %v1199_v44 = vunpack.c.l.bf16 (!%p1352_p6), %v1196_v34 }
 0x15f   : > { %v1167_v17 = vld [vmem:[#allocation4] sm:$0x1] (!%p1352_p6) }
 0x160   : > { %v1168_v19 = vmul.f32 (!%p1352_p6), 0.013888889, %v1167_v17  ;;  %v1185_v32 = vsub.s32 (!%p1352_p6), 0, %v1184_v26 }
 0x161   : > { %v1169_v18 = vld [vmem:[#allocation5] sm:$0x1] (!%p1352_p6) }
 0x162   : > { %v1170_v20 = vmul.f32 (!%p1352_p6), 0.013888889, %v1169_v18  ;;  %v1171_v21 = vmul.f32 (!%p1352_p6), %v1168_v19, %v1168_v19 }
 0x164   : > { %v1172_v22 = vsub.f32 %v1170_v20, %v1171_v21 }
 0x166   : > { %v1173_v23 = vmax.f32 %v1172_v22, 0.0 }
 0x168   : > { %v1175_v24 = vadd.f32 1e-05, %v1173_v23 }
 0x16a   : > { %1638 = vrsqrt.f32 %v1175_v24 }
 0x174   : > { %v1639_v29 = vpop.eup %1638 }
 0x175   : > { %v1177_v31 = vmul.f32 %v1639_v29, %v1174_v27 }
 0x177   : > { %v1179_v37 = vmul.f32 %v1177_v31, %v1168_v19  ;;  %vm1181_vm1 = vcmp.ge.f32.partialorder %v1177_v31, 0.0  ;;  %v1206_v47 = vrot.slane %v1177_v31, %v1185_v32 }
 0x178   : > { %v1182_v41 = vsel %vm1181_vm1, 1, %v1649_v40 }
 0x179   : > { %v1180_v45 = vsub.f32 %v1178_v35, %v1179_v37  ;;  %v1186_v46 = vrot.slane %v1182_v41, %v1185_v32 }
 0x17b   : > { %vm1187_vm2 = vcmp.eq.s32.totalorder %v1186_v46, 1  ;;  %v1213_v48 = vrot.slane %v1180_v45, %v1185_v32 }
 0x17c   : > { %v1200_v49 = vsel %vm1187_vm2, %v1383_v36, %v1387_v38  ;;  %v1201_v50 = vsel %vm1187_vm2, %v1384_v39, %v1388_v42  ;;  %v1202_v51 = vsel %vm1187_vm2, %v1193_v43, %v1199_v44 }
 0x17d   : > { %v1207_v52 = vmul.f32 %v1206_v47, %v1200_v49  ;;  %v1208_v53 = vmul.f32 %v1206_v47, %v1201_v50  ;;  %v1209_v54 = vmul.f32 %v1206_v47, %v1202_v51 }
 0x17f   : > { %v1214_v55 = vadd.f32 %v1213_v48, %v1207_v52  ;;  %v1215_v56 = vadd.f32 %v1213_v48, %v1208_v53  ;;  %v1216_v57 = vadd.f32 %v1213_v48, %v1209_v54 }
 0x181   : > { %1217 = vst [vmem:[%s1944_s3] sm:$0xff] %v1214_v55  ;;  %1218 = vst [vmem:[%s1944_s3 + $0x8] sm:$0xff] %v1215_v56 }
 0x182   : > { %1219 = vst [vmem:[%s1944_s3 + $0x10] sm:$0x3] %v1216_v57 }
 0x183 PF: > { %s13_s12 = sadd.s32 1, %s1646_s12  }
 0x184   : > { %p10_p7 = scmp.ge.s32.totalorder %s13_s12, 6  }
 0x186   :  { %12 = sbr.rel (!%p10_p7) target bundleno = 1 (0x1), region = 70 }

// kernel: _lambda_.9
= control target key start
LH: loop header
LB: loop body
LE: loop exit
PB: predicated region body
PF: predicated region fallthrough
CT: control target
= control target key end

     0   :  { %vm2096_vm1 = vmmov 0   ;;  %s2714_s1 = inlined_call_operand.vmem [shape: bf16[1152,256], index: 1, kind: input, shape index: {}]   ;;  %s2715_s0 = inlined_call_operand.vmem [shape: bf16[8,1152], index: 0, kind: input, shape index: {}]   ;;  %s2716_s3 = inlined_call_operand.vmem [shape: bf16[256,128], index: 3, kind: input, shape index: {}]   ;;  %s2717_s2 = inlined_call_operand.vmem [shape: f32[8,256], index: 2, kind: input, shape index: {}]   ;;  %s2718_s5 = inlined_call_operand.vmem [shape: bf16[128,128], index: 5, kind: input, shape index: {}]   ;;  %s2719_s4 = inlined_call_operand.vmem [shape: f32[8,128], index: 4, kind: input, shape index: {}]   ;;  %s2720_s6 = inlined_call_operand.vmem [shape: f32[8,128], index: 6, kind: output, shape index: {}]  }
   0x1   :  { %v1838_v0 = vld [vmem:[%s2714_s1 + $0x4] ss:$8 sps:$4 sm:$0xff]   ;;  %v1842_v2 = vld [vmem:[%s2714_s1] ss:$8 sps:$4 sm:$0xff]   ;;  %v1844_v4 = vld [vmem:[%s2714_s1 + $0x14] ss:$8 sps:$4 sm:$0xff]  }
   0x2   :  { %v1840_v1 = vld [vmem:[%s2714_s1 + $0x204] ss:$8 sps:$4 sm:$0xff]   ;;  %937 = vmatprep.subr.bf16.mxu1 %v1838_v0  ;;  %v1843_v3 = vld [vmem:[%s2714_s1 + $0x200] ss:$8 sps:$4 sm:$0xff]   ;;  %v1846_v5 = vld [vmem:[%s2714_s1 + $0x214] ss:$8 sps:$4 sm:$0xff]  }
   0x3   :  { %1019 = vmatprep.subr.bf16.mxu0 %v1840_v1  ;;  %938 = vmatpush1.bf16.msra.mxu1 %v1842_v2  ;;  %v1848_v6 = vld [vmem:[%s2714_s1 + $0x10] ss:$8 sps:$4 sm:$0xff]   ;;  %v1850_v8 = vld [vmem:[%s2714_s1 + $0x24] ss:$8 sps:$4 sm:$0xff]   ;;  %v1854_v10 = vld [vmem:[%s2714_s1 + $0x20] ss:$8 sps:$4 sm:$0xff]  }
   0x4   :  { %1020 = vmatpush1.bf16.msra.mxu0 %v1843_v3  ;;  %939 = vmatprep.subr.bf16.mxu1 %v1844_v4  ;;  %v1849_v7 = vld [vmem:[%s2714_s1 + $0x210] ss:$8 sps:$4 sm:$0xff]   ;;  %v1852_v9 = vld [vmem:[%s2714_s1 + $0x224] ss:$8 sps:$4 sm:$0xff]   ;;  %v1855_v11 = vld [vmem:[%s2714_s1 + $0x220] ss:$8 sps:$4 sm:$0xff]  }
   0x5   :  { %1021 = vmatprep.subr.bf16.mxu0 %v1846_v5  ;;  %v1856_v12 = vld [vmem:[%s2714_s1 + $0x34] ss:$8 sps:$4 sm:$0xff]   ;;  %v1860_v14 = vld [vmem:[%s2714_s1 + $0x30] ss:$8 sps:$4 sm:$0xff]   ;;  %v1862_v16 = vld [vmem:[%s2714_s1 + $0x44] ss:$8 sps:$4 sm:$0xff]  }
   0x6   :  { %v1858_v13 = vld [vmem:[%s2714_s1 + $0x234] ss:$8 sps:$4 sm:$0xff]   ;;  %v1861_v15 = vld [vmem:[%s2714_s1 + $0x230] ss:$8 sps:$4 sm:$0xff]   ;;  %v1864_v17 = vld [vmem:[%s2714_s1 + $0x244] ss:$8 sps:$4 sm:$0xff]  }
   0x7   :  { %940 = vmatpush1.bf16.msra.mxu1 %v1848_v6  ;;  %v1866_v18 = vld [vmem:[%s2714_s1 + $0x40] ss:$8 sps:$4 sm:$0xff]   ;;  %v1868_v20 = vld [vmem:[%s2714_s1 + $0x54] ss:$8 sps:$4 sm:$0xff]   ;;  %v1872_v22 = vld [vmem:[%s2714_s1 + $0x50] ss:$8 sps:$4 sm:$0xff]  }
   0x8   :  { %1022 = vmatpush1.bf16.msra.mxu0 %v1849_v7  ;;  %941 = vmatprep.subr.bf16.mxu1 %v1850_v8  ;;  %v1867_v19 = vld [vmem:[%s2714_s1 + $0x240] ss:$8 sps:$4 sm:$0xff]   ;;  %v1870_v21 = vld [vmem:[%s2714_s1 + $0x254] ss:$8 sps:$4 sm:$0xff]   ;;  %v1873_v23 = vld [vmem:[%s2714_s1 + $0x250] ss:$8 sps:$4 sm:$0xff]  }
   0x9   :  { %1023 = vmatprep.subr.bf16.mxu0 %v1852_v9  ;;  %v1874_v24 = vld [vmem:[%s2714_s1 + $0x64] ss:$8 sps:$4 sm:$0xff]   ;;  %v1878_v26 = vld [vmem:[%s2714_s1 + $0x60] ss:$8 sps:$4 sm:$0xff]   ;;  %v1880_v28 = vld [vmem:[%s2714_s1 + $0x74] ss:$8 sps:$4 sm:$0xff]  }
   0xa   :  { %v1876_v25 = vld [vmem:[%s2714_s1 + $0x264] ss:$8 sps:$4 sm:$0xff]   ;;  %v1879_v27 = vld [vmem:[%s2714_s1 + $0x260] ss:$8 sps:$4 sm:$0xff]   ;;  %v1882_v29 = vld [vmem:[%s2714_s1 + $0x274] ss:$8 sps:$4 sm:$0xff]  }
   0xb   :  { %942 = vmatpush1.bf16.msra.mxu1 %v1854_v10  ;;  %v1884_v30 = vld [vmem:[%s2714_s1 + $0x70] ss:$8 sps:$4 sm:$0xff]   ;;  %v1886_v32 = vld [vmem:[%s2714_s1 + $0x84] ss:$8 sps:$4 sm:$0xff]   ;;  %v1890_v34 = vld [vmem:[%s2714_s1 + $0x80] ss:$8 sps:$4 sm:$0xff]  }
   0xc   :  { %1024 = vmatpush1.bf16.msra.mxu0 %v1855_v11  ;;  %943 = vmatprep.subr.bf16.mxu1 %v1856_v12  ;;  %v1885_v31 = vld [vmem:[%s2714_s1 + $0x270] ss:$8 sps:$4 sm:$0xff]   ;;  %v1888_v33 = vld [vmem:[%s2714_s1 + $0x284] ss:$8 sps:$4 sm:$0xff]   ;;  %v1891_v35 = vld [vmem:[%s2714_s1 + $0x280] ss:$8 sps:$4 sm:$0xff]  }
   0xd   :  { %1025 = vmatprep.subr.bf16.mxu0 %v1858_v13  ;;  %v1892_v36 = vld [vmem:[%s2714_s1 + $0x94] ss:$8 sps:$4 sm:$0xff]   ;;  %v1896_v38 = vld [vmem:[%s2714_s1 + $0x90] ss:$8 sps:$4 sm:$0xff]   ;;  %v1898_v40 = vld [vmem:[%s2714_s1 + $0xa4] ss:$8 sps:$4 sm:$0xff]  }
   0xe   :  { %v1894_v37 = vld [vmem:[%s2714_s1 + $0x294] ss:$8 sps:$4 sm:$0xff]   ;;  %v1897_v39 = vld [vmem:[%s2714_s1 + $0x290] ss:$8 sps:$4 sm:$0xff]   ;;  %v1900_v41 = vld [vmem:[%s2714_s1 + $0x2a4] ss:$8 sps:$4 sm:$0xff]  }
   0xf   :  { %944 = vmatpush1.bf16.msra.mxu1 %v1860_v14  ;;  %v1902_v42 = vld [vmem:[%s2714_s1 + $0xa0] ss:$8 sps:$4 sm:$0xff]   ;;  %v1904_v44 = vld [vmem:[%s2714_s1 + $0xb4] ss:$8 sps:$4 sm:$0xff]   ;;  %v1908_v47 = vld [vmem:[%s2714_s1 + $0xb0] ss:$8 sps:$4 sm:$0xff]  }
  0x10   :  { %1026 = vmatpush1.bf16.msra.mxu0 %v1861_v15  ;;  %945 = vmatprep.subr.bf16.mxu1 %v1862_v16  ;;  %v1903_v43 = vld [vmem:[%s2714_s1 + $0x2a0] ss:$8 sps:$4 sm:$0xff]   ;;  %v1906_v45 = vld [vmem:[%s2714_s1 + $0x2b4] ss:$8 sps:$4 sm:$0xff]   ;;  %v1909_v49 = vld [vmem:[%s2714_s1 + $0x2b0] ss:$8 sps:$4 sm:$0xff]  }
  0x11   :  { %1027 = vmatprep.subr.bf16.mxu0 %v1864_v17  ;;  %v24_v46 = vld [vmem:[%s2715_s0] sm:$0xff]  ;;  %v26_v50 = vld [vmem:[%s2715_s0 + $0x10] sm:$0xff] }
  0x12   :  { %v1587_v48 = vcombine.high %v24_v46, %v24_v46  ;;  %v1910_v51 = vld [vmem:[%s2714_s1 + $0xc4] ss:$8 sps:$4 sm:$0xff]   ;;  %v1591_v53 = vcombine.high %v26_v50, %v26_v50  ;;  %v1914_v54 = vld [vmem:[%s2714_s1 + $0xc0] ss:$8 sps:$4 sm:$0xff]   ;;  %v1916_v56 = vld [vmem:[%s2714_s1 + $0xd4] ss:$8 sps:$4 sm:$0xff]   ;;  %v1586_v6 = vcombine.low %v24_v46, %v24_v46  ;;  %v1590_v7 = vcombine.low %v26_v50, %v26_v50 }
  0x13   :  { %946 = vmatpush1.bf16.msra.mxu1 %v1866_v18  ;;  %v1912_v52 = vld [vmem:[%s2714_s1 + $0x2c4] ss:$8 sps:$4 sm:$0xff]   ;;  %v1915_v55 = vld [vmem:[%s2714_s1 + $0x2c0] ss:$8 sps:$4 sm:$0xff]   ;;  %v1918_v57 = vld [vmem:[%s2714_s1 + $0x2d4] ss:$8 sps:$4 sm:$0xff]  }
  0x14   :  { %1028 = vmatpush1.bf16.msra.mxu0 %v1867_v19  ;;  %947 = vmatprep.subr.bf16.mxu1 %v1868_v20  ;;  %v1920_v58 = vld [vmem:[%s2714_s1 + $0xd0] ss:$8 sps:$4 sm:$0xff]   ;;  %v1922_v60 = vld [vmem:[%s2714_s1 + $0xe4] ss:$8 sps:$4 sm:$0xff]   ;;  %v1926_v62 = vld [vmem:[%s2714_s1 + $0xe0] ss:$8 sps:$4 sm:$0xff]  }
  0x15   :  { %1029 = vmatprep.subr.bf16.mxu0 %v1870_v21  ;;  %969 = vmatprep.mubr.bf16.mxu1 %v1587_v48  ;;  %v1921_v59 = vld [vmem:[%s2714_s1 + $0x2d0] ss:$8 sps:$4 sm:$0xff]   ;;  %v1924_v61 = vld [vmem:[%s2714_s1 + $0x2e4] ss:$8 sps:$4 sm:$0xff]   ;;  %v1927_v63 = vld [vmem:[%s2714_s1 + $0x2e0] ss:$8 sps:$4 sm:$0xff]  }
  0x16   :  { %1051 = vmatprep.mubr.bf16.mxu0 %v1591_v53  ;;  %v1928_v0 = vld [vmem:[%s2714_s1 + $0xf4] ss:$8 sps:$4 sm:$0xff]   ;;  %v1932_v2 = vld [vmem:[%s2714_s1 + $0xf0] ss:$8 sps:$4 sm:$0xff]   ;;  %v1938_v4 = vld [vmem:[%s2714_s1 + $0x104] ss:$8 sps:$4 sm:$0xff]  }
  0x17   :  { %948 = vmatpush1.bf16.msra.mxu1 %v1872_v22  ;;  %v1930_v1 = vld [vmem:[%s2714_s1 + $0x2f4] ss:$8 sps:$4 sm:$0xff]   ;;  %v1933_v3 = vld [vmem:[%s2714_s1 + $0x2f0] ss:$8 sps:$4 sm:$0xff]   ;;  %v1943_v5 = vld [vmem:[%s2714_s1 + $0x304] ss:$8 sps:$4 sm:$0xff]  }
  0x18   :  { %1030 = vmatpush1.bf16.msra.mxu0 %v1873_v23  ;;  %949 = vmatprep.subr.bf16.mxu1 %v1874_v24  ;;  %v1936_v8 = vld [vmem:[%s2714_s1 + $0x100] ss:$8 sps:$4 sm:$0xff]   ;;  %v1946_v10 = vld [vmem:[%s2714_s1 + $0x114] ss:$8 sps:$4 sm:$0xff]   ;;  %v1944_v12 = vld [vmem:[%s2714_s1 + $0x110] ss:$8 sps:$4 sm:$0xff]  }
  0x19   :  { %1031 = vmatprep.subr.bf16.mxu0 %v1876_v25  ;;  %v1941_v9 = vld [vmem:[%s2714_s1 + $0x300] ss:$8 sps:$4 sm:$0xff]   ;;  %v1949_v11 = vld [vmem:[%s2714_s1 + $0x314] ss:$8 sps:$4 sm:$0xff]   ;;  %v1947_v13 = vld [vmem:[%s2714_s1 + $0x310] ss:$8 sps:$4 sm:$0xff]  }
  0x1a   :  { %v1952_v14 = vld [vmem:[%s2714_s1 + $0x124] ss:$8 sps:$4 sm:$0xff]   ;;  %v1950_v16 = vld [vmem:[%s2714_s1 + $0x120] ss:$8 sps:$4 sm:$0xff]   ;;  %v1958_v18 = vld [vmem:[%s2714_s1 + $0x134] ss:$8 sps:$4 sm:$0xff]  }
  0x1b   :  { %950 = vmatpush1.bf16.msra.mxu1 %v1878_v26  ;;  %v1955_v15 = vld [vmem:[%s2714_s1 + $0x324] ss:$8 sps:$4 sm:$0xff]   ;;  %v1953_v17 = vld [vmem:[%s2714_s1 + $0x320] ss:$8 sps:$4 sm:$0xff]   ;;  %v1961_v19 = vld [vmem:[%s2714_s1 + $0x334] ss:$8 sps:$4 sm:$0xff]  }
  0x1c   :  { %1032 = vmatpush1.bf16.msra.mxu0 %v1879_v27  ;;  %951 = vmatprep.subr.bf16.mxu1 %v1880_v28  ;;  %v1956_v20 = vld [vmem:[%s2714_s1 + $0x130] ss:$8 sps:$4 sm:$0xff]   ;;  %v1964_v22 = vld [vmem:[%s2714_s1 + $0x144] ss:$8 sps:$4 sm:$0xff]   ;;  %v1962_v24 = vld [vmem:[%s2714_s1 + $0x140] ss:$8 sps:$4 sm:$0xff]  }
  0x1d   :  { %1033 = vmatprep.subr.bf16.mxu0 %v1882_v29  ;;  %v1959_v21 = vld [vmem:[%s2714_s1 + $0x330] ss:$8 sps:$4 sm:$0xff]   ;;  %v1967_v23 = vld [vmem:[%s2714_s1 + $0x344] ss:$8 sps:$4 sm:$0xff]   ;;  %v1965_v25 = vld [vmem:[%s2714_s1 + $0x340] ss:$8 sps:$4 sm:$0xff]  }
  0x1e   :  { %v1970_v26 = vld [vmem:[%s2714_s1 + $0x154] ss:$8 sps:$4 sm:$0xff]   ;;  %v1968_v28 = vld [vmem:[%s2714_s1 + $0x150] ss:$8 sps:$4 sm:$0xff]   ;;  %v2000_v50 = vld [vmem:[%s2714_s1 + $0x1a4] ss:$8 sps:$4 sm:$0xff]  }
  0x1f   :  { %952 = vmatpush1.bf16.msra.mxu1 %v1884_v30  ;;  %v1973_v27 = vld [vmem:[%s2714_s1 + $0x354] ss:$8 sps:$4 sm:$0xff]   ;;  %v1971_v29 = vld [vmem:[%s2714_s1 + $0x350] ss:$8 sps:$4 sm:$0xff]   ;;  %v1976_v30 = vld [vmem:[%s2714_s1 + $0x164] ss:$8 sps:$4 sm:$0xff]  }
  0x20   :  { %1034 = vmatpush1.bf16.msra.mxu0 %v1885_v31  ;;  %953 = vmatprep.subr.bf16.mxu1 %v1886_v32  ;;  %v1979_v31 = vld [vmem:[%s2714_s1 + $0x364] ss:$8 sps:$4 sm:$0xff]   ;;  %v1994_v46 = vld [vmem:[%s2714_s1 + $0x194] ss:$8 sps:$4 sm:$0xff]   ;;  %v1992_v48 = vld [vmem:[%s2714_s1 + $0x190] ss:$8 sps:$4 sm:$0xff]  }
  0x21   :  { %1035 = vmatprep.subr.bf16.mxu0 %v1888_v33  ;;  %v2411_v32 = vld [vmem:[%s2715_s0 + $0x8] sm:$0xff]  ;;  %v2416_v33 = vld [vmem:[%s2715_s0 + $0x18] sm:$0xff] }
  0x22   :  { %v2001_v53 = vld [vmem:[%s2714_s1 + $0x3a0] ss:$8 sps:$4 sm:$0xff]  }
  0x23   :  { %954 = vmatpush1.bf16.msra.mxu1 %v1890_v34  ;;  %v1974_v34 = vld [vmem:[%s2714_s1 + $0x160] ss:$8 sps:$4 sm:$0xff]  }
  0x24   :  { %1036 = vmatpush1.bf16.msra.mxu0 %v1891_v35  ;;  %955 = vmatprep.subr.bf16.mxu1 %v1892_v36  ;;  %v1977_v35 = vld [vmem:[%s2714_s1 + $0x360] ss:$8 sps:$4 sm:$0xff]   ;;  %v1589_v36 = vcombine.high %v2411_v32, %v2411_v32 }
  0x25   :  { %1037 = vmatprep.subr.bf16.mxu0 %v1894_v37  ;;  %v1593_v37 = vcombine.high %v2416_v33, %v2416_v33 }
  0x27   :  { %956 = vmatpush1.bf16.msra.mxu1 %v1896_v38  ;;  %v1982_v38 = vld [vmem:[%s2714_s1 + $0x174] ss:$8 sps:$4 sm:$0xff]  }
  0x28   :  { %1038 = vmatpush1.bf16.msra.mxu0 %v1897_v39  ;;  %957 = vmatprep.subr.bf16.mxu1 %v1898_v40  ;;  %v1985_v39 = vld [vmem:[%s2714_s1 + $0x374] ss:$8 sps:$4 sm:$0xff]   ;;  %v1980_v40 = vld [vmem:[%s2714_s1 + $0x170] ss:$8 sps:$4 sm:$0xff]  }
  0x29   :  { %1039 = vmatprep.subr.bf16.mxu0 %v1900_v41  ;;  %v1983_v41 = vld [vmem:[%s2714_s1 + $0x370] ss:$8 sps:$4 sm:$0xff]  }
  0x2b   :  { %958 = vmatpush1.bf16.msra.mxu1 %v1902_v42  ;;  %v1988_v42 = vld [vmem:[%s2714_s1 + $0x184] ss:$8 sps:$4 sm:$0xff]  }
  0x2c   :  { %1040 = vmatpush1.bf16.msra.mxu0 %v1903_v43  ;;  %959 = vmatprep.subr.bf16.mxu1 %v1904_v44  ;;  %v1991_v43 = vld [vmem:[%s2714_s1 + $0x384] ss:$8 sps:$4 sm:$0xff]   ;;  %v1986_v44 = vld [vmem:[%s2714_s1 + $0x180] ss:$8 sps:$4 sm:$0xff]  }
  0x2d   :  { %1041 = vmatprep.subr.bf16.mxu0 %v1906_v45  ;;  %v1989_v45 = vld [vmem:[%s2714_s1 + $0x380] ss:$8 sps:$4 sm:$0xff]  }
  0x2f   :  { %960 = vmatpush1.bf16.msra.mxu1 %v1908_v47  ;;  %v1997_v47 = vld [vmem:[%s2714_s1 + $0x394] ss:$8 sps:$4 sm:$0xff]  }
  0x30   :  { %1042 = vmatpush1.bf16.msra.mxu0 %v1909_v49  ;;  %961 = vmatprep.subr.bf16.mxu1 %v1910_v51  ;;  %v1995_v49 = vld [vmem:[%s2714_s1 + $0x390] ss:$8 sps:$4 sm:$0xff]   ;;  %v2003_v51 = vld [vmem:[%s2714_s1 + $0x3a4] ss:$8 sps:$4 sm:$0xff]  }
  0x31   :  { %1043 = vmatprep.subr.bf16.mxu0 %v1912_v52  ;;  %v1998_v52 = vld [vmem:[%s2714_s1 + $0x1a0] ss:$8 sps:$4 sm:$0xff]  }
  0x33   :  { %962 = vmatpush1.bf16.msra.mxu1 %v1914_v54  ;;  %v2006_v54 = vld [vmem:[%s2714_s1 + $0x1b4] ss:$8 sps:$4 sm:$0xff]  }
  0x34   :  { %1044 = vmatpush1.bf16.msra.mxu0 %v1915_v55  ;;  %963 = vmatprep.subr.bf16.mxu1 %v1916_v56  ;;  %v2009_v55 = vld [vmem:[%s2714_s1 + $0x3b4] ss:$8 sps:$4 sm:$0xff]   ;;  %v2004_v56 = vld [vmem:[%s2714_s1 + $0x1b0] ss:$8 sps:$4 sm:$0xff]  }
  0x35   :  { %1045 = vmatprep.subr.bf16.mxu0 %v1918_v57  ;;  %v2007_v57 = vld [vmem:[%s2714_s1 + $0x3b0] ss:$8 sps:$4 sm:$0xff]  }
  0x37   :  { %964 = vmatpush1.bf16.msra.mxu1 %v1920_v58  ;;  %v2012_v58 = vld [vmem:[%s2714_s1 + $0x1c4] ss:$8 sps:$4 sm:$0xff]  }
  0x38   :  { %1046 = vmatpush1.bf16.msra.mxu0 %v1921_v59  ;;  %965 = vmatprep.subr.bf16.mxu1 %v1922_v60  ;;  %v2015_v59 = vld [vmem:[%s2714_s1 + $0x3c4] ss:$8 sps:$4 sm:$0xff]   ;;  %v2010_v60 = vld [vmem:[%s2714_s1 + $0x1c0] ss:$8 sps:$4 sm:$0xff]  }
  0x39   :  { %1047 = vmatprep.subr.bf16.mxu0 %v1924_v61  ;;  %v2013_v61 = vld [vmem:[%s2714_s1 + $0x3c0] ss:$8 sps:$4 sm:$0xff]  }
  0x3b   :  { %966 = vmatpush1.bf16.msra.mxu1 %v1926_v62  ;;  %v2018_v62 = vld [vmem:[%s2714_s1 + $0x1d4] ss:$8 sps:$4 sm:$0xff]  }
  0x3c   :  { %1048 = vmatpush1.bf16.msra.mxu0 %v1927_v63  ;;  %967 = vmatprep.subr.bf16.mxu1 %v1928_v0  ;;  %v2021_v63 = vld [vmem:[%s2714_s1 + $0x3d4] ss:$8 sps:$4 sm:$0xff]   ;;  %v2016_v0 = vld [vmem:[%s2714_s1 + $0x1d0] ss:$8 sps:$4 sm:$0xff]  }
  0x3d   :  { %1049 = vmatprep.subr.bf16.mxu0 %v1930_v1  ;;  %v2019_v1 = vld [vmem:[%s2714_s1 + $0x3d0] ss:$8 sps:$4 sm:$0xff]  }
  0x3f   :  { %968 = vmatpush1.bf16.msra.mxu1 %v1932_v2  ;;  %v2024_v2 = vld [vmem:[%s2714_s1 + $0x1e4] ss:$8 sps:$4 sm:$0xff]  }
  0x40   :  { %1050 = vmatpush1.bf16.msra.mxu0 %v1933_v3  ;;  %978 = vmatprep.subr.bf16.mxu1 %v1938_v4  ;;  %v2027_v3 = vld [vmem:[%s2714_s1 + $0x3e4] ss:$8 sps:$4 sm:$0xff]   ;;  %v2022_v4 = vld [vmem:[%s2714_s1 + $0x1e0] ss:$8 sps:$4 sm:$0xff]  }
  0x41   :  { %1060 = vmatprep.subr.bf16.mxu0 %v1943_v5  ;;  %v2025_v5 = vld [vmem:[%s2714_s1 + $0x3e0] ss:$8 sps:$4 sm:$0xff]  }
  0x42   :  { %970 = vmatmul.mubr.bf16.vlgmr.msra.gmra.mrb[0].mxu1 %v1586_v6  ;;  %v2030_v6 = vld [vmem:[%s2714_s1 + $0x1f4] ss:$8 sps:$4 sm:$0xff]  }
  0x43   :  { %1052 = vmatmul.mubr.bf16.vlgmr.msra.gmra.mrb[0].mxu0 %v1590_v7  ;;  %979 = vmatpush1.bf16.msra.mxu1 %v1936_v8  ;;  %v2033_v7 = vld [vmem:[%s2714_s1 + $0x3f4] ss:$8 sps:$4 sm:$0xff]   ;;  %v2028_v8 = vld [vmem:[%s2714_s1 + $0x1f0] ss:$8 sps:$4 sm:$0xff]  }
  0x44   :  { %1061 = vmatpush1.bf16.msra.mxu0 %v1941_v9  ;;  %980 = vmatprep.subr.bf16.mxu1 %v1946_v10  ;;  %v2031_v9 = vld [vmem:[%s2714_s1 + $0x3f0] ss:$8 sps:$4 sm:$0xff]   ;;  %v2040_v10 = vld [vmem:[%s2714_s1 + $0x404] ss:$8 sps:$4 sm:$0xff]  }
  0x45   :  { %1062 = vmatprep.subr.bf16.mxu0 %v1949_v11  ;;  %1010 = vmatprep.mubr.bf16.mxu1 %v1589_v36  ;;  %v1588_v11 = vcombine.low %v2411_v32, %v2411_v32  ;;  %v2065_v32 = vld [vmem:[%s2716_s3 + $0x48] sm:$0xff]   ;;  %v2069_v36 = vld [vmem:[%s2716_s3 + $0x58] sm:$0xff]  }
  0x46   :  { %1092 = vmatprep.mubr.bf16.mxu0 %v1593_v37  ;;  %v2070_v37 = vld [vmem:[%s2716_s3 + $0x18] sm:$0xff]  }
  0x47   :  { %981 = vmatpush1.bf16.msra.mxu1 %v1944_v12  ;;  %v1592_v12 = vcombine.low %v2416_v33, %v2416_v33  ;;  %v2066_v33 = vld [vmem:[%s2716_s3 + $0x8] sm:$0xff]  }
  0x48   :  { %1063 = vmatpush1.bf16.msra.mxu0 %v1947_v13  ;;  %982 = vmatprep.subr.bf16.mxu1 %v1952_v14  ;;  %v2038_v13 = vld [vmem:[%s2714_s1 + $0x400] ss:$8 sps:$4 sm:$0xff]   ;;  %v2043_v14 = vld [vmem:[%s2714_s1 + $0x414] ss:$8 sps:$4 sm:$0xff]  }
  0x49   :  { %1064 = vmatprep.subr.bf16.mxu0 %v1955_v15  ;;  %v2041_v15 = vld [vmem:[%s2714_s1 + $0x410] ss:$8 sps:$4 sm:$0xff]  }
  0x4b   :  { %983 = vmatpush1.bf16.msra.mxu1 %v1950_v16  ;;  %v2093_v16 = vmov 0  }
  0x4c   :  { %1065 = vmatpush1.bf16.msra.mxu0 %v1953_v17  ;;  %984 = vmatprep.subr.bf16.mxu1 %v1958_v18  ;;  %v2046_v17 = vld [vmem:[%s2714_s1 + $0x424] ss:$8 sps:$4 sm:$0xff]   ;;  %v2044_v18 = vld [vmem:[%s2714_s1 + $0x420] ss:$8 sps:$4 sm:$0xff]  }
  0x4d   :  { %1066 = vmatprep.subr.bf16.mxu0 %v1961_v19  ;;  %v2049_v19 = vld [vmem:[%s2714_s1 + $0x434] ss:$8 sps:$4 sm:$0xff]  }
  0x4f   :  { %985 = vmatpush1.bf16.msra.mxu1 %v1956_v20  ;;  %v2047_v20 = vld [vmem:[%s2714_s1 + $0x430] ss:$8 sps:$4 sm:$0xff]  }
  0x50   :  { %1067 = vmatpush1.bf16.msra.mxu0 %v1959_v21  ;;  %986 = vmatprep.subr.bf16.mxu1 %v1964_v22  ;;  %v2052_v21 = vld [vmem:[%s2714_s1 + $0x444] ss:$8 sps:$4 sm:$0xff]   ;;  %v2050_v22 = vld [vmem:[%s2714_s1 + $0x440] ss:$8 sps:$4 sm:$0xff]  }
  0x51   :  { %1068 = vmatprep.subr.bf16.mxu0 %v1967_v23  ;;  %v2055_v23 = vld [vmem:[%s2714_s1 + $0x454] ss:$8 sps:$4 sm:$0xff]  }
  0x53   :  { %987 = vmatpush1.bf16.msra.mxu1 %v1962_v24  ;;  %v2053_v24 = vld [vmem:[%s2714_s1 + $0x450] ss:$8 sps:$4 sm:$0xff]  }
  0x54   :  { %1069 = vmatpush1.bf16.msra.mxu0 %v1965_v25  ;;  %988 = vmatprep.subr.bf16.mxu1 %v1970_v26  ;;  %v2058_v25 = vld [vmem:[%s2714_s1 + $0x464] ss:$8 sps:$4 sm:$0xff]   ;;  %v2056_v26 = vld [vmem:[%s2714_s1 + $0x460] ss:$8 sps:$4 sm:$0xff]  }
  0x55   :  { %1070 = vmatprep.subr.bf16.mxu0 %v1973_v27  ;;  %v2061_v27 = vld [vmem:[%s2714_s1 + $0x474] ss:$8 sps:$4 sm:$0xff]  }
  0x57   :  { %989 = vmatpush1.bf16.msra.mxu1 %v1968_v28  ;;  %v2059_v28 = vld [vmem:[%s2714_s1 + $0x470] ss:$8 sps:$4 sm:$0xff]  }
  0x58   :  { %1071 = vmatpush1.bf16.msra.mxu0 %v1971_v29  ;;  %990 = vmatprep.subr.bf16.mxu1 %v1976_v30  ;;  %v2062_v29 = vld [vmem:[%s2715_s0 + $0x20] ss:$0 sps:$4 sm:$0xff]  }
  0x59   :  { %1072 = vmatprep.subr.bf16.mxu0 %v1979_v31  ;;  %v2063_v30 = vld [vmem:[%s2716_s3 + $0x40] sm:$0xff]  }
  0x5a   :  { %v2064_v31 = vld [vmem:[%s2716_s3] sm:$0xff]  }
  0x5b   :  { %991 = vmatpush1.bf16.msra.mxu1 %v1974_v34  ;;  %v2067_v34 = vld [vmem:[%s2716_s3 + $0x50] sm:$0xff]  }
  0x5c   :  { %1073 = vmatpush1.bf16.msra.mxu0 %v1977_v35  ;;  %992 = vmatprep.subr.bf16.mxu1 %v1982_v38  ;;  %v2068_v35 = vld [vmem:[%s2716_s3 + $0x10] sm:$0xff]   ;;  %v2071_v38 = vld [vmem:[%s2716_s3 + $0x60] sm:$0xff]  }
  0x5d   :  { %1074 = vmatprep.subr.bf16.mxu0 %v1985_v39  ;;  %v2072_v39 = vld [vmem:[%s2716_s3 + $0x20] sm:$0xff]  }
  0x5f   :  { %993 = vmatpush1.bf16.msra.mxu1 %v1980_v40  ;;  %v2073_v40 = vld [vmem:[%s2716_s3 + $0x68] sm:$0xff]  }
  0x60   :  { %1075 = vmatpush1.bf16.msra.mxu0 %v1983_v41  ;;  %994 = vmatprep.subr.bf16.mxu1 %v1988_v42  ;;  %v2074_v41 = vld [vmem:[%s2716_s3 + $0x28] sm:$0xff]   ;;  %v2075_v42 = vld [vmem:[%s2716_s3 + $0x70] sm:$0xff]  }
  0x61   :  { %1076 = vmatprep.subr.bf16.mxu0 %v1991_v43  ;;  %v2076_v43 = vld [vmem:[%s2716_s3 + $0x30] sm:$0xff]  }
  0x63   :  { %995 = vmatpush1.bf16.msra.mxu1 %v1986_v44  ;;  %v2077_v44 = vld [vmem:[%s2716_s3 + $0x78] sm:$0xff]  }
  0x64   :  { %1077 = vmatpush1.bf16.msra.mxu0 %v1989_v45  ;;  %996 = vmatprep.subr.bf16.mxu1 %v1994_v46  ;;  %v2078_v45 = vld [vmem:[%s2716_s3 + $0x38] sm:$0xff]  }
  0x65   :  { %1078 = vmatprep.subr.bf16.mxu0 %v1997_v47 }
  0x67   :  { %997 = vmatpush1.bf16.msra.mxu1 %v1992_v48 }
  0x68   :  { %1079 = vmatpush1.bf16.msra.mxu0 %v1995_v49  ;;  %998 = vmatprep.subr.bf16.mxu1 %v2000_v50  ;;  %v175_v50 = vlaneseq }
  0x69   :  { %1080 = vmatprep.subr.bf16.mxu0 %v2003_v51 }
  0x6a   :  { %v2639_v51 = vshrl.u32 %v175_v50, 7 }
  0x6b   :  { %999 = vmatpush1.bf16.msra.mxu1 %v1998_v52 }
  0x6c   :  { %1081 = vmatpush1.bf16.msra.mxu0 %v2001_v53  ;;  %1000 = vmatprep.subr.bf16.mxu1 %v2006_v54  ;;  %v2642_v52 = vsub.s32 0, %v2639_v51  ;;  %v173_v53 = vld [vmem:[%s2717_s2] ss:$8 sm:$0x3]  ;;  %v2648_v54 = vsub.s32 1, %v2639_v51  ;;  %vm1150_vm0 = vcmp.lt.s32.totalorder %v2639_v51, 2 }
  0x6d   :  { %1082 = vmatprep.subr.bf16.mxu0 %v2009_v55 }
  0x6e   :  { %v178_v55 = vrot.slane %v173_v53, %v2642_v52 }
  0x6f   :  { %1001 = vmatpush1.bf16.msra.mxu1 %v2004_v56  ;;  %v182_v56 = vrot.slane %v173_v53, %v2648_v54  ;;  %v1739_v53 = vld [vmem:[%s2717_s2 + $0x1] ss:$8 sm:$0x3] }
  0x70   :  { %1083 = vmatpush1.bf16.msra.mxu0 %v2007_v57  ;;  %1002 = vmatprep.subr.bf16.mxu1 %v2012_v58 }
  0x71   :  { %1084 = vmatprep.subr.bf16.mxu0 %v2015_v59 }
  0x73   :  { %1003 = vmatpush1.bf16.msra.mxu1 %v2010_v60 }
  0x74   :  { %1085 = vmatpush1.bf16.msra.mxu0 %v2013_v61  ;;  %1004 = vmatprep.subr.bf16.mxu1 %v2018_v62 }
  0x75   :  { %1086 = vmatprep.subr.bf16.mxu0 %v2021_v63 }
  0x77   :  { %1005 = vmatpush1.bf16.msra.mxu1 %v2016_v0 }
  0x78   :  { %1087 = vmatpush1.bf16.msra.mxu0 %v2019_v1  ;;  %1006 = vmatprep.subr.bf16.mxu1 %v2024_v2 }
  0x79   :  { %1088 = vmatprep.subr.bf16.mxu0 %v2027_v3 }
  0x7b   :  { %1007 = vmatpush1.bf16.msra.mxu1 %v2022_v4 }
  0x7c   :  { %1089 = vmatpush1.bf16.msra.mxu0 %v2025_v5  ;;  %1008 = vmatprep.subr.bf16.mxu1 %v2030_v6 }
  0x7d   :  { %1090 = vmatprep.subr.bf16.mxu0 %v2033_v7 }
  0x7f   :  { %1009 = vmatpush1.bf16.msra.mxu1 %v2028_v8 }
  0x80   :  { %1091 = vmatpush1.bf16.msra.mxu0 %v2031_v9  ;;  %1767 = vmatprep.subr.bf16.mxu1 %v2063_v30 }
  0x81   :  { %1101 = vmatprep.subr.bf16.mxu0 %v2040_v10 }
  0x82   :  { %1011 = vmatmul.mubr.bf16.vlgmr.msra.gmra.mrb[0].mxu1 %v1588_v11 }
  0x83   :  { %1093 = vmatmul.mubr.bf16.vlgmr.msra.gmra.mrb[0].mxu0 %v1592_v12  ;;  %1768 = vmatpush3.bf16.msra.mxu1 %v2064_v31 }
  0x84   :  { %1102 = vmatpush1.bf16.msra.mxu0 %v2038_v13  ;;  %1133 = vmatprep.mubr.bf16.mxu0 %v2093_v16 }
  0x85   :  { %1103 = vmatprep.subr.bf16.mxu0 %v2043_v14  ;;  %1769 = vmatprep.subr.bf16.mxu1 %v2065_v32 }
  0x87   :  { %1770 = vmatpush3.bf16.msra.mxu1 %v2066_v33 }
  0x88   :  { %1104 = vmatpush1.bf16.msra.mxu0 %v2041_v15  ;;  %1771 = vmatprep.subr.bf16.mxu1 %v2067_v34 }
  0x89   :  { %1105 = vmatprep.subr.bf16.mxu0 %v2046_v17 }
  0x8b   :  { %1772 = vmatpush3.bf16.msra.mxu1 %v2068_v35 }
  0x8c   :  { %1106 = vmatpush1.bf16.msra.mxu0 %v2044_v18  ;;  %1773 = vmatprep.subr.bf16.mxu1 %v2069_v36 }
  0x8d   :  { %1107 = vmatprep.subr.bf16.mxu0 %v2049_v19 }
  0x8f   :  { %1774 = vmatpush3.bf16.msra.mxu1 %v2070_v37 }
  0x90   :  { %1108 = vmatpush1.bf16.msra.mxu0 %v2047_v20  ;;  %1775 = vmatprep.subr.bf16.mxu1 %v2071_v38 }
  0x91   :  { %1109 = vmatprep.subr.bf16.mxu0 %v2052_v21 }
  0x93   :  { %1776 = vmatpush3.bf16.msra.mxu1 %v2072_v39 }
  0x94   :  { %1110 = vmatpush1.bf16.msra.mxu0 %v2050_v22  ;;  %1777 = vmatprep.subr.bf16.mxu1 %v2073_v40 }
  0x95   :  { %1111 = vmatprep.subr.bf16.mxu0 %v2055_v23 }
  0x97   :  { %1778 = vmatpush3.bf16.msra.mxu1 %v2074_v41 }
  0x98   :  { %1112 = vmatpush1.bf16.msra.mxu0 %v2053_v24  ;;  %1779 = vmatprep.subr.bf16.mxu1 %v2075_v42 }
  0x99   :  { %1113 = vmatprep.subr.bf16.mxu0 %v2058_v25 }
  0x9b   :  { %1780 = vmatpush3.bf16.msra.mxu1 %v2076_v43  ;;  %v2094_v43 = vmov 1966171168  }
  0x9c   :  { %1114 = vmatpush1.bf16.msra.mxu0 %v2056_v26  ;;  %1781 = vmatprep.subr.bf16.mxu1 %v2077_v44  ;;  %v1197_v44 = vunpack.c.l.s4 %v2094_v43 }
  0x9d   :  { %1115 = vmatprep.subr.bf16.mxu0 %v2061_v27 }
  0x9f   :  { %1782 = vmatpush3.bf16.msra.mxu1 %v2078_v45  ;;  %v1198_v45 = vunpack.c.0.s8 %v1197_v44 }
  0xa0   :  { %1116 = vmatpush1.bf16.msra.mxu0 %v2059_v28 }
  0xa3   :  { %1134 = vmatmul.mubr.bf16.vlgmr.msra.gmra.mrb[0].mxu0 %v2062_v29 }
 0x155   :  { %v1012_v46 = vpop.f32.mrb[0].mxu1 }
 0x156   :  { %v1014_v47 = vpop.f32.mrb[1].mxu1  ;;  %v1818_v57 = vadd.f32 %v1012_v46, %v178_v55 }
 0x157   :  { %v1016_v48 = vpop.f32.mrb[2].mxu1  ;;  %v1820_v58 = vadd.f32 %v1014_v47, %v182_v56  ;;  %v1201_v47 = vsub.s32 %v1198_v45, %v2639_v51  ;;  %v1435_v45 = vld [vmem:[%s2719_s4 + $0x1] sm:$0x1] }
 0x158   :  { %v1017_v49 = vpop.f32.mrb[3].mxu1 }
 0x176   :  { %v1135_v59 = vpop.f32.mrb[0].mxu0 }
 0x177   :  { %v2652_v60 = vadd.f32 %v1818_v57, %v1135_v59  ;;  %v1137_v61 = vpop.f32.mrb[1].mxu0 }
 0x178   :  { %v1821_v62 = vadd.f32 %v1820_v58, %v1137_v61  ;;  %v1139_v63 = vpop.f32.mrb[2].mxu0 }
 0x179   :  { %v1142_v0 = vmax.f32 %v2652_v60, 0.0  ;;  %v1140_v1 = vpop.f32.mrb[3].mxu0 }
 0x17a   :  { %v1143_v2 = vmax.f32 %v1821_v62, 0.0 }
 0x17b   :  { %v1151_v3 = vsel %vm1150_vm0, %v1142_v0, 0.0 }
 0x17c   :  { %v1153_v4 = vrot.slane %v1151_v3, 4  ;;  %v1167_v5 = vmul.f32 %v1151_v3, %v1151_v3  ;;  %v1152_v6 = vsel %vm1150_vm0, %v1143_v2, 0.0 }
 0x17d   :  { %v1159_v7 = vrot.slane %v1152_v6, 4  ;;  %v1168_v8 = vmul.f32 %v1152_v6, %v1152_v6 }
 0x17e   :  { %v1154_v9 = vadd.f32 %v1153_v4, %v1151_v3  ;;  %v1169_v10 = vrot.slane %v1167_v5, 4  ;;  %v1740_v3 = vld [vmem:[%s2717_s2 + $0x2] ss:$8 sm:$0x3] }
 0x17f   :  { %v1160_v11 = vadd.f32 %v1159_v7, %v1152_v6  ;;  %v1175_v12 = vrot.slane %v1168_v8, 4 }
 0x180   :  { %v1155_v13 = vrot.slane %v1154_v9, 2  ;;  %v1170_v14 = vadd.f32 %v1169_v10, %v1167_v5 }
 0x181   :  { %v1161_v15 = vrot.slane %v1160_v11, 2  ;;  %v1176_v16 = vadd.f32 %v1175_v12, %v1168_v8  ;;  %v2081_v12 = vld [vmem:[%s2718_s5 + $0x10] sm:$0xff]  }
 0x182   :  { %v1156_v17 = vadd.f32 %v1155_v13, %v1154_v9  ;;  %v1171_v18 = vrot.slane %v1170_v14, 2  ;;  %v2082_v13 = vld [vmem:[%s2718_s5 + $0x18] sm:$0xff]  }
 0x183   :  { %v1162_v19 = vadd.f32 %v1161_v15, %v1160_v11  ;;  %v1177_v20 = vrot.slane %v1176_v16, 2  ;;  %v2084_v15 = vld [vmem:[%s2718_s5 + $0x28] sm:$0xff]  }
 0x184   :  { %v1157_v21 = vrot.slane %v1156_v17, 1  ;;  %v1172_v22 = vadd.f32 %v1171_v18, %v1170_v14  ;;  %v2083_v14 = vld [vmem:[%s2718_s5 + $0x20] sm:$0xff]  }
 0x185   :  { %v1163_v23 = vrot.slane %v1162_v19, 1  ;;  %v1178_v24 = vadd.f32 %v1177_v20, %v1176_v16  ;;  %v2085_v16 = vld [vmem:[%s2718_s5 + $0x30] sm:$0xff]  }
 0x186   :  { %v1158_v25 = vadd.f32 %v1157_v21, %v1156_v17  ;;  %v1173_v26 = vrot.slane %v1172_v22, 1  ;;  %v2086_v17 = vld [vmem:[%s2718_s5 + $0x38] sm:$0xff]  }
 0x187   :  { %v1164_v27 = vadd.f32 %v1163_v23, %v1162_v19  ;;  %v1179_v28 = vrot.slane %v1178_v24, 1  ;;  %v1741_v19 = vld [vmem:[%s2719_s4] ss:$0 sm:$0xff] }
 0x188   :  { %v1165_v29 = vmul.f32 0.5, %v1158_v25  ;;  %v1174_v30 = vadd.f32 %v1173_v26, %v1172_v22 }
 0x189   :  { %v1166_v31 = vmul.f32 0.5, %v1164_v27  ;;  %v1180_v32 = vadd.f32 %v1179_v28, %v1178_v24 }
 0x18a   :  { %v1181_v33 = vmul.f32 0.5, %v1174_v30  ;;  %v1183_v34 = vmul.f32 %v1165_v29, %v1165_v29 }
 0x18b   :  { %v1182_v35 = vmul.f32 0.5, %v1180_v32  ;;  %v1184_v36 = vmul.f32 %v1166_v31, %v1166_v31 }
 0x18c   :  { %v1185_v37 = vsub.f32 %v1181_v33, %v1183_v34 }
 0x18d   :  { %v1186_v38 = vsub.f32 %v1182_v35, %v1184_v36 }
 0x18e   :  { %v1187_v39 = vmax.f32 %v1185_v37, 0.0 }
 0x18f   :  { %v1188_v40 = vmax.f32 %v1186_v38, 0.0 }
 0x190   :  { %v1189_v41 = vadd.f32 1e-05, %v1187_v39 }
 0x191   :  { %v1190_v42 = vadd.f32 1e-05, %v1188_v40 }
 0x192   :  { %2087 = vrsqrt.f32 %v1189_v41 }
 0x193   :  { %2089 = vrsqrt.f32 %v1190_v42 }
 0x19c   :  { %v2088_v46 = vpop.eup %2087 }
 0x19d   :  { %v2090_v48 = vpop.eup %2089 }
 0x19e   :  { %v1195_v49 = vcombine.low %v2088_v46, %v2090_v48  ;;  %v1436_v48 = vld [vmem:[%s2719_s4 + $0x2] sm:$0x1] }
 0x1a0   :  { %v1202_v50 = vrot.slane %v1195_v49, %v1201_v47 }
 0x1a2   :  { %v1209_v55 = vrot.slane %v1202_v50, %v1201_v47 }
 0x1a4   :  { %v1211_v56 = vmul.f32 %v1739_v53, %v1209_v55 }
 0x1a6   :  { %v1216_v57 = vrot.slane %v1211_v56, %v2642_v52  ;;  %v1220_v58 = vrot.slane %v1211_v56, %v2648_v54 }
 0x1a8   :  { %v1224_v59 = vmul.f32 %v1220_v58, %v1143_v2  ;;  %v1225_v60 = vmul.f32 %v1216_v57, %v1165_v29  ;;  %v1226_v61 = vmul.f32 %v1220_v58, %v1166_v31  ;;  %v1223_v62 = vmul.f32 %v1216_v57, %v1142_v0  ;;  %v2079_v0 = vld [vmem:[%s2718_s5] sm:$0xff]  }
 0x1a9   :  { %v2095_v2 = vmov 0.0  }
 0x1aa   :  { %v1229_v63 = vcombine.low %v1225_v60, %v1226_v61  ;;  %1798 = vmatprep.subr.bf16.mxu1 %v2095_v2 }
 0x1ac   :  { %v1236_v1 = vrot.slane %v1229_v63, %v1201_v47 }
 0x1ae   :  { %v1243_v4 = vrot.slane %v1236_v1, %v1201_v47 }
 0x1b0   :  { %v1245_v5 = vsub.f32 %v1740_v3, %v1243_v4 }
 0x1b2   :  { %v1254_v6 = vrot.slane %v1245_v5, %v2648_v54  ;;  %v1250_v7 = vrot.slane %v1245_v5, %v2642_v52  ;;  %v2080_v54 = vld [vmem:[%s2718_s5 + $0x8] sm:$0xff]  }
 0x1b4   :  { %v1258_v8 = vadd.f32 %v1254_v6, %v1224_v59  ;;  %v1257_v9 = vadd.f32 %v1250_v7, %v1223_v62  ;;  %v1758_v59 = vld [vmem:[%s2719_s4 + $0x3] ss:$0 sm:$0xff] }
 0x1b6   :  { %v1260_v10 = vpack.c.bf16 %v1258_v8, %v1258_v8  ;;  %v1259_v11 = vpack.c.bf16 %v1257_v9, %v1257_v9 }
 0x1b8   :  { %1426 = vmatprep.mubr.bf16.mxu1 %v1260_v10 }
 0x1b9   :  { %1427 = vmatmul.mubr.bf16.vlgmr.msra.gmra.mrb[4].mxu1 %v1259_v11 }
 0x1ba   :  { %1799 = vmatpush3.bf16.msra.mxu1 %v2079_v0  ;;  %1814 = vmatprep.mubr.msk.bf16.mxu1 %vm2096_vm1, %v2095_v2 }
 0x1bb   :  { %1800 = vmatprep.subr.bf16.mxu1 %v2095_v2 }
 0x1be   :  { %1801 = vmatpush3.bf16.msra.mxu1 %v2080_v54 }
 0x1bf   :  { %1802 = vmatprep.subr.bf16.mxu1 %v2095_v2 }
 0x1c2   :  { %1803 = vmatpush3.bf16.msra.mxu1 %v2081_v12 }
 0x1c3   :  { %1804 = vmatprep.subr.bf16.mxu1 %v2095_v2 }
 0x1c6   :  { %1805 = vmatpush3.bf16.msra.mxu1 %v2082_v13 }
 0x1c7   :  { %1806 = vmatprep.subr.bf16.mxu1 %v2095_v2 }
 0x1ca   :  { %1807 = vmatpush3.bf16.msra.mxu1 %v2083_v14 }
 0x1cb   :  { %1808 = vmatprep.subr.bf16.mxu1 %v2095_v2 }
 0x1ce   :  { %1809 = vmatpush3.bf16.msra.mxu1 %v2084_v15 }
 0x1cf   :  { %1810 = vmatprep.subr.bf16.mxu1 %v2095_v2 }
 0x1d2   :  { %1811 = vmatpush3.bf16.msra.mxu1 %v2085_v16 }
 0x1d3   :  { %1812 = vmatprep.subr.bf16.mxu1 %v2095_v2 }
 0x1d6   :  { %1813 = vmatpush3.bf16.msra.mxu1 %v2086_v17 }
 0x28c   :  { %v1783_v18 = vpop.f32.mrb[4].mxu1 }
 0x28d   :  { %v1784_v20 = vpop.f32.mrb[5].mxu1 }
 0x28e   :  { %v1785_v21 = vadd.f32 %v1784_v20, %v1783_v18  ;;  %v1786_v22 = vpop.f32.mrb[6].mxu1 }
 0x28f   :  { %v1787_v23 = vpop.f32.mrb[7].mxu1 }
 0x290   :  { %v1429_v24 = vadd.f32 %v1785_v21, %v1741_v19 }
 0x292   :  { %v1434_v25 = vmax.f32 %v1429_v24, 0.0 }
 0x294   :  { %v1437_v26 = vsel %vm1150_vm0, %v1434_v25, 0.0 }
 0x295   :  { %v1438_v27 = vrot.slane %v1437_v26, 4  ;;  %v1445_v28 = vmul.f32 %v1437_v26, %v1437_v26 }
 0x297   :  { %v1439_v29 = vadd.f32 %v1438_v27, %v1437_v26  ;;  %v1446_v30 = vrot.slane %v1445_v28, 4 }
 0x299   :  { %v1440_v31 = vrot.slane %v1439_v29, 2  ;;  %v1447_v32 = vadd.f32 %v1446_v30, %v1445_v28 }
 0x29b   :  { %v1441_v33 = vadd.f32 %v1440_v31, %v1439_v29  ;;  %v1448_v34 = vrot.slane %v1447_v32, 2 }
 0x29d   :  { %v1442_v35 = vrot.slane %v1441_v33, 1  ;;  %v1449_v36 = vadd.f32 %v1448_v34, %v1447_v32 }
 0x29f   :  { %v1443_v37 = vadd.f32 %v1442_v35, %v1441_v33  ;;  %v1450_v38 = vrot.slane %v1449_v36, 1 }
 0x2a1   :  { %v1444_v39 = vmul.f32 0.5, %v1443_v37  ;;  %v1451_v40 = vadd.f32 %v1450_v38, %v1449_v36 }
 0x2a3   :  { %v1452_v41 = vmul.f32 0.5, %v1451_v40  ;;  %v1453_v42 = vmul.f32 %v1444_v39, %v1444_v39 }
 0x2a5   :  { %v1454_v43 = vsub.f32 %v1452_v41, %v1453_v42 }
 0x2a7   :  { %v1455_v44 = vmax.f32 %v1454_v43, 0.0 }
 0x2a9   :  { %v1456_v51 = vadd.f32 1e-05, %v1455_v44 }
 0x2ab   :  { %2091 = vrsqrt.f32 %v1456_v51 }
 0x2b5   :  { %v2092_v46 = vpop.eup %2091 }
 0x2b6   :  { %v1458_v47 = vmul.f32 %v2092_v46, %v1435_v45 }
 0x2b8   :  { %v1462_v49 = vrot.slane %v1458_v47, %v2642_v52  ;;  %v1464_v50 = vmul.f32 %v1458_v47, %v1444_v39 }
 0x2ba   :  { %v1465_v53 = vsub.f32 %v1436_v48, %v1464_v50  ;;  %v1463_v55 = vmul.f32 %v1462_v49, %v1434_v25 }
 0x2bc   :  { %v1469_v56 = vrot.slane %v1465_v53, %v2642_v52 }
 0x2be   :  { %v1470_v57 = vadd.f32 %v1469_v56, %v1463_v55 }
 0x2c0   :  { %v1471_v58 = vpack.c.bf16 %v1470_v57, %v1470_v57 }
 0x2c2   :  { %1815 = vmatmul.mubr.bf16.vlgmr.msra.gmra.mrb[8].mxu1 %v1471_v58 }
 0x395   :  { %v1575_v60 = vpop.f32.mrb[8].mxu1 }
 0x396   :  { %v1576_v61 = vadd.f32 %v1758_v59, %v1575_v60  ;;  %v1816_v62 = vpop.f32.mrb[9].mxu1 }
 0x397   :  { %v1578_v63 = vpop.f32.mrb[10].mxu1 }
 0x398   :  { %1581 = vst [vmem:[%s2720_s6] sm:$0xff] %v1576_v61  ;;  %v1817_v1 = vpop.f32.mrb[11].mxu1 }

</bundles_post_ra>
